<compile_context>
chip_gen: v7x
topology: tpu7x:2x2x1
jax: 0.10.0
libtpu: 0.0.40
codegen_flags: <defaults>
</compile_context>

<pallas_src>
import numpy as np
import jax
import jax.numpy as jnp
from jax.experimental import pallas as pl
from jax.experimental.pallas import tpu as pltpu

DIM = 8                      # `dim` of TextureEncoder (small for the demo)
BLOCK_NUMS = [6, 6, 4, 4]    # as in the PyTorch module
BT = 8                       # images stacked along the MXU M axis per grid step


# ------------------------------ fused Pallas kernel ------------------------------
def _fused_kernel(rt_ref, pt_ref,
                  bwr_ref, brr_ref, bwp_ref, bpp_ref,
                  bw1_ref, b1_ref,
                  bw2a_ref, bw2b_ref, b2_ref,
                  bw3a_ref, bw3b_ref, b3_ref,
                  bw4a_ref, bw4b_ref, b4_ref,
                  prow1_ref, prow2_ref, prow3_ref,
                  m1_ref, m2_ref, m3_ref, m4_ref,
                  pgr_ref, pgc_ref,
                  o_ref):
    """Entire TextureEncoder forward for Bt images stacked along the M axis."""
    f32 = jnp.float32
    cdt = bwr_ref.dtype                           # bf16 matmul-input dtype

    def band_conv(yb, get_w, bias):
        """3x3 'same' conv as 3 MXU matmuls against banded (3, K, N) weights.

        yb: (M, K) bf16 activation in stacked-padded layout (a zero pad row
        above/below every image), so one row shift of the whole stack gives
        the correct vertical tap for every image; the rows shifted in land on
        pad rows, which are ignored downstream.
        """
        m, n = yb.shape[0], yb.shape[1]
        zrow = jnp.zeros((1, n), yb.dtype)
        up = jnp.concatenate([zrow, yb[:m - 1, :]], axis=0)   # up[r] = yb[r-1]
        dn = jnp.concatenate([yb[1:, :], zrow], axis=0)       # dn[r] = yb[r+1]
        acc = jnp.dot(up, get_w(0), preferred_element_type=f32) + bias
        acc = acc + jnp.dot(yb, get_w(1), preferred_element_type=f32)
        acc = acc + jnp.dot(dn, get_w(2), preferred_element_type=f32)
        return acc

    # ---- rich_texture(rt) - poor_texture(pt): Conv3x3 + Hardtanh each ----
    r = band_conv(rt_ref[0], lambda ky: bwr_ref[ky], brr_ref[...])
    p = band_conv(pt_ref[0], lambda ky: bwp_ref[ky], bpp_ref[...])
    y0 = (jnp.clip(r, -1.0, 1.0) - jnp.clip(p, -1.0, 1.0)) * m1_ref[...]
    yb = y0.astype(cdt)                                       # single cast per layer

    def run_stage(yb, wgets, b_ref, mask_ref):
        nb = len(wgets)
        for li in range(nb):
            acc = jnp.maximum(band_conv(yb, wgets[li], b_ref[li]), 0.0)   # ReLU
            if li < nb - 1:
                # Re-zero pad rows so the next conv's vertical taps see zeros
                # across image boundaries.  The pool operators that consume the
                # stage's last conv already have zero coefficients at pad rows.
                acc = acc * mask_ref[...]
            yb = acc.astype(cdt)
        return yb

    # ---- stage 1: 6 convs at 16x16 (128 lanes) ----
    yb = run_stage(yb,
                   [(lambda ky, _i=i: bw1_ref[_i, ky]) for i in range(6)],
                   b1_ref, m1_ref)
    # AvgPool 16->8: row pool as an MXU matmul on the stacked-row axis; the
    # column pool is folded into the next stage's first banded weights.
    yb = jnp.dot(prow1_ref[...], yb, preferred_element_type=f32).astype(cdt)

    # ---- stage 2: 6 convs at 8x8 (64 lanes); first conv has folded (128,64) weights ----
    yb = run_stage(yb,
                   [lambda ky: bw2a_ref[ky]]
                   + [(lambda ky, _i=i: bw2b_ref[_i, ky]) for i in range(5)],
                   b2_ref, m2_ref)
    yb = jnp.dot(prow2_ref[...], yb, preferred_element_type=f32).astype(cdt)

    # ---- stage 3: 4 convs at 4x4 (32 lanes) ----
    yb = run_stage(yb,
                   [lambda ky: bw3a_ref[ky]]
                   + [(lambda ky, _i=i: bw3b_ref[_i, ky]) for i in range(3)],
                   b3_ref, m3_ref)
    yb = jnp.dot(prow3_ref[...], yb, preferred_element_type=f32).astype(cdt)

    # ---- stage 4: 4 convs at 2x2 (16 lanes) ----
    yb = run_stage(yb,
                   [lambda ky: bw4a_ref[ky]]
                   + [(lambda ky, _i=i: bw4b_ref[_i, ky]) for i in range(3)],
                   b4_ref, m4_ref)

    # ---- AdaptiveAvgPool2d(1) + Flatten: mean over rows (per image) then columns ----
    g = jnp.dot(pgr_ref[...], yb, preferred_element_type=f32)                 # (Bt, W4*C)
    g = jnp.dot(g.astype(cdt), pgc_ref[...], preferred_element_type=f32)      # (Bt, C)
    o_ref[0] = g.astype(o_ref.dtype)


# ------------------------- parameter preparation (once) -------------------------
def _band_weights(w, wsp, dtype=jnp.bfloat16):
    """(3,3,Cin,Cout) conv weight -> 3 banded matrices (wsp*Cin, wsp*Cout).

    Horizontal taps and horizontal zero-padding are baked into the matrices,
    so activations only need (zero) vertical pad rows.
    """
    cin, cout = w.shape[2], w.shape[3]
    shifts = np.stack([np.eye(wsp, wsp, k=1 - kx, dtype=np.float32)
                       for kx in range(3)])                 # (3, wsp, wsp)
    bw = jnp.einsum("xrc,yxio->yrico", jnp.asarray(shifts), w.astype(jnp.float32))
    return bw.reshape(3, wsp * cin, wsp * cout).astype(dtype)


def _flat_bias(b, wsp):
    return jnp.tile(b.astype(jnp.float32), wsp)[None, :]    # (1, wsp*Cout) f32


def _col_pool_mat(ws, dim):
    """Lane-side 2x2-column average operator (ws*dim, (ws//2)*dim)."""
    wo = ws // 2
    cp = np.zeros((ws, wo), np.float32)
    cp[2 * np.arange(wo), np.arange(wo)] = 0.5
    cp[2 * np.arange(wo) + 1, np.arange(wo)] = 0.5
    return np.kron(cp, np.eye(dim, dtype=np.float32))


def prepare_params(params, H, dim=DIM, bt=BT):
    """Build all kernel-side operands once for a given (H, dim, Bt)."""
    bf16, f32 = jnp.bfloat16, jnp.float32
    widths = [H, H // 2, H // 4, H // 8]

    wr, br = params["rich"]
    wp, bp = params["poor"]
    P = {
        "bwr": _band_weights(wr, H), "brr": _flat_bias(br, H),
        "bwp": _band_weights(wp, H), "bpp": _flat_bias(bp, H),
    }

    li = 0
    # Stage 1: plain banded weights.
    bws, bs = [], []
    for _ in range(BLOCK_NUMS[0]):
        w, b = params["cls"][li]; li += 1
        bws.append(_band_weights(w, widths[0]))
        bs.append(_flat_bias(b, widths[0]))
    P["bw1"] = jnp.stack(bws)                                # (6,3,128,128) bf16
    P["b1"] = jnp.stack(bs)                                  # (6,1,128)     f32

    # Stages 2..4: the first conv of each stage absorbs the preceding column pool.
    for s in range(1, 4):
        ws_prev, ws = widths[s - 1], widths[s]
        pw = jnp.asarray(_col_pool_mat(ws_prev, dim))        # (ws_prev*dim, ws*dim)
        w, b = params["cls"][li]; li += 1
        band0 = _band_weights(w, ws, dtype=f32)              # (3, ws*dim, ws*dim)
        P[f"bw{s+1}a"] = jnp.einsum("ij,yjk->yik", pw, band0).astype(bf16)
        bs = [_flat_bias(b, ws)]
        bws = []
        for _ in range(BLOCK_NUMS[s] - 1):
            w, b = params["cls"][li]; li += 1
            bws.append(_band_weights(w, ws))
            bs.append(_flat_bias(b, ws))
        P[f"bw{s+1}b"] = jnp.stack(bws)
        P[f"b{s+1}"] = jnp.stack(bs)

    # Row-pool operators (block-diagonal over the Bt stacked images; pad rows -> 0).
    for s in range(1, 4):
        h_in, h_out = widths[s - 1], widths[s]
        rp = np.zeros((bt * (h_out + 2), bt * (h_in + 2)), np.float32)
        for bi in range(bt):
            for i in range(h_out):
                r = bi * (h_out + 2) + 1 + i
                rp[r, bi * (h_in + 2) + 1 + 2 * i] = 0.5
                rp[r, bi * (h_in + 2) + 2 + 2 * i] = 0.5
        P[f"prow{s}"] = jnp.asarray(rp, dtype=bf16)

    # Pad-row masks (1 on interior rows, 0 on the pad row above/below each image).
    for s in range(4):
        h = widths[s]
        m = np.ones((bt * (h + 2), widths[s] * dim), np.float32)
        for bi in range(bt):
            m[bi * (h + 2), :] = 0.0
            m[bi * (h + 2) + h + 1, :] = 0.0
        P[f"m{s+1}"] = jnp.asarray(m)

    # Global average pool: rows (per image) then columns (per channel).
    hf, wf = widths[3], widths[3]
    pgr = np.zeros((bt, bt * (hf + 2)), np.float32)
    for bi in range(bt):
        pgr[bi, bi * (hf + 2) + 1: bi * (hf + 2) + 1 + hf] = 1.0 / hf
    P["pgr"] = jnp.asarray(pgr, dtype=bf16)                  # (Bt, M4)
    P["pgc"] = jnp.asarray(np.kron(np.full((wf, 1), 1.0 / wf, np.float32),
                                   np.eye(dim, dtype=np.float32)),
                           dtype=bf16)                       # (wf*dim, dim)
    return P


# ------------------------------ fused pallas_call ------------------------------
def _const_spec(shape):
    zeros = (0,) * len(shape)
    return pl.BlockSpec(tuple(shape), lambda s, _z=zeros: _z)


def _fused_forward(rtf, ptf, P, n_steps, bt, C):
    M1, W = rtf.shape[1], rtf.shape[2]
    arrays = [rtf, ptf,
              P["bwr"], P["brr"], P["bwp"], P["bpp"],
              P["bw1"], P["b1"],
              P["bw2a"], P["bw2b"], P["b2"],
              P["bw3a"], P["bw3b"], P["b3"],
              P["bw4a"], P["bw4b"], P["b4"],
              P["prow1"], P["prow2"], P["prow3"],
              P["m1"], P["m2"], P["m3"], P["m4"],
              P["pgr"], P["pgc"]]
    in_specs = ([pl.BlockSpec((1, M1, W), lambda s: (s, 0, 0)),
                 pl.BlockSpec((1, M1, W), lambda s: (s, 0, 0))]
                + [_const_spec(a.shape) for a in arrays[2:]])
    return pl.pallas_call(
        _fused_kernel,
        out_shape=jax.ShapeDtypeStruct((n_steps, bt, C), jnp.float32),
        grid=(n_steps,),
        in_specs=in_specs,
        out_specs=pl.BlockSpec((1, bt, C), lambda s: (s, 0, 0)),
        compiler_params=pltpu.CompilerParams(
            dimension_semantics=("parallel",),     # megacore-splittable on v7x
            vmem_limit_bytes=32 * 1024 * 1024),
    )(*arrays)


@jax.jit
def texture_encoder_forward(rt_nchw, pt_nchw, prepped):
    bt = prepped["pgr"].shape[0]
    C = prepped["pgc"].shape[-1]
    B, H, W = rt_nchw.shape[0], rt_nchw.shape[2], rt_nchw.shape[3]
    n_steps = -(-B // bt)
    Bp = n_steps * bt

    def pack(x):
        # NCHW (Cin==1) -> per-image vertically zero-padded rows, Bt images
        # stacked along the row axis per grid step, bf16 (MXU input dtype).
        x = x[:, 0, :, :]
        x = jnp.pad(x, ((0, Bp - B), (1, 1), (0, 0)))
        return x.reshape(n_steps, bt * (H + 2), W).astype(jnp.bfloat16)

    out = _fused_forward(pack(rt_nchw), pack(pt_nchw), prepped, n_steps, bt, C)
    return out.reshape(Bp, C)[:B]


# -------------------------- model: parameter init --------------------------
def init_params(key, dim=DIM):
    def conv_init(k, cin, cout):
        kw, kb = jax.random.split(k)
        w = jax.random.normal(kw, (3, 3, cin, cout), jnp.float32) * np.sqrt(2.0 / (9 * cin))
        b = jax.random.normal(kb, (cout,), jnp.float32) * 0.01
        return w, b
    keys = jax.random.split(key, 2 + sum(BLOCK_NUMS))
    return {
        "rich": conv_init(keys[0], 1, dim),
        "poor": conv_init(keys[1], 1, dim),
        "cls": [conv_init(keys[2 + i], dim, dim) for i in range(sum(BLOCK_NUMS))],
    }


# -------------------- pure-JAX reference (matched MXU precision) --------------------
def ref_forward(rt_nchw, pt_nchw, params):
    """Reference with the kernel's precision policy: every conv consumes bf16
    inputs/weights and accumulates in float32 (standard TPU MXU precision)."""
    bf16, f32 = jnp.bfloat16, jnp.float32

    def conv(x, w, b):                             # x: NCHW f32
        w_oihw = jnp.transpose(w, (3, 2, 0, 1)).astype(bf16)
        y = jax.lax.conv_general_dilated(
            x.astype(bf16), w_oihw, (1, 1), ((1, 1), (1, 1)),
            dimension_numbers=("NCHW", "OIHW", "NCHW"),
            preferred_element_type=f32)
        return y + b[None, :, None, None]

    def pool2(x):                                  # rows first, then cols
        xb = x.astype(bf16).astype(f32)
        t = 0.5 * (xb[:, :, 0::2, :] + xb[:, :, 1::2, :])
        tb = t.astype(bf16).astype(f32)
        return 0.5 * (tb[:, :, :, 0::2] + tb[:, :, :, 1::2])

    (wr, br), (wp, bp) = params["rich"], params["poor"]
    x = (jnp.clip(conv(rt_nchw, wr, br), -1.0, 1.0)
         - jnp.clip(conv(pt_nchw, wp, bp), -1.0, 1.0))
    li = 0
    for si, nb in enumerate(BLOCK_NUMS):
        for _ in range(nb):
            w, b = params["cls"][li]; li += 1
            x = jnp.maximum(conv(x, w, b), 0.0)
        if si < len(BLOCK_NUMS) - 1:
            x = pool2(x)
    return x.astype(bf16).astype(f32).mean(axis=(2, 3))


# ------------------------------------ main ------------------------------------
if __name__ == "__main__":
    key = jax.random.PRNGKey(0)
    kp, krt, kpt = jax.random.split(key, 3)
    params = init_params(kp, DIM)
    prepped = prepare_params(params, H=16, dim=DIM, bt=BT)   # built once

    B = 16                                   # -> grid=(2,), even for v7x megacore
    rt = jax.random.normal(krt, (B, 1, 16, 16), jnp.float32)   # rich-texture patch
    pt = jax.random.normal(kpt, (B, 1, 16, 16), jnp.float32)   # poor-texture patch

    y = jax.block_until_ready(texture_encoder_forward(rt, pt, prepped))
    assert y.shape == (B, DIM), y.shape

    y_ref = jax.block_until_ready(ref_forward(rt, pt, params))
    ya, yr = np.asarray(y), np.asarray(y_ref)
    if not np.allclose(ya, yr, atol=2e-2, rtol=2e-2):
        raise AssertionError(
            f"Pallas/reference mismatch (max abs err {np.max(np.abs(ya - yr))}):\n{ya}\nvs\n{yr}")

    print("KERNEL_OK")
</pallas_src>

<mosaic_0001>
module attributes {stable_mosaic.version = 11 : i64} {
  func.func @_fused_kernel(%arg0: i32, %arg1: memref<1x144x16xbf16, #tpu.memory_space<vmem>>, %arg2: memref<1x144x16xbf16, #tpu.memory_space<vmem>>, %arg3: memref<3x16x128xbf16, #tpu.memory_space<vmem>>, %arg4: memref<1x128xf32, #tpu.memory_space<vmem>>, %arg5: memref<3x16x128xbf16, #tpu.memory_space<vmem>>, %arg6: memref<1x128xf32, #tpu.memory_space<vmem>>, %arg7: memref<6x3x128x128xbf16, #tpu.memory_space<vmem>>, %arg8: memref<6x1x128xf32, #tpu.memory_space<vmem>>, %arg9: memref<3x128x64xbf16, #tpu.memory_space<vmem>>, %arg10: memref<5x3x64x64xbf16, #tpu.memory_space<vmem>>, %arg11: memref<6x1x64xf32, #tpu.memory_space<vmem>>, %arg12: memref<3x64x32xbf16, #tpu.memory_space<vmem>>, %arg13: memref<3x3x32x32xbf16, #tpu.memory_space<vmem>>, %arg14: memref<4x1x32xf32, #tpu.memory_space<vmem>>, %arg15: memref<3x32x16xbf16, #tpu.memory_space<vmem>>, %arg16: memref<3x3x16x16xbf16, #tpu.memory_space<vmem>>, %arg17: memref<4x1x16xf32, #tpu.memory_space<vmem>>, %arg18: memref<80x144xbf16, #tpu.memory_space<vmem>>, %arg19: memref<48x80xbf16, #tpu.memory_space<vmem>>, %arg20: memref<32x48xbf16, #tpu.memory_space<vmem>>, %arg21: memref<144x128xf32, #tpu.memory_space<vmem>>, %arg22: memref<80x64xf32, #tpu.memory_space<vmem>>, %arg23: memref<48x32xf32, #tpu.memory_space<vmem>>, %arg24: memref<32x16xf32, #tpu.memory_space<vmem>>, %arg25: memref<8x32xbf16, #tpu.memory_space<vmem>>, %arg26: memref<16x8xbf16, #tpu.memory_space<vmem>>, %arg27: memref<1x8x8xf32, #tpu.memory_space<vmem>>) attributes {dimension_semantics = [#tpu.dimension_semantics<parallel>], iteration_bounds = array<i64: 2>, scalar_prefetch = 0 : i64, scratch_operands = 0 : i64, tpu.core_type = #tpu.core_type<tc>, window_params = [{transform_indices = @transform_0, window_bounds = array<i64: 1, 144, 16>}, {transform_indices = @transform_1, window_bounds = array<i64: 1, 144, 16>}, {pipeline_mode = #tpu.pipeline_mode<synchronous>, transform_indices = @transform_2, window_bounds = array<i64: 3, 16, 128>}, {pipeline_mode = #tpu.pipeline_mode<synchronous>, transform_indices = @transform_3, window_bounds = array<i64: 1, 128>}, {pipeline_mode = #tpu.pipeline_mode<synchronous>, transform_indices = @transform_4, window_bounds = array<i64: 3, 16, 128>}, {pipeline_mode = #tpu.pipeline_mode<synchronous>, transform_indices = @transform_5, window_bounds = array<i64: 1, 128>}, {pipeline_mode = #tpu.pipeline_mode<synchronous>, transform_indices = @transform_6, window_bounds = array<i64: 6, 3, 128, 128>}, {pipeline_mode = #tpu.pipeline_mode<synchronous>, transform_indices = @transform_7, window_bounds = array<i64: 6, 1, 128>}, {pipeline_mode = #tpu.pipeline_mode<synchronous>, transform_indices = @transform_8, window_bounds = array<i64: 3, 128, 64>}, {pipeline_mode = #tpu.pipeline_mode<synchronous>, transform_indices = @transform_9, window_bounds = array<i64: 5, 3, 64, 64>}, {pipeline_mode = #tpu.pipeline_mode<synchronous>, transform_indices = @transform_10, window_bounds = array<i64: 6, 1, 64>}, {pipeline_mode = #tpu.pipeline_mode<synchronous>, transform_indices = @transform_11, window_bounds = array<i64: 3, 64, 32>}, {pipeline_mode = #tpu.pipeline_mode<synchronous>, transform_indices = @transform_12, window_bounds = array<i64: 3, 3, 32, 32>}, {pipeline_mode = #tpu.pipeline_mode<synchronous>, transform_indices = @transform_13, window_bounds = array<i64: 4, 1, 32>}, {pipeline_mode = #tpu.pipeline_mode<synchronous>, transform_indices = @transform_14, window_bounds = array<i64: 3, 32, 16>}, {pipeline_mode = #tpu.pipeline_mode<synchronous>, transform_indices = @transform_15, window_bounds = array<i64: 3, 3, 16, 16>}, {pipeline_mode = #tpu.pipeline_mode<synchronous>, transform_indices = @transform_16, window_bounds = array<i64: 4, 1, 16>}, {pipeline_mode = #tpu.pipeline_mode<synchronous>, transform_indices = @transform_17, window_bounds = array<i64: 80, 144>}, {pipeline_mode = #tpu.pipeline_mode<synchronous>, transform_indices = @transform_18, window_bounds = array<i64: 48, 80>}, {pipeline_mode = #tpu.pipeline_mode<synchronous>, transform_indices = @transform_19, window_bounds = array<i64: 32, 48>}, {pipeline_mode = #tpu.pipeline_mode<synchronous>, transform_indices = @transform_20, window_bounds = array<i64: 144, 128>}, {pipeline_mode = #tpu.pipeline_mode<synchronous>, transform_indices = @transform_21, window_bounds = array<i64: 80, 64>}, {pipeline_mode = #tpu.pipeline_mode<synchronous>, transform_indices = @transform_22, window_bounds = array<i64: 48, 32>}, {pipeline_mode = #tpu.pipeline_mode<synchronous>, transform_indices = @transform_23, window_bounds = array<i64: 32, 16>}, {pipeline_mode = #tpu.pipeline_mode<synchronous>, transform_indices = @transform_24, window_bounds = array<i64: 8, 32>}, {pipeline_mode = #tpu.pipeline_mode<synchronous>, transform_indices = @transform_25, window_bounds = array<i64: 16, 8>}, {transform_indices = @transform_26, window_bounds = array<i64: 1, 8, 8>}]} {
    %c0 = arith.constant 0 : index
    %c0_0 = arith.constant 0 : index
    %c0_1 = arith.constant 0 : index
    %0 = vector.load %arg1[%c0, %c0_0, %c0_1] : memref<1x144x16xbf16, #tpu.memory_space<vmem>>, vector<1x144x16xbf16>
    %1 = vector.shape_cast %0 : vector<1x144x16xbf16> to vector<144x16xbf16>
    %c0_2 = arith.constant 0 : index
    %c0_3 = arith.constant 0 : index
    %2 = vector.load %arg4[%c0_2, %c0_3] : memref<1x128xf32, #tpu.memory_space<vmem>>, vector<1x128xf32>
    %cst = arith.constant 0.000000e+00 : bf16
    %3 = vector.broadcast %cst : bf16 to vector<1x16xbf16>
    %4 = vector.extract_strided_slice %1 {offsets = [0, 0], sizes = [143, 16], strides = [1, 1]} : vector<144x16xbf16> to vector<143x16xbf16>
    %5 = tpu.concatenate %3, %4 in 0 : vector<1x16xbf16>, vector<143x16xbf16> -> vector<144x16xbf16>
    %6 = vector.extract_strided_slice %1 {offsets = [1, 0], sizes = [143, 16], strides = [1, 1]} : vector<144x16xbf16> to vector<143x16xbf16>
    %7 = tpu.concatenate %6, %3 in 0 : vector<143x16xbf16>, vector<1x16xbf16> -> vector<144x16xbf16>
    %c0_4 = arith.constant 0 : index
    %c0_5 = arith.constant 0 : index
    %c0_6 = arith.constant 0 : index
    %8 = vector.load %arg3[%c0_4, %c0_5, %c0_6] : memref<3x16x128xbf16, #tpu.memory_space<vmem>>, vector<1x16x128xbf16>
    %9 = vector.shape_cast %8 : vector<1x16x128xbf16> to vector<16x128xbf16>
    %cst_7 = arith.constant dense<0.000000e+00> : vector<144x128xf32>
    %10 = tpu.matmul %5, %9, %cst_7 {dimension_numbers = #tpu.dot_dimension_numbers<[1], [0], [0], [1], [0, 0, 1, 1], [], []>} : vector<144x16xbf16>, vector<16x128xbf16>, vector<144x128xf32> -> vector<144x128xf32>
    %11 = vector.broadcast %2 : vector<1x128xf32> to vector<144x128xf32>
    %12 = arith.addf %10, %11 : vector<144x128xf32>
    %c1 = arith.constant 1 : index
    %c0_8 = arith.constant 0 : index
    %c0_9 = arith.constant 0 : index
    %13 = vector.load %arg3[%c1, %c0_8, %c0_9] : memref<3x16x128xbf16, #tpu.memory_space<vmem>>, vector<1x16x128xbf16>
    %14 = vector.shape_cast %13 : vector<1x16x128xbf16> to vector<16x128xbf16>
    %cst_10 = arith.constant dense<0.000000e+00> : vector<144x128xf32>
    %15 = tpu.matmul %1, %14, %cst_10 {dimension_numbers = #tpu.dot_dimension_numbers<[1], [0], [0], [1], [0, 0, 1, 1], [], []>} : vector<144x16xbf16>, vector<16x128xbf16>, vector<144x128xf32> -> vector<144x128xf32>
    %16 = arith.addf %12, %15 : vector<144x128xf32>
    %c2 = arith.constant 2 : index
    %c0_11 = arith.constant 0 : index
    %c0_12 = arith.constant 0 : index
    %17 = vector.load %arg3[%c2, %c0_11, %c0_12] : memref<3x16x128xbf16, #tpu.memory_space<vmem>>, vector<1x16x128xbf16>
    %18 = vector.shape_cast %17 : vector<1x16x128xbf16> to vector<16x128xbf16>
    %cst_13 = arith.constant dense<0.000000e+00> : vector<144x128xf32>
    %19 = tpu.matmul %7, %18, %cst_13 {dimension_numbers = #tpu.dot_dimension_numbers<[1], [0], [0], [1], [0, 0, 1, 1], [], []>} : vector<144x16xbf16>, vector<16x128xbf16>, vector<144x128xf32> -> vector<144x128xf32>
    %20 = arith.addf %16, %19 : vector<144x128xf32>
    %c0_14 = arith.constant 0 : index
    %c0_15 = arith.constant 0 : index
    %c0_16 = arith.constant 0 : index
    %21 = vector.load %arg2[%c0_14, %c0_15, %c0_16] : memref<1x144x16xbf16, #tpu.memory_space<vmem>>, vector<1x144x16xbf16>
    %22 = vector.shape_cast %21 : vector<1x144x16xbf16> to vector<144x16xbf16>
    %c0_17 = arith.constant 0 : index
    %c0_18 = arith.constant 0 : index
    %23 = vector.load %arg6[%c0_17, %c0_18] : memref<1x128xf32, #tpu.memory_space<vmem>>, vector<1x128xf32>
    %cst_19 = arith.constant 0.000000e+00 : bf16
    %24 = vector.broadcast %cst_19 : bf16 to vector<1x16xbf16>
    %25 = vector.extract_strided_slice %22 {offsets = [0, 0], sizes = [143, 16], strides = [1, 1]} : vector<144x16xbf16> to vector<143x16xbf16>
    %26 = tpu.concatenate %24, %25 in 0 : vector<1x16xbf16>, vector<143x16xbf16> -> vector<144x16xbf16>
    %27 = vector.extract_strided_slice %22 {offsets = [1, 0], sizes = [143, 16], strides = [1, 1]} : vector<144x16xbf16> to vector<143x16xbf16>
    %28 = tpu.concatenate %27, %24 in 0 : vector<143x16xbf16>, vector<1x16xbf16> -> vector<144x16xbf16>
    %c0_20 = arith.constant 0 : index
    %c0_21 = arith.constant 0 : index
    %c0_22 = arith.constant 0 : index
    %29 = vector.load %arg5[%c0_20, %c0_21, %c0_22] : memref<3x16x128xbf16, #tpu.memory_space<vmem>>, vector<1x16x128xbf16>
    %30 = vector.shape_cast %29 : vector<1x16x128xbf16> to vector<16x128xbf16>
    %cst_23 = arith.constant dense<0.000000e+00> : vector<144x128xf32>
    %31 = tpu.matmul %26, %30, %cst_23 {dimension_numbers = #tpu.dot_dimension_numbers<[1], [0], [0], [1], [0, 0, 1, 1], [], []>} : vector<144x16xbf16>, vector<16x128xbf16>, vector<144x128xf32> -> vector<144x128xf32>
    %32 = vector.broadcast %23 : vector<1x128xf32> to vector<144x128xf32>
    %33 = arith.addf %31, %32 : vector<144x128xf32>
    %c1_24 = arith.constant 1 : index
    %c0_25 = arith.constant 0 : index
    %c0_26 = arith.constant 0 : index
    %34 = vector.load %arg5[%c1_24, %c0_25, %c0_26] : memref<3x16x128xbf16, #tpu.memory_space<vmem>>, vector<1x16x128xbf16>
    %35 = vector.shape_cast %34 : vector<1x16x128xbf16> to vector<16x128xbf16>
    %cst_27 = arith.constant dense<0.000000e+00> : vector<144x128xf32>
    %36 = tpu.matmul %22, %35, %cst_27 {dimension_numbers = #tpu.dot_dimension_numbers<[1], [0], [0], [1], [0, 0, 1, 1], [], []>} : vector<144x16xbf16>, vector<16x128xbf16>, vector<144x128xf32> -> vector<144x128xf32>
    %37 = arith.addf %33, %36 : vector<144x128xf32>
    %c2_28 = arith.constant 2 : index
    %c0_29 = arith.constant 0 : index
    %c0_30 = arith.constant 0 : index
    %38 = vector.load %arg5[%c2_28, %c0_29, %c0_30] : memref<3x16x128xbf16, #tpu.memory_space<vmem>>, vector<1x16x128xbf16>
    %39 = vector.shape_cast %38 : vector<1x16x128xbf16> to vector<16x128xbf16>
    %cst_31 = arith.constant dense<0.000000e+00> : vector<144x128xf32>
    %40 = tpu.matmul %28, %39, %cst_31 {dimension_numbers = #tpu.dot_dimension_numbers<[1], [0], [0], [1], [0, 0, 1, 1], [], []>} : vector<144x16xbf16>, vector<16x128xbf16>, vector<144x128xf32> -> vector<144x128xf32>
    %41 = arith.addf %37, %40 : vector<144x128xf32>
    %cst_32 = arith.constant -1.000000e+00 : f32
    %cst_33 = arith.constant 1.000000e+00 : f32
    %42 = vector.broadcast %cst_32 : f32 to vector<144x128xf32>
    %43 = arith.maximumf %42, %20 : vector<144x128xf32>
    %44 = vector.broadcast %cst_33 : f32 to vector<144x128xf32>
    %45 = arith.minimumf %44, %43 : vector<144x128xf32>
    %cst_34 = arith.constant -1.000000e+00 : f32
    %cst_35 = arith.constant 1.000000e+00 : f32
    %46 = vector.broadcast %cst_34 : f32 to vector<144x128xf32>
    %47 = arith.maximumf %46, %41 : vector<144x128xf32>
    %48 = vector.broadcast %cst_35 : f32 to vector<144x128xf32>
    %49 = arith.minimumf %48, %47 : vector<144x128xf32>
    %50 = arith.subf %45, %49 : vector<144x128xf32>
    %c0_36 = arith.constant 0 : index
    %c0_37 = arith.constant 0 : index
    %51 = vector.load %arg21[%c0_36, %c0_37] : memref<144x128xf32, #tpu.memory_space<vmem>>, vector<144x128xf32>
    %52 = arith.mulf %50, %51 : vector<144x128xf32>
    %53 = arith.truncf %52 : vector<144x128xf32> to vector<144x128xbf16>
    %c0_38 = arith.constant 0 : index
    %c0_39 = arith.constant 0 : index
    %c0_40 = arith.constant 0 : index
    %54 = vector.load %arg8[%c0_38, %c0_39, %c0_40] : memref<6x1x128xf32, #tpu.memory_space<vmem>>, vector<1x1x128xf32>
    %55 = vector.shape_cast %54 : vector<1x1x128xf32> to vector<1x128xf32>
    %cst_41 = arith.constant 0.000000e+00 : bf16
    %56 = vector.broadcast %cst_41 : bf16 to vector<1x128xbf16>
    %57 = vector.extract_strided_slice %53 {offsets = [0, 0], sizes = [143, 128], strides = [1, 1]} : vector<144x128xbf16> to vector<143x128xbf16>
    %58 = tpu.concatenate %56, %57 in 0 : vector<1x128xbf16>, vector<143x128xbf16> -> vector<144x128xbf16>
    %59 = vector.extract_strided_slice %53 {offsets = [1, 0], sizes = [143, 128], strides = [1, 1]} : vector<144x128xbf16> to vector<143x128xbf16>
    %60 = tpu.concatenate %59, %56 in 0 : vector<143x128xbf16>, vector<1x128xbf16> -> vector<144x128xbf16>
    %c0_42 = arith.constant 0 : index
    %c0_43 = arith.constant 0 : index
    %c0_44 = arith.constant 0 : index
    %c0_45 = arith.constant 0 : index
    %61 = vector.load %arg7[%c0_42, %c0_43, %c0_44, %c0_45] : memref<6x3x128x128xbf16, #tpu.memory_space<vmem>>, vector<1x1x128x128xbf16>
    %62 = vector.shape_cast %61 : vector<1x1x128x128xbf16> to vector<128x128xbf16>
    %cst_46 = arith.constant dense<0.000000e+00> : vector<144x128xf32>
    %63 = tpu.matmul %58, %62, %cst_46 {dimension_numbers = #tpu.dot_dimension_numbers<[1], [0], [0], [1], [0, 0, 1, 1], [], []>} : vector<144x128xbf16>, vector<128x128xbf16>, vector<144x128xf32> -> vector<144x128xf32>
    %64 = vector.broadcast %55 : vector<1x128xf32> to vector<144x128xf32>
    %65 = arith.addf %63, %64 : vector<144x128xf32>
    %c0_47 = arith.constant 0 : index
    %c1_48 = arith.constant 1 : index
    %c0_49 = arith.constant 0 : index
    %c0_50 = arith.constant 0 : index
    %66 = vector.load %arg7[%c0_47, %c1_48, %c0_49, %c0_50] : memref<6x3x128x128xbf16, #tpu.memory_space<vmem>>, vector<1x1x128x128xbf16>
    %67 = vector.shape_cast %66 : vector<1x1x128x128xbf16> to vector<128x128xbf16>
    %cst_51 = arith.constant dense<0.000000e+00> : vector<144x128xf32>
    %68 = tpu.matmul %53, %67, %cst_51 {dimension_numbers = #tpu.dot_dimension_numbers<[1], [0], [0], [1], [0, 0, 1, 1], [], []>} : vector<144x128xbf16>, vector<128x128xbf16>, vector<144x128xf32> -> vector<144x128xf32>
    %69 = arith.addf %65, %68 : vector<144x128xf32>
    %c0_52 = arith.constant 0 : index
    %c2_53 = arith.constant 2 : index
    %c0_54 = arith.constant 0 : index
    %c0_55 = arith.constant 0 : index
    %70 = vector.load %arg7[%c0_52, %c2_53, %c0_54, %c0_55] : memref<6x3x128x128xbf16, #tpu.memory_space<vmem>>, vector<1x1x128x128xbf16>
    %71 = vector.shape_cast %70 : vector<1x1x128x128xbf16> to vector<128x128xbf16>
    %cst_56 = arith.constant dense<0.000000e+00> : vector<144x128xf32>
    %72 = tpu.matmul %60, %71, %cst_56 {dimension_numbers = #tpu.dot_dimension_numbers<[1], [0], [0], [1], [0, 0, 1, 1], [], []>} : vector<144x128xbf16>, vector<128x128xbf16>, vector<144x128xf32> -> vector<144x128xf32>
    %73 = arith.addf %69, %72 : vector<144x128xf32>
    %cst_57 = arith.constant 0.000000e+00 : f32
    %74 = vector.broadcast %cst_57 : f32 to vector<144x128xf32>
    %75 = arith.maximumf %73, %74 : vector<144x128xf32>
    %c0_58 = arith.constant 0 : index
    %c0_59 = arith.constant 0 : index
    %76 = vector.load %arg21[%c0_58, %c0_59] : memref<144x128xf32, #tpu.memory_space<vmem>>, vector<144x128xf32>
    %77 = arith.mulf %75, %76 : vector<144x128xf32>
    %78 = arith.truncf %77 : vector<144x128xf32> to vector<144x128xbf16>
    %c1_60 = arith.constant 1 : index
    %c0_61 = arith.constant 0 : index
    %c0_62 = arith.constant 0 : index
    %79 = vector.load %arg8[%c1_60, %c0_61, %c0_62] : memref<6x1x128xf32, #tpu.memory_space<vmem>>, vector<1x1x128xf32>
    %80 = vector.shape_cast %79 : vector<1x1x128xf32> to vector<1x128xf32>
    %cst_63 = arith.constant 0.000000e+00 : bf16
    %81 = vector.broadcast %cst_63 : bf16 to vector<1x128xbf16>
    %82 = vector.extract_strided_slice %78 {offsets = [0, 0], sizes = [143, 128], strides = [1, 1]} : vector<144x128xbf16> to vector<143x128xbf16>
    %83 = tpu.concatenate %81, %82 in 0 : vector<1x128xbf16>, vector<143x128xbf16> -> vector<144x128xbf16>
    %84 = vector.extract_strided_slice %78 {offsets = [1, 0], sizes = [143, 128], strides = [1, 1]} : vector<144x128xbf16> to vector<143x128xbf16>
    %85 = tpu.concatenate %84, %81 in 0 : vector<143x128xbf16>, vector<1x128xbf16> -> vector<144x128xbf16>
    %c1_64 = arith.constant 1 : index
    %c0_65 = arith.constant 0 : index
    %c0_66 = arith.constant 0 : index
    %c0_67 = arith.constant 0 : index
    %86 = vector.load %arg7[%c1_64, %c0_65, %c0_66, %c0_67] : memref<6x3x128x128xbf16, #tpu.memory_space<vmem>>, vector<1x1x128x128xbf16>
    %87 = vector.shape_cast %86 : vector<1x1x128x128xbf16> to vector<128x128xbf16>
    %cst_68 = arith.constant dense<0.000000e+00> : vector<144x128xf32>
    %88 = tpu.matmul %83, %87, %cst_68 {dimension_numbers = #tpu.dot_dimension_numbers<[1], [0], [0], [1], [0, 0, 1, 1], [], []>} : vector<144x128xbf16>, vector<128x128xbf16>, vector<144x128xf32> -> vector<144x128xf32>
    %89 = vector.broadcast %80 : vector<1x128xf32> to vector<144x128xf32>
    %90 = arith.addf %88, %89 : vector<144x128xf32>
    %c1_69 = arith.constant 1 : index
    %c1_70 = arith.constant 1 : index
    %c0_71 = arith.constant 0 : index
    %c0_72 = arith.constant 0 : index
    %91 = vector.load %arg7[%c1_69, %c1_70, %c0_71, %c0_72] : memref<6x3x128x128xbf16, #tpu.memory_space<vmem>>, vector<1x1x128x128xbf16>
    %92 = vector.shape_cast %91 : vector<1x1x128x128xbf16> to vector<128x128xbf16>
    %cst_73 = arith.constant dense<0.000000e+00> : vector<144x128xf32>
    %93 = tpu.matmul %78, %92, %cst_73 {dimension_numbers = #tpu.dot_dimension_numbers<[1], [0], [0], [1], [0, 0, 1, 1], [], []>} : vector<144x128xbf16>, vector<128x128xbf16>, vector<144x128xf32> -> vector<144x128xf32>
    %94 = arith.addf %90, %93 : vector<144x128xf32>
    %c1_74 = arith.constant 1 : index
    %c2_75 = arith.constant 2 : index
    %c0_76 = arith.constant 0 : index
    %c0_77 = arith.constant 0 : index
    %95 = vector.load %arg7[%c1_74, %c2_75, %c0_76, %c0_77] : memref<6x3x128x128xbf16, #tpu.memory_space<vmem>>, vector<1x1x128x128xbf16>
    %96 = vector.shape_cast %95 : vector<1x1x128x128xbf16> to vector<128x128xbf16>
    %cst_78 = arith.constant dense<0.000000e+00> : vector<144x128xf32>
    %97 = tpu.matmul %85, %96, %cst_78 {dimension_numbers = #tpu.dot_dimension_numbers<[1], [0], [0], [1], [0, 0, 1, 1], [], []>} : vector<144x128xbf16>, vector<128x128xbf16>, vector<144x128xf32> -> vector<144x128xf32>
    %98 = arith.addf %94, %97 : vector<144x128xf32>
    %cst_79 = arith.constant 0.000000e+00 : f32
    %99 = vector.broadcast %cst_79 : f32 to vector<144x128xf32>
    %100 = arith.maximumf %98, %99 : vector<144x128xf32>
    %c0_80 = arith.constant 0 : index
    %c0_81 = arith.constant 0 : index
    %101 = vector.load %arg21[%c0_80, %c0_81] : memref<144x128xf32, #tpu.memory_space<vmem>>, vector<144x128xf32>
    %102 = arith.mulf %100, %101 : vector<144x128xf32>
    %103 = arith.truncf %102 : vector<144x128xf32> to vector<144x128xbf16>
    %c2_82 = arith.constant 2 : index
    %c0_83 = arith.constant 0 : index
    %c0_84 = arith.constant 0 : index
    %104 = vector.load %arg8[%c2_82, %c0_83, %c0_84] : memref<6x1x128xf32, #tpu.memory_space<vmem>>, vector<1x1x128xf32>
    %105 = vector.shape_cast %104 : vector<1x1x128xf32> to vector<1x128xf32>
    %cst_85 = arith.constant 0.000000e+00 : bf16
    %106 = vector.broadcast %cst_85 : bf16 to vector<1x128xbf16>
    %107 = vector.extract_strided_slice %103 {offsets = [0, 0], sizes = [143, 128], strides = [1, 1]} : vector<144x128xbf16> to vector<143x128xbf16>
    %108 = tpu.concatenate %106, %107 in 0 : vector<1x128xbf16>, vector<143x128xbf16> -> vector<144x128xbf16>
    %109 = vector.extract_strided_slice %103 {offsets = [1, 0], sizes = [143, 128], strides = [1, 1]} : vector<144x128xbf16> to vector<143x128xbf16>
    %110 = tpu.concatenate %109, %106 in 0 : vector<143x128xbf16>, vector<1x128xbf16> -> vector<144x128xbf16>
    %c2_86 = arith.constant 2 : index
    %c0_87 = arith.constant 0 : index
    %c0_88 = arith.constant 0 : index
    %c0_89 = arith.constant 0 : index
    %111 = vector.load %arg7[%c2_86, %c0_87, %c0_88, %c0_89] : memref<6x3x128x128xbf16, #tpu.memory_space<vmem>>, vector<1x1x128x128xbf16>
    %112 = vector.shape_cast %111 : vector<1x1x128x128xbf16> to vector<128x128xbf16>
    %cst_90 = arith.constant dense<0.000000e+00> : vector<144x128xf32>
    %113 = tpu.matmul %108, %112, %cst_90 {dimension_numbers = #tpu.dot_dimension_numbers<[1], [0], [0], [1], [0, 0, 1, 1], [], []>} : vector<144x128xbf16>, vector<128x128xbf16>, vector<144x128xf32> -> vector<144x128xf32>
    %114 = vector.broadcast %105 : vector<1x128xf32> to vector<144x128xf32>
    %115 = arith.addf %113, %114 : vector<144x128xf32>
    %c2_91 = arith.constant 2 : index
    %c1_92 = arith.constant 1 : index
    %c0_93 = arith.constant 0 : index
    %c0_94 = arith.constant 0 : index
    %116 = vector.load %arg7[%c2_91, %c1_92, %c0_93, %c0_94] : memref<6x3x128x128xbf16, #tpu.memory_space<vmem>>, vector<1x1x128x128xbf16>
    %117 = vector.shape_cast %116 : vector<1x1x128x128xbf16> to vector<128x128xbf16>
    %cst_95 = arith.constant dense<0.000000e+00> : vector<144x128xf32>
    %118 = tpu.matmul %103, %117, %cst_95 {dimension_numbers = #tpu.dot_dimension_numbers<[1], [0], [0], [1], [0, 0, 1, 1], [], []>} : vector<144x128xbf16>, vector<128x128xbf16>, vector<144x128xf32> -> vector<144x128xf32>
    %119 = arith.addf %115, %118 : vector<144x128xf32>
    %c2_96 = arith.constant 2 : index
    %c2_97 = arith.constant 2 : index
    %c0_98 = arith.constant 0 : index
    %c0_99 = arith.constant 0 : index
    %120 = vector.load %arg7[%c2_96, %c2_97, %c0_98, %c0_99] : memref<6x3x128x128xbf16, #tpu.memory_space<vmem>>, vector<1x1x128x128xbf16>
    %121 = vector.shape_cast %120 : vector<1x1x128x128xbf16> to vector<128x128xbf16>
    %cst_100 = arith.constant dense<0.000000e+00> : vector<144x128xf32>
    %122 = tpu.matmul %110, %121, %cst_100 {dimension_numbers = #tpu.dot_dimension_numbers<[1], [0], [0], [1], [0, 0, 1, 1], [], []>} : vector<144x128xbf16>, vector<128x128xbf16>, vector<144x128xf32> -> vector<144x128xf32>
    %123 = arith.addf %119, %122 : vector<144x128xf32>
    %cst_101 = arith.constant 0.000000e+00 : f32
    %124 = vector.broadcast %cst_101 : f32 to vector<144x128xf32>
    %125 = arith.maximumf %123, %124 : vector<144x128xf32>
    %c0_102 = arith.constant 0 : index
    %c0_103 = arith.constant 0 : index
    %126 = vector.load %arg21[%c0_102, %c0_103] : memref<144x128xf32, #tpu.memory_space<vmem>>, vector<144x128xf32>
    %127 = arith.mulf %125, %126 : vector<144x128xf32>
    %128 = arith.truncf %127 : vector<144x128xf32> to vector<144x128xbf16>
    %c3 = arith.constant 3 : index
    %c0_104 = arith.constant 0 : index
    %c0_105 = arith.constant 0 : index
    %129 = vector.load %arg8[%c3, %c0_104, %c0_105] : memref<6x1x128xf32, #tpu.memory_space<vmem>>, vector<1x1x128xf32>
    %130 = vector.shape_cast %129 : vector<1x1x128xf32> to vector<1x128xf32>
    %cst_106 = arith.constant 0.000000e+00 : bf16
    %131 = vector.broadcast %cst_106 : bf16 to vector<1x128xbf16>
    %132 = vector.extract_strided_slice %128 {offsets = [0, 0], sizes = [143, 128], strides = [1, 1]} : vector<144x128xbf16> to vector<143x128xbf16>
    %133 = tpu.concatenate %131, %132 in 0 : vector<1x128xbf16>, vector<143x128xbf16> -> vector<144x128xbf16>
    %134 = vector.extract_strided_slice %128 {offsets = [1, 0], sizes = [143, 128], strides = [1, 1]} : vector<144x128xbf16> to vector<143x128xbf16>
    %135 = tpu.concatenate %134, %131 in 0 : vector<143x128xbf16>, vector<1x128xbf16> -> vector<144x128xbf16>
    %c3_107 = arith.constant 3 : index
    %c0_108 = arith.constant 0 : index
    %c0_109 = arith.constant 0 : index
    %c0_110 = arith.constant 0 : index
    %136 = vector.load %arg7[%c3_107, %c0_108, %c0_109, %c0_110] : memref<6x3x128x128xbf16, #tpu.memory_space<vmem>>, vector<1x1x128x128xbf16>
    %137 = vector.shape_cast %136 : vector<1x1x128x128xbf16> to vector<128x128xbf16>
    %cst_111 = arith.constant dense<0.000000e+00> : vector<144x128xf32>
    %138 = tpu.matmul %133, %137, %cst_111 {dimension_numbers = #tpu.dot_dimension_numbers<[1], [0], [0], [1], [0, 0, 1, 1], [], []>} : vector<144x128xbf16>, vector<128x128xbf16>, vector<144x128xf32> -> vector<144x128xf32>
    %139 = vector.broadcast %130 : vector<1x128xf32> to vector<144x128xf32>
    %140 = arith.addf %138, %139 : vector<144x128xf32>
    %c3_112 = arith.constant 3 : index
    %c1_113 = arith.constant 1 : index
    %c0_114 = arith.constant 0 : index
    %c0_115 = arith.constant 0 : index
    %141 = vector.load %arg7[%c3_112, %c1_113, %c0_114, %c0_115] : memref<6x3x128x128xbf16, #tpu.memory_space<vmem>>, vector<1x1x128x128xbf16>
    %142 = vector.shape_cast %141 : vector<1x1x128x128xbf16> to vector<128x128xbf16>
    %cst_116 = arith.constant dense<0.000000e+00> : vector<144x128xf32>
    %143 = tpu.matmul %128, %142, %cst_116 {dimension_numbers = #tpu.dot_dimension_numbers<[1], [0], [0], [1], [0, 0, 1, 1], [], []>} : vector<144x128xbf16>, vector<128x128xbf16>, vector<144x128xf32> -> vector<144x128xf32>
    %144 = arith.addf %140, %143 : vector<144x128xf32>
    %c3_117 = arith.constant 3 : index
    %c2_118 = arith.constant 2 : index
    %c0_119 = arith.constant 0 : index
    %c0_120 = arith.constant 0 : index
    %145 = vector.load %arg7[%c3_117, %c2_118, %c0_119, %c0_120] : memref<6x3x128x128xbf16, #tpu.memory_space<vmem>>, vector<1x1x128x128xbf16>
    %146 = vector.shape_cast %145 : vector<1x1x128x128xbf16> to vector<128x128xbf16>
    %cst_121 = arith.constant dense<0.000000e+00> : vector<144x128xf32>
    %147 = tpu.matmul %135, %146, %cst_121 {dimension_numbers = #tpu.dot_dimension_numbers<[1], [0], [0], [1], [0, 0, 1, 1], [], []>} : vector<144x128xbf16>, vector<128x128xbf16>, vector<144x128xf32> -> vector<144x128xf32>
    %148 = arith.addf %144, %147 : vector<144x128xf32>
    %cst_122 = arith.constant 0.000000e+00 : f32
    %149 = vector.broadcast %cst_122 : f32 to vector<144x128xf32>
    %150 = arith.maximumf %148, %149 : vector<144x128xf32>
    %c0_123 = arith.constant 0 : index
    %c0_124 = arith.constant 0 : index
    %151 = vector.load %arg21[%c0_123, %c0_124] : memref<144x128xf32, #tpu.memory_space<vmem>>, vector<144x128xf32>
    %152 = arith.mulf %150, %151 : vector<144x128xf32>
    %153 = arith.truncf %152 : vector<144x128xf32> to vector<144x128xbf16>
    %c4 = arith.constant 4 : index
    %c0_125 = arith.constant 0 : index
    %c0_126 = arith.constant 0 : index
    %154 = vector.load %arg8[%c4, %c0_125, %c0_126] : memref<6x1x128xf32, #tpu.memory_space<vmem>>, vector<1x1x128xf32>
    %155 = vector.shape_cast %154 : vector<1x1x128xf32> to vector<1x128xf32>
    %cst_127 = arith.constant 0.000000e+00 : bf16
    %156 = vector.broadcast %cst_127 : bf16 to vector<1x128xbf16>
    %157 = vector.extract_strided_slice %153 {offsets = [0, 0], sizes = [143, 128], strides = [1, 1]} : vector<144x128xbf16> to vector<143x128xbf16>
    %158 = tpu.concatenate %156, %157 in 0 : vector<1x128xbf16>, vector<143x128xbf16> -> vector<144x128xbf16>
    %159 = vector.extract_strided_slice %153 {offsets = [1, 0], sizes = [143, 128], strides = [1, 1]} : vector<144x128xbf16> to vector<143x128xbf16>
    %160 = tpu.concatenate %159, %156 in 0 : vector<143x128xbf16>, vector<1x128xbf16> -> vector<144x128xbf16>
    %c4_128 = arith.constant 4 : index
    %c0_129 = arith.constant 0 : index
    %c0_130 = arith.constant 0 : index
    %c0_131 = arith.constant 0 : index
    %161 = vector.load %arg7[%c4_128, %c0_129, %c0_130, %c0_131] : memref<6x3x128x128xbf16, #tpu.memory_space<vmem>>, vector<1x1x128x128xbf16>
    %162 = vector.shape_cast %161 : vector<1x1x128x128xbf16> to vector<128x128xbf16>
    %cst_132 = arith.constant dense<0.000000e+00> : vector<144x128xf32>
    %163 = tpu.matmul %158, %162, %cst_132 {dimension_numbers = #tpu.dot_dimension_numbers<[1], [0], [0], [1], [0, 0, 1, 1], [], []>} : vector<144x128xbf16>, vector<128x128xbf16>, vector<144x128xf32> -> vector<144x128xf32>
    %164 = vector.broadcast %155 : vector<1x128xf32> to vector<144x128xf32>
    %165 = arith.addf %163, %164 : vector<144x128xf32>
    %c4_133 = arith.constant 4 : index
    %c1_134 = arith.constant 1 : index
    %c0_135 = arith.constant 0 : index
    %c0_136 = arith.constant 0 : index
    %166 = vector.load %arg7[%c4_133, %c1_134, %c0_135, %c0_136] : memref<6x3x128x128xbf16, #tpu.memory_space<vmem>>, vector<1x1x128x128xbf16>
    %167 = vector.shape_cast %166 : vector<1x1x128x128xbf16> to vector<128x128xbf16>
    %cst_137 = arith.constant dense<0.000000e+00> : vector<144x128xf32>
    %168 = tpu.matmul %153, %167, %cst_137 {dimension_numbers = #tpu.dot_dimension_numbers<[1], [0], [0], [1], [0, 0, 1, 1], [], []>} : vector<144x128xbf16>, vector<128x128xbf16>, vector<144x128xf32> -> vector<144x128xf32>
    %169 = arith.addf %165, %168 : vector<144x128xf32>
    %c4_138 = arith.constant 4 : index
    %c2_139 = arith.constant 2 : index
    %c0_140 = arith.constant 0 : index
    %c0_141 = arith.constant 0 : index
    %170 = vector.load %arg7[%c4_138, %c2_139, %c0_140, %c0_141] : memref<6x3x128x128xbf16, #tpu.memory_space<vmem>>, vector<1x1x128x128xbf16>
    %171 = vector.shape_cast %170 : vector<1x1x128x128xbf16> to vector<128x128xbf16>
    %cst_142 = arith.constant dense<0.000000e+00> : vector<144x128xf32>
    %172 = tpu.matmul %160, %171, %cst_142 {dimension_numbers = #tpu.dot_dimension_numbers<[1], [0], [0], [1], [0, 0, 1, 1], [], []>} : vector<144x128xbf16>, vector<128x128xbf16>, vector<144x128xf32> -> vector<144x128xf32>
    %173 = arith.addf %169, %172 : vector<144x128xf32>
    %cst_143 = arith.constant 0.000000e+00 : f32
    %174 = vector.broadcast %cst_143 : f32 to vector<144x128xf32>
    %175 = arith.maximumf %173, %174 : vector<144x128xf32>
    %c0_144 = arith.constant 0 : index
    %c0_145 = arith.constant 0 : index
    %176 = vector.load %arg21[%c0_144, %c0_145] : memref<144x128xf32, #tpu.memory_space<vmem>>, vector<144x128xf32>
    %177 = arith.mulf %175, %176 : vector<144x128xf32>
    %178 = arith.truncf %177 : vector<144x128xf32> to vector<144x128xbf16>
    %c5 = arith.constant 5 : index
    %c0_146 = arith.constant 0 : index
    %c0_147 = arith.constant 0 : index
    %179 = vector.load %arg8[%c5, %c0_146, %c0_147] : memref<6x1x128xf32, #tpu.memory_space<vmem>>, vector<1x1x128xf32>
    %180 = vector.shape_cast %179 : vector<1x1x128xf32> to vector<1x128xf32>
    %cst_148 = arith.constant 0.000000e+00 : bf16
    %181 = vector.broadcast %cst_148 : bf16 to vector<1x128xbf16>
    %182 = vector.extract_strided_slice %178 {offsets = [0, 0], sizes = [143, 128], strides = [1, 1]} : vector<144x128xbf16> to vector<143x128xbf16>
    %183 = tpu.concatenate %181, %182 in 0 : vector<1x128xbf16>, vector<143x128xbf16> -> vector<144x128xbf16>
    %184 = vector.extract_strided_slice %178 {offsets = [1, 0], sizes = [143, 128], strides = [1, 1]} : vector<144x128xbf16> to vector<143x128xbf16>
    %185 = tpu.concatenate %184, %181 in 0 : vector<143x128xbf16>, vector<1x128xbf16> -> vector<144x128xbf16>
    %c5_149 = arith.constant 5 : index
    %c0_150 = arith.constant 0 : index
    %c0_151 = arith.constant 0 : index
    %c0_152 = arith.constant 0 : index
    %186 = vector.load %arg7[%c5_149, %c0_150, %c0_151, %c0_152] : memref<6x3x128x128xbf16, #tpu.memory_space<vmem>>, vector<1x1x128x128xbf16>
    %187 = vector.shape_cast %186 : vector<1x1x128x128xbf16> to vector<128x128xbf16>
    %cst_153 = arith.constant dense<0.000000e+00> : vector<144x128xf32>
    %188 = tpu.matmul %183, %187, %cst_153 {dimension_numbers = #tpu.dot_dimension_numbers<[1], [0], [0], [1], [0, 0, 1, 1], [], []>} : vector<144x128xbf16>, vector<128x128xbf16>, vector<144x128xf32> -> vector<144x128xf32>
    %189 = vector.broadcast %180 : vector<1x128xf32> to vector<144x128xf32>
    %190 = arith.addf %188, %189 : vector<144x128xf32>
    %c5_154 = arith.constant 5 : index
    %c1_155 = arith.constant 1 : index
    %c0_156 = arith.constant 0 : index
    %c0_157 = arith.constant 0 : index
    %191 = vector.load %arg7[%c5_154, %c1_155, %c0_156, %c0_157] : memref<6x3x128x128xbf16, #tpu.memory_space<vmem>>, vector<1x1x128x128xbf16>
    %192 = vector.shape_cast %191 : vector<1x1x128x128xbf16> to vector<128x128xbf16>
    %cst_158 = arith.constant dense<0.000000e+00> : vector<144x128xf32>
    %193 = tpu.matmul %178, %192, %cst_158 {dimension_numbers = #tpu.dot_dimension_numbers<[1], [0], [0], [1], [0, 0, 1, 1], [], []>} : vector<144x128xbf16>, vector<128x128xbf16>, vector<144x128xf32> -> vector<144x128xf32>
    %194 = arith.addf %190, %193 : vector<144x128xf32>
    %c5_159 = arith.constant 5 : index
    %c2_160 = arith.constant 2 : index
    %c0_161 = arith.constant 0 : index
    %c0_162 = arith.constant 0 : index
    %195 = vector.load %arg7[%c5_159, %c2_160, %c0_161, %c0_162] : memref<6x3x128x128xbf16, #tpu.memory_space<vmem>>, vector<1x1x128x128xbf16>
    %196 = vector.shape_cast %195 : vector<1x1x128x128xbf16> to vector<128x128xbf16>
    %cst_163 = arith.constant dense<0.000000e+00> : vector<144x128xf32>
    %197 = tpu.matmul %185, %196, %cst_163 {dimension_numbers = #tpu.dot_dimension_numbers<[1], [0], [0], [1], [0, 0, 1, 1], [], []>} : vector<144x128xbf16>, vector<128x128xbf16>, vector<144x128xf32> -> vector<144x128xf32>
    %198 = arith.addf %194, %197 : vector<144x128xf32>
    %cst_164 = arith.constant 0.000000e+00 : f32
    %199 = vector.broadcast %cst_164 : f32 to vector<144x128xf32>
    %200 = arith.maximumf %198, %199 : vector<144x128xf32>
    %201 = arith.truncf %200 : vector<144x128xf32> to vector<144x128xbf16>
    %c0_165 = arith.constant 0 : index
    %c0_166 = arith.constant 0 : index
    %202 = vector.load %arg18[%c0_165, %c0_166] : memref<80x144xbf16, #tpu.memory_space<vmem>>, vector<80x144xbf16>
    %cst_167 = arith.constant dense<0.000000e+00> : vector<80x128xf32>
    %203 = tpu.matmul %202, %201, %cst_167 {dimension_numbers = #tpu.dot_dimension_numbers<[1], [0], [0], [1], [0, 0, 1, 1], [], []>} : vector<80x144xbf16>, vector<144x128xbf16>, vector<80x128xf32> -> vector<80x128xf32>
    %204 = arith.truncf %203 : vector<80x128xf32> to vector<80x128xbf16>
    %c0_168 = arith.constant 0 : index
    %c0_169 = arith.constant 0 : index
    %c0_170 = arith.constant 0 : index
    %205 = vector.load %arg11[%c0_168, %c0_169, %c0_170] : memref<6x1x64xf32, #tpu.memory_space<vmem>>, vector<1x1x64xf32>
    %206 = vector.shape_cast %205 : vector<1x1x64xf32> to vector<1x64xf32>
    %cst_171 = arith.constant 0.000000e+00 : bf16
    %207 = vector.broadcast %cst_171 : bf16 to vector<1x128xbf16>
    %208 = vector.extract_strided_slice %204 {offsets = [0, 0], sizes = [79, 128], strides = [1, 1]} : vector<80x128xbf16> to vector<79x128xbf16>
    %209 = tpu.concatenate %207, %208 in 0 : vector<1x128xbf16>, vector<79x128xbf16> -> vector<80x128xbf16>
    %210 = vector.extract_strided_slice %204 {offsets = [1, 0], sizes = [79, 128], strides = [1, 1]} : vector<80x128xbf16> to vector<79x128xbf16>
    %211 = tpu.concatenate %210, %207 in 0 : vector<79x128xbf16>, vector<1x128xbf16> -> vector<80x128xbf16>
    %c0_172 = arith.constant 0 : index
    %c0_173 = arith.constant 0 : index
    %c0_174 = arith.constant 0 : index
    %212 = vector.load %arg9[%c0_172, %c0_173, %c0_174] : memref<3x128x64xbf16, #tpu.memory_space<vmem>>, vector<1x128x64xbf16>
    %213 = vector.shape_cast %212 : vector<1x128x64xbf16> to vector<128x64xbf16>
    %cst_175 = arith.constant dense<0.000000e+00> : vector<80x64xf32>
    %214 = tpu.matmul %209, %213, %cst_175 {dimension_numbers = #tpu.dot_dimension_numbers<[1], [0], [0], [1], [0, 0, 1, 1], [], []>} : vector<80x128xbf16>, vector<128x64xbf16>, vector<80x64xf32> -> vector<80x64xf32>
    %215 = vector.broadcast %206 : vector<1x64xf32> to vector<80x64xf32>
    %216 = arith.addf %214, %215 : vector<80x64xf32>
    %c1_176 = arith.constant 1 : index
    %c0_177 = arith.constant 0 : index
    %c0_178 = arith.constant 0 : index
    %217 = vector.load %arg9[%c1_176, %c0_177, %c0_178] : memref<3x128x64xbf16, #tpu.memory_space<vmem>>, vector<1x128x64xbf16>
    %218 = vector.shape_cast %217 : vector<1x128x64xbf16> to vector<128x64xbf16>
    %cst_179 = arith.constant dense<0.000000e+00> : vector<80x64xf32>
    %219 = tpu.matmul %204, %218, %cst_179 {dimension_numbers = #tpu.dot_dimension_numbers<[1], [0], [0], [1], [0, 0, 1, 1], [], []>} : vector<80x128xbf16>, vector<128x64xbf16>, vector<80x64xf32> -> vector<80x64xf32>
    %220 = arith.addf %216, %219 : vector<80x64xf32>
    %c2_180 = arith.constant 2 : index
    %c0_181 = arith.constant 0 : index
    %c0_182 = arith.constant 0 : index
    %221 = vector.load %arg9[%c2_180, %c0_181, %c0_182] : memref<3x128x64xbf16, #tpu.memory_space<vmem>>, vector<1x128x64xbf16>
    %222 = vector.shape_cast %221 : vector<1x128x64xbf16> to vector<128x64xbf16>
    %cst_183 = arith.constant dense<0.000000e+00> : vector<80x64xf32>
    %223 = tpu.matmul %211, %222, %cst_183 {dimension_numbers = #tpu.dot_dimension_numbers<[1], [0], [0], [1], [0, 0, 1, 1], [], []>} : vector<80x128xbf16>, vector<128x64xbf16>, vector<80x64xf32> -> vector<80x64xf32>
    %224 = arith.addf %220, %223 : vector<80x64xf32>
    %cst_184 = arith.constant 0.000000e+00 : f32
    %225 = vector.broadcast %cst_184 : f32 to vector<80x64xf32>
    %226 = arith.maximumf %224, %225 : vector<80x64xf32>
    %c0_185 = arith.constant 0 : index
    %c0_186 = arith.constant 0 : index
    %227 = vector.load %arg22[%c0_185, %c0_186] : memref<80x64xf32, #tpu.memory_space<vmem>>, vector<80x64xf32>
    %228 = arith.mulf %226, %227 : vector<80x64xf32>
    %229 = arith.truncf %228 : vector<80x64xf32> to vector<80x64xbf16>
    %c1_187 = arith.constant 1 : index
    %c0_188 = arith.constant 0 : index
    %c0_189 = arith.constant 0 : index
    %230 = vector.load %arg11[%c1_187, %c0_188, %c0_189] : memref<6x1x64xf32, #tpu.memory_space<vmem>>, vector<1x1x64xf32>
    %231 = vector.shape_cast %230 : vector<1x1x64xf32> to vector<1x64xf32>
    %cst_190 = arith.constant 0.000000e+00 : bf16
    %232 = vector.broadcast %cst_190 : bf16 to vector<1x64xbf16>
    %233 = vector.extract_strided_slice %229 {offsets = [0, 0], sizes = [79, 64], strides = [1, 1]} : vector<80x64xbf16> to vector<79x64xbf16>
    %234 = tpu.concatenate %232, %233 in 0 : vector<1x64xbf16>, vector<79x64xbf16> -> vector<80x64xbf16>
    %235 = vector.extract_strided_slice %229 {offsets = [1, 0], sizes = [79, 64], strides = [1, 1]} : vector<80x64xbf16> to vector<79x64xbf16>
    %236 = tpu.concatenate %235, %232 in 0 : vector<79x64xbf16>, vector<1x64xbf16> -> vector<80x64xbf16>
    %c0_191 = arith.constant 0 : index
    %c0_192 = arith.constant 0 : index
    %c0_193 = arith.constant 0 : index
    %c0_194 = arith.constant 0 : index
    %237 = vector.load %arg10[%c0_191, %c0_192, %c0_193, %c0_194] : memref<5x3x64x64xbf16, #tpu.memory_space<vmem>>, vector<1x1x64x64xbf16>
    %238 = vector.shape_cast %237 : vector<1x1x64x64xbf16> to vector<64x64xbf16>
    %cst_195 = arith.constant dense<0.000000e+00> : vector<80x64xf32>
    %239 = tpu.matmul %234, %238, %cst_195 {dimension_numbers = #tpu.dot_dimension_numbers<[1], [0], [0], [1], [0, 0, 1, 1], [], []>} : vector<80x64xbf16>, vector<64x64xbf16>, vector<80x64xf32> -> vector<80x64xf32>
    %240 = vector.broadcast %231 : vector<1x64xf32> to vector<80x64xf32>
    %241 = arith.addf %239, %240 : vector<80x64xf32>
    %c0_196 = arith.constant 0 : index
    %c1_197 = arith.constant 1 : index
    %c0_198 = arith.constant 0 : index
    %c0_199 = arith.constant 0 : index
    %242 = vector.load %arg10[%c0_196, %c1_197, %c0_198, %c0_199] : memref<5x3x64x64xbf16, #tpu.memory_space<vmem>>, vector<1x1x64x64xbf16>
    %243 = vector.shape_cast %242 : vector<1x1x64x64xbf16> to vector<64x64xbf16>
    %cst_200 = arith.constant dense<0.000000e+00> : vector<80x64xf32>
    %244 = tpu.matmul %229, %243, %cst_200 {dimension_numbers = #tpu.dot_dimension_numbers<[1], [0], [0], [1], [0, 0, 1, 1], [], []>} : vector<80x64xbf16>, vector<64x64xbf16>, vector<80x64xf32> -> vector<80x64xf32>
    %245 = arith.addf %241, %244 : vector<80x64xf32>
    %c0_201 = arith.constant 0 : index
    %c2_202 = arith.constant 2 : index
    %c0_203 = arith.constant 0 : index
    %c0_204 = arith.constant 0 : index
    %246 = vector.load %arg10[%c0_201, %c2_202, %c0_203, %c0_204] : memref<5x3x64x64xbf16, #tpu.memory_space<vmem>>, vector<1x1x64x64xbf16>
    %247 = vector.shape_cast %246 : vector<1x1x64x64xbf16> to vector<64x64xbf16>
    %cst_205 = arith.constant dense<0.000000e+00> : vector<80x64xf32>
    %248 = tpu.matmul %236, %247, %cst_205 {dimension_numbers = #tpu.dot_dimension_numbers<[1], [0], [0], [1], [0, 0, 1, 1], [], []>} : vector<80x64xbf16>, vector<64x64xbf16>, vector<80x64xf32> -> vector<80x64xf32>
    %249 = arith.addf %245, %248 : vector<80x64xf32>
    %cst_206 = arith.constant 0.000000e+00 : f32
    %250 = vector.broadcast %cst_206 : f32 to vector<80x64xf32>
    %251 = arith.maximumf %249, %250 : vector<80x64xf32>
    %c0_207 = arith.constant 0 : index
    %c0_208 = arith.constant 0 : index
    %252 = vector.load %arg22[%c0_207, %c0_208] : memref<80x64xf32, #tpu.memory_space<vmem>>, vector<80x64xf32>
    %253 = arith.mulf %251, %252 : vector<80x64xf32>
    %254 = arith.truncf %253 : vector<80x64xf32> to vector<80x64xbf16>
    %c2_209 = arith.constant 2 : index
    %c0_210 = arith.constant 0 : index
    %c0_211 = arith.constant 0 : index
    %255 = vector.load %arg11[%c2_209, %c0_210, %c0_211] : memref<6x1x64xf32, #tpu.memory_space<vmem>>, vector<1x1x64xf32>
    %256 = vector.shape_cast %255 : vector<1x1x64xf32> to vector<1x64xf32>
    %cst_212 = arith.constant 0.000000e+00 : bf16
    %257 = vector.broadcast %cst_212 : bf16 to vector<1x64xbf16>
    %258 = vector.extract_strided_slice %254 {offsets = [0, 0], sizes = [79, 64], strides = [1, 1]} : vector<80x64xbf16> to vector<79x64xbf16>
    %259 = tpu.concatenate %257, %258 in 0 : vector<1x64xbf16>, vector<79x64xbf16> -> vector<80x64xbf16>
    %260 = vector.extract_strided_slice %254 {offsets = [1, 0], sizes = [79, 64], strides = [1, 1]} : vector<80x64xbf16> to vector<79x64xbf16>
    %261 = tpu.concatenate %260, %257 in 0 : vector<79x64xbf16>, vector<1x64xbf16> -> vector<80x64xbf16>
    %c1_213 = arith.constant 1 : index
    %c0_214 = arith.constant 0 : index
    %c0_215 = arith.constant 0 : index
    %c0_216 = arith.constant 0 : index
    %262 = vector.load %arg10[%c1_213, %c0_214, %c0_215, %c0_216] : memref<5x3x64x64xbf16, #tpu.memory_space<vmem>>, vector<1x1x64x64xbf16>
    %263 = vector.shape_cast %262 : vector<1x1x64x64xbf16> to vector<64x64xbf16>
    %cst_217 = arith.constant dense<0.000000e+00> : vector<80x64xf32>
    %264 = tpu.matmul %259, %263, %cst_217 {dimension_numbers = #tpu.dot_dimension_numbers<[1], [0], [0], [1], [0, 0, 1, 1], [], []>} : vector<80x64xbf16>, vector<64x64xbf16>, vector<80x64xf32> -> vector<80x64xf32>
    %265 = vector.broadcast %256 : vector<1x64xf32> to vector<80x64xf32>
    %266 = arith.addf %264, %265 : vector<80x64xf32>
    %c1_218 = arith.constant 1 : index
    %c1_219 = arith.constant 1 : index
    %c0_220 = arith.constant 0 : index
    %c0_221 = arith.constant 0 : index
    %267 = vector.load %arg10[%c1_218, %c1_219, %c0_220, %c0_221] : memref<5x3x64x64xbf16, #tpu.memory_space<vmem>>, vector<1x1x64x64xbf16>
    %268 = vector.shape_cast %267 : vector<1x1x64x64xbf16> to vector<64x64xbf16>
    %cst_222 = arith.constant dense<0.000000e+00> : vector<80x64xf32>
    %269 = tpu.matmul %254, %268, %cst_222 {dimension_numbers = #tpu.dot_dimension_numbers<[1], [0], [0], [1], [0, 0, 1, 1], [], []>} : vector<80x64xbf16>, vector<64x64xbf16>, vector<80x64xf32> -> vector<80x64xf32>
    %270 = arith.addf %266, %269 : vector<80x64xf32>
    %c1_223 = arith.constant 1 : index
    %c2_224 = arith.constant 2 : index
    %c0_225 = arith.constant 0 : index
    %c0_226 = arith.constant 0 : index
    %271 = vector.load %arg10[%c1_223, %c2_224, %c0_225, %c0_226] : memref<5x3x64x64xbf16, #tpu.memory_space<vmem>>, vector<1x1x64x64xbf16>
    %272 = vector.shape_cast %271 : vector<1x1x64x64xbf16> to vector<64x64xbf16>
    %cst_227 = arith.constant dense<0.000000e+00> : vector<80x64xf32>
    %273 = tpu.matmul %261, %272, %cst_227 {dimension_numbers = #tpu.dot_dimension_numbers<[1], [0], [0], [1], [0, 0, 1, 1], [], []>} : vector<80x64xbf16>, vector<64x64xbf16>, vector<80x64xf32> -> vector<80x64xf32>
    %274 = arith.addf %270, %273 : vector<80x64xf32>
    %cst_228 = arith.constant 0.000000e+00 : f32
    %275 = vector.broadcast %cst_228 : f32 to vector<80x64xf32>
    %276 = arith.maximumf %274, %275 : vector<80x64xf32>
    %c0_229 = arith.constant 0 : index
    %c0_230 = arith.constant 0 : index
    %277 = vector.load %arg22[%c0_229, %c0_230] : memref<80x64xf32, #tpu.memory_space<vmem>>, vector<80x64xf32>
    %278 = arith.mulf %276, %277 : vector<80x64xf32>
    %279 = arith.truncf %278 : vector<80x64xf32> to vector<80x64xbf16>
    %c3_231 = arith.constant 3 : index
    %c0_232 = arith.constant 0 : index
    %c0_233 = arith.constant 0 : index
    %280 = vector.load %arg11[%c3_231, %c0_232, %c0_233] : memref<6x1x64xf32, #tpu.memory_space<vmem>>, vector<1x1x64xf32>
    %281 = vector.shape_cast %280 : vector<1x1x64xf32> to vector<1x64xf32>
    %cst_234 = arith.constant 0.000000e+00 : bf16
    %282 = vector.broadcast %cst_234 : bf16 to vector<1x64xbf16>
    %283 = vector.extract_strided_slice %279 {offsets = [0, 0], sizes = [79, 64], strides = [1, 1]} : vector<80x64xbf16> to vector<79x64xbf16>
    %284 = tpu.concatenate %282, %283 in 0 : vector<1x64xbf16>, vector<79x64xbf16> -> vector<80x64xbf16>
    %285 = vector.extract_strided_slice %279 {offsets = [1, 0], sizes = [79, 64], strides = [1, 1]} : vector<80x64xbf16> to vector<79x64xbf16>
    %286 = tpu.concatenate %285, %282 in 0 : vector<79x64xbf16>, vector<1x64xbf16> -> vector<80x64xbf16>
    %c2_235 = arith.constant 2 : index
    %c0_236 = arith.constant 0 : index
    %c0_237 = arith.constant 0 : index
    %c0_238 = arith.constant 0 : index
    %287 = vector.load %arg10[%c2_235, %c0_236, %c0_237, %c0_238] : memref<5x3x64x64xbf16, #tpu.memory_space<vmem>>, vector<1x1x64x64xbf16>
    %288 = vector.shape_cast %287 : vector<1x1x64x64xbf16> to vector<64x64xbf16>
    %cst_239 = arith.constant dense<0.000000e+00> : vector<80x64xf32>
    %289 = tpu.matmul %284, %288, %cst_239 {dimension_numbers = #tpu.dot_dimension_numbers<[1], [0], [0], [1], [0, 0, 1, 1], [], []>} : vector<80x64xbf16>, vector<64x64xbf16>, vector<80x64xf32> -> vector<80x64xf32>
    %290 = vector.broadcast %281 : vector<1x64xf32> to vector<80x64xf32>
    %291 = arith.addf %289, %290 : vector<80x64xf32>
    %c2_240 = arith.constant 2 : index
    %c1_241 = arith.constant 1 : index
    %c0_242 = arith.constant 0 : index
    %c0_243 = arith.constant 0 : index
    %292 = vector.load %arg10[%c2_240, %c1_241, %c0_242, %c0_243] : memref<5x3x64x64xbf16, #tpu.memory_space<vmem>>, vector<1x1x64x64xbf16>
    %293 = vector.shape_cast %292 : vector<1x1x64x64xbf16> to vector<64x64xbf16>
    %cst_244 = arith.constant dense<0.000000e+00> : vector<80x64xf32>
    %294 = tpu.matmul %279, %293, %cst_244 {dimension_numbers = #tpu.dot_dimension_numbers<[1], [0], [0], [1], [0, 0, 1, 1], [], []>} : vector<80x64xbf16>, vector<64x64xbf16>, vector<80x64xf32> -> vector<80x64xf32>
    %295 = arith.addf %291, %294 : vector<80x64xf32>
    %c2_245 = arith.constant 2 : index
    %c2_246 = arith.constant 2 : index
    %c0_247 = arith.constant 0 : index
    %c0_248 = arith.constant 0 : index
    %296 = vector.load %arg10[%c2_245, %c2_246, %c0_247, %c0_248] : memref<5x3x64x64xbf16, #tpu.memory_space<vmem>>, vector<1x1x64x64xbf16>
    %297 = vector.shape_cast %296 : vector<1x1x64x64xbf16> to vector<64x64xbf16>
    %cst_249 = arith.constant dense<0.000000e+00> : vector<80x64xf32>
    %298 = tpu.matmul %286, %297, %cst_249 {dimension_numbers = #tpu.dot_dimension_numbers<[1], [0], [0], [1], [0, 0, 1, 1], [], []>} : vector<80x64xbf16>, vector<64x64xbf16>, vector<80x64xf32> -> vector<80x64xf32>
    %299 = arith.addf %295, %298 : vector<80x64xf32>
    %cst_250 = arith.constant 0.000000e+00 : f32
    %300 = vector.broadcast %cst_250 : f32 to vector<80x64xf32>
    %301 = arith.maximumf %299, %300 : vector<80x64xf32>
    %c0_251 = arith.constant 0 : index
    %c0_252 = arith.constant 0 : index
    %302 = vector.load %arg22[%c0_251, %c0_252] : memref<80x64xf32, #tpu.memory_space<vmem>>, vector<80x64xf32>
    %303 = arith.mulf %301, %302 : vector<80x64xf32>
    %304 = arith.truncf %303 : vector<80x64xf32> to vector<80x64xbf16>
    %c4_253 = arith.constant 4 : index
    %c0_254 = arith.constant 0 : index
    %c0_255 = arith.constant 0 : index
    %305 = vector.load %arg11[%c4_253, %c0_254, %c0_255] : memref<6x1x64xf32, #tpu.memory_space<vmem>>, vector<1x1x64xf32>
    %306 = vector.shape_cast %305 : vector<1x1x64xf32> to vector<1x64xf32>
    %cst_256 = arith.constant 0.000000e+00 : bf16
    %307 = vector.broadcast %cst_256 : bf16 to vector<1x64xbf16>
    %308 = vector.extract_strided_slice %304 {offsets = [0, 0], sizes = [79, 64], strides = [1, 1]} : vector<80x64xbf16> to vector<79x64xbf16>
    %309 = tpu.concatenate %307, %308 in 0 : vector<1x64xbf16>, vector<79x64xbf16> -> vector<80x64xbf16>
    %310 = vector.extract_strided_slice %304 {offsets = [1, 0], sizes = [79, 64], strides = [1, 1]} : vector<80x64xbf16> to vector<79x64xbf16>
    %311 = tpu.concatenate %310, %307 in 0 : vector<79x64xbf16>, vector<1x64xbf16> -> vector<80x64xbf16>
    %c3_257 = arith.constant 3 : index
    %c0_258 = arith.constant 0 : index
    %c0_259 = arith.constant 0 : index
    %c0_260 = arith.constant 0 : index
    %312 = vector.load %arg10[%c3_257, %c0_258, %c0_259, %c0_260] : memref<5x3x64x64xbf16, #tpu.memory_space<vmem>>, vector<1x1x64x64xbf16>
    %313 = vector.shape_cast %312 : vector<1x1x64x64xbf16> to vector<64x64xbf16>
    %cst_261 = arith.constant dense<0.000000e+00> : vector<80x64xf32>
    %314 = tpu.matmul %309, %313, %cst_261 {dimension_numbers = #tpu.dot_dimension_numbers<[1], [0], [0], [1], [0, 0, 1, 1], [], []>} : vector<80x64xbf16>, vector<64x64xbf16>, vector<80x64xf32> -> vector<80x64xf32>
    %315 = vector.broadcast %306 : vector<1x64xf32> to vector<80x64xf32>
    %316 = arith.addf %314, %315 : vector<80x64xf32>
    %c3_262 = arith.constant 3 : index
    %c1_263 = arith.constant 1 : index
    %c0_264 = arith.constant 0 : index
    %c0_265 = arith.constant 0 : index
    %317 = vector.load %arg10[%c3_262, %c1_263, %c0_264, %c0_265] : memref<5x3x64x64xbf16, #tpu.memory_space<vmem>>, vector<1x1x64x64xbf16>
    %318 = vector.shape_cast %317 : vector<1x1x64x64xbf16> to vector<64x64xbf16>
    %cst_266 = arith.constant dense<0.000000e+00> : vector<80x64xf32>
    %319 = tpu.matmul %304, %318, %cst_266 {dimension_numbers = #tpu.dot_dimension_numbers<[1], [0], [0], [1], [0, 0, 1, 1], [], []>} : vector<80x64xbf16>, vector<64x64xbf16>, vector<80x64xf32> -> vector<80x64xf32>
    %320 = arith.addf %316, %319 : vector<80x64xf32>
    %c3_267 = arith.constant 3 : index
    %c2_268 = arith.constant 2 : index
    %c0_269 = arith.constant 0 : index
    %c0_270 = arith.constant 0 : index
    %321 = vector.load %arg10[%c3_267, %c2_268, %c0_269, %c0_270] : memref<5x3x64x64xbf16, #tpu.memory_space<vmem>>, vector<1x1x64x64xbf16>
    %322 = vector.shape_cast %321 : vector<1x1x64x64xbf16> to vector<64x64xbf16>
    %cst_271 = arith.constant dense<0.000000e+00> : vector<80x64xf32>
    %323 = tpu.matmul %311, %322, %cst_271 {dimension_numbers = #tpu.dot_dimension_numbers<[1], [0], [0], [1], [0, 0, 1, 1], [], []>} : vector<80x64xbf16>, vector<64x64xbf16>, vector<80x64xf32> -> vector<80x64xf32>
    %324 = arith.addf %320, %323 : vector<80x64xf32>
    %cst_272 = arith.constant 0.000000e+00 : f32
    %325 = vector.broadcast %cst_272 : f32 to vector<80x64xf32>
    %326 = arith.maximumf %324, %325 : vector<80x64xf32>
    %c0_273 = arith.constant 0 : index
    %c0_274 = arith.constant 0 : index
    %327 = vector.load %arg22[%c0_273, %c0_274] : memref<80x64xf32, #tpu.memory_space<vmem>>, vector<80x64xf32>
    %328 = arith.mulf %326, %327 : vector<80x64xf32>
    %329 = arith.truncf %328 : vector<80x64xf32> to vector<80x64xbf16>
    %c5_275 = arith.constant 5 : index
    %c0_276 = arith.constant 0 : index
    %c0_277 = arith.constant 0 : index
    %330 = vector.load %arg11[%c5_275, %c0_276, %c0_277] : memref<6x1x64xf32, #tpu.memory_space<vmem>>, vector<1x1x64xf32>
    %331 = vector.shape_cast %330 : vector<1x1x64xf32> to vector<1x64xf32>
    %cst_278 = arith.constant 0.000000e+00 : bf16
    %332 = vector.broadcast %cst_278 : bf16 to vector<1x64xbf16>
    %333 = vector.extract_strided_slice %329 {offsets = [0, 0], sizes = [79, 64], strides = [1, 1]} : vector<80x64xbf16> to vector<79x64xbf16>
    %334 = tpu.concatenate %332, %333 in 0 : vector<1x64xbf16>, vector<79x64xbf16> -> vector<80x64xbf16>
    %335 = vector.extract_strided_slice %329 {offsets = [1, 0], sizes = [79, 64], strides = [1, 1]} : vector<80x64xbf16> to vector<79x64xbf16>
    %336 = tpu.concatenate %335, %332 in 0 : vector<79x64xbf16>, vector<1x64xbf16> -> vector<80x64xbf16>
    %c4_279 = arith.constant 4 : index
    %c0_280 = arith.constant 0 : index
    %c0_281 = arith.constant 0 : index
    %c0_282 = arith.constant 0 : index
    %337 = vector.load %arg10[%c4_279, %c0_280, %c0_281, %c0_282] : memref<5x3x64x64xbf16, #tpu.memory_space<vmem>>, vector<1x1x64x64xbf16>
    %338 = vector.shape_cast %337 : vector<1x1x64x64xbf16> to vector<64x64xbf16>
    %cst_283 = arith.constant dense<0.000000e+00> : vector<80x64xf32>
    %339 = tpu.matmul %334, %338, %cst_283 {dimension_numbers = #tpu.dot_dimension_numbers<[1], [0], [0], [1], [0, 0, 1, 1], [], []>} : vector<80x64xbf16>, vector<64x64xbf16>, vector<80x64xf32> -> vector<80x64xf32>
    %340 = vector.broadcast %331 : vector<1x64xf32> to vector<80x64xf32>
    %341 = arith.addf %339, %340 : vector<80x64xf32>
    %c4_284 = arith.constant 4 : index
    %c1_285 = arith.constant 1 : index
    %c0_286 = arith.constant 0 : index
    %c0_287 = arith.constant 0 : index
    %342 = vector.load %arg10[%c4_284, %c1_285, %c0_286, %c0_287] : memref<5x3x64x64xbf16, #tpu.memory_space<vmem>>, vector<1x1x64x64xbf16>
    %343 = vector.shape_cast %342 : vector<1x1x64x64xbf16> to vector<64x64xbf16>
    %cst_288 = arith.constant dense<0.000000e+00> : vector<80x64xf32>
    %344 = tpu.matmul %329, %343, %cst_288 {dimension_numbers = #tpu.dot_dimension_numbers<[1], [0], [0], [1], [0, 0, 1, 1], [], []>} : vector<80x64xbf16>, vector<64x64xbf16>, vector<80x64xf32> -> vector<80x64xf32>
    %345 = arith.addf %341, %344 : vector<80x64xf32>
    %c4_289 = arith.constant 4 : index
    %c2_290 = arith.constant 2 : index
    %c0_291 = arith.constant 0 : index
    %c0_292 = arith.constant 0 : index
    %346 = vector.load %arg10[%c4_289, %c2_290, %c0_291, %c0_292] : memref<5x3x64x64xbf16, #tpu.memory_space<vmem>>, vector<1x1x64x64xbf16>
    %347 = vector.shape_cast %346 : vector<1x1x64x64xbf16> to vector<64x64xbf16>
    %cst_293 = arith.constant dense<0.000000e+00> : vector<80x64xf32>
    %348 = tpu.matmul %336, %347, %cst_293 {dimension_numbers = #tpu.dot_dimension_numbers<[1], [0], [0], [1], [0, 0, 1, 1], [], []>} : vector<80x64xbf16>, vector<64x64xbf16>, vector<80x64xf32> -> vector<80x64xf32>
    %349 = arith.addf %345, %348 : vector<80x64xf32>
    %cst_294 = arith.constant 0.000000e+00 : f32
    %350 = vector.broadcast %cst_294 : f32 to vector<80x64xf32>
    %351 = arith.maximumf %349, %350 : vector<80x64xf32>
    %352 = arith.truncf %351 : vector<80x64xf32> to vector<80x64xbf16>
    %c0_295 = arith.constant 0 : index
    %c0_296 = arith.constant 0 : index
    %353 = vector.load %arg19[%c0_295, %c0_296] : memref<48x80xbf16, #tpu.memory_space<vmem>>, vector<48x80xbf16>
    %cst_297 = arith.constant dense<0.000000e+00> : vector<48x64xf32>
    %354 = tpu.matmul %353, %352, %cst_297 {dimension_numbers = #tpu.dot_dimension_numbers<[1], [0], [0], [1], [0, 0, 1, 1], [], []>} : vector<48x80xbf16>, vector<80x64xbf16>, vector<48x64xf32> -> vector<48x64xf32>
    %355 = arith.truncf %354 : vector<48x64xf32> to vector<48x64xbf16>
    %c0_298 = arith.constant 0 : index
    %c0_299 = arith.constant 0 : index
    %c0_300 = arith.constant 0 : index
    %356 = vector.load %arg14[%c0_298, %c0_299, %c0_300] : memref<4x1x32xf32, #tpu.memory_space<vmem>>, vector<1x1x32xf32>
    %357 = vector.shape_cast %356 : vector<1x1x32xf32> to vector<1x32xf32>
    %cst_301 = arith.constant 0.000000e+00 : bf16
    %358 = vector.broadcast %cst_301 : bf16 to vector<1x64xbf16>
    %359 = vector.extract_strided_slice %355 {offsets = [0, 0], sizes = [47, 64], strides = [1, 1]} : vector<48x64xbf16> to vector<47x64xbf16>
    %360 = tpu.concatenate %358, %359 in 0 : vector<1x64xbf16>, vector<47x64xbf16> -> vector<48x64xbf16>
    %361 = vector.extract_strided_slice %355 {offsets = [1, 0], sizes = [47, 64], strides = [1, 1]} : vector<48x64xbf16> to vector<47x64xbf16>
    %362 = tpu.concatenate %361, %358 in 0 : vector<47x64xbf16>, vector<1x64xbf16> -> vector<48x64xbf16>
    %c0_302 = arith.constant 0 : index
    %c0_303 = arith.constant 0 : index
    %c0_304 = arith.constant 0 : index
    %363 = vector.load %arg12[%c0_302, %c0_303, %c0_304] : memref<3x64x32xbf16, #tpu.memory_space<vmem>>, vector<1x64x32xbf16>
    %364 = vector.shape_cast %363 : vector<1x64x32xbf16> to vector<64x32xbf16>
    %cst_305 = arith.constant dense<0.000000e+00> : vector<48x32xf32>
    %365 = tpu.matmul %360, %364, %cst_305 {dimension_numbers = #tpu.dot_dimension_numbers<[1], [0], [0], [1], [0, 0, 1, 1], [], []>} : vector<48x64xbf16>, vector<64x32xbf16>, vector<48x32xf32> -> vector<48x32xf32>
    %366 = vector.broadcast %357 : vector<1x32xf32> to vector<48x32xf32>
    %367 = arith.addf %365, %366 : vector<48x32xf32>
    %c1_306 = arith.constant 1 : index
    %c0_307 = arith.constant 0 : index
    %c0_308 = arith.constant 0 : index
    %368 = vector.load %arg12[%c1_306, %c0_307, %c0_308] : memref<3x64x32xbf16, #tpu.memory_space<vmem>>, vector<1x64x32xbf16>
    %369 = vector.shape_cast %368 : vector<1x64x32xbf16> to vector<64x32xbf16>
    %cst_309 = arith.constant dense<0.000000e+00> : vector<48x32xf32>
    %370 = tpu.matmul %355, %369, %cst_309 {dimension_numbers = #tpu.dot_dimension_numbers<[1], [0], [0], [1], [0, 0, 1, 1], [], []>} : vector<48x64xbf16>, vector<64x32xbf16>, vector<48x32xf32> -> vector<48x32xf32>
    %371 = arith.addf %367, %370 : vector<48x32xf32>
    %c2_310 = arith.constant 2 : index
    %c0_311 = arith.constant 0 : index
    %c0_312 = arith.constant 0 : index
    %372 = vector.load %arg12[%c2_310, %c0_311, %c0_312] : memref<3x64x32xbf16, #tpu.memory_space<vmem>>, vector<1x64x32xbf16>
    %373 = vector.shape_cast %372 : vector<1x64x32xbf16> to vector<64x32xbf16>
    %cst_313 = arith.constant dense<0.000000e+00> : vector<48x32xf32>
    %374 = tpu.matmul %362, %373, %cst_313 {dimension_numbers = #tpu.dot_dimension_numbers<[1], [0], [0], [1], [0, 0, 1, 1], [], []>} : vector<48x64xbf16>, vector<64x32xbf16>, vector<48x32xf32> -> vector<48x32xf32>
    %375 = arith.addf %371, %374 : vector<48x32xf32>
    %cst_314 = arith.constant 0.000000e+00 : f32
    %376 = vector.broadcast %cst_314 : f32 to vector<48x32xf32>
    %377 = arith.maximumf %375, %376 : vector<48x32xf32>
    %c0_315 = arith.constant 0 : index
    %c0_316 = arith.constant 0 : index
    %378 = vector.load %arg23[%c0_315, %c0_316] : memref<48x32xf32, #tpu.memory_space<vmem>>, vector<48x32xf32>
    %379 = arith.mulf %377, %378 : vector<48x32xf32>
    %380 = arith.truncf %379 : vector<48x32xf32> to vector<48x32xbf16>
    %c1_317 = arith.constant 1 : index
    %c0_318 = arith.constant 0 : index
    %c0_319 = arith.constant 0 : index
    %381 = vector.load %arg14[%c1_317, %c0_318, %c0_319] : memref<4x1x32xf32, #tpu.memory_space<vmem>>, vector<1x1x32xf32>
    %382 = vector.shape_cast %381 : vector<1x1x32xf32> to vector<1x32xf32>
    %cst_320 = arith.constant 0.000000e+00 : bf16
    %383 = vector.broadcast %cst_320 : bf16 to vector<1x32xbf16>
    %384 = vector.extract_strided_slice %380 {offsets = [0, 0], sizes = [47, 32], strides = [1, 1]} : vector<48x32xbf16> to vector<47x32xbf16>
    %385 = tpu.concatenate %383, %384 in 0 : vector<1x32xbf16>, vector<47x32xbf16> -> vector<48x32xbf16>
    %386 = vector.extract_strided_slice %380 {offsets = [1, 0], sizes = [47, 32], strides = [1, 1]} : vector<48x32xbf16> to vector<47x32xbf16>
    %387 = tpu.concatenate %386, %383 in 0 : vector<47x32xbf16>, vector<1x32xbf16> -> vector<48x32xbf16>
    %c0_321 = arith.constant 0 : index
    %c0_322 = arith.constant 0 : index
    %c0_323 = arith.constant 0 : index
    %c0_324 = arith.constant 0 : index
    %388 = vector.load %arg13[%c0_321, %c0_322, %c0_323, %c0_324] : memref<3x3x32x32xbf16, #tpu.memory_space<vmem>>, vector<1x1x32x32xbf16>
    %389 = vector.shape_cast %388 : vector<1x1x32x32xbf16> to vector<32x32xbf16>
    %cst_325 = arith.constant dense<0.000000e+00> : vector<48x32xf32>
    %390 = tpu.matmul %385, %389, %cst_325 {dimension_numbers = #tpu.dot_dimension_numbers<[1], [0], [0], [1], [0, 0, 1, 1], [], []>} : vector<48x32xbf16>, vector<32x32xbf16>, vector<48x32xf32> -> vector<48x32xf32>
    %391 = vector.broadcast %382 : vector<1x32xf32> to vector<48x32xf32>
    %392 = arith.addf %390, %391 : vector<48x32xf32>
    %c0_326 = arith.constant 0 : index
    %c1_327 = arith.constant 1 : index
    %c0_328 = arith.constant 0 : index
    %c0_329 = arith.constant 0 : index
    %393 = vector.load %arg13[%c0_326, %c1_327, %c0_328, %c0_329] : memref<3x3x32x32xbf16, #tpu.memory_space<vmem>>, vector<1x1x32x32xbf16>
    %394 = vector.shape_cast %393 : vector<1x1x32x32xbf16> to vector<32x32xbf16>
    %cst_330 = arith.constant dense<0.000000e+00> : vector<48x32xf32>
    %395 = tpu.matmul %380, %394, %cst_330 {dimension_numbers = #tpu.dot_dimension_numbers<[1], [0], [0], [1], [0, 0, 1, 1], [], []>} : vector<48x32xbf16>, vector<32x32xbf16>, vector<48x32xf32> -> vector<48x32xf32>
    %396 = arith.addf %392, %395 : vector<48x32xf32>
    %c0_331 = arith.constant 0 : index
    %c2_332 = arith.constant 2 : index
    %c0_333 = arith.constant 0 : index
    %c0_334 = arith.constant 0 : index
    %397 = vector.load %arg13[%c0_331, %c2_332, %c0_333, %c0_334] : memref<3x3x32x32xbf16, #tpu.memory_space<vmem>>, vector<1x1x32x32xbf16>
    %398 = vector.shape_cast %397 : vector<1x1x32x32xbf16> to vector<32x32xbf16>
    %cst_335 = arith.constant dense<0.000000e+00> : vector<48x32xf32>
    %399 = tpu.matmul %387, %398, %cst_335 {dimension_numbers = #tpu.dot_dimension_numbers<[1], [0], [0], [1], [0, 0, 1, 1], [], []>} : vector<48x32xbf16>, vector<32x32xbf16>, vector<48x32xf32> -> vector<48x32xf32>
    %400 = arith.addf %396, %399 : vector<48x32xf32>
    %cst_336 = arith.constant 0.000000e+00 : f32
    %401 = vector.broadcast %cst_336 : f32 to vector<48x32xf32>
    %402 = arith.maximumf %400, %401 : vector<48x32xf32>
    %c0_337 = arith.constant 0 : index
    %c0_338 = arith.constant 0 : index
    %403 = vector.load %arg23[%c0_337, %c0_338] : memref<48x32xf32, #tpu.memory_space<vmem>>, vector<48x32xf32>
    %404 = arith.mulf %402, %403 : vector<48x32xf32>
    %405 = arith.truncf %404 : vector<48x32xf32> to vector<48x32xbf16>
    %c2_339 = arith.constant 2 : index
    %c0_340 = arith.constant 0 : index
    %c0_341 = arith.constant 0 : index
    %406 = vector.load %arg14[%c2_339, %c0_340, %c0_341] : memref<4x1x32xf32, #tpu.memory_space<vmem>>, vector<1x1x32xf32>
    %407 = vector.shape_cast %406 : vector<1x1x32xf32> to vector<1x32xf32>
    %cst_342 = arith.constant 0.000000e+00 : bf16
    %408 = vector.broadcast %cst_342 : bf16 to vector<1x32xbf16>
    %409 = vector.extract_strided_slice %405 {offsets = [0, 0], sizes = [47, 32], strides = [1, 1]} : vector<48x32xbf16> to vector<47x32xbf16>
    %410 = tpu.concatenate %408, %409 in 0 : vector<1x32xbf16>, vector<47x32xbf16> -> vector<48x32xbf16>
    %411 = vector.extract_strided_slice %405 {offsets = [1, 0], sizes = [47, 32], strides = [1, 1]} : vector<48x32xbf16> to vector<47x32xbf16>
    %412 = tpu.concatenate %411, %408 in 0 : vector<47x32xbf16>, vector<1x32xbf16> -> vector<48x32xbf16>
    %c1_343 = arith.constant 1 : index
    %c0_344 = arith.constant 0 : index
    %c0_345 = arith.constant 0 : index
    %c0_346 = arith.constant 0 : index
    %413 = vector.load %arg13[%c1_343, %c0_344, %c0_345, %c0_346] : memref<3x3x32x32xbf16, #tpu.memory_space<vmem>>, vector<1x1x32x32xbf16>
    %414 = vector.shape_cast %413 : vector<1x1x32x32xbf16> to vector<32x32xbf16>
    %cst_347 = arith.constant dense<0.000000e+00> : vector<48x32xf32>
    %415 = tpu.matmul %410, %414, %cst_347 {dimension_numbers = #tpu.dot_dimension_numbers<[1], [0], [0], [1], [0, 0, 1, 1], [], []>} : vector<48x32xbf16>, vector<32x32xbf16>, vector<48x32xf32> -> vector<48x32xf32>
    %416 = vector.broadcast %407 : vector<1x32xf32> to vector<48x32xf32>
    %417 = arith.addf %415, %416 : vector<48x32xf32>
    %c1_348 = arith.constant 1 : index
    %c1_349 = arith.constant 1 : index
    %c0_350 = arith.constant 0 : index
    %c0_351 = arith.constant 0 : index
    %418 = vector.load %arg13[%c1_348, %c1_349, %c0_350, %c0_351] : memref<3x3x32x32xbf16, #tpu.memory_space<vmem>>, vector<1x1x32x32xbf16>
    %419 = vector.shape_cast %418 : vector<1x1x32x32xbf16> to vector<32x32xbf16>
    %cst_352 = arith.constant dense<0.000000e+00> : vector<48x32xf32>
    %420 = tpu.matmul %405, %419, %cst_352 {dimension_numbers = #tpu.dot_dimension_numbers<[1], [0], [0], [1], [0, 0, 1, 1], [], []>} : vector<48x32xbf16>, vector<32x32xbf16>, vector<48x32xf32> -> vector<48x32xf32>
    %421 = arith.addf %417, %420 : vector<48x32xf32>
    %c1_353 = arith.constant 1 : index
    %c2_354 = arith.constant 2 : index
    %c0_355 = arith.constant 0 : index
    %c0_356 = arith.constant 0 : index
    %422 = vector.load %arg13[%c1_353, %c2_354, %c0_355, %c0_356] : memref<3x3x32x32xbf16, #tpu.memory_space<vmem>>, vector<1x1x32x32xbf16>
    %423 = vector.shape_cast %422 : vector<1x1x32x32xbf16> to vector<32x32xbf16>
    %cst_357 = arith.constant dense<0.000000e+00> : vector<48x32xf32>
    %424 = tpu.matmul %412, %423, %cst_357 {dimension_numbers = #tpu.dot_dimension_numbers<[1], [0], [0], [1], [0, 0, 1, 1], [], []>} : vector<48x32xbf16>, vector<32x32xbf16>, vector<48x32xf32> -> vector<48x32xf32>
    %425 = arith.addf %421, %424 : vector<48x32xf32>
    %cst_358 = arith.constant 0.000000e+00 : f32
    %426 = vector.broadcast %cst_358 : f32 to vector<48x32xf32>
    %427 = arith.maximumf %425, %426 : vector<48x32xf32>
    %c0_359 = arith.constant 0 : index
    %c0_360 = arith.constant 0 : index
    %428 = vector.load %arg23[%c0_359, %c0_360] : memref<48x32xf32, #tpu.memory_space<vmem>>, vector<48x32xf32>
    %429 = arith.mulf %427, %428 : vector<48x32xf32>
    %430 = arith.truncf %429 : vector<48x32xf32> to vector<48x32xbf16>
    %c3_361 = arith.constant 3 : index
    %c0_362 = arith.constant 0 : index
    %c0_363 = arith.constant 0 : index
    %431 = vector.load %arg14[%c3_361, %c0_362, %c0_363] : memref<4x1x32xf32, #tpu.memory_space<vmem>>, vector<1x1x32xf32>
    %432 = vector.shape_cast %431 : vector<1x1x32xf32> to vector<1x32xf32>
    %cst_364 = arith.constant 0.000000e+00 : bf16
    %433 = vector.broadcast %cst_364 : bf16 to vector<1x32xbf16>
    %434 = vector.extract_strided_slice %430 {offsets = [0, 0], sizes = [47, 32], strides = [1, 1]} : vector<48x32xbf16> to vector<47x32xbf16>
    %435 = tpu.concatenate %433, %434 in 0 : vector<1x32xbf16>, vector<47x32xbf16> -> vector<48x32xbf16>
    %436 = vector.extract_strided_slice %430 {offsets = [1, 0], sizes = [47, 32], strides = [1, 1]} : vector<48x32xbf16> to vector<47x32xbf16>
    %437 = tpu.concatenate %436, %433 in 0 : vector<47x32xbf16>, vector<1x32xbf16> -> vector<48x32xbf16>
    %c2_365 = arith.constant 2 : index
    %c0_366 = arith.constant 0 : index
    %c0_367 = arith.constant 0 : index
    %c0_368 = arith.constant 0 : index
    %438 = vector.load %arg13[%c2_365, %c0_366, %c0_367, %c0_368] : memref<3x3x32x32xbf16, #tpu.memory_space<vmem>>, vector<1x1x32x32xbf16>
    %439 = vector.shape_cast %438 : vector<1x1x32x32xbf16> to vector<32x32xbf16>
    %cst_369 = arith.constant dense<0.000000e+00> : vector<48x32xf32>
    %440 = tpu.matmul %435, %439, %cst_369 {dimension_numbers = #tpu.dot_dimension_numbers<[1], [0], [0], [1], [0, 0, 1, 1], [], []>} : vector<48x32xbf16>, vector<32x32xbf16>, vector<48x32xf32> -> vector<48x32xf32>
    %441 = vector.broadcast %432 : vector<1x32xf32> to vector<48x32xf32>
    %442 = arith.addf %440, %441 : vector<48x32xf32>
    %c2_370 = arith.constant 2 : index
    %c1_371 = arith.constant 1 : index
    %c0_372 = arith.constant 0 : index
    %c0_373 = arith.constant 0 : index
    %443 = vector.load %arg13[%c2_370, %c1_371, %c0_372, %c0_373] : memref<3x3x32x32xbf16, #tpu.memory_space<vmem>>, vector<1x1x32x32xbf16>
    %444 = vector.shape_cast %443 : vector<1x1x32x32xbf16> to vector<32x32xbf16>
    %cst_374 = arith.constant dense<0.000000e+00> : vector<48x32xf32>
    %445 = tpu.matmul %430, %444, %cst_374 {dimension_numbers = #tpu.dot_dimension_numbers<[1], [0], [0], [1], [0, 0, 1, 1], [], []>} : vector<48x32xbf16>, vector<32x32xbf16>, vector<48x32xf32> -> vector<48x32xf32>
    %446 = arith.addf %442, %445 : vector<48x32xf32>
    %c2_375 = arith.constant 2 : index
    %c2_376 = arith.constant 2 : index
    %c0_377 = arith.constant 0 : index
    %c0_378 = arith.constant 0 : index
    %447 = vector.load %arg13[%c2_375, %c2_376, %c0_377, %c0_378] : memref<3x3x32x32xbf16, #tpu.memory_space<vmem>>, vector<1x1x32x32xbf16>
    %448 = vector.shape_cast %447 : vector<1x1x32x32xbf16> to vector<32x32xbf16>
    %cst_379 = arith.constant dense<0.000000e+00> : vector<48x32xf32>
    %449 = tpu.matmul %437, %448, %cst_379 {dimension_numbers = #tpu.dot_dimension_numbers<[1], [0], [0], [1], [0, 0, 1, 1], [], []>} : vector<48x32xbf16>, vector<32x32xbf16>, vector<48x32xf32> -> vector<48x32xf32>
    %450 = arith.addf %446, %449 : vector<48x32xf32>
    %cst_380 = arith.constant 0.000000e+00 : f32
    %451 = vector.broadcast %cst_380 : f32 to vector<48x32xf32>
    %452 = arith.maximumf %450, %451 : vector<48x32xf32>
    %453 = arith.truncf %452 : vector<48x32xf32> to vector<48x32xbf16>
    %c0_381 = arith.constant 0 : index
    %c0_382 = arith.constant 0 : index
    %454 = vector.load %arg20[%c0_381, %c0_382] : memref<32x48xbf16, #tpu.memory_space<vmem>>, vector<32x48xbf16>
    %cst_383 = arith.constant dense<0.000000e+00> : vector<32x32xf32>
    %455 = tpu.matmul %454, %453, %cst_383 {dimension_numbers = #tpu.dot_dimension_numbers<[1], [0], [0], [1], [0, 0, 1, 1], [], []>} : vector<32x48xbf16>, vector<48x32xbf16>, vector<32x32xf32> -> vector<32x32xf32>
    %456 = arith.truncf %455 : vector<32x32xf32> to vector<32x32xbf16>
    %c0_384 = arith.constant 0 : index
    %c0_385 = arith.constant 0 : index
    %c0_386 = arith.constant 0 : index
    %457 = vector.load %arg17[%c0_384, %c0_385, %c0_386] : memref<4x1x16xf32, #tpu.memory_space<vmem>>, vector<1x1x16xf32>
    %458 = vector.shape_cast %457 : vector<1x1x16xf32> to vector<1x16xf32>
    %cst_387 = arith.constant 0.000000e+00 : bf16
    %459 = vector.broadcast %cst_387 : bf16 to vector<1x32xbf16>
    %460 = vector.extract_strided_slice %456 {offsets = [0, 0], sizes = [31, 32], strides = [1, 1]} : vector<32x32xbf16> to vector<31x32xbf16>
    %461 = tpu.concatenate %459, %460 in 0 : vector<1x32xbf16>, vector<31x32xbf16> -> vector<32x32xbf16>
    %462 = vector.extract_strided_slice %456 {offsets = [1, 0], sizes = [31, 32], strides = [1, 1]} : vector<32x32xbf16> to vector<31x32xbf16>
    %463 = tpu.concatenate %462, %459 in 0 : vector<31x32xbf16>, vector<1x32xbf16> -> vector<32x32xbf16>
    %c0_388 = arith.constant 0 : index
    %c0_389 = arith.constant 0 : index
    %c0_390 = arith.constant 0 : index
    %464 = vector.load %arg15[%c0_388, %c0_389, %c0_390] : memref<3x32x16xbf16, #tpu.memory_space<vmem>>, vector<1x32x16xbf16>
    %465 = vector.shape_cast %464 : vector<1x32x16xbf16> to vector<32x16xbf16>
    %cst_391 = arith.constant dense<0.000000e+00> : vector<32x16xf32>
    %466 = tpu.matmul %461, %465, %cst_391 {dimension_numbers = #tpu.dot_dimension_numbers<[1], [0], [0], [1], [0, 0, 1, 1], [], []>} : vector<32x32xbf16>, vector<32x16xbf16>, vector<32x16xf32> -> vector<32x16xf32>
    %467 = vector.broadcast %458 : vector<1x16xf32> to vector<32x16xf32>
    %468 = arith.addf %466, %467 : vector<32x16xf32>
    %c1_392 = arith.constant 1 : index
    %c0_393 = arith.constant 0 : index
    %c0_394 = arith.constant 0 : index
    %469 = vector.load %arg15[%c1_392, %c0_393, %c0_394] : memref<3x32x16xbf16, #tpu.memory_space<vmem>>, vector<1x32x16xbf16>
    %470 = vector.shape_cast %469 : vector<1x32x16xbf16> to vector<32x16xbf16>
    %cst_395 = arith.constant dense<0.000000e+00> : vector<32x16xf32>
    %471 = tpu.matmul %456, %470, %cst_395 {dimension_numbers = #tpu.dot_dimension_numbers<[1], [0], [0], [1], [0, 0, 1, 1], [], []>} : vector<32x32xbf16>, vector<32x16xbf16>, vector<32x16xf32> -> vector<32x16xf32>
    %472 = arith.addf %468, %471 : vector<32x16xf32>
    %c2_396 = arith.constant 2 : index
    %c0_397 = arith.constant 0 : index
    %c0_398 = arith.constant 0 : index
    %473 = vector.load %arg15[%c2_396, %c0_397, %c0_398] : memref<3x32x16xbf16, #tpu.memory_space<vmem>>, vector<1x32x16xbf16>
    %474 = vector.shape_cast %473 : vector<1x32x16xbf16> to vector<32x16xbf16>
    %cst_399 = arith.constant dense<0.000000e+00> : vector<32x16xf32>
    %475 = tpu.matmul %463, %474, %cst_399 {dimension_numbers = #tpu.dot_dimension_numbers<[1], [0], [0], [1], [0, 0, 1, 1], [], []>} : vector<32x32xbf16>, vector<32x16xbf16>, vector<32x16xf32> -> vector<32x16xf32>
    %476 = arith.addf %472, %475 : vector<32x16xf32>
    %cst_400 = arith.constant 0.000000e+00 : f32
    %477 = vector.broadcast %cst_400 : f32 to vector<32x16xf32>
    %478 = arith.maximumf %476, %477 : vector<32x16xf32>
    %c0_401 = arith.constant 0 : index
    %c0_402 = arith.constant 0 : index
    %479 = vector.load %arg24[%c0_401, %c0_402] : memref<32x16xf32, #tpu.memory_space<vmem>>, vector<32x16xf32>
    %480 = arith.mulf %478, %479 : vector<32x16xf32>
    %481 = arith.truncf %480 : vector<32x16xf32> to vector<32x16xbf16>
    %c1_403 = arith.constant 1 : index
    %c0_404 = arith.constant 0 : index
    %c0_405 = arith.constant 0 : index
    %482 = vector.load %arg17[%c1_403, %c0_404, %c0_405] : memref<4x1x16xf32, #tpu.memory_space<vmem>>, vector<1x1x16xf32>
    %483 = vector.shape_cast %482 : vector<1x1x16xf32> to vector<1x16xf32>
    %cst_406 = arith.constant 0.000000e+00 : bf16
    %484 = vector.broadcast %cst_406 : bf16 to vector<1x16xbf16>
    %485 = vector.extract_strided_slice %481 {offsets = [0, 0], sizes = [31, 16], strides = [1, 1]} : vector<32x16xbf16> to vector<31x16xbf16>
    %486 = tpu.concatenate %484, %485 in 0 : vector<1x16xbf16>, vector<31x16xbf16> -> vector<32x16xbf16>
    %487 = vector.extract_strided_slice %481 {offsets = [1, 0], sizes = [31, 16], strides = [1, 1]} : vector<32x16xbf16> to vector<31x16xbf16>
    %488 = tpu.concatenate %487, %484 in 0 : vector<31x16xbf16>, vector<1x16xbf16> -> vector<32x16xbf16>
    %c0_407 = arith.constant 0 : index
    %c0_408 = arith.constant 0 : index
    %c0_409 = arith.constant 0 : index
    %c0_410 = arith.constant 0 : index
    %489 = vector.load %arg16[%c0_407, %c0_408, %c0_409, %c0_410] : memref<3x3x16x16xbf16, #tpu.memory_space<vmem>>, vector<1x1x16x16xbf16>
    %490 = vector.shape_cast %489 : vector<1x1x16x16xbf16> to vector<16x16xbf16>
    %cst_411 = arith.constant dense<0.000000e+00> : vector<32x16xf32>
    %491 = tpu.matmul %486, %490, %cst_411 {dimension_numbers = #tpu.dot_dimension_numbers<[1], [0], [0], [1], [0, 0, 1, 1], [], []>} : vector<32x16xbf16>, vector<16x16xbf16>, vector<32x16xf32> -> vector<32x16xf32>
    %492 = vector.broadcast %483 : vector<1x16xf32> to vector<32x16xf32>
    %493 = arith.addf %491, %492 : vector<32x16xf32>
    %c0_412 = arith.constant 0 : index
    %c1_413 = arith.constant 1 : index
    %c0_414 = arith.constant 0 : index
    %c0_415 = arith.constant 0 : index
    %494 = vector.load %arg16[%c0_412, %c1_413, %c0_414, %c0_415] : memref<3x3x16x16xbf16, #tpu.memory_space<vmem>>, vector<1x1x16x16xbf16>
    %495 = vector.shape_cast %494 : vector<1x1x16x16xbf16> to vector<16x16xbf16>
    %cst_416 = arith.constant dense<0.000000e+00> : vector<32x16xf32>
    %496 = tpu.matmul %481, %495, %cst_416 {dimension_numbers = #tpu.dot_dimension_numbers<[1], [0], [0], [1], [0, 0, 1, 1], [], []>} : vector<32x16xbf16>, vector<16x16xbf16>, vector<32x16xf32> -> vector<32x16xf32>
    %497 = arith.addf %493, %496 : vector<32x16xf32>
    %c0_417 = arith.constant 0 : index
    %c2_418 = arith.constant 2 : index
    %c0_419 = arith.constant 0 : index
    %c0_420 = arith.constant 0 : index
    %498 = vector.load %arg16[%c0_417, %c2_418, %c0_419, %c0_420] : memref<3x3x16x16xbf16, #tpu.memory_space<vmem>>, vector<1x1x16x16xbf16>
    %499 = vector.shape_cast %498 : vector<1x1x16x16xbf16> to vector<16x16xbf16>
    %cst_421 = arith.constant dense<0.000000e+00> : vector<32x16xf32>
    %500 = tpu.matmul %488, %499, %cst_421 {dimension_numbers = #tpu.dot_dimension_numbers<[1], [0], [0], [1], [0, 0, 1, 1], [], []>} : vector<32x16xbf16>, vector<16x16xbf16>, vector<32x16xf32> -> vector<32x16xf32>
    %501 = arith.addf %497, %500 : vector<32x16xf32>
    %cst_422 = arith.constant 0.000000e+00 : f32
    %502 = vector.broadcast %cst_422 : f32 to vector<32x16xf32>
    %503 = arith.maximumf %501, %502 : vector<32x16xf32>
    %c0_423 = arith.constant 0 : index
    %c0_424 = arith.constant 0 : index
    %504 = vector.load %arg24[%c0_423, %c0_424] : memref<32x16xf32, #tpu.memory_space<vmem>>, vector<32x16xf32>
    %505 = arith.mulf %503, %504 : vector<32x16xf32>
    %506 = arith.truncf %505 : vector<32x16xf32> to vector<32x16xbf16>
    %c2_425 = arith.constant 2 : index
    %c0_426 = arith.constant 0 : index
    %c0_427 = arith.constant 0 : index
    %507 = vector.load %arg17[%c2_425, %c0_426, %c0_427] : memref<4x1x16xf32, #tpu.memory_space<vmem>>, vector<1x1x16xf32>
    %508 = vector.shape_cast %507 : vector<1x1x16xf32> to vector<1x16xf32>
    %cst_428 = arith.constant 0.000000e+00 : bf16
    %509 = vector.broadcast %cst_428 : bf16 to vector<1x16xbf16>
    %510 = vector.extract_strided_slice %506 {offsets = [0, 0], sizes = [31, 16], strides = [1, 1]} : vector<32x16xbf16> to vector<31x16xbf16>
    %511 = tpu.concatenate %509, %510 in 0 : vector<1x16xbf16>, vector<31x16xbf16> -> vector<32x16xbf16>
    %512 = vector.extract_strided_slice %506 {offsets = [1, 0], sizes = [31, 16], strides = [1, 1]} : vector<32x16xbf16> to vector<31x16xbf16>
    %513 = tpu.concatenate %512, %509 in 0 : vector<31x16xbf16>, vector<1x16xbf16> -> vector<32x16xbf16>
    %c1_429 = arith.constant 1 : index
    %c0_430 = arith.constant 0 : index
    %c0_431 = arith.constant 0 : index
    %c0_432 = arith.constant 0 : index
    %514 = vector.load %arg16[%c1_429, %c0_430, %c0_431, %c0_432] : memref<3x3x16x16xbf16, #tpu.memory_space<vmem>>, vector<1x1x16x16xbf16>
    %515 = vector.shape_cast %514 : vector<1x1x16x16xbf16> to vector<16x16xbf16>
    %cst_433 = arith.constant dense<0.000000e+00> : vector<32x16xf32>
    %516 = tpu.matmul %511, %515, %cst_433 {dimension_numbers = #tpu.dot_dimension_numbers<[1], [0], [0], [1], [0, 0, 1, 1], [], []>} : vector<32x16xbf16>, vector<16x16xbf16>, vector<32x16xf32> -> vector<32x16xf32>
    %517 = vector.broadcast %508 : vector<1x16xf32> to vector<32x16xf32>
    %518 = arith.addf %516, %517 : vector<32x16xf32>
    %c1_434 = arith.constant 1 : index
    %c1_435 = arith.constant 1 : index
    %c0_436 = arith.constant 0 : index
    %c0_437 = arith.constant 0 : index
    %519 = vector.load %arg16[%c1_434, %c1_435, %c0_436, %c0_437] : memref<3x3x16x16xbf16, #tpu.memory_space<vmem>>, vector<1x1x16x16xbf16>
    %520 = vector.shape_cast %519 : vector<1x1x16x16xbf16> to vector<16x16xbf16>
    %cst_438 = arith.constant dense<0.000000e+00> : vector<32x16xf32>
    %521 = tpu.matmul %506, %520, %cst_438 {dimension_numbers = #tpu.dot_dimension_numbers<[1], [0], [0], [1], [0, 0, 1, 1], [], []>} : vector<32x16xbf16>, vector<16x16xbf16>, vector<32x16xf32> -> vector<32x16xf32>
    %522 = arith.addf %518, %521 : vector<32x16xf32>
    %c1_439 = arith.constant 1 : index
    %c2_440 = arith.constant 2 : index
    %c0_441 = arith.constant 0 : index
    %c0_442 = arith.constant 0 : index
    %523 = vector.load %arg16[%c1_439, %c2_440, %c0_441, %c0_442] : memref<3x3x16x16xbf16, #tpu.memory_space<vmem>>, vector<1x1x16x16xbf16>
    %524 = vector.shape_cast %523 : vector<1x1x16x16xbf16> to vector<16x16xbf16>
    %cst_443 = arith.constant dense<0.000000e+00> : vector<32x16xf32>
    %525 = tpu.matmul %513, %524, %cst_443 {dimension_numbers = #tpu.dot_dimension_numbers<[1], [0], [0], [1], [0, 0, 1, 1], [], []>} : vector<32x16xbf16>, vector<16x16xbf16>, vector<32x16xf32> -> vector<32x16xf32>
    %526 = arith.addf %522, %525 : vector<32x16xf32>
    %cst_444 = arith.constant 0.000000e+00 : f32
    %527 = vector.broadcast %cst_444 : f32 to vector<32x16xf32>
    %528 = arith.maximumf %526, %527 : vector<32x16xf32>
    %c0_445 = arith.constant 0 : index
    %c0_446 = arith.constant 0 : index
    %529 = vector.load %arg24[%c0_445, %c0_446] : memref<32x16xf32, #tpu.memory_space<vmem>>, vector<32x16xf32>
    %530 = arith.mulf %528, %529 : vector<32x16xf32>
    %531 = arith.truncf %530 : vector<32x16xf32> to vector<32x16xbf16>
    %c3_447 = arith.constant 3 : index
    %c0_448 = arith.constant 0 : index
    %c0_449 = arith.constant 0 : index
    %532 = vector.load %arg17[%c3_447, %c0_448, %c0_449] : memref<4x1x16xf32, #tpu.memory_space<vmem>>, vector<1x1x16xf32>
    %533 = vector.shape_cast %532 : vector<1x1x16xf32> to vector<1x16xf32>
    %cst_450 = arith.constant 0.000000e+00 : bf16
    %534 = vector.broadcast %cst_450 : bf16 to vector<1x16xbf16>
    %535 = vector.extract_strided_slice %531 {offsets = [0, 0], sizes = [31, 16], strides = [1, 1]} : vector<32x16xbf16> to vector<31x16xbf16>
    %536 = tpu.concatenate %534, %535 in 0 : vector<1x16xbf16>, vector<31x16xbf16> -> vector<32x16xbf16>
    %537 = vector.extract_strided_slice %531 {offsets = [1, 0], sizes = [31, 16], strides = [1, 1]} : vector<32x16xbf16> to vector<31x16xbf16>
    %538 = tpu.concatenate %537, %534 in 0 : vector<31x16xbf16>, vector<1x16xbf16> -> vector<32x16xbf16>
    %c2_451 = arith.constant 2 : index
    %c0_452 = arith.constant 0 : index
    %c0_453 = arith.constant 0 : index
    %c0_454 = arith.constant 0 : index
    %539 = vector.load %arg16[%c2_451, %c0_452, %c0_453, %c0_454] : memref<3x3x16x16xbf16, #tpu.memory_space<vmem>>, vector<1x1x16x16xbf16>
    %540 = vector.shape_cast %539 : vector<1x1x16x16xbf16> to vector<16x16xbf16>
    %cst_455 = arith.constant dense<0.000000e+00> : vector<32x16xf32>
    %541 = tpu.matmul %536, %540, %cst_455 {dimension_numbers = #tpu.dot_dimension_numbers<[1], [0], [0], [1], [0, 0, 1, 1], [], []>} : vector<32x16xbf16>, vector<16x16xbf16>, vector<32x16xf32> -> vector<32x16xf32>
    %542 = vector.broadcast %533 : vector<1x16xf32> to vector<32x16xf32>
    %543 = arith.addf %541, %542 : vector<32x16xf32>
    %c2_456 = arith.constant 2 : index
    %c1_457 = arith.constant 1 : index
    %c0_458 = arith.constant 0 : index
    %c0_459 = arith.constant 0 : index
    %544 = vector.load %arg16[%c2_456, %c1_457, %c0_458, %c0_459] : memref<3x3x16x16xbf16, #tpu.memory_space<vmem>>, vector<1x1x16x16xbf16>
    %545 = vector.shape_cast %544 : vector<1x1x16x16xbf16> to vector<16x16xbf16>
    %cst_460 = arith.constant dense<0.000000e+00> : vector<32x16xf32>
    %546 = tpu.matmul %531, %545, %cst_460 {dimension_numbers = #tpu.dot_dimension_numbers<[1], [0], [0], [1], [0, 0, 1, 1], [], []>} : vector<32x16xbf16>, vector<16x16xbf16>, vector<32x16xf32> -> vector<32x16xf32>
    %547 = arith.addf %543, %546 : vector<32x16xf32>
    %c2_461 = arith.constant 2 : index
    %c2_462 = arith.constant 2 : index
    %c0_463 = arith.constant 0 : index
    %c0_464 = arith.constant 0 : index
    %548 = vector.load %arg16[%c2_461, %c2_462, %c0_463, %c0_464] : memref<3x3x16x16xbf16, #tpu.memory_space<vmem>>, vector<1x1x16x16xbf16>
    %549 = vector.shape_cast %548 : vector<1x1x16x16xbf16> to vector<16x16xbf16>
    %cst_465 = arith.constant dense<0.000000e+00> : vector<32x16xf32>
    %550 = tpu.matmul %538, %549, %cst_465 {dimension_numbers = #tpu.dot_dimension_numbers<[1], [0], [0], [1], [0, 0, 1, 1], [], []>} : vector<32x16xbf16>, vector<16x16xbf16>, vector<32x16xf32> -> vector<32x16xf32>
    %551 = arith.addf %547, %550 : vector<32x16xf32>
    %cst_466 = arith.constant 0.000000e+00 : f32
    %552 = vector.broadcast %cst_466 : f32 to vector<32x16xf32>
    %553 = arith.maximumf %551, %552 : vector<32x16xf32>
    %554 = arith.truncf %553 : vector<32x16xf32> to vector<32x16xbf16>
    %c0_467 = arith.constant 0 : index
    %c0_468 = arith.constant 0 : index
    %555 = vector.load %arg25[%c0_467, %c0_468] : memref<8x32xbf16, #tpu.memory_space<vmem>>, vector<8x32xbf16>
    %cst_469 = arith.constant dense<0.000000e+00> : vector<8x16xf32>
    %556 = tpu.matmul %555, %554, %cst_469 {dimension_numbers = #tpu.dot_dimension_numbers<[1], [0], [0], [1], [0, 0, 1, 1], [], []>} : vector<8x32xbf16>, vector<32x16xbf16>, vector<8x16xf32> -> vector<8x16xf32>
    %557 = arith.truncf %556 : vector<8x16xf32> to vector<8x16xbf16>
    %c0_470 = arith.constant 0 : index
    %c0_471 = arith.constant 0 : index
    %558 = vector.load %arg26[%c0_470, %c0_471] : memref<16x8xbf16, #tpu.memory_space<vmem>>, vector<16x8xbf16>
    %cst_472 = arith.constant dense<0.000000e+00> : vector<8x8xf32>
    %559 = tpu.matmul %557, %558, %cst_472 {dimension_numbers = #tpu.dot_dimension_numbers<[1], [0], [0], [1], [0, 0, 1, 1], [], []>} : vector<8x16xbf16>, vector<16x8xbf16>, vector<8x8xf32> -> vector<8x8xf32>
    %c0_473 = arith.constant 0 : index
    %c0_474 = arith.constant 0 : index
    %c0_475 = arith.constant 0 : index
    %560 = vector.load %arg27[%c0_473, %c0_474, %c0_475] : memref<1x8x8xf32, #tpu.memory_space<vmem>>, vector<1x8x8xf32>
    %561 = vector.shape_cast %560 : vector<1x8x8xf32> to vector<8x8xf32>
    %562 = vector.shape_cast %559 : vector<8x8xf32> to vector<1x8x8xf32>
    tpu.vector_store %arg27[%c0_473, %c0_474, %c0_475], %562 {strides = array<i32>} : memref<1x8x8xf32, #tpu.memory_space<vmem>>, vector<1x8x8xf32>,
    return
  }
  func.func @transform_0(%arg0: i32) -> (i32, i32, i32) {
    %c0_i32 = arith.constant 0 : i32
    %c0_i32_0 = arith.constant 0 : i32
    %c0_i32_1 = arith.constant 0 : i32
    return %arg0, %c0_i32, %c0_i32_0 : i32, i32, i32
  }
  func.func @transform_1(%arg0: i32) -> (i32, i32, i32) {
    %c0_i32 = arith.constant 0 : i32
    %c0_i32_0 = arith.constant 0 : i32
    %c0_i32_1 = arith.constant 0 : i32
    return %arg0, %c0_i32, %c0_i32_0 : i32, i32, i32
  }
  func.func @transform_2(%arg0: i32) -> (i32, i32, i32) {
    %c0_i32 = arith.constant 0 : i32
    %c0_i32_0 = arith.constant 0 : i32
    %c0_i32_1 = arith.constant 0 : i32
    %c0_i32_2 = arith.constant 0 : i32
    return %c0_i32, %c0_i32_0, %c0_i32_1 : i32, i32, i32
  }
  func.func @transform_3(%arg0: i32) -> (i32, i32) {
    %c0_i32 = arith.constant 0 : i32
    %c0_i32_0 = arith.constant 0 : i32
    %c0_i32_1 = arith.constant 0 : i32
    return %c0_i32, %c0_i32_0 : i32, i32
  }
  func.func @transform_4(%arg0: i32) -> (i32, i32, i32) {
    %c0_i32 = arith.constant 0 : i32
    %c0_i32_0 = arith.constant 0 : i32
    %c0_i32_1 = arith.constant 0 : i32
    %c0_i32_2 = arith.constant 0 : i32
    return %c0_i32, %c0_i32_0, %c0_i32_1 : i32, i32, i32
  }
  func.func @transform_5(%arg0: i32) -> (i32, i32) {
    %c0_i32 = arith.constant 0 : i32
    %c0_i32_0 = arith.constant 0 : i32
    %c0_i32_1 = arith.constant 0 : i32
    return %c0_i32, %c0_i32_0 : i32, i32
  }
  func.func @transform_6(%arg0: i32) -> (i32, i32, i32, i32) {
    %c0_i32 = arith.constant 0 : i32
    %c0_i32_0 = arith.constant 0 : i32
    %c0_i32_1 = arith.constant 0 : i32
    %c0_i32_2 = arith.constant 0 : i32
    %c0_i32_3 = arith.constant 0 : i32
    return %c0_i32, %c0_i32_0, %c0_i32_1, %c0_i32_2 : i32, i32, i32, i32
  }
  func.func @transform_7(%arg0: i32) -> (i32, i32, i32) {
    %c0_i32 = arith.constant 0 : i32
    %c0_i32_0 = arith.constant 0 : i32
    %c0_i32_1 = arith.constant 0 : i32
    %c0_i32_2 = arith.constant 0 : i32
    return %c0_i32, %c0_i32_0, %c0_i32_1 : i32, i32, i32
  }
  func.func @transform_8(%arg0: i32) -> (i32, i32, i32) {
    %c0_i32 = arith.constant 0 : i32
    %c0_i32_0 = arith.constant 0 : i32
    %c0_i32_1 = arith.constant 0 : i32
    %c0_i32_2 = arith.constant 0 : i32
    return %c0_i32, %c0_i32_0, %c0_i32_1 : i32, i32, i32
  }
  func.func @transform_9(%arg0: i32) -> (i32, i32, i32, i32) {
    %c0_i32 = arith.constant 0 : i32
    %c0_i32_0 = arith.constant 0 : i32
    %c0_i32_1 = arith.constant 0 : i32
    %c0_i32_2 = arith.constant 0 : i32
    %c0_i32_3 = arith.constant 0 : i32
    return %c0_i32, %c0_i32_0, %c0_i32_1, %c0_i32_2 : i32, i32, i32, i32
  }
  func.func @transform_10(%arg0: i32) -> (i32, i32, i32) {
    %c0_i32 = arith.constant 0 : i32
    %c0_i32_0 = arith.constant 0 : i32
    %c0_i32_1 = arith.constant 0 : i32
    %c0_i32_2 = arith.constant 0 : i32
    return %c0_i32, %c0_i32_0, %c0_i32_1 : i32, i32, i32
  }
  func.func @transform_11(%arg0: i32) -> (i32, i32, i32) {
    %c0_i32 = arith.constant 0 : i32
    %c0_i32_0 = arith.constant 0 : i32
    %c0_i32_1 = arith.constant 0 : i32
    %c0_i32_2 = arith.constant 0 : i32
    return %c0_i32, %c0_i32_0, %c0_i32_1 : i32, i32, i32
  }
  func.func @transform_12(%arg0: i32) -> (i32, i32, i32, i32) {
    %c0_i32 = arith.constant 0 : i32
    %c0_i32_0 = arith.constant 0 : i32
    %c0_i32_1 = arith.constant 0 : i32
    %c0_i32_2 = arith.constant 0 : i32
    %c0_i32_3 = arith.constant 0 : i32
    return %c0_i32, %c0_i32_0, %c0_i32_1, %c0_i32_2 : i32, i32, i32, i32
  }
  func.func @transform_13(%arg0: i32) -> (i32, i32, i32) {
    %c0_i32 = arith.constant 0 : i32
    %c0_i32_0 = arith.constant 0 : i32
    %c0_i32_1 = arith.constant 0 : i32
    %c0_i32_2 = arith.constant 0 : i32
    return %c0_i32, %c0_i32_0, %c0_i32_1 : i32, i32, i32
  }
  func.func @transform_14(%arg0: i32) -> (i32, i32, i32) {
    %c0_i32 = arith.constant 0 : i32
    %c0_i32_0 = arith.constant 0 : i32
    %c0_i32_1 = arith.constant 0 : i32
    %c0_i32_2 = arith.constant 0 : i32
    return %c0_i32, %c0_i32_0, %c0_i32_1 : i32, i32, i32
  }
  func.func @transform_15(%arg0: i32) -> (i32, i32, i32, i32) {
    %c0_i32 = arith.constant 0 : i32
    %c0_i32_0 = arith.constant 0 : i32
    %c0_i32_1 = arith.constant 0 : i32
    %c0_i32_2 = arith.constant 0 : i32
    %c0_i32_3 = arith.constant 0 : i32
    return %c0_i32, %c0_i32_0, %c0_i32_1, %c0_i32_2 : i32, i32, i32, i32
  }
  func.func @transform_16(%arg0: i32) -> (i32, i32, i32) {
    %c0_i32 = arith.constant 0 : i32
    %c0_i32_0 = arith.constant 0 : i32
    %c0_i32_1 = arith.constant 0 : i32
    %c0_i32_2 = arith.constant 0 : i32
    return %c0_i32, %c0_i32_0, %c0_i32_1 : i32, i32, i32
  }
  func.func @transform_17(%arg0: i32) -> (i32, i32) {
    %c0_i32 = arith.constant 0 : i32
    %c0_i32_0 = arith.constant 0 : i32
    %c0_i32_1 = arith.constant 0 : i32
    return %c0_i32, %c0_i32_0 : i32, i32
  }
  func.func @transform_18(%arg0: i32) -> (i32, i32) {
    %c0_i32 = arith.constant 0 : i32
    %c0_i32_0 = arith.constant 0 : i32
    %c0_i32_1 = arith.constant 0 : i32
    return %c0_i32, %c0_i32_0 : i32, i32
  }
  func.func @transform_19(%arg0: i32) -> (i32, i32) {
    %c0_i32 = arith.constant 0 : i32
    %c0_i32_0 = arith.constant 0 : i32
    %c0_i32_1 = arith.constant 0 : i32
    return %c0_i32, %c0_i32_0 : i32, i32
  }
  func.func @transform_20(%arg0: i32) -> (i32, i32) {
    %c0_i32 = arith.constant 0 : i32
    %c0_i32_0 = arith.constant 0 : i32
    %c0_i32_1 = arith.constant 0 : i32
    return %c0_i32, %c0_i32_0 : i32, i32
  }
  func.func @transform_21(%arg0: i32) -> (i32, i32) {
    %c0_i32 = arith.constant 0 : i32
    %c0_i32_0 = arith.constant 0 : i32
    %c0_i32_1 = arith.constant 0 : i32
    return %c0_i32, %c0_i32_0 : i32, i32
  }
  func.func @transform_22(%arg0: i32) -> (i32, i32) {
    %c0_i32 = arith.constant 0 : i32
    %c0_i32_0 = arith.constant 0 : i32
    %c0_i32_1 = arith.constant 0 : i32
    return %c0_i32, %c0_i32_0 : i32, i32
  }
  func.func @transform_23(%arg0: i32) -> (i32, i32) {
    %c0_i32 = arith.constant 0 : i32
    %c0_i32_0 = arith.constant 0 : i32
    %c0_i32_1 = arith.constant 0 : i32
    return %c0_i32, %c0_i32_0 : i32, i32
  }
  func.func @transform_24(%arg0: i32) -> (i32, i32) {
    %c0_i32 = arith.constant 0 : i32
    %c0_i32_0 = arith.constant 0 : i32
    %c0_i32_1 = arith.constant 0 : i32
    return %c0_i32, %c0_i32_0 : i32, i32
  }
  func.func @transform_25(%arg0: i32) -> (i32, i32) {
    %c0_i32 = arith.constant 0 : i32
    %c0_i32_0 = arith.constant 0 : i32
    %c0_i32_1 = arith.constant 0 : i32
    return %c0_i32, %c0_i32_0 : i32, i32
  }
  func.func @transform_26(%arg0: i32) -> (i32, i32, i32) {
    %c0_i32 = arith.constant 0 : i32
    %c0_i32_0 = arith.constant 0 : i32
    %c0_i32_1 = arith.constant 0 : i32
    return %arg0, %c0_i32, %c0_i32_0 : i32, i32, i32
  }
}

</mosaic_0001>

<bundles_post_ra>
// kernel: texture_encoder_forward.1
= control target key start
LH: loop header
LB: loop body
LE: loop exit
PB: predicated region body
PF: predicated region fallthrough
CT: control target
= control target key end

     0   :  { %s17591_s27 = smov 0   ;;  %s21766_s0 = inlined_call_operand.vmem [shape: bf16[2,144,16], index: 0, kind: input, shape index: {}]   ;;  %s21767_s1 = inlined_call_operand.vmem [shape: bf16[2,144,16], index: 1, kind: input, shape index: {}]   ;;  %s21768_s2 = inlined_call_operand.vmem [shape: bf16[3,16,128], index: 2, kind: input, shape index: {}]   ;;  %s21769_s3 = inlined_call_operand.vmem [shape: f32[1,128], index: 3, kind: input, shape index: {}]   ;;  %s21770_s4 = inlined_call_operand.vmem [shape: bf16[3,16,128], index: 4, kind: input, shape index: {}]   ;;  %s21771_s5 = inlined_call_operand.vmem [shape: f32[1,128], index: 5, kind: input, shape index: {}]   ;;  %s21772_s6 = inlined_call_operand.vmem [shape: bf16[6,3,128,128], index: 6, kind: input, shape index: {}]   ;;  %s21773_s7 = inlined_call_operand.vmem [shape: f32[6,1,128], index: 7, kind: input, shape index: {}]   ;;  %s21774_s8 = inlined_call_operand.vmem [shape: bf16[3,128,64], index: 8, kind: input, shape index: {}]   ;;  %s21775_s9 = inlined_call_operand.vmem [shape: bf16[5,3,64,64], index: 9, kind: input, shape index: {}]   ;;  %s21776_s10 = inlined_call_operand.vmem [shape: f32[6,1,64], index: 10, kind: input, shape index: {}]   ;;  %s21777_s11 = inlined_call_operand.vmem [shape: bf16[3,64,32], index: 11, kind: input, shape index: {}]   ;;  %s21778_s12 = inlined_call_operand.vmem [shape: bf16[3,3,32,32], index: 12, kind: input, shape index: {}]   ;;  %s21779_s13 = inlined_call_operand.vmem [shape: f32[4,1,32], index: 13, kind: input, shape index: {}]   ;;  %s21780_s14 = inlined_call_operand.vmem [shape: bf16[3,32,16], index: 14, kind: input, shape index: {}]   ;;  %s21781_s15 = inlined_call_operand.vmem [shape: bf16[3,3,16,16], index: 15, kind: input, shape index: {}]   ;;  %s21782_s16 = inlined_call_operand.vmem [shape: f32[4,1,16], index: 16, kind: input, shape index: {}]   ;;  %s21783_s17 = inlined_call_operand.vmem [shape: bf16[80,144], index: 17, kind: input, shape index: {}]   ;;  %s21784_s18 = inlined_call_operand.vmem [shape: bf16[48,80], index: 18, kind: input, shape index: {}]   ;;  %s21785_s19 = inlined_call_operand.vmem [shape: bf16[32,48], index: 19, kind: input, shape index: {}]   ;;  %s21786_s20 = inlined_call_operand.vmem [shape: f32[144,128], index: 20, kind: input, shape index: {}]   ;;  %s21787_s21 = inlined_call_operand.vmem [shape: f32[80,64], index: 21, kind: input, shape index: {}]   ;;  %s21788_s22 = inlined_call_operand.vmem [shape: f32[48,32], index: 22, kind: input, shape index: {}]   ;;  %s21789_s23 = inlined_call_operand.vmem [shape: f32[32,16], index: 23, kind: input, shape index: {}]   ;;  %s21790_s24 = inlined_call_operand.vmem [shape: bf16[8,32], index: 24, kind: input, shape index: {}]   ;;  %s21791_s25 = inlined_call_operand.vmem [shape: bf16[16,8], index: 25, kind: input, shape index: {}]   ;;  %s21792_s26 = inlined_call_operand.vmem [shape: f32[2,8,8], index: 26, kind: output, shape index: {}]  }
   0x1   :  { %21809 = sst [smem:[#allocation2_spill]] %s21766_s0 }
   0x2   :  { %21810 = sst [smem:[#allocation3_spill]] %s21767_s1 }
   0x3   :  { %21811 = sst [smem:[#allocation4_spill]] %s21768_s2 }
   0x4   :  { %21812 = sst [smem:[#allocation5_spill]] %s21769_s3 }
   0x5   :  { %21813 = sst [smem:[#allocation6_spill]] %s21770_s4 }
   0x6   :  { %21814 = sst [smem:[#allocation7_spill]] %s21771_s5 }
   0x7   :  { %21815 = sst [smem:[#allocation8_spill]] %s21772_s6 }
   0x8   :  { %21816 = sst [smem:[#allocation9_spill]] %s21773_s7 }
   0x9   :  { %21817 = sst [smem:[#allocation10_spill]] %s21774_s8 }
   0xa   :  { %21818 = sst [smem:[#allocation11_spill]] %s21775_s9 }
   0xb   :  { %21819 = sst [smem:[#allocation12_spill]] %s21776_s10 }
   0xc LB: > { %s12104_s3 = sadd.s32 4294967295, %s17451_s27   ;;  %p12108_p0 = scmp.ge.s32.totalorder %s17451_s27, 1  ;;  %s17451_s27 = sphi %s17591_s27, %s36_s27  }
   0xd   : > { %p722_p1 = scmp.lt.s32.totalorder %s17451_s27, 3 }
   0xf   : > { %p723_p2 = pnand %p12108_p0, %p722_p1 }
  0x10   : > { %s21820_s8 = sld [smem:[#allocation4_spill]] (!%p723_p2)  ;;  %v17453_v1 = vmov (!%p723_p2), 0.0   ;;  %s21821_s0 = sld [smem:[#allocation6_spill]] (!%p723_p2)  ;;  %vm17454_vm0 = vmmov (!%p723_p2), 0   ;;  %vm875_vm1 = vsmask.f32 (!%p723_p2), 256 }
  0x11   : > { %726 = sbr.rel (%p723_p2) target bundleno = 7824 (0x1e90), region = 124  ;;  %13861 = vmatprep.subr.bf16.mxu0 (!%p723_p2), %v17453_v1  ;;  %13975 = vmatprep.subr.bf16.mxu1 (!%p723_p2), %v17453_v1  ;;  %p796_p3 = scmp.lt.s32.totalorder (!%p723_p2), %s12104_s3, 1  ;;  %vm948_vm2 = vcmask (!%p723_p2), 1040384   ;;  %vm996_vm3 = vcmask (!%p723_p2), 130048   ;;  %vm951_vm5 = vsmask.f32 (!%p723_p2), 7424 }
  0x12   : > { %13863 = vmatprep.mubr.msk.bf16.mxu0 (!%p723_p2), %vm17454_vm0, %v17453_v1  ;;  %13977 = vmatprep.mubr.msk.bf16.mxu1 (!%p723_p2), %vm17454_vm0, %v17453_v1  ;;  %s21822_s5 = sld [smem:[#allocation2_spill]] (!%p723_p2)  ;;  %s21823_s7 = sld [smem:[#allocation3_spill]] (!%p723_p2)  ;;  %vm17646_vm4 = vmand (!%p723_p2), %vm948_vm2, %vm875_vm1  ;;  %vm979_vm6 = vcmask (!%p723_p2), 1047552   ;;  %vm7254_vm8 = vcmask (!%p723_p2), 523264   ;;  %vm9508_vm9 = vcmask (!%p723_p2), 654336   ;;  %vm10005_vm10 = vcmask (!%p723_p2), 261120  }
  0x13   : > { %vm18070_vm7 = vmand (!%p723_p2), %vm979_vm6, %vm951_vm5  ;;  %s21848_s2 = sld [smem:[#allocation11_spill]] (!%p723_p2)  ;;  %s21849_s30 = sld [smem:[#allocation12_spill]] (!%p723_p2)  ;;  %vm10902_vm11 = vcmask (!%p723_p2), 392192   ;;  %vm12037_vm12 = vcmask (!%p723_p2), 64512  }
  0x16   : > { %v17081_v0 = vld [vmem:[%s21820_s8] sm:$0xff] (!%p723_p2)   ;;  %v17085_v13 = vld [vmem:[%s21820_s8 + $0x8] sm:$0xff] (!%p723_p2)  }
  0x17   : > { %v17082_v2 = vld [vmem:[%s21821_s0] sm:$0xff] (!%p723_p2)   ;;  %13862 = vmatpush3.bf16.msra.mxu0 (!%p723_p2), %v17081_v0  ;;  %v17086_v17 = vld [vmem:[%s21821_s0 + $0x8] sm:$0xff] (!%p723_p2)  }
  0x18   : > { %13976 = vmatpush3.bf16.msra.mxu1 %v17082_v2  ;;  %s21851_s3 = smov (!%p796_p3, %s12104_s3), 1  ;;  %13899 = vmatprep.subr.bf16.mxu0 %v17453_v1 }
  0x19   : > { %14013 = vmatprep.subr.bf16.mxu1 %v17453_v1  ;;  %s17069_s9 = smul.u32 72, %s21851_s3  ;;  %s12111_s29 = sshll.u32 %s21851_s3, 3 }
  0x1b   : > { %s17619_s10 = scalar_lea.vmem %s21822_s5, %s17069_s9  ;;  %s17624_s28 = scalar_lea.vmem %s21823_s7, %s17069_s9 }
  0x1c   : > { %v17627_v3 = vld [vmem:[%s17619_s10] sm:$0xff]   ;;  %v17637_v9 = vld [vmem:[%s17619_s10 + $0x8] sm:$0xff]   ;;  %v17660_v24 = vld [vmem:[%s17619_s10 + $0x10] sm:$0xff]   ;;  %s21845_s7 = sld [smem:[#allocation7_spill]]  ;;  %s809_s5 = scalar_lea.vmem %s21792_s26, %s12111_s29 }
  0x1d   : > { %v17630_v4 = vld [vmem:[%s17624_s28] sm:$0xff]   ;;  %v877_v5 = vshrl.u32 %v17627_v3, 16  ;;  %v880_v6 = vshll.u32 %v17627_v3, 16  ;;  %v17640_v10 = vld [vmem:[%s17624_s28 + $0x8] sm:$0xff]   ;;  %v884_v18 = vshrl.u32 %v17637_v9, 16  ;;  %v887_v19 = vshll.u32 %v17637_v9, 16 }
  0x1e   : > { %v1503_v7 = vshrl.u32 %v17630_v4, 16  ;;  %v1506_v8 = vshll.u32 %v17630_v4, 16  ;;  %v1510_v22 = vshrl.u32 %v17640_v10, 16  ;;  %v1513_v23 = vshll.u32 %v17640_v10, 16  ;;  %v17663_v25 = vld [vmem:[%s17624_s28 + $0x10] sm:$0xff]   ;;  %v17688_v37 = vld [vmem:[%s17619_s10 + $0x18] sm:$0xff]  }
  0x1f   : > { %v879_v11 = vrot.slane %v877_v5, 7  ;;  %v952_v12 = vrot.slane %v880_v6, 1  ;;  %v17669_v28 = vrot.slane %v884_v18, 7  ;;  %v17671_v29 = vrot.slane %v887_v19, 1  ;;  %v17698_v41 = vld [vmem:[%s17624_s28 + $0x18] sm:$0xff]   ;;  %v17701_v42 = vld [vmem:[%s17619_s10 + $0x20] sm:$0xff]  }
  0x20   : > { %v1505_v15 = vrot.slane %v1503_v7, 7  ;;  %v1575_v16 = vrot.slane %v1506_v8, 1  ;;  %v17677_v31 = vrot.slane %v1510_v22, 7  ;;  %v17679_v32 = vrot.slane %v1513_v23, 1  ;;  %v17713_v47 = vld [vmem:[%s17624_s28 + $0x20] sm:$0xff]   ;;  %v17727_v53 = vld [vmem:[%s17619_s10 + $0x28] sm:$0xff]  }
  0x21   : > { %v882_v20 = vor.u32 %v880_v6, %v879_v11  ;;  %v17655_v21 = vor.u32 %v952_v12, %v877_v5  ;;  %v892_v33 = vshrl.u32 %v17660_v24, 16  ;;  %v895_v35 = vshll.u32 %v17660_v24, 16  ;;  %v17738_v58 = vld [vmem:[%s17624_s28 + $0x28] sm:$0xff]   ;;  %v17753_v2 = vld [vmem:[%s17619_s10 + $0x30] sm:$0xff]  }
  0x22   : > { %v1508_v26 = vor.u32 %v1506_v8, %v1505_v15  ;;  %v17665_v27 = vor.u32 %v1575_v16, %v1503_v7  ;;  %v1518_v36 = vshrl.u32 %v17663_v25, 16  ;;  %v889_v38 = vor.u32 %v887_v19, %v17669_v28 }
  0x23   : > { %v950_v30 = vsel %vm17646_vm4, 0, %v882_v20  ;;  %v17694_v39 = vrot.slane %v892_v33, 7  ;;  %v1521_v40 = vshll.u32 %v17663_v25, 16  ;;  %v1515_v43 = vor.u32 %v1513_v23, %v17677_v31  ;;  %v17791_v23 = vld [vmem:[%s17624_s28 + $0x38] sm:$0xff]  }
  0x24   : > { %13864 = vmatmul.mubr.msk.bf16.vlgmr.msra.gmra.mrb[0].mxu0 %vm996_vm3, %v950_v30  ;;  %v1574_v34 = vsel %vm17646_vm4, 0, %v1508_v26  ;;  %v17708_v44 = vrot.slane %v1518_v36, 7  ;;  %v900_v45 = vshrl.u32 %v17688_v37, 16  ;;  %v903_v46 = vshll.u32 %v17688_v37, 16  ;;  %v17794_v26 = vld [vmem:[%s17619_s10 + $0x40] sm:$0xff]  }
  0x25   : > { %13978 = vmatmul.mubr.msk.bf16.vlgmr.msra.gmra.mrb[0].mxu1 %vm996_vm3, %v1574_v34  ;;  %13900 = vmatpush3.bf16.msra.mxu0 %v17085_v13  ;;  %v1526_v48 = vshrl.u32 %v17698_v41, 16  ;;  %v1529_v49 = vshll.u32 %v17698_v41, 16  ;;  %v908_v51 = vshrl.u32 %v17701_v42, 16  ;;  %v911_v52 = vshll.u32 %v17701_v42, 16 }
  0x26   : > { %14014 = vmatpush3.bf16.msra.mxu1 %v17086_v17  ;;  %13867 = vmatprep.mubr.msk.bf16.mxu0 %vm17454_vm0, %v17453_v1  ;;  %v17722_v50 = vrot.slane %v900_v45, 7  ;;  %v890_v54 = vsel %vm875_vm1, %v879_v11, %v889_v38  ;;  %v1534_v56 = vshrl.u32 %v17713_v47, 16  ;;  %v1537_v57 = vshll.u32 %v17713_v47, 16  ;;  %v17786_v17 = vld [vmem:[%s17619_s10 + $0x38] sm:$0xff]   ;;  %s21844_s10 = sld [smem:[#allocation5_spill]] }
  0x27   : > { %13981 = vmatprep.mubr.msk.bf16.mxu1 %vm17454_vm0, %v17453_v1  ;;  %13937 = vmatprep.subr.bf16.mxu0 %v17453_v1  ;;  %v17733_v55 = vrot.slane %v1526_v48, 7  ;;  %v1516_v59 = vsel %vm875_vm1, %v1505_v15, %v1515_v43  ;;  %v17743_v60 = vrot.slane %v908_v51, 7  ;;  %v21806_v61 = vshrl.u32 %v17727_v53, 16  ;;  %v17779_v15 = vld [vmem:[%s17624_s28 + $0x30] sm:$0xff]  }
  0x28   : > { %14051 = vmatprep.subr.bf16.mxu1 %v17453_v1  ;;  %v17748_v62 = vrot.slane %v1534_v56, 7  ;;  %v919_v63 = vshll.u32 %v17727_v53, 16  ;;  %v21801_v0 = vshrl.u32 %v17738_v58, 16  ;;  %v1545_v6 = vshll.u32 %v17738_v58, 16 }
  0x29   : > { %v17758_v5 = vrot.slane %v21806_v61, 7  ;;  %v897_v7 = vor.u32 %v895_v35, %v17694_v39  ;;  %v1523_v8 = vor.u32 %v1521_v40, %v17708_v44  ;;  %v21800_v12 = vshrl.u32 %v17753_v2, 16 }
  0x2a   : > { %v17772_v11 = vrot.slane %v21801_v0, 7  ;;  %v927_v13 = vshll.u32 %v17753_v2, 16  ;;  %v21802_v19 = vshrl.u32 %v17779_v15, 16  ;;  %v1553_v20 = vshll.u32 %v17779_v15, 16 }
  0x2b   : > { %v17783_v16 = vrot.slane %v21800_v12, 7  ;;  %v898_v30 = vsel %vm875_vm1, %v17669_v28, %v897_v7  ;;  %v1524_v34 = vsel %vm875_vm1, %v17677_v31, %v1523_v8  ;;  %v21803_v38 = vshrl.u32 %v17786_v17, 16  ;;  %v17815_v7 = vld [vmem:[%s17624_s28 + $0x40] sm:$0xff]   ;;  %s21843_s28 = sld [smem:[#allocation8_spill]] }
  0x2c   : > { %13868 = vmatmul.mubr.msk.bf16.gmra.mrb[4].mxu0 %vm996_vm3, %v890_v54  ;;  %v17804_v54 = vrot.slane %v21802_v19, 7  ;;  %v21805_v0 = vshrl.u32 %v17794_v26, 16  ;;  %v957_v31 = vrot.slane %v895_v35, 1 }
  0x2d   : > { %13982 = vmatmul.mubr.msk.bf16.gmra.mrb[4].mxu1 %vm996_vm3, %v1516_v59  ;;  %13871 = vmatprep.mubr.msk.bf16.mxu0 %vm17454_vm0, %v17453_v1  ;;  %v21804_v59 = vshrl.u32 %v17791_v23, 16  ;;  %v17811_v28 = vrot.slane %v21803_v38, 7  ;;  %v17829_v38 = vsel %vm951_vm5, %v17655_v21, %v17671_v29  ;;  %v1531_v21 = vor.u32 %v1529_v49, %v17733_v55 }
  0x2e   : > { %13985 = vmatprep.mubr.msk.bf16.mxu1 %vm17454_vm0, %v17453_v1  ;;  %v17824_v19 = vrot.slane %v21805_v0, 7  ;;  %v17842_v0 = vsel %vm951_vm5, %v17665_v27, %v17679_v32 }
  0x2f   : > { %v17820_v8 = vrot.slane %v21804_v59, 7  ;;  %v1566_v59 = vshrl.u32 %v17815_v7, 16  ;;  %v1532_v43 = vsel %vm875_vm1, %v17708_v44, %v1531_v21 }
  0x31   : > { %v17854_v61 = vrot.slane %v1566_v59, 7 }
  0x34   : > { %13872 = vmatmul.mubr.msk.bf16.gmra.mrb[8].mxu0 %vm996_vm3, %v898_v30  ;;  %v905_v30 = vor.u32 %v903_v46, %v17722_v50 }
  0x35   : > { %13986 = vmatmul.mubr.msk.bf16.gmra.mrb[8].mxu1 %vm996_vm3, %v1524_v34  ;;  %13875 = vmatprep.mubr.msk.bf16.mxu0 %vm17454_vm0, %v17453_v1  ;;  %v956_v34 = vor.u32 %v17671_v29, %v884_v18  ;;  %v1579_v18 = vor.u32 %v17679_v32, %v1510_v22  ;;  %v1580_v29 = vrot.slane %v1521_v40, 1  ;;  %v1539_v22 = vor.u32 %v1537_v57, %v17748_v62 }
  0x36   : > { %13989 = vmatprep.mubr.msk.bf16.mxu1 %vm17454_vm0, %v17453_v1  ;;  %v906_v27 = vsel %vm875_vm1, %v17694_v39, %v905_v30  ;;  %v913_v39 = vor.u32 %v911_v52, %v17743_v60  ;;  %v959_v32 = vor.u32 %v957_v31, %v892_v33  ;;  %v960_v40 = vrot.slane %v903_v46, 1 }
  0x37   : > { %v17861_v12 = vsel %vm951_vm5, %v956_v34, %v957_v31  ;;  %v17872_v35 = vsel %vm951_vm5, %v1579_v18, %v1580_v29  ;;  %v1540_v30 = vsel %vm875_vm1, %v17733_v55, %v1539_v22  ;;  %v1582_v21 = vor.u32 %v1580_v29, %v1518_v36 }
  0x38   : > { %v17890_v44 = vsel %vm951_vm5, %v959_v32, %v960_v40  ;;  %v1583_v34 = vrot.slane %v1529_v49, 1  ;;  %v921_v46 = vor.u32 %v919_v63, %v17758_v5  ;;  %v1547_v36 = vor.u32 %v1545_v6, %v17772_v11 }
  0x39   : > { %v962_v49 = vor.u32 %v960_v40, %v900_v45  ;;  %v1586_v29 = vrot.slane %v1537_v57, 1  ;;  %v1589_v40 = vrot.slane %v1545_v6, 1 }
  0x3a   : > { %v17902_v33 = vsel %vm951_vm5, %v1582_v21, %v1583_v34  ;;  %v922_v31 = vsel %vm875_vm1, %v17743_v60, %v921_v46  ;;  %v1585_v18 = vor.u32 %v1583_v34, %v1526_v48  ;;  %v1555_v48 = vor.u32 %v1553_v20, %v17804_v54 }
  0x3b   : > { %v966_v60 = vrot.slane %v919_v63, 1  ;;  %v1588_v32 = vor.u32 %v1586_v29, %v1534_v56  ;;  %v21826_v63 = vshll.u32 %v17786_v17, 16  ;;  %v21827_v56 = vshll.u32 %v17791_v23, 16 }
  0x3c   : > { %13876 = vmatmul.mubr.msk.bf16.gmra.mrb[12].mxu0 %vm996_vm3, %v906_v27  ;;  %v1548_v27 = vsel %vm875_vm1, %v17748_v62, %v1547_v36  ;;  %v17932_v45 = vsel %vm951_vm5, %v1585_v18, %v1586_v29  ;;  %v1556_v22 = vsel %vm875_vm1, %v17772_v11, %v1555_v48  ;;  %v21828_v11 = vshrl.u32 %v17727_v53, 16 }
  0x3d   : > { %13990 = vmatmul.mubr.msk.bf16.gmra.mrb[12].mxu1 %vm996_vm3, %v1532_v43  ;;  %13879 = vmatprep.mubr.msk.bf16.mxu0 %vm17454_vm0, %v17453_v1  ;;  %v914_v43 = vsel %vm875_vm1, %v17722_v50, %v913_v39  ;;  %v963_v50 = vrot.slane %v911_v52, 1  ;;  %v929_v52 = vor.u32 %v927_v13, %v17783_v16  ;;  %v1563_v6 = vor.u32 %v21827_v56, %v17820_v8 }
  0x3e   : > { %13993 = vmatprep.mubr.msk.bf16.mxu1 %vm17454_vm0, %v17453_v1  ;;  %v21829_v36 = vshrl.u32 %v17738_v58, 16  ;;  %v21833_v29 = vmov %v21826_v63 }
  0x3f   : > { %v17920_v55 = vsel %vm951_vm5, %v962_v49, %v963_v50  ;;  %v965_v57 = vor.u32 %v963_v50, %v908_v51  ;;  %v930_v39 = vsel %vm875_vm1, %v17758_v5, %v929_v52  ;;  %v17962_v51 = vsel %vm951_vm5, %v1588_v32, %v1589_v40 }
  0x40   : > { %v937_v5 = vor.u32 %v21826_v63, %v17811_v28  ;;  %v1564_v46 = vsel %vm875_vm1, %v17804_v54, %v1563_v6  ;;  %v1591_v49 = vor.u32 %v1589_v40, %v21829_v36  ;;  %v1592_v50 = vrot.slane %v1553_v20, 1  ;;  %v17104_v6 = vld [vmem:[%s21821_s0 + $0x10] sm:$0xff]  }
  0x41   : > { %v17950_v62 = vsel %vm951_vm5, %v965_v57, %v966_v60  ;;  %v21831_v20 = vshll.u32 %v17815_v7, 16  ;;  %v972_v52 = vrot.slane %v21833_v29, 1  ;;  %v21840_v36 = vshrl.u32 %v17794_v26, 16 }
  0x42   : > { %v938_v34 = vsel %vm875_vm1, %v17783_v16, %v937_v5  ;;  %v17103_v5 = vld [vmem:[%s21820_s8 + $0x10] sm:$0xff]  }
  0x43   : > { %v1571_v54 = vor.u32 %v21831_v20, %v17854_v61  ;;  %v21835_v61 = vmov %v21827_v56 }
  0x44   : > { %13880 = vmatmul.mubr.msk.bf16.gmra.mrb[16].mxu0 %vm996_vm3, %v914_v43  ;;  %v968_v43 = vor.u32 %v966_v60, %v21828_v11  ;;  %v21834_v60 = vshrl.u32 %v17779_v15, 16  ;;  %v21838_v11 = vshrl.u32 %v17791_v23, 16 }
  0x45   : > { %13994 = vmatmul.mubr.msk.bf16.gmra.mrb[16].mxu1 %vm996_vm3, %v1540_v30  ;;  %13883 = vmatprep.mubr.msk.bf16.mxu0 %vm17454_vm0, %v17453_v1  ;;  %v969_v30 = vrot.slane %v927_v13, 1  ;;  %v21830_v13 = vshll.u32 %v17794_v26, 16 }
  0x46   : > { %13997 = vmatprep.mubr.msk.bf16.mxu1 %vm17454_vm0, %v17453_v1 }
  0x47   : > { %v17980_v21 = vsel %vm951_vm5, %v968_v43, %v969_v30  ;;  %v945_v16 = vor.u32 %v21830_v13, %v17824_v19  ;;  %v1572_v19 = vsel %vm875_vm1, %v17820_v8, %v1571_v54  ;;  %v21837_v40 = vmov %v21830_v13  ;;  %v18274_v13 = vld [vmem:[%s21786_s20 + $0x8] sm:$0xff] }
  0x48   : > { %v975_v63 = vrot.slane %v21837_v40, 1 }
  0x49   : > { %v946_v57 = vsel %vm875_vm1, %v17811_v28, %v945_v16  ;;  %v21836_v28 = vshrl.u32 %v17786_v17, 16 }
  0x4b   : > { %v974_v8 = vor.u32 %v972_v52, %v21836_v28 }
  0x4c   : > { %13884 = vmatmul.mubr.msk.bf16.gmra.mrb[20].mxu0 %vm996_vm3, %v922_v31  ;;  %v17992_v31 = vsel %vm951_vm5, %v1591_v49, %v1592_v50  ;;  %v18057_v49 = vor.u32 %v975_v63, %v21840_v36 }
  0x4d   : > { %13998 = vmatmul.mubr.msk.bf16.gmra.mrb[20].mxu1 %vm996_vm3, %v1548_v27  ;;  %13887 = vmatprep.mubr.msk.bf16.mxu0 %vm17454_vm0, %v17453_v1  ;;  %v21832_v27 = vshrl.u32 %v17753_v2, 16  ;;  %v18037_v56 = vsel %vm951_vm5, %v974_v8, %v975_v63 }
  0x4e   : > { %14001 = vmatprep.mubr.msk.bf16.mxu1 %vm17454_vm0, %v17453_v1 }
  0x4f   : > { %v971_v18 = vor.u32 %v969_v30, %v21832_v27  ;;  %v21839_v30 = vmov %v21831_v20 }
  0x51   : > { %v18010_v48 = vsel %vm951_vm5, %v971_v18, %v972_v52 }
  0x54   : > { %13888 = vmatmul.mubr.msk.bf16.gmra.mrb[24].mxu0 %vm996_vm3, %v930_v39  ;;  %v1594_v39 = vor.u32 %v1592_v50, %v21834_v60 }
  0x55   : > { %14002 = vmatmul.mubr.msk.bf16.gmra.mrb[24].mxu1 %vm996_vm3, %v1556_v22  ;;  %13891 = vmatprep.mubr.msk.bf16.mxu0 %vm17454_vm0, %v17453_v1  ;;  %v1595_v22 = vrot.slane %v21835_v61, 1 }
  0x56   : > { %14005 = vmatprep.mubr.msk.bf16.mxu1 %vm17454_vm0, %v17453_v1 }
  0x57   : > { %v18022_v32 = vsel %vm951_vm5, %v1594_v39, %v1595_v22  ;;  %v1597_v43 = vor.u32 %v1595_v22, %v21838_v11 }
  0x5c   : > { %13892 = vmatmul.mubr.msk.bf16.gmra.mrb[28].mxu0 %vm996_vm3, %v938_v34  ;;  %v1598_v34 = vrot.slane %v21839_v30, 1  ;;  %v18294_v30 = vld [vmem:[%s21786_s20 + $0x18] sm:$0xff] }
  0x5d   : > { %14006 = vmatmul.mubr.msk.bf16.gmra.mrb[28].mxu1 %vm996_vm3, %v1564_v46  ;;  %13895 = vmatprep.mubr.msk.bf16.mxu0 %vm17454_vm0, %v17453_v1 }
  0x5e   : > { %14009 = vmatprep.mubr.msk.bf16.mxu1 %vm17454_vm0, %v17453_v1  ;;  %v18049_v46 = vsel %vm951_vm5, %v1597_v43, %v1598_v34 }
  0x64   : > { %13896 = vmatmul.mubr.msk.bf16.gmra.mrb[32].mxu0 %vm996_vm3, %v946_v57 }
  0x65   : > { %14010 = vmatmul.mubr.msk.bf16.gmra.mrb[32].mxu1 %vm996_vm3, %v1572_v19  ;;  %13901 = vmatprep.mubr.msk.bf16.mxu0 %vm17454_vm0, %v17453_v1 }
  0x66   : > { %14015 = vmatprep.mubr.msk.bf16.mxu1 %vm17454_vm0, %v17453_v1 }
  0x6c   : > { %13902 = vmatmul.mubr.msk.bf16.vlgmr.msra.gmra.mrb[0].mxu0 %vm996_vm3, %v17627_v3  ;;  %v18065_v3 = vor.u32 %v1598_v34, %v1566_v59  ;;  %v981_v59 = vsel %vm18070_vm7, %v18057_v49, 0 }
  0x6d   : > { %14016 = vmatmul.mubr.msk.bf16.vlgmr.msra.gmra.mrb[0].mxu1 %vm996_vm3, %v17630_v4  ;;  %13938 = vmatpush3.bf16.msra.mxu0 %v17103_v5 }
  0x6e   : > { %14052 = vmatpush3.bf16.msra.mxu1 %v17104_v6  ;;  %13905 = vmatprep.mubr.msk.bf16.mxu0 %vm17454_vm0, %v17453_v1  ;;  %v18288_v6 = vld [vmem:[%s21786_s20 + $0x10] sm:$0xff] }
  0x6f   : > { %14019 = vmatprep.mubr.msk.bf16.mxu1 %vm17454_vm0, %v17453_v1  ;;  %14089 = vmatprep.subr.bf16.mxu0 %v17453_v1 }
  0x70   : > { %14245 = vmatprep.subr.bf16.mxu1 %v17453_v1 }
  0x74   : > { %13906 = vmatmul.mubr.msk.bf16.gmra.mrb[4].mxu0 %vm996_vm3, %v17637_v9  ;;  %v1602_v9 = vsel %vm18070_vm7, %v18065_v3, 0 }
  0x75   : > { %14020 = vmatmul.mubr.msk.bf16.gmra.mrb[4].mxu1 %vm996_vm3, %v17640_v10  ;;  %13909 = vmatprep.mubr.msk.bf16.mxu0 %vm17454_vm0, %v17453_v1  ;;  %v17105_v10 = vld [vmem:[%s21843_s28] sm:$0xff]  }
  0x76   : > { %14023 = vmatprep.mubr.msk.bf16.mxu1 %vm17454_vm0, %v17453_v1 }
  0x7c   : > { %13910 = vmatmul.mubr.msk.bf16.gmra.mrb[8].mxu0 %vm996_vm3, %v17660_v24  ;;  %v17106_v24 = vld [vmem:[%s21843_s28 + $0x8] sm:$0xff]  }
  0x7d   : > { %14024 = vmatmul.mubr.msk.bf16.gmra.mrb[8].mxu1 %vm996_vm3, %v17663_v25  ;;  %13913 = vmatprep.mubr.msk.bf16.mxu0 %vm17454_vm0, %v17453_v1  ;;  %v17107_v25 = vld [vmem:[%s21843_s28 + $0x10] sm:$0xff]  }
  0x7e   : > { %14027 = vmatprep.mubr.msk.bf16.mxu1 %vm17454_vm0, %v17453_v1 }
  0x84   : > { %13914 = vmatmul.mubr.msk.bf16.gmra.mrb[12].mxu0 %vm996_vm3, %v17688_v37  ;;  %v17108_v37 = vld [vmem:[%s21843_s28 + $0x18] sm:$0xff]  }
  0x85   : > { %14028 = vmatmul.mubr.msk.bf16.gmra.mrb[12].mxu1 %vm996_vm3, %v17698_v41  ;;  %13917 = vmatprep.mubr.msk.bf16.mxu0 %vm17454_vm0, %v17453_v1  ;;  %v17109_v41 = vld [vmem:[%s21843_s28 + $0x20] sm:$0xff]  }
  0x86   : > { %14031 = vmatprep.mubr.msk.bf16.mxu1 %vm17454_vm0, %v17453_v1 }
  0x8c   : > { %13918 = vmatmul.mubr.msk.bf16.gmra.mrb[16].mxu0 %vm996_vm3, %v17701_v42  ;;  %v17110_v42 = vld [vmem:[%s21843_s28 + $0x28] sm:$0xff]  }
  0x8d   : > { %14032 = vmatmul.mubr.msk.bf16.gmra.mrb[16].mxu1 %vm996_vm3, %v17713_v47  ;;  %13921 = vmatprep.mubr.msk.bf16.mxu0 %vm17454_vm0, %v17453_v1  ;;  %v17111_v47 = vld [vmem:[%s21843_s28 + $0x30] sm:$0xff]  }
  0x8e   : > { %14035 = vmatprep.mubr.msk.bf16.mxu1 %vm17454_vm0, %v17453_v1 }
  0x94   : > { %13922 = vmatmul.mubr.msk.bf16.gmra.mrb[20].mxu0 %vm996_vm3, %v17727_v53  ;;  %v17112_v53 = vld [vmem:[%s21843_s28 + $0x38] sm:$0xff]  }
  0x95   : > { %14036 = vmatmul.mubr.msk.bf16.gmra.mrb[20].mxu1 %vm996_vm3, %v17738_v58  ;;  %13925 = vmatprep.mubr.msk.bf16.mxu0 %vm17454_vm0, %v17453_v1  ;;  %v18255_v58 = vld [vmem:[%s21844_s10] ss:$0 sm:$0xff]  ;;  %s21846_s10 = sld [smem:[#allocation9_spill]] }
  0x96   : > { %14039 = vmatprep.mubr.msk.bf16.mxu1 %vm17454_vm0, %v17453_v1 }
  0x9c   : > { %13926 = vmatmul.mubr.msk.bf16.gmra.mrb[24].mxu0 %vm996_vm3, %v17753_v2 }
  0x9d   : > { %14040 = vmatmul.mubr.msk.bf16.gmra.mrb[24].mxu1 %vm996_vm3, %v17779_v15  ;;  %13929 = vmatprep.mubr.msk.bf16.mxu0 %vm17454_vm0, %v17453_v1 }
  0x9e   : > { %14043 = vmatprep.mubr.msk.bf16.mxu1 %vm17454_vm0, %v17453_v1 }
  0xa4   : > { %13930 = vmatmul.mubr.msk.bf16.gmra.mrb[28].mxu0 %vm996_vm3, %v17786_v17 }
  0xa5   : > { %14044 = vmatmul.mubr.msk.bf16.gmra.mrb[28].mxu1 %vm996_vm3, %v17791_v23  ;;  %13933 = vmatprep.mubr.msk.bf16.mxu0 %vm17454_vm0, %v17453_v1 }
  0xa6   : > { %14047 = vmatprep.mubr.msk.bf16.mxu1 %vm17454_vm0, %v17453_v1 }
  0xac   : > { %13934 = vmatmul.mubr.msk.bf16.gmra.mrb[32].mxu0 %vm996_vm3, %v17794_v26 }
  0xad   : > { %14048 = vmatmul.mubr.msk.bf16.gmra.mrb[32].mxu1 %vm996_vm3, %v17815_v7  ;;  %13939 = vmatprep.mubr.msk.bf16.mxu0 %vm17454_vm0, %v17453_v1 }
  0xae   : > { %14053 = vmatprep.mubr.msk.bf16.mxu1 %vm17454_vm0, %v17453_v1 }
  0xb4   : > { %13940 = vmatmul.mubr.msk.bf16.vlgmr.msra.gmra.mrb[0].mxu0 %vm996_vm3, %v17829_v38 }
  0xb5   : > { %14054 = vmatmul.mubr.msk.bf16.vlgmr.msra.gmra.mrb[0].mxu1 %vm996_vm3, %v17842_v0  ;;  %13943 = vmatprep.mubr.msk.bf16.mxu0 %vm17454_vm0, %v17453_v1  ;;  %v18260_v0 = vld [vmem:[%s21845_s7] ss:$0 sm:$0xff]  ;;  %s21847_s7 = sld [smem:[#allocation10_spill]] }
  0xb6   : > { %14057 = vmatprep.mubr.msk.bf16.mxu1 %vm17454_vm0, %v17453_v1  ;;  %14090 = vmatpush3.bf16.msra.mxu0 %v17105_v10 }
  0xb7   : > { %14091 = vmatprep.subr.bf16.mxu0 %v17453_v1 }
  0xba   : > { %14092 = vmatpush3.bf16.msra.mxu0 %v17106_v24 }
  0xbb   : > { %14093 = vmatprep.subr.bf16.mxu0 %v17453_v1 }
  0xbc   : > { %13944 = vmatmul.mubr.msk.bf16.gmra.mrb[4].mxu0 %vm996_vm3, %v17861_v12 }
  0xbd   : > { %14058 = vmatmul.mubr.msk.bf16.gmra.mrb[4].mxu1 %vm996_vm3, %v17872_v35  ;;  %13947 = vmatprep.mubr.msk.bf16.mxu0 %vm17454_vm0, %v17453_v1 }
  0xbe   : > { %14061 = vmatprep.mubr.msk.bf16.mxu1 %vm17454_vm0, %v17453_v1  ;;  %14094 = vmatpush3.bf16.msra.mxu0 %v17107_v25 }
  0xbf   : > { %14095 = vmatprep.subr.bf16.mxu0 %v17453_v1 }
  0xc2   : > { %14096 = vmatpush3.bf16.msra.mxu0 %v17108_v37 }
  0xc3   : > { %14097 = vmatprep.subr.bf16.mxu0 %v17453_v1 }
  0xc4   : > { %13948 = vmatmul.mubr.msk.bf16.gmra.mrb[8].mxu0 %vm996_vm3, %v17890_v44 }
  0xc5   : > { %14062 = vmatmul.mubr.msk.bf16.gmra.mrb[8].mxu1 %vm996_vm3, %v17902_v33  ;;  %13951 = vmatprep.mubr.msk.bf16.mxu0 %vm17454_vm0, %v17453_v1 }
  0xc6   : > { %14065 = vmatprep.mubr.msk.bf16.mxu1 %vm17454_vm0, %v17453_v1  ;;  %14098 = vmatpush3.bf16.msra.mxu0 %v17109_v41 }
  0xc7   : > { %14099 = vmatprep.subr.bf16.mxu0 %v17453_v1 }
  0xca   : > { %14100 = vmatpush3.bf16.msra.mxu0 %v17110_v42 }
  0xcb   : > { %14101 = vmatprep.subr.bf16.mxu0 %v17453_v1 }
  0xcc   : > { %13952 = vmatmul.mubr.msk.bf16.gmra.mrb[12].mxu0 %vm996_vm3, %v17920_v55 }
  0xcd   : > { %14066 = vmatmul.mubr.msk.bf16.gmra.mrb[12].mxu1 %vm996_vm3, %v17932_v45  ;;  %13955 = vmatprep.mubr.msk.bf16.mxu0 %vm17454_vm0, %v17453_v1 }
  0xce   : > { %14069 = vmatprep.mubr.msk.bf16.mxu1 %vm17454_vm0, %v17453_v1  ;;  %14102 = vmatpush3.bf16.msra.mxu0 %v17111_v47  ;;  %v17113_v47 = vld [vmem:[%s21843_s28 + $0x40] sm:$0xff]  }
  0xcf   : > { %14103 = vmatprep.subr.bf16.mxu0 %v17453_v1 }
  0xd2   : > { %14104 = vmatpush3.bf16.msra.mxu0 %v17112_v53 }
  0xd3   : > { %14141 = vmatprep.subr.bf16.mxu0 %v17453_v1 }
  0xd4   : > { %13956 = vmatmul.mubr.msk.bf16.gmra.mrb[16].mxu0 %vm996_vm3, %v17950_v62 }
  0xd5   : > { %14070 = vmatmul.mubr.msk.bf16.gmra.mrb[16].mxu1 %vm996_vm3, %v17962_v51  ;;  %13959 = vmatprep.mubr.msk.bf16.mxu0 %vm17454_vm0, %v17453_v1 }
  0xd6   : > { %14073 = vmatprep.mubr.msk.bf16.mxu1 %vm17454_vm0, %v17453_v1 }
  0xdc   : > { %13960 = vmatmul.mubr.msk.bf16.gmra.mrb[20].mxu0 %vm996_vm3, %v17980_v21 }
  0xdd   : > { %14074 = vmatmul.mubr.msk.bf16.gmra.mrb[20].mxu1 %vm996_vm3, %v17992_v31  ;;  %13963 = vmatprep.mubr.msk.bf16.mxu0 %vm17454_vm0, %v17453_v1  ;;  %v18269_v31 = vld [vmem:[%s21786_s20] sm:$0xff] }
  0xde   : > { %14077 = vmatprep.mubr.msk.bf16.mxu1 %vm17454_vm0, %v17453_v1 }
  0xe4   : > { %13964 = vmatmul.mubr.msk.bf16.gmra.mrb[24].mxu0 %vm996_vm3, %v18010_v48 }
  0xe5   : > { %14078 = vmatmul.mubr.msk.bf16.gmra.mrb[24].mxu1 %vm996_vm3, %v18022_v32  ;;  %13967 = vmatprep.mubr.msk.bf16.mxu0 %vm17454_vm0, %v17453_v1 }
  0xe6   : > { %14081 = vmatprep.mubr.msk.bf16.mxu1 %vm17454_vm0, %v17453_v1 }
  0xec   : > { %13968 = vmatmul.mubr.msk.bf16.gmra.mrb[28].mxu0 %vm996_vm3, %v18037_v56 }
  0xed   : > { %14082 = vmatmul.mubr.msk.bf16.gmra.mrb[28].mxu1 %vm996_vm3, %v18049_v46  ;;  %13971 = vmatprep.mubr.msk.bf16.mxu0 %vm17454_vm0, %v17453_v1 }
  0xee   : > { %14085 = vmatprep.mubr.msk.bf16.mxu1 %vm17454_vm0, %v17453_v1 }
  0xf4   : > { %13972 = vmatmul.mubr.msk.bf16.gmra.mrb[32].mxu0 %vm996_vm3, %v981_v59 }
  0xf5   : > { %14086 = vmatmul.mubr.msk.bf16.gmra.mrb[32].mxu1 %vm996_vm3, %v1602_v9  ;;  %14105 = vmatprep.mubr.msk.bf16.mxu0 %vm17454_vm0, %v17453_v1 }
  0xf6   : > { %14261 = vmatprep.mubr.msk.bf16.mxu1 %vm17454_vm0, %v17453_v1 }
 0x187   : > { %v1349_v2 = vpop.f32.mrb[0].mxu0 }
 0x188   : > { %v15881_v12 = vadd.f32 %v18255_v58, %v1349_v2  ;;  %v1969_v15 = vpop.f32.mrb[0].mxu1  ;;  %v13941_v17 = vpop.f32.mrb[1].mxu0 }
 0x189   : > { %v15899_v23 = vadd.f32 %v18260_v0, %v1969_v15  ;;  %v14055_v26 = vpop.f32.mrb[1].mxu1  ;;  %v1352_v38 = vpop.f32.mrb[2].mxu0 }
 0x18a   : > { %v12200_v7 = vclamps-f32 %v15881_v12, 1.0  ;;  %v15882_v35 = vadd.f32 %v18255_v58, %v1352_v38  ;;  %v1972_v44 = vpop.f32.mrb[2].mxu1  ;;  %v13942_v33 = vpop.f32.mrb[3].mxu0 }
 0x18b   : > { %v12218_v55 = vclamps-f32 %v15899_v23, 1.0  ;;  %v15900_v45 = vadd.f32 %v18260_v0, %v1972_v44  ;;  %v14056_v62 = vpop.f32.mrb[3].mxu1 }
 0x18c   : > { %v12201_v51 = vclamps-f32 %v15882_v35, 1.0 }
 0x18d   : > { %v2130_v21 = vsub.f32 %v12200_v7, %v12218_v55  ;;  %v12219_v50 = vclamps-f32 %v15900_v45, 1.0  ;;  %v18312_v55 = vld [vmem:[%s21786_s20 + $0x20] sm:$0xff] }
 0x18f   : > { %v2131_v16 = vsub.f32 %v12201_v51, %v12219_v50  ;;  %v1357_v20 = vpop.f32.mrb[4].mxu0  ;;  %v2166_v29 = vmul.f32 %v18269_v31, %v2130_v21  ;;  %v17114_v21 = vld [vmem:[%s21843_s28 + $0x48] sm:$0xff]  }
 0x190   : > { %v15883_v54 = vadd.f32 %v18255_v58, %v1357_v20  ;;  %v1977_v27 = vpop.f32.mrb[4].mxu1  ;;  %v13945_v18 = vpop.f32.mrb[5].mxu0  ;;  %v18324_v50 = vld [vmem:[%s21786_s20 + $0x28] sm:$0xff] }
 0x191   : > { %v2167_v52 = vmul.f32 %v18274_v13, %v2131_v16  ;;  %v15901_v48 = vadd.f32 %v18260_v0, %v1977_v27  ;;  %v14059_v57 = vpop.f32.mrb[5].mxu1  ;;  %v1360_v19 = vpop.f32.mrb[6].mxu0 }
 0x192   : > { %v12202_v60 = vclamps-f32 %v15883_v54, 1.0  ;;  %v15884_v39 = vadd.f32 %v18255_v58, %v1360_v19  ;;  %v1980_v61 = vpop.f32.mrb[6].mxu1  ;;  %v13946_v22 = vpop.f32.mrb[7].mxu0 }
 0x193   : > { %v18281_v32 = vpack.c.bf16 %v2167_v52, %v2166_v29  ;;  %v12220_v28 = vclamps-f32 %v15901_v48, 1.0  ;;  %v15902_v8 = vadd.f32 %v18260_v0, %v1980_v61  ;;  %v14060_v40 = vpop.f32.mrb[7].mxu1  ;;  %v17115_v22 = vld [vmem:[%s21843_s28 + $0x50] sm:$0xff]  }
 0x194   : > { %v12203_v63 = vclamps-f32 %v15884_v39, 1.0 }
 0x195   : > { %v2195_v5 = vshrl.u32 %v18281_v32, 16  ;;  %v2132_v56 = vsub.f32 %v12202_v60, %v12220_v28  ;;  %v12221_v11 = vclamps-f32 %v15902_v8, 1.0  ;;  %v2198_v43 = vshll.u32 %v18281_v32, 16 }
 0x197   : > { %v2133_v34 = vsub.f32 %v12203_v63, %v12221_v11  ;;  %v1365_v46 = vpop.f32.mrb[8].mxu0  ;;  %v2197_v36 = vrot.slane %v2195_v5, 7  ;;  %v2275_v49 = vrot.slane %v2198_v43, 1  ;;  %v2168_v3 = vmul.f32 %v18288_v6, %v2132_v56 }
 0x198   : > { %v15885_v59 = vadd.f32 %v18255_v58, %v1365_v46  ;;  %v1985_v9 = vpop.f32.mrb[8].mxu1  ;;  %v13949_v10 = vpop.f32.mrb[9].mxu0 }
 0x199   : > { %v2169_v24 = vmul.f32 %v18294_v30, %v2133_v34  ;;  %v15903_v25 = vadd.f32 %v18260_v0, %v1985_v9  ;;  %v14063_v37 = vpop.f32.mrb[9].mxu1  ;;  %v1368_v41 = vpop.f32.mrb[10].mxu0  ;;  %v2200_v42 = vor.u32 %v2198_v43, %v2197_v36  ;;  %v2276_v53 = vor.u32 %v2275_v49, %v2195_v5  ;;  %v18349_v9 = vld [vmem:[%s21786_s20 + $0x30] sm:$0xff] }
 0x19a   : > { %v12204_v2 = vclamps-f32 %v15885_v59, 1.0  ;;  %v15886_v12 = vadd.f32 %v18255_v58, %v1368_v41  ;;  %v1988_v15 = vpop.f32.mrb[10].mxu1  ;;  %v13950_v17 = vpop.f32.mrb[11].mxu0  ;;  %v18361_v37 = vld [vmem:[%s21786_s20 + $0x38] sm:$0xff] }
 0x19b   : > { %v18304_v23 = vpack.c.bf16 %v2169_v24, %v2168_v3  ;;  %v12222_v26 = vclamps-f32 %v15903_v25, 1.0  ;;  %v15904_v38 = vadd.f32 %v18260_v0, %v1988_v15  ;;  %v14064_v7 = vpop.f32.mrb[11].mxu1  ;;  %v2274_v35 = vsel %vm17646_vm4, 0, %v2200_v42 }
 0x19c   : > { %v12205_v44 = vclamps-f32 %v15886_v12, 1.0  ;;  %14106 = vmatmul.mubr.bf16.vlgmr.msra.gmra.mrb[36].mxu0 %v2274_v35 }
 0x19d   : > { %v2134_v33 = vsub.f32 %v12204_v2, %v12222_v26  ;;  %v12223_v45 = vclamps-f32 %v15904_v38, 1.0  ;;  %14142 = vmatpush3.bf16.msra.mxu0 %v17113_v47  ;;  %14109 = vmatprep.mubr.msk.bf16.mxu0 %vm17454_vm0, %v17453_v1  ;;  %v2202_v62 = vshrl.u32 %v18304_v23, 16  ;;  %v2205_v51 = vshll.u32 %v18304_v23, 16 }
 0x19e   : > { %14143 = vmatprep.subr.bf16.mxu0 %v17453_v1 }
 0x19f   : > { %v2135_v16 = vsub.f32 %v12205_v44, %v12223_v45  ;;  %v1373_v20 = vpop.f32.mrb[12].mxu0  ;;  %v18327_v54 = vrot.slane %v2202_v62, 7  ;;  %v2277_v27 = vrot.slane %v2205_v51, 1  ;;  %v2170_v18 = vmul.f32 %v18312_v55, %v2134_v33  ;;  %v17117_v33 = vld [vmem:[%s21843_s28 + $0x60] sm:$0xff]  }
 0x1a0   : > { %v15887_v29 = vadd.f32 %v18255_v58, %v1373_v20  ;;  %v1993_v52 = vpop.f32.mrb[12].mxu1  ;;  %v13953_v48 = vpop.f32.mrb[13].mxu0 }
 0x1a1   : > { %v2171_v57 = vmul.f32 %v18324_v50, %v2135_v16  ;;  %v15905_v19 = vadd.f32 %v18260_v0, %v1993_v52  ;;  %v14067_v60 = vpop.f32.mrb[13].mxu1  ;;  %v1376_v39 = vpop.f32.mrb[14].mxu0  ;;  %v2207_v61 = vor.u32 %v2205_v51, %v18327_v54  ;;  %14144 = vmatpush3.bf16.msra.mxu0 %v17114_v21  ;;  %v18338_v28 = vsel %vm951_vm5, %v2276_v53, %v2277_v27 }
 0x1a2   : > { %v12206_v8 = vclamps-f32 %v15887_v29, 1.0  ;;  %v15888_v40 = vadd.f32 %v18255_v58, %v1376_v39  ;;  %v1996_v63 = vpop.f32.mrb[14].mxu1  ;;  %v13954_v5 = vpop.f32.mrb[15].mxu0  ;;  %14145 = vmatprep.subr.bf16.mxu0 %v17453_v1  ;;  %v2279_v56 = vor.u32 %v2277_v27, %v2202_v62  ;;  %v18387_v60 = vld [vmem:[%s21786_s20 + $0x40] sm:$0xff] }
 0x1a3   : > { %v18342_v11 = vpack.c.bf16 %v2171_v57, %v2170_v18  ;;  %v12224_v43 = vclamps-f32 %v15905_v19, 1.0  ;;  %v15906_v34 = vadd.f32 %v18260_v0, %v1996_v63  ;;  %v14068_v46 = vpop.f32.mrb[15].mxu1  ;;  %v2208_v49 = vsel %vm875_vm1, %v2197_v36, %v2207_v61  ;;  %v17116_v36 = vld [vmem:[%s21843_s28 + $0x58] sm:$0xff]  }
 0x1a4   : > { %v12207_v3 = vclamps-f32 %v15888_v40, 1.0  ;;  %14110 = vmatmul.mubr.bf16.gmra.mrb[40].mxu0 %v2208_v49 }
 0x1a5   : > { %v2136_v59 = vsub.f32 %v12206_v8, %v12224_v43  ;;  %v12225_v10 = vclamps-f32 %v15906_v34, 1.0  ;;  %14113 = vmatprep.mubr.msk.bf16.mxu0 %vm17454_vm0, %v17453_v1  ;;  %v2210_v24 = vshrl.u32 %v18342_v11, 16  ;;  %v2213_v25 = vshll.u32 %v18342_v11, 16  ;;  %14146 = vmatpush3.bf16.msra.mxu0 %v17115_v22  ;;  %v18399_v8 = vld [vmem:[%s21786_s20 + $0x48] sm:$0xff] }
 0x1a6   : > { %14147 = vmatprep.subr.bf16.mxu0 %v17453_v1 }
 0x1a7   : > { %v2137_v41 = vsub.f32 %v12207_v3, %v12225_v10  ;;  %v1381_v42 = vpop.f32.mrb[16].mxu0  ;;  %v18364_v47 = vrot.slane %v2210_v24, 7  ;;  %v2280_v53 = vrot.slane %v2213_v25, 1  ;;  %v2172_v2 = vmul.f32 %v18349_v9, %v2136_v59 }
 0x1a8   : > { %v15889_v12 = vadd.f32 %v18255_v58, %v1381_v42  ;;  %v2001_v15 = vpop.f32.mrb[16].mxu1  ;;  %v13957_v17 = vpop.f32.mrb[17].mxu0 }
 0x1a9   : > { %v2173_v26 = vmul.f32 %v18361_v37, %v2137_v41  ;;  %v15907_v38 = vadd.f32 %v18260_v0, %v2001_v15  ;;  %v14071_v7 = vpop.f32.mrb[17].mxu1  ;;  %v1384_v35 = vpop.f32.mrb[18].mxu0  ;;  %v2215_v44 = vor.u32 %v2213_v25, %v18364_v47  ;;  %14148 = vmatpush3.bf16.msra.mxu0 %v17116_v36  ;;  %v18375_v45 = vsel %vm951_vm5, %v2279_v56, %v2280_v53  ;;  %v17119_v36 = vld [vmem:[%s21843_s28 + $0x70] sm:$0xff]  }
 0x1aa   : > { %v12208_v62 = vclamps-f32 %v15889_v12, 1.0  ;;  %v15890_v51 = vadd.f32 %v18255_v58, %v1384_v35  ;;  %v2004_v21 = vpop.f32.mrb[18].mxu1  ;;  %v13958_v16 = vpop.f32.mrb[19].mxu0  ;;  %14149 = vmatprep.subr.bf16.mxu0 %v17453_v1  ;;  %v2282_v20 = vor.u32 %v2280_v53, %v2210_v24 }
 0x1ab   : > { %v18379_v27 = vpack.c.bf16 %v2173_v26, %v2172_v2  ;;  %v12226_v18 = vclamps-f32 %v15907_v38, 1.0  ;;  %v15908_v29 = vadd.f32 %v18260_v0, %v2004_v21  ;;  %v14072_v52 = vpop.f32.mrb[19].mxu1  ;;  %v2216_v48 = vsel %vm875_vm1, %v18327_v54, %v2215_v44  ;;  %v17118_v54 = vld [vmem:[%s21843_s28 + $0x68] sm:$0xff]  }
 0x1ac   : > { %v12209_v57 = vclamps-f32 %v15890_v51, 1.0  ;;  %14114 = vmatmul.mubr.bf16.gmra.mrb[44].mxu0 %v2216_v48 }
 0x1ad   : > { %v2138_v19 = vsub.f32 %v12208_v62, %v12226_v18  ;;  %v12227_v39 = vclamps-f32 %v15908_v29, 1.0  ;;  %14117 = vmatprep.mubr.msk.bf16.mxu0 %vm17454_vm0, %v17453_v1  ;;  %v2218_v61 = vshrl.u32 %v18379_v27, 16  ;;  %v2221_v22 = vshll.u32 %v18379_v27, 16  ;;  %14150 = vmatpush3.bf16.msra.mxu0 %v17117_v33  ;;  %v18425_v62 = vld [vmem:[%s21786_s20 + $0x50] sm:$0xff] }
 0x1ae   : > { %14151 = vmatprep.subr.bf16.mxu0 %v17453_v1 }
 0x1af   : > { %v2139_v40 = vsub.f32 %v12209_v57, %v12227_v39  ;;  %v1389_v63 = vpop.f32.mrb[20].mxu0  ;;  %v18402_v5 = vrot.slane %v2218_v61, 7  ;;  %v2283_v56 = vrot.slane %v2221_v22, 1  ;;  %v2174_v43 = vmul.f32 %v18387_v60, %v2138_v19 }
 0x1b0   : > { %v15891_v34 = vadd.f32 %v18255_v58, %v1389_v63  ;;  %v2009_v46 = vpop.f32.mrb[20].mxu1  ;;  %v13961_v49 = vpop.f32.mrb[21].mxu0 }
 0x1b1   : > { %v2175_v3 = vmul.f32 %v18399_v8, %v2139_v40  ;;  %v15909_v59 = vadd.f32 %v18260_v0, %v2009_v46  ;;  %v14075_v10 = vpop.f32.mrb[21].mxu1  ;;  %v1392_v24 = vpop.f32.mrb[22].mxu0  ;;  %v2223_v25 = vor.u32 %v2221_v22, %v18402_v5  ;;  %14152 = vmatpush3.bf16.msra.mxu0 %v17118_v54  ;;  %v18413_v41 = vsel %vm951_vm5, %v2282_v20, %v2283_v56  ;;  %v18437_v20 = vld [vmem:[%s21786_s20 + $0x58] sm:$0xff] }
 0x1b2   : > { %v12210_v42 = vclamps-f32 %v15891_v34, 1.0  ;;  %v15892_v53 = vadd.f32 %v18255_v58, %v1392_v24  ;;  %v2012_v2 = vpop.f32.mrb[22].mxu1  ;;  %v13962_v12 = vpop.f32.mrb[23].mxu0  ;;  %14153 = vmatprep.subr.bf16.mxu0 %v17453_v1  ;;  %v2285_v15 = vor.u32 %v2283_v56, %v2218_v61 }
 0x1b3   : > { %v18417_v17 = vpack.c.bf16 %v2175_v3, %v2174_v43  ;;  %v12228_v26 = vclamps-f32 %v15909_v59, 1.0  ;;  %v15910_v38 = vadd.f32 %v18260_v0, %v2012_v2  ;;  %v14076_v7 = vpop.f32.mrb[23].mxu1  ;;  %v2224_v35 = vsel %vm875_vm1, %v18364_v47, %v2223_v25  ;;  %v17120_v47 = vld [vmem:[%s21843_s28 + $0x78] sm:$0xff]   ;;  %v18457_v12 = vld [vmem:[%s21786_s20 + $0x60] sm:$0xff] }
 0x1b4   : > { %v12211_v44 = vclamps-f32 %v15892_v53, 1.0  ;;  %14118 = vmatmul.mubr.bf16.gmra.mrb[48].mxu0 %v2224_v35 }
 0x1b5   : > { %v2140_v33 = vsub.f32 %v12210_v42, %v12228_v26  ;;  %v12229_v51 = vclamps-f32 %v15910_v38, 1.0  ;;  %14121 = vmatprep.mubr.msk.bf16.mxu0 %vm17454_vm0, %v17453_v1  ;;  %v2226_v21 = vshrl.u32 %v18417_v17, 16  ;;  %v2229_v16 = vshll.u32 %v18417_v17, 16  ;;  %14154 = vmatpush3.bf16.msra.mxu0 %v17119_v36 }
 0x1b6   : > { %14155 = vmatprep.subr.bf16.mxu0 %v17453_v1 }
 0x1b7   : > { %v2141_v18 = vsub.f32 %v12211_v44, %v12229_v51  ;;  %v1397_v29 = vpop.f32.mrb[24].mxu0  ;;  %v2228_v52 = vrot.slane %v2226_v21, 7  ;;  %v2286_v48 = vrot.slane %v2229_v16, 1  ;;  %v2176_v57 = vmul.f32 %v18425_v62, %v2140_v33 }
 0x1b8   : > { %v15893_v19 = vadd.f32 %v18255_v58, %v1397_v29  ;;  %v2017_v39 = vpop.f32.mrb[24].mxu1  ;;  %v13965_v61 = vpop.f32.mrb[25].mxu0 }
 0x1b9   : > { %v2177_v22 = vmul.f32 %v18437_v20, %v2141_v18  ;;  %v15911_v54 = vadd.f32 %v18260_v0, %v2017_v39  ;;  %v14079_v40 = vpop.f32.mrb[25].mxu1  ;;  %v1400_v63 = vpop.f32.mrb[26].mxu0  ;;  %v2231_v56 = vor.u32 %v2229_v16, %v2228_v52  ;;  %14156 = vmatpush3.bf16.msra.mxu0 %v17120_v47  ;;  %v18445_v43 = vsel %vm951_vm5, %v2285_v15, %v2286_v48 }
 0x1ba   : > { %v12212_v34 = vclamps-f32 %v15893_v19, 1.0  ;;  %v15894_v46 = vadd.f32 %v18255_v58, %v1400_v63  ;;  %v2020_v49 = vpop.f32.mrb[26].mxu1  ;;  %v13966_v3 = vpop.f32.mrb[27].mxu0  ;;  %14193 = vmatprep.subr.bf16.mxu0 %v17453_v1  ;;  %v2288_v59 = vor.u32 %v2286_v48, %v2226_v21 }
 0x1bb   : > { %v18449_v10 = vpack.c.bf16 %v2177_v22, %v2176_v57  ;;  %v12230_v24 = vclamps-f32 %v15911_v54, 1.0  ;;  %v15912_v25 = vadd.f32 %v18260_v0, %v2020_v49  ;;  %v14080_v36 = vpop.f32.mrb[27].mxu1  ;;  %v2232_v42 = vsel %vm875_vm1, %v18402_v5, %v2231_v56  ;;  %v18466_v5 = vld [vmem:[%s21786_s20 + $0x68] sm:$0xff] }
 0x1bc   : > { %v12213_v53 = vclamps-f32 %v15894_v46, 1.0  ;;  %14122 = vmatmul.mubr.bf16.gmra.mrb[52].mxu0 %v2232_v42 }
 0x1bd   : > { %v2142_v2 = vsub.f32 %v12212_v34, %v12230_v24  ;;  %v12231_v15 = vclamps-f32 %v15912_v25, 1.0  ;;  %14125 = vmatprep.mubr.msk.bf16.mxu0 %vm17454_vm0, %v17453_v1  ;;  %v2234_v26 = vshrl.u32 %v18449_v10, 16  ;;  %v2237_v38 = vshll.u32 %v18449_v10, 16 }
 0x1bf   : > { %v2143_v7 = vsub.f32 %v12213_v53, %v12231_v15  ;;  %v1405_v35 = vpop.f32.mrb[28].mxu0  ;;  %v2236_v44 = vrot.slane %v2234_v26, 7  ;;  %v2289_v33 = vrot.slane %v2237_v38, 1  ;;  %v2178_v51 = vmul.f32 %v18457_v12, %v2142_v2 }
 0x1c0   : > { %v15895_v21 = vadd.f32 %v18255_v58, %v1405_v35  ;;  %v2025_v16 = vpop.f32.mrb[28].mxu1  ;;  %v13969_v47 = vpop.f32.mrb[29].mxu0 }
 0x1c1   : > { %v2179_v18 = vmul.f32 %v18466_v5, %v2143_v7  ;;  %v15913_v29 = vadd.f32 %v18260_v0, %v2025_v16  ;;  %v14083_v48 = vpop.f32.mrb[29].mxu1  ;;  %v1408_v57 = vpop.f32.mrb[30].mxu0  ;;  %v2239_v19 = vor.u32 %v2237_v38, %v2236_v44  ;;  %v18473_v39 = vsel %vm951_vm5, %v2288_v59, %v2289_v33  ;;  %v18483_v59 = vld [vmem:[%s21786_s20 + $0x70] sm:$0xff] }
 0x1c2   : > { %v12214_v61 = vclamps-f32 %v15895_v21, 1.0  ;;  %v15896_v22 = vadd.f32 %v18255_v58, %v1408_v57  ;;  %v2028_v54 = vpop.f32.mrb[30].mxu1  ;;  %v13970_v40 = vpop.f32.mrb[31].mxu0  ;;  %v2291_v63 = vor.u32 %v2289_v33, %v2234_v26 }
 0x1c3   : > { %v18476_v56 = vpack.c.bf16 %v2179_v18, %v2178_v51  ;;  %v12232_v34 = vclamps-f32 %v15913_v29, 1.0  ;;  %v15914_v46 = vadd.f32 %v18260_v0, %v2028_v54  ;;  %v14084_v49 = vpop.f32.mrb[31].mxu1  ;;  %v2240_v3 = vsel %vm875_vm1, %v2228_v52, %v2239_v19  ;;  %v18492_v52 = vld [vmem:[%s21786_s20 + $0x78] sm:$0xff] }
 0x1c4   : > { %v12215_v24 = vclamps-f32 %v15896_v22, 1.0  ;;  %14126 = vmatmul.mubr.bf16.gmra.mrb[56].mxu0 %v2240_v3 }
 0x1c5   : > { %v2144_v25 = vsub.f32 %v12214_v61, %v12232_v34  ;;  %v12233_v36 = vclamps-f32 %v15914_v46, 1.0  ;;  %14129 = vmatprep.mubr.msk.bf16.mxu0 %vm17454_vm0, %v17453_v1  ;;  %v2242_v42 = vshrl.u32 %v18476_v56, 16  ;;  %v2245_v53 = vshll.u32 %v18476_v56, 16 }
 0x1c7   : > { %v2145_v2 = vsub.f32 %v12215_v24, %v12233_v36  ;;  %v1413_v15 = vpop.f32.mrb[32].mxu0  ;;  %v2244_v26 = vrot.slane %v2242_v42, 7  ;;  %v2292_v38 = vrot.slane %v2245_v53, 1  ;;  %v2180_v7 = vmul.f32 %v18483_v59, %v2144_v25 }
 0x1c8   : > { %v15897_v35 = vadd.f32 %v18255_v58, %v1413_v15  ;;  %v2033_v33 = vpop.f32.mrb[32].mxu1  ;;  %v13973_v51 = vpop.f32.mrb[33].mxu0 }
 0x1c9   : > { %v2181_v21 = vmul.f32 %v18492_v52, %v2145_v2  ;;  %v15915_v16 = vadd.f32 %v18260_v0, %v2033_v33  ;;  %v14087_v47 = vpop.f32.mrb[33].mxu1  ;;  %v1416_v18 = vpop.f32.mrb[34].mxu0  ;;  %v2247_v29 = vor.u32 %v2245_v53, %v2244_v26  ;;  %v18499_v48 = vsel %vm951_vm5, %v2291_v63, %v2292_v38  ;;  %v18509_v63 = vld [vmem:[%s21786_s20 + $0x80] sm:$0xff] }
 0x1ca   : > { %v12216_v57 = vclamps-f32 %v15897_v35, 1.0  ;;  %v15898_v19 = vadd.f32 %v18255_v58, %v1416_v18  ;;  %v2036_v61 = vpop.f32.mrb[34].mxu1  ;;  %v13974_v22 = vpop.f32.mrb[35].mxu0  ;;  %v2294_v54 = vor.u32 %v2292_v38, %v2242_v42 }
 0x1cb   : > { %v18502_v40 = vpack.c.bf16 %v2181_v21, %v2180_v7  ;;  %v12234_v34 = vclamps-f32 %v15915_v16, 1.0  ;;  %v15916_v46 = vadd.f32 %v18260_v0, %v2036_v61  ;;  %v14088_v49 = vpop.f32.mrb[35].mxu1  ;;  %v2248_v3 = vsel %vm875_vm1, %v2236_v44, %v2247_v29  ;;  %v18518_v0 = vld [vmem:[%s21786_s20 + $0x88] sm:$0xff] }
 0x1cc   : > { %v12217_v24 = vclamps-f32 %v15898_v19, 1.0  ;;  %14130 = vmatmul.mubr.bf16.gmra.mrb[60].mxu0 %v2248_v3  ;;  %v17130_v49 = vld [vmem:[%s21843_s28 + $0xc8] sm:$0xff]   ;;  %v17131_v3 = vld [vmem:[%s21843_s28 + $0xd0] sm:$0xff]  }
 0x1cd   : > { %v2146_v25 = vsub.f32 %v12216_v57, %v12234_v34  ;;  %v12235_v58 = vclamps-f32 %v15916_v46, 1.0  ;;  %14133 = vmatprep.mubr.msk.bf16.mxu0 %vm17454_vm0, %v17453_v1  ;;  %v2250_v36 = vshrl.u32 %v18502_v40, 16  ;;  %v2253_v42 = vshll.u32 %v18502_v40, 16  ;;  %v17123_v34 = vld [vmem:[%s21843_s28 + $0x90] sm:$0xff]   ;;  %v17124_v46 = vld [vmem:[%s21843_s28 + $0x98] sm:$0xff]  }
 0x1cf   : > { %v2147_v44 = vsub.f32 %v12217_v24, %v12235_v58  ;;  %v2252_v53 = vrot.slane %v2250_v36, 7  ;;  %v2295_v2 = vrot.slane %v2253_v42, 1  ;;  %v2182_v15 = vmul.f32 %v18509_v63, %v2146_v25  ;;  %v17126_v24 = vld [vmem:[%s21843_s28 + $0xa8] sm:$0xff]   ;;  %v17132_v25 = vld [vmem:[%s21843_s28 + $0xd8] sm:$0xff]   ;;  %v17133_v58 = vld [vmem:[%s21843_s28 + $0xe0] sm:$0xff]  }
 0x1d1   : > { %v2183_v38 = vmul.f32 %v18518_v0, %v2147_v44  ;;  %v2255_v7 = vor.u32 %v2253_v42, %v2252_v53  ;;  %v18523_v35 = vsel %vm951_vm5, %v2294_v54, %v2295_v2  ;;  %v2297_v33 = vor.u32 %v2295_v2, %v2250_v36  ;;  %v17122_v54 = vld [vmem:[%s21843_s28 + $0x88] sm:$0xff]   ;;  %v17128_v36 = vld [vmem:[%s21843_s28 + $0xb8] sm:$0xff]  }
 0x1d2   : > { %v17134_v42 = vld [vmem:[%s21843_s28 + $0xe8] sm:$0xff]  }
 0x1d3   : > { %v18525_v51 = vpack.c.bf16 %v2183_v38, %v2182_v15  ;;  %v2256_v21 = vsel %vm875_vm1, %v2244_v26, %v2255_v7  ;;  %v17121_v26 = vld [vmem:[%s21843_s28 + $0x80] sm:$0xff]  }
 0x1d4   : > { %14134 = vmatmul.mubr.bf16.gmra.mrb[64].mxu0 %v2256_v21 }
 0x1d5   : > { %14137 = vmatprep.mubr.msk.bf16.mxu0 %vm17454_vm0, %v17453_v1  ;;  %v2258_v16 = vshrl.u32 %v18525_v51, 16  ;;  %v2261_v47 = vshll.u32 %v18525_v51, 16 }
 0x1d7   : > { %v2260_v18 = vrot.slane %v2258_v16, 7  ;;  %v2298_v29 = vrot.slane %v2261_v47, 1 }
 0x1d9   : > { %v2263_v57 = vor.u32 %v2261_v47, %v2260_v18  ;;  %v18533_v19 = vsel %vm951_vm5, %v2297_v33, %v2298_v29  ;;  %v18535_v61 = vor.u32 %v2298_v29, %v2258_v16 }
 0x1db   : > { %v2264_v22 = vsel %vm875_vm1, %v2252_v53, %v2263_v57 }
 0x1dc   : > { %14138 = vmatmul.mubr.bf16.gmra.mrb[68].mxu0 %v2264_v22  ;;  %v17137_v22 = vld [vmem:[%s21843_s28 + $0x100] sm:$0xff]  }
 0x1dd   : > { %14157 = vmatprep.mubr.msk.bf16.mxu0 %vm17454_vm0, %v17453_v1 }
 0x1e4   : > { %14158 = vmatmul.mubr.bf16.vlgmr.msra.gmra.mrb[36].mxu0 %v18281_v32  ;;  %v17129_v32 = vld [vmem:[%s21843_s28 + $0xc0] sm:$0xff]  }
 0x1e5   : > { %14194 = vmatpush3.bf16.msra.mxu0 %v17121_v26  ;;  %14161 = vmatprep.mubr.msk.bf16.mxu0 %vm17454_vm0, %v17453_v1 }
 0x1e6   : > { %14195 = vmatprep.subr.bf16.mxu0 %v17453_v1  ;;  %14246 = vmatpush3.bf16.msra.mxu1 %v17129_v32 }
 0x1e7   : > { %14247 = vmatprep.subr.bf16.mxu1 %v17453_v1 }
 0x1e9   : > { %14196 = vmatpush3.bf16.msra.mxu0 %v17122_v54 }
 0x1ea   : > { %14197 = vmatprep.subr.bf16.mxu0 %v17453_v1  ;;  %14248 = vmatpush3.bf16.msra.mxu1 %v17130_v49 }
 0x1eb   : > { %14249 = vmatprep.subr.bf16.mxu1 %v17453_v1 }
 0x1ec   : > { %14162 = vmatmul.mubr.bf16.gmra.mrb[40].mxu0 %v18304_v23  ;;  %v17125_v23 = vld [vmem:[%s21843_s28 + $0xa0] sm:$0xff]  }
 0x1ed   : > { %14165 = vmatprep.mubr.msk.bf16.mxu0 %vm17454_vm0, %v17453_v1  ;;  %14198 = vmatpush3.bf16.msra.mxu0 %v17123_v34 }
 0x1ee   : > { %14199 = vmatprep.subr.bf16.mxu0 %v17453_v1  ;;  %14250 = vmatpush3.bf16.msra.mxu1 %v17131_v3 }
 0x1ef   : > { %14251 = vmatprep.subr.bf16.mxu1 %v17453_v1 }
 0x1f1   : > { %14200 = vmatpush3.bf16.msra.mxu0 %v17124_v46 }
 0x1f2   : > { %14201 = vmatprep.subr.bf16.mxu0 %v17453_v1  ;;  %14252 = vmatpush3.bf16.msra.mxu1 %v17132_v25 }
 0x1f3   : > { %14253 = vmatprep.subr.bf16.mxu1 %v17453_v1 }
 0x1f4   : > { %14166 = vmatmul.mubr.bf16.gmra.mrb[44].mxu0 %v18342_v11  ;;  %v17127_v11 = vld [vmem:[%s21843_s28 + $0xb0] sm:$0xff]  }
 0x1f5   : > { %14169 = vmatprep.mubr.msk.bf16.mxu0 %vm17454_vm0, %v17453_v1  ;;  %14202 = vmatpush3.bf16.msra.mxu0 %v17125_v23 }
 0x1f6   : > { %14203 = vmatprep.subr.bf16.mxu0 %v17453_v1  ;;  %14254 = vmatpush3.bf16.msra.mxu1 %v17133_v58 }
 0x1f7   : > { %14255 = vmatprep.subr.bf16.mxu1 %v17453_v1 }
 0x1f9   : > { %14204 = vmatpush3.bf16.msra.mxu0 %v17126_v24 }
 0x1fa   : > { %14205 = vmatprep.subr.bf16.mxu0 %v17453_v1  ;;  %14256 = vmatpush3.bf16.msra.mxu1 %v17134_v42 }
 0x1fb   : > { %14257 = vmatprep.subr.bf16.mxu1 %v17453_v1 }
 0x1fc   : > { %14170 = vmatmul.mubr.bf16.gmra.mrb[48].mxu0 %v18379_v27  ;;  %v17136_v27 = vld [vmem:[%s21843_s28 + $0xf8] sm:$0xff]  }
 0x1fd   : > { %14173 = vmatprep.mubr.msk.bf16.mxu0 %vm17454_vm0, %v17453_v1  ;;  %14206 = vmatpush3.bf16.msra.mxu0 %v17127_v11  ;;  %v17138_v11 = vld [vmem:[%s21843_s28 + $0x108] sm:$0xff]  }
 0x1fe   : > { %14207 = vmatprep.subr.bf16.mxu0 %v17453_v1 }
 0x201   : > { %14208 = vmatpush3.bf16.msra.mxu0 %v17128_v36 }
 0x202   : > { %14401 = vmatprep.subr.bf16.mxu0 %v17453_v1 }
 0x204   : > { %14174 = vmatmul.mubr.bf16.gmra.mrb[52].mxu0 %v18417_v17 }
 0x205   : > { %14177 = vmatprep.mubr.msk.bf16.mxu0 %vm17454_vm0, %v17453_v1 }
 0x20c   : > { %14178 = vmatmul.mubr.bf16.gmra.mrb[56].mxu0 %v18449_v10 }
 0x20d   : > { %14181 = vmatprep.mubr.msk.bf16.mxu0 %vm17454_vm0, %v17453_v1 }
 0x214   : > { %14182 = vmatmul.mubr.bf16.gmra.mrb[60].mxu0 %v18476_v56 }
 0x215   : > { %14185 = vmatprep.mubr.msk.bf16.mxu0 %vm17454_vm0, %v17453_v1 }
 0x21c   : > { %14186 = vmatmul.mubr.bf16.gmra.mrb[64].mxu0 %v18502_v40 }
 0x21d   : > { %14189 = vmatprep.mubr.msk.bf16.mxu0 %vm17454_vm0, %v17453_v1 }
 0x224   : > { %14190 = vmatmul.mubr.bf16.gmra.mrb[68].mxu0 %v18525_v51 }
 0x225   : > { %14209 = vmatprep.mubr.msk.bf16.mxu0 %vm17454_vm0, %v17453_v1 }
 0x22c   : > { %14210 = vmatmul.mubr.bf16.vlgmr.msra.gmra.mrb[36].mxu0 %v18338_v28  ;;  %v2310_v28 = vsel %vm18070_vm7, %v18535_v61, 0 }
 0x22d   : > { %14213 = vmatprep.mubr.msk.bf16.mxu0 %vm17454_vm0, %v17453_v1 }
 0x234   : > { %14214 = vmatmul.mubr.bf16.gmra.mrb[40].mxu0 %v18375_v45  ;;  %v17135_v45 = vld [vmem:[%s21843_s28 + $0xf0] sm:$0xff]  }
 0x235   : > { %14217 = vmatprep.mubr.msk.bf16.mxu0 %vm17454_vm0, %v17453_v1  ;;  %14258 = vmatpush3.bf16.msra.mxu1 %v17135_v45 }
 0x236   : > { %14259 = vmatprep.subr.bf16.mxu1 %v17453_v1 }
 0x239   : > { %14260 = vmatpush3.bf16.msra.mxu1 %v17136_v27 }
 0x23a   : > { %14297 = vmatprep.subr.bf16.mxu1 %v17453_v1 }
 0x23c   : > { %14218 = vmatmul.mubr.bf16.gmra.mrb[44].mxu0 %v18413_v41  ;;  %v18663_v41 = vld [vmem:[%s21846_s10] ss:$0 sm:$0xff] }
 0x23d   : > { %14221 = vmatprep.mubr.msk.bf16.mxu0 %vm17454_vm0, %v17453_v1 }
 0x244   : > { %14222 = vmatmul.mubr.bf16.gmra.mrb[48].mxu0 %v18445_v43 }
 0x245   : > { %14225 = vmatprep.mubr.msk.bf16.mxu0 %vm17454_vm0, %v17453_v1 }
 0x24c   : > { %14226 = vmatmul.mubr.bf16.gmra.mrb[52].mxu0 %v18473_v39 }
 0x24d   : > { %14229 = vmatprep.mubr.msk.bf16.mxu0 %vm17454_vm0, %v17453_v1 }
 0x254   : > { %14230 = vmatmul.mubr.bf16.gmra.mrb[56].mxu0 %v18499_v48 }
 0x255   : > { %14233 = vmatprep.mubr.msk.bf16.mxu0 %vm17454_vm0, %v17453_v1 }
 0x25c   : > { %14234 = vmatmul.mubr.bf16.gmra.mrb[60].mxu0 %v18523_v35 }
 0x25d   : > { %14237 = vmatprep.mubr.msk.bf16.mxu0 %vm17454_vm0, %v17453_v1 }
 0x264   : > { %14238 = vmatmul.mubr.bf16.gmra.mrb[64].mxu0 %v18533_v19 }
 0x265   : > { %14241 = vmatprep.mubr.msk.bf16.mxu0 %vm17454_vm0, %v17453_v1 }
 0x26c   : > { %14242 = vmatmul.mubr.bf16.gmra.mrb[68].mxu0 %v2310_v28 }
 0x26d   : > { %14417 = vmatprep.mubr.msk.bf16.mxu0 %vm17454_vm0, %v17453_v1 }
 0x2ff   : > { %v2773_v17 = vpop.f32.mrb[36].mxu0 }
 0x300   : > { %v15917_v43 = vadd.f32 %v18663_v41, %v2773_v17  ;;  %v14211_v10 = vpop.f32.mrb[37].mxu0  ;;  %v17139_v17 = vld [vmem:[%s21843_s28 + $0x110] sm:$0xff]  }
 0x301   : > { %v2776_v39 = vpop.f32.mrb[38].mxu0 }
 0x302   : > { %v2862_v56 = vmax.f32 %v15917_v43, 0.0  ;;  %v15918_v48 = vadd.f32 %v18663_v41, %v2776_v39  ;;  %v14212_v40 = vpop.f32.mrb[39].mxu0 }
 0x304   : > { %v2863_v44 = vmax.f32 %v15918_v48, 0.0  ;;  %v2880_v53 = vmul.f32 %v2862_v56, %v18269_v31 }
 0x306   : > { %v2881_v2 = vmul.f32 %v2863_v44, %v18274_v13 }
 0x307   : > { %v2781_v15 = vpop.f32.mrb[40].mxu0 }
 0x308   : > { %v18669_v38 = vpack.c.bf16 %v2881_v2, %v2880_v53  ;;  %v15919_v7 = vadd.f32 %v18663_v41, %v2781_v15  ;;  %v14215_v35 = vpop.f32.mrb[41].mxu0 }
 0x309   : > { %v2784_v33 = vpop.f32.mrb[42].mxu0  ;;  %v17140_v35 = vld [vmem:[%s21843_s28 + $0x118] sm:$0xff]  }
 0x30a   : > { %v2910_v51 = vshrl.u32 %v18669_v38, 16  ;;  %v2913_v21 = vshll.u32 %v18669_v38, 16  ;;  %v2864_v16 = vmax.f32 %v15919_v7, 0.0  ;;  %v15920_v47 = vadd.f32 %v18663_v41, %v2784_v33  ;;  %v14216_v18 = vpop.f32.mrb[43].mxu0 }
 0x30c   : > { %v2990_v29 = vrot.slane %v2913_v21, 1  ;;  %v2865_v57 = vmax.f32 %v15920_v47, 0.0  ;;  %v2912_v31 = vrot.slane %v2910_v51, 7  ;;  %v2882_v13 = vmul.f32 %v2864_v16, %v18288_v6 }
 0x30e   : > { %v2883_v19 = vmul.f32 %v2865_v57, %v18294_v30  ;;  %v2915_v61 = vor.u32 %v2913_v21, %v2912_v31  ;;  %v2991_v26 = vor.u32 %v2990_v29, %v2910_v51  ;;  %v17141_v29 = vld [vmem:[%s21843_s28 + $0x120] sm:$0xff]  }
 0x30f   : > { %v2789_v54 = vpop.f32.mrb[44].mxu0 }
 0x310   : > { %v18680_v34 = vpack.c.bf16 %v2883_v19, %v2882_v13  ;;  %v15921_v32 = vadd.f32 %v18663_v41, %v2789_v54  ;;  %v14219_v46 = vpop.f32.mrb[45].mxu0  ;;  %v2989_v49 = vsel %vm17646_vm4, 0, %v2915_v61 }
 0x311   : > { %v2792_v23 = vpop.f32.mrb[46].mxu0  ;;  %14262 = vmatmul.mubr.bf16.vlgmr.msra.gmra.mrb[36].mxu1 %v2989_v49 }
 0x312   : > { %v2917_v6 = vshrl.u32 %v18680_v34, 16  ;;  %v2866_v30 = vmax.f32 %v15921_v32, 0.0  ;;  %v15922_v3 = vadd.f32 %v18663_v41, %v2792_v23  ;;  %v14220_v24 = vpop.f32.mrb[47].mxu0  ;;  %14298 = vmatpush3.bf16.msra.mxu1 %v17137_v22  ;;  %14265 = vmatprep.mubr.msk.bf16.mxu1 %vm17454_vm0, %v17453_v1  ;;  %v2920_v25 = vshll.u32 %v18680_v34, 16  ;;  %v17142_v23 = vld [vmem:[%s21843_s28 + $0x128] sm:$0xff]  }
 0x313   : > { %14299 = vmatprep.subr.bf16.mxu1 %v17453_v1 }
 0x314   : > { %v2867_v58 = vmax.f32 %v15922_v3, 0.0  ;;  %v2919_v36 = vrot.slane %v2917_v6, 7  ;;  %v2992_v42 = vrot.slane %v2920_v25, 1  ;;  %v2884_v28 = vmul.f32 %v2866_v30, %v18312_v55 }
 0x316   : > { %v2885_v45 = vmul.f32 %v2867_v58, %v18324_v50  ;;  %v2922_v27 = vor.u32 %v2920_v25, %v2919_v36  ;;  %14300 = vmatpush3.bf16.msra.mxu1 %v17138_v11  ;;  %v18700_v43 = vsel %vm951_vm5, %v2991_v26, %v2992_v42  ;;  %v2994_v10 = vor.u32 %v2992_v42, %v2917_v6  ;;  %v17143_v58 = vld [vmem:[%s21843_s28 + $0x130] sm:$0xff]  }
 0x317   : > { %v2797_v39 = vpop.f32.mrb[48].mxu0  ;;  %14301 = vmatprep.subr.bf16.mxu1 %v17453_v1 }
 0x318   : > { %v18703_v56 = vpack.c.bf16 %v2885_v45, %v2884_v28  ;;  %v15923_v48 = vadd.f32 %v18663_v41, %v2797_v39  ;;  %v14223_v55 = vpop.f32.mrb[49].mxu0  ;;  %v2923_v50 = vsel %vm875_vm1, %v2912_v31, %v2922_v27 }
 0x319   : > { %v2800_v40 = vpop.f32.mrb[50].mxu0  ;;  %14266 = vmatmul.mubr.bf16.gmra.mrb[40].mxu1 %v2923_v50 }
 0x31a   : > { %v2925_v44 = vshrl.u32 %v18703_v56, 16  ;;  %v2868_v53 = vmax.f32 %v15923_v48, 0.0  ;;  %v15924_v2 = vadd.f32 %v18663_v41, %v2800_v40  ;;  %v14224_v15 = vpop.f32.mrb[51].mxu0  ;;  %14269 = vmatprep.mubr.msk.bf16.mxu1 %vm17454_vm0, %v17453_v1  ;;  %v2928_v7 = vshll.u32 %v18703_v56, 16  ;;  %14302 = vmatpush3.bf16.msra.mxu1 %v17139_v17  ;;  %v17144_v40 = vld [vmem:[%s21843_s28 + $0x138] sm:$0xff]  }
 0x31b   : > { %14303 = vmatprep.subr.bf16.mxu1 %v17453_v1 }
 0x31c   : > { %v2869_v33 = vmax.f32 %v15924_v2, 0.0  ;;  %v2927_v51 = vrot.slane %v2925_v44, 7  ;;  %v2995_v21 = vrot.slane %v2928_v7, 1  ;;  %v2886_v16 = vmul.f32 %v2868_v53, %v18349_v9 }
 0x31e   : > { %v2887_v47 = vmul.f32 %v2869_v33, %v18361_v37  ;;  %v2930_v18 = vor.u32 %v2928_v7, %v2927_v51  ;;  %14304 = vmatpush3.bf16.msra.mxu1 %v17140_v35  ;;  %v18722_v57 = vsel %vm951_vm5, %v2994_v10, %v2995_v21  ;;  %v2997_v31 = vor.u32 %v2995_v21, %v2925_v44 }
 0x31f   : > { %v2805_v13 = vpop.f32.mrb[52].mxu0  ;;  %14305 = vmatprep.subr.bf16.mxu1 %v17453_v1 }
 0x320   : > { %v18725_v19 = vpack.c.bf16 %v2887_v47, %v2886_v16  ;;  %v15925_v61 = vadd.f32 %v18663_v41, %v2805_v13  ;;  %v14227_v9 = vpop.f32.mrb[53].mxu0  ;;  %v2931_v37 = vsel %vm875_vm1, %v2919_v36, %v2930_v18 }
 0x321   : > { %v2808_v22 = vpop.f32.mrb[54].mxu0  ;;  %14270 = vmatmul.mubr.bf16.gmra.mrb[44].mxu1 %v2931_v37 }
 0x322   : > { %v2933_v26 = vshrl.u32 %v18725_v19, 16  ;;  %v2870_v54 = vmax.f32 %v15925_v61, 0.0  ;;  %v15926_v32 = vadd.f32 %v18663_v41, %v2808_v22  ;;  %v14228_v46 = vpop.f32.mrb[55].mxu0  ;;  %14273 = vmatprep.mubr.msk.bf16.mxu1 %vm17454_vm0, %v17453_v1  ;;  %v2936_v49 = vshll.u32 %v18725_v19, 16  ;;  %14306 = vmatpush3.bf16.msra.mxu1 %v17141_v29 }
 0x323   : > { %14307 = vmatprep.subr.bf16.mxu1 %v17453_v1 }
 0x324   : > { %v2871_v6 = vmax.f32 %v15926_v32, 0.0  ;;  %v2935_v30 = vrot.slane %v2933_v26, 7  ;;  %v2998_v3 = vrot.slane %v2936_v49, 1  ;;  %v2888_v24 = vmul.f32 %v2870_v54, %v18387_v60 }
 0x326   : > { %v2889_v25 = vmul.f32 %v2871_v6, %v18399_v8  ;;  %v2938_v11 = vor.u32 %v2936_v49, %v2935_v30  ;;  %14308 = vmatpush3.bf16.msra.mxu1 %v17142_v23  ;;  %v18744_v36 = vsel %vm951_vm5, %v2997_v31, %v2998_v3  ;;  %v3000_v42 = vor.u32 %v2998_v3, %v2933_v26 }
 0x327   : > { %v2813_v28 = vpop.f32.mrb[56].mxu0  ;;  %14309 = vmatprep.subr.bf16.mxu1 %v17453_v1 }
 0x328   : > { %v18747_v45 = vpack.c.bf16 %v2889_v25, %v2888_v24  ;;  %v15927_v27 = vadd.f32 %v18663_v41, %v2813_v28  ;;  %v14231_v60 = vpop.f32.mrb[57].mxu0  ;;  %v2939_v8 = vsel %vm875_vm1, %v2927_v51, %v2938_v11 }
 0x329   : > { %v2816_v17 = vpop.f32.mrb[58].mxu0  ;;  %14274 = vmatmul.mubr.bf16.gmra.mrb[48].mxu1 %v2939_v8 }
 0x32a   : > { %v2941_v10 = vshrl.u32 %v18747_v45, 16  ;;  %v2872_v39 = vmax.f32 %v15927_v27, 0.0  ;;  %v15928_v48 = vadd.f32 %v18663_v41, %v2816_v17  ;;  %v14232_v55 = vpop.f32.mrb[59].mxu0  ;;  %14277 = vmatprep.mubr.msk.bf16.mxu1 %vm17454_vm0, %v17453_v1  ;;  %v2944_v50 = vshll.u32 %v18747_v45, 16  ;;  %14310 = vmatpush3.bf16.msra.mxu1 %v17143_v58 }
 0x32b   : > { %14311 = vmatprep.subr.bf16.mxu1 %v17453_v1 }
 0x32c   : > { %v2873_v44 = vmax.f32 %v15928_v48, 0.0  ;;  %v2943_v53 = vrot.slane %v2941_v10, 7  ;;  %v3001_v2 = vrot.slane %v2944_v50, 1  ;;  %v2890_v15 = vmul.f32 %v2872_v39, %v18425_v62 }
 0x32e   : > { %v2891_v7 = vmul.f32 %v2873_v44, %v18437_v20  ;;  %v2946_v35 = vor.u32 %v2944_v50, %v2943_v53  ;;  %14312 = vmatpush3.bf16.msra.mxu1 %v17144_v40  ;;  %v18763_v33 = vsel %vm951_vm5, %v3000_v42, %v3001_v2  ;;  %v3003_v51 = vor.u32 %v3001_v2, %v2941_v10 }
 0x32f   : > { %v2821_v21 = vpop.f32.mrb[60].mxu0  ;;  %14349 = vmatprep.subr.bf16.mxu1 %v17453_v1 }
 0x330   : > { %v18766_v16 = vpack.c.bf16 %v2891_v7, %v2890_v15  ;;  %v15929_v47 = vadd.f32 %v18663_v41, %v2821_v21  ;;  %v14235_v18 = vpop.f32.mrb[61].mxu0  ;;  %v2947_v29 = vsel %vm875_vm1, %v2935_v30, %v2946_v35 }
 0x331   : > { %v2824_v31 = vpop.f32.mrb[62].mxu0  ;;  %14278 = vmatmul.mubr.bf16.gmra.mrb[52].mxu1 %v2947_v29 }
 0x332   : > { %v2949_v62 = vshrl.u32 %v18766_v16, 16  ;;  %v2874_v20 = vmax.f32 %v15929_v47, 0.0  ;;  %v15930_v13 = vadd.f32 %v18663_v41, %v2824_v31  ;;  %v14236_v61 = vpop.f32.mrb[63].mxu0  ;;  %14281 = vmatprep.mubr.msk.bf16.mxu1 %vm17454_vm0, %v17453_v1  ;;  %v2952_v9 = vshll.u32 %v18766_v16, 16 }
 0x334   : > { %v2875_v37 = vmax.f32 %v15930_v13, 0.0  ;;  %v2951_v22 = vrot.slane %v2949_v62, 7  ;;  %v3004_v26 = vrot.slane %v2952_v9, 1  ;;  %v2892_v54 = vmul.f32 %v2874_v20, %v18457_v12 }
 0x336   : > { %v2893_v32 = vmul.f32 %v2875_v37, %v18466_v5  ;;  %v2954_v46 = vor.u32 %v2952_v9, %v2951_v22  ;;  %v18778_v49 = vsel %vm951_vm5, %v3003_v51, %v3004_v26  ;;  %v3006_v23 = vor.u32 %v3004_v26, %v2949_v62 }
 0x337   : > { %v2829_v6 = vpop.f32.mrb[64].mxu0 }
 0x338   : > { %v18780_v30 = vpack.c.bf16 %v2893_v32, %v2892_v54  ;;  %v15931_v3 = vadd.f32 %v18663_v41, %v2829_v6  ;;  %v14239_v24 = vpop.f32.mrb[65].mxu0  ;;  %v2955_v25 = vsel %vm875_vm1, %v2943_v53, %v2954_v46  ;;  %v17145_v46 = vld [vmem:[%s21843_s28 + $0x140] sm:$0xff]   ;;  %v17147_v6 = vld [vmem:[%s21843_s28 + $0x150] sm:$0xff]  }
 0x339   : > { %v2832_v11 = vpop.f32.mrb[66].mxu0  ;;  %14282 = vmatmul.mubr.bf16.gmra.mrb[56].mxu1 %v2955_v25  ;;  %v17154_v24 = vld [vmem:[%s21843_s28 + $0x188] sm:$0xff]   ;;  %v17155_v25 = vld [vmem:[%s21843_s28 + $0x190] sm:$0xff]  }
 0x33a   : > { %v2957_v58 = vshrl.u32 %v18780_v30, 16  ;;  %v2876_v12 = vmax.f32 %v15931_v3, 0.0  ;;  %v15932_v5 = vadd.f32 %v18663_v41, %v2832_v11  ;;  %v14240_v42 = vpop.f32.mrb[67].mxu0  ;;  %14285 = vmatprep.mubr.msk.bf16.mxu1 %vm17454_vm0, %v17453_v1  ;;  %v2960_v28 = vshll.u32 %v18780_v30, 16  ;;  %v17148_v3 = vld [vmem:[%s21843_s28 + $0x158] sm:$0xff]   ;;  %v17150_v11 = vld [vmem:[%s21843_s28 + $0x168] sm:$0xff]  }
 0x33b   : > { %v17158_v42 = vld [vmem:[%s21843_s28 + $0x1a8] sm:$0xff]  }
 0x33c   : > { %v2877_v27 = vmax.f32 %v15932_v5, 0.0  ;;  %v2959_v60 = vrot.slane %v2957_v58, 7  ;;  %v3007_v8 = vrot.slane %v2960_v28, 1  ;;  %v2894_v17 = vmul.f32 %v2876_v12, %v18483_v59  ;;  %v17157_v12 = vld [vmem:[%s21843_s28 + $0x1a0] sm:$0xff]   ;;  %v17152_v5 = vld [vmem:[%s21843_s28 + $0x178] sm:$0xff]  }
 0x33e   : > { %v2895_v10 = vmul.f32 %v2877_v27, %v18492_v52  ;;  %v2962_v39 = vor.u32 %v2960_v28, %v2959_v60  ;;  %v18792_v48 = vsel %vm951_vm5, %v3006_v23, %v3007_v8  ;;  %v3009_v55 = vor.u32 %v3007_v8, %v2957_v58  ;;  %v17146_v23 = vld [vmem:[%s21843_s28 + $0x148] sm:$0xff]   ;;  %v17156_v58 = vld [vmem:[%s21843_s28 + $0x198] sm:$0xff]   ;;  %v18953_v8 = vld [vmem:[%s21786_s20] sm:$0xff] }
 0x33f   : > { %v2837_v50 = vpop.f32.mrb[68].mxu0 }
 0x340   : > { %v18794_v40 = vpack.c.bf16 %v2895_v10, %v2894_v17  ;;  %v15933_v44 = vadd.f32 %v18663_v41, %v2837_v50  ;;  %v14243_v53 = vpop.f32.mrb[69].mxu0  ;;  %v2963_v2 = vsel %vm875_vm1, %v2951_v22, %v2962_v39  ;;  %v18959_v10 = vld [vmem:[%s21786_s20 + $0x8] sm:$0xff] }
 0x341   : > { %v2840_v15 = vpop.f32.mrb[70].mxu0  ;;  %14286 = vmatmul.mubr.bf16.gmra.mrb[60].mxu1 %v2963_v2 }
 0x342   : > { %v2965_v7 = vshrl.u32 %v18794_v40, 16  ;;  %v2878_v59 = vmax.f32 %v15933_v44, 0.0  ;;  %v15934_v52 = vadd.f32 %v18663_v41, %v2840_v15  ;;  %v14244_v35 = vpop.f32.mrb[71].mxu0  ;;  %14289 = vmatprep.mubr.msk.bf16.mxu1 %vm17454_vm0, %v17453_v1  ;;  %v2968_v51 = vshll.u32 %v18794_v40, 16 }
 0x344   : > { %v2879_v21 = vmax.f32 %v15934_v52, 0.0  ;;  %v2967_v47 = vrot.slane %v2965_v7, 7  ;;  %v3010_v18 = vrot.slane %v2968_v51, 1  ;;  %v2896_v29 = vmul.f32 %v2878_v59, %v18509_v63 }
 0x346   : > { %v2897_v31 = vmul.f32 %v2879_v21, %v18518_v0  ;;  %v2970_v62 = vor.u32 %v2968_v51, %v2967_v47  ;;  %v18806_v20 = vsel %vm951_vm5, %v3009_v55, %v3010_v18  ;;  %v3012_v13 = vor.u32 %v3010_v18, %v2965_v7  ;;  %v18971_v21 = vld [vmem:[%s21786_s20 + $0x10] sm:$0xff]  ;;  %v18977_v18 = vld [vmem:[%s21786_s20 + $0x18] sm:$0xff] }
 0x348   : > { %v18808_v61 = vpack.c.bf16 %v2897_v31, %v2896_v29  ;;  %v2971_v41 = vsel %vm875_vm1, %v2959_v60, %v2970_v62  ;;  %v17161_v62 = vld [vmem:[%s21843_s28 + $0x1c0] sm:$0xff]  }
 0x349   : > { %14290 = vmatmul.mubr.bf16.gmra.mrb[64].mxu1 %v2971_v41 }
 0x34a   : > { %v2973_v9 = vshrl.u32 %v18808_v61, 16  ;;  %14293 = vmatprep.mubr.msk.bf16.mxu1 %vm17454_vm0, %v17453_v1  ;;  %v2976_v37 = vshll.u32 %v18808_v61, 16 }
 0x34c   : > { %v2975_v63 = vrot.slane %v2973_v9, 7  ;;  %v3013_v22 = vrot.slane %v2976_v37, 1 }
 0x34e   : > { %v2978_v0 = vor.u32 %v2976_v37, %v2975_v63  ;;  %v18816_v26 = vsel %vm951_vm5, %v3012_v13, %v3013_v22  ;;  %v18818_v54 = vor.u32 %v3013_v22, %v2973_v9 }
 0x350   : > { %v2979_v32 = vsel %vm875_vm1, %v2967_v47, %v2978_v0 }
 0x351   : > { %14294 = vmatmul.mubr.bf16.gmra.mrb[68].mxu1 %v2979_v32 }
 0x352   : > { %14313 = vmatprep.mubr.msk.bf16.mxu1 %vm17454_vm0, %v17453_v1 }
 0x359   : > { %14314 = vmatmul.mubr.bf16.vlgmr.msra.gmra.mrb[36].mxu1 %v18669_v38  ;;  %v17153_v38 = vld [vmem:[%s21843_s28 + $0x180] sm:$0xff]  }
 0x35a   : > { %14350 = vmatpush3.bf16.msra.mxu1 %v17145_v46  ;;  %14317 = vmatprep.mubr.msk.bf16.mxu1 %vm17454_vm0, %v17453_v1  ;;  %v17162_v46 = vld [vmem:[%s21843_s28 + $0x1c8] sm:$0xff]  }
 0x35b   : > { %14351 = vmatprep.subr.bf16.mxu1 %v17453_v1  ;;  %14402 = vmatpush3.bf16.msra.mxu0 %v17153_v38 }
 0x35c   : > { %14403 = vmatprep.subr.bf16.mxu0 %v17453_v1 }
 0x35e   : > { %14352 = vmatpush3.bf16.msra.mxu1 %v17146_v23 }
 0x35f   : > { %14353 = vmatprep.subr.bf16.mxu1 %v17453_v1  ;;  %14404 = vmatpush3.bf16.msra.mxu0 %v17154_v24 }
 0x360   : > { %14405 = vmatprep.subr.bf16.mxu0 %v17453_v1 }
 0x361   : > { %14318 = vmatmul.mubr.bf16.gmra.mrb[40].mxu1 %v18680_v34  ;;  %v17149_v34 = vld [vmem:[%s21843_s28 + $0x160] sm:$0xff]  }
 0x362   : > { %14321 = vmatprep.mubr.msk.bf16.mxu1 %vm17454_vm0, %v17453_v1  ;;  %14354 = vmatpush3.bf16.msra.mxu1 %v17147_v6 }
 0x363   : > { %14355 = vmatprep.subr.bf16.mxu1 %v17453_v1  ;;  %14406 = vmatpush3.bf16.msra.mxu0 %v17155_v25 }
 0x364   : > { %14407 = vmatprep.subr.bf16.mxu0 %v17453_v1 }
 0x366   : > { %14356 = vmatpush3.bf16.msra.mxu1 %v17148_v3  ;;  %v19000_v3 = vld [vmem:[%s21786_s20 + $0x20] sm:$0xff] }
 0x367   : > { %14357 = vmatprep.subr.bf16.mxu1 %v17453_v1  ;;  %14408 = vmatpush3.bf16.msra.mxu0 %v17156_v58  ;;  %v17163_v58 = vld [vmem:[%s21843_s28 + $0x1d0] sm:$0xff]  }
 0x368   : > { %14409 = vmatprep.subr.bf16.mxu0 %v17453_v1 }
 0x369   : > { %14322 = vmatmul.mubr.bf16.gmra.mrb[44].mxu1 %v18703_v56  ;;  %v17151_v56 = vld [vmem:[%s21843_s28 + $0x170] sm:$0xff]  }
 0x36a   : > { %14325 = vmatprep.mubr.msk.bf16.mxu1 %vm17454_vm0, %v17453_v1  ;;  %14358 = vmatpush3.bf16.msra.mxu1 %v17149_v34  ;;  %v19006_v34 = vld [vmem:[%s21786_s20 + $0x28] sm:$0xff] }
 0x36b   : > { %14359 = vmatprep.subr.bf16.mxu1 %v17453_v1  ;;  %14410 = vmatpush3.bf16.msra.mxu0 %v17157_v12 }
 0x36c   : > { %14411 = vmatprep.subr.bf16.mxu0 %v17453_v1 }
 0x36e   : > { %14360 = vmatpush3.bf16.msra.mxu1 %v17150_v11 }
 0x36f   : > { %14361 = vmatprep.subr.bf16.mxu1 %v17453_v1  ;;  %14412 = vmatpush3.bf16.msra.mxu0 %v17158_v42 }
 0x370   : > { %14413 = vmatprep.subr.bf16.mxu0 %v17453_v1 }
 0x371   : > { %14326 = vmatmul.mubr.bf16.gmra.mrb[48].mxu1 %v18725_v19  ;;  %v17160_v19 = vld [vmem:[%s21843_s28 + $0x1b8] sm:$0xff]  }
 0x372   : > { %14329 = vmatprep.mubr.msk.bf16.mxu1 %vm17454_vm0, %v17453_v1  ;;  %14362 = vmatpush3.bf16.msra.mxu1 %v17151_v56 }
 0x373   : > { %14363 = vmatprep.subr.bf16.mxu1 %v17453_v1 }
 0x376   : > { %14364 = vmatpush3.bf16.msra.mxu1 %v17152_v5 }
 0x377   : > { %14557 = vmatprep.subr.bf16.mxu1 %v17453_v1 }
 0x379   : > { %14330 = vmatmul.mubr.bf16.gmra.mrb[52].mxu1 %v18747_v45 }
 0x37a   : > { %14333 = vmatprep.mubr.msk.bf16.mxu1 %vm17454_vm0, %v17453_v1 }
 0x381   : > { %14334 = vmatmul.mubr.bf16.gmra.mrb[56].mxu1 %v18766_v16 }
 0x382   : > { %14337 = vmatprep.mubr.msk.bf16.mxu1 %vm17454_vm0, %v17453_v1 }
 0x389   : > { %14338 = vmatmul.mubr.bf16.gmra.mrb[60].mxu1 %v18780_v30 }
 0x38a   : > { %14341 = vmatprep.mubr.msk.bf16.mxu1 %vm17454_vm0, %v17453_v1 }
 0x391   : > { %14342 = vmatmul.mubr.bf16.gmra.mrb[64].mxu1 %v18794_v40 }
 0x392   : > { %14345 = vmatprep.mubr.msk.bf16.mxu1 %vm17454_vm0, %v17453_v1 }
 0x399   : > { %14346 = vmatmul.mubr.bf16.gmra.mrb[68].mxu1 %v18808_v61 }
 0x39a   : > { %14365 = vmatprep.mubr.msk.bf16.mxu1 %vm17454_vm0, %v17453_v1 }
 0x3a1   : > { %14366 = vmatmul.mubr.bf16.vlgmr.msra.gmra.mrb[36].mxu1 %v18700_v43  ;;  %v3025_v43 = vsel %vm18070_vm7, %v18818_v54, 0 }
 0x3a2   : > { %14369 = vmatprep.mubr.msk.bf16.mxu1 %vm17454_vm0, %v17453_v1 }
 0x3a9   : > { %14370 = vmatmul.mubr.bf16.gmra.mrb[40].mxu1 %v18722_v57  ;;  %v17159_v57 = vld [vmem:[%s21843_s28 + $0x1b0] sm:$0xff]  }
 0x3aa   : > { %14373 = vmatprep.mubr.msk.bf16.mxu1 %vm17454_vm0, %v17453_v1  ;;  %14414 = vmatpush3.bf16.msra.mxu0 %v17159_v57 }
 0x3ab   : > { %14415 = vmatprep.subr.bf16.mxu0 %v17453_v1 }
 0x3ae   : > { %14416 = vmatpush3.bf16.msra.mxu0 %v17160_v19 }
 0x3af   : > { %14453 = vmatprep.subr.bf16.mxu0 %v17453_v1 }
 0x3b1   : > { %14374 = vmatmul.mubr.bf16.gmra.mrb[44].mxu1 %v18744_v36  ;;  %v18946_v36 = vld [vmem:[%s21846_s10 + $0x1] ss:$0 sm:$0xff] }
 0x3b2   : > { %14377 = vmatprep.mubr.msk.bf16.mxu1 %vm17454_vm0, %v17453_v1 }
 0x3b9   : > { %14378 = vmatmul.mubr.bf16.gmra.mrb[48].mxu1 %v18763_v33 }
 0x3ba   : > { %14381 = vmatprep.mubr.msk.bf16.mxu1 %vm17454_vm0, %v17453_v1 }
 0x3c1   : > { %14382 = vmatmul.mubr.bf16.gmra.mrb[52].mxu1 %v18778_v49 }
 0x3c2   : > { %14385 = vmatprep.mubr.msk.bf16.mxu1 %vm17454_vm0, %v17453_v1 }
 0x3c9   : > { %14386 = vmatmul.mubr.bf16.gmra.mrb[56].mxu1 %v18792_v48 }
 0x3ca   : > { %14389 = vmatprep.mubr.msk.bf16.mxu1 %vm17454_vm0, %v17453_v1 }
 0x3d1   : > { %14390 = vmatmul.mubr.bf16.gmra.mrb[60].mxu1 %v18806_v20 }
 0x3d2   : > { %14393 = vmatprep.mubr.msk.bf16.mxu1 %vm17454_vm0, %v17453_v1 }
 0x3d9   : > { %14394 = vmatmul.mubr.bf16.gmra.mrb[64].mxu1 %v18816_v26 }
 0x3da   : > { %14397 = vmatprep.mubr.msk.bf16.mxu1 %vm17454_vm0, %v17453_v1 }
 0x3e1   : > { %14398 = vmatmul.mubr.bf16.gmra.mrb[68].mxu1 %v3025_v43 }
 0x3e2   : > { %14573 = vmatprep.mubr.msk.bf16.mxu1 %vm17454_vm0, %v17453_v1 }
 0x474   : > { %v3489_v45 = vpop.f32.mrb[36].mxu1 }
 0x475   : > { %v15935_v33 = vadd.f32 %v18946_v36, %v3489_v45  ;;  %v14367_v16 = vpop.f32.mrb[37].mxu1 }
 0x476   : > { %v3492_v49 = vpop.f32.mrb[38].mxu1 }
 0x477   : > { %v3578_v30 = vmax.f32 %v15935_v33, 0.0  ;;  %v15936_v28 = vadd.f32 %v18946_v36, %v3492_v49  ;;  %v14368_v27 = vpop.f32.mrb[39].mxu1 }
 0x478   : > { %v17164_v27 = vld [vmem:[%s21843_s28 + $0x1d8] sm:$0xff]  }
 0x479   : > { %v3579_v60 = vmax.f32 %v15936_v28, 0.0  ;;  %v3596_v17 = vmul.f32 %v18953_v8, %v3578_v30 }
 0x47b   : > { %v3597_v39 = vmul.f32 %v18959_v10, %v3579_v60 }
 0x47c   : > { %v3497_v48 = vpop.f32.mrb[40].mxu1 }
 0x47d   : > { %v18962_v55 = vpack.c.bf16 %v3597_v39, %v3596_v17  ;;  %v15937_v50 = vadd.f32 %v18946_v36, %v3497_v48  ;;  %v14371_v40 = vpop.f32.mrb[41].mxu1  ;;  %v19032_v48 = vld [vmem:[%s21786_s20 + $0x30] sm:$0xff] }
 0x47e   : > { %v3500_v44 = vpop.f32.mrb[42].mxu1  ;;  %v19038_v40 = vld [vmem:[%s21786_s20 + $0x38] sm:$0xff] }
 0x47f   : > { %v3626_v53 = vshrl.u32 %v18962_v55, 16  ;;  %v3629_v2 = vshll.u32 %v18962_v55, 16  ;;  %v3580_v15 = vmax.f32 %v15937_v50, 0.0  ;;  %v15938_v7 = vadd.f32 %v18946_v36, %v3500_v44  ;;  %v14372_v59 = vpop.f32.mrb[43].mxu1 }
 0x481   : > { %v3706_v52 = vrot.slane %v3629_v2, 1  ;;  %v3581_v35 = vmax.f32 %v15938_v7, 0.0  ;;  %v3628_v51 = vrot.slane %v3626_v53, 7  ;;  %v3598_v47 = vmul.f32 %v18971_v21, %v3580_v15 }
 0x483   : > { %v3599_v29 = vmul.f32 %v18977_v18, %v3581_v35  ;;  %v3631_v31 = vor.u32 %v3629_v2, %v3628_v51  ;;  %v3707_v20 = vor.u32 %v3706_v52, %v3626_v53  ;;  %v17165_v2 = vld [vmem:[%s21843_s28 + $0x1e0] sm:$0xff]  }
 0x484   : > { %v3505_v13 = vpop.f32.mrb[44].mxu1 }
 0x485   : > { %v18983_v61 = vpack.c.bf16 %v3599_v29, %v3598_v47  ;;  %v15939_v41 = vadd.f32 %v18946_v36, %v3505_v13  ;;  %v14375_v9 = vpop.f32.mrb[45].mxu1  ;;  %v3705_v37 = vsel %vm17646_vm4, 0, %v3631_v31 }
 0x486   : > { %v3508_v63 = vpop.f32.mrb[46].mxu1  ;;  %14418 = vmatmul.mubr.bf16.vlgmr.msra.gmra.mrb[72].mxu0 %v3705_v37  ;;  %v17166_v9 = vld [vmem:[%s21843_s28 + $0x1e8] sm:$0xff]  }
 0x487   : > { %v3633_v22 = vshrl.u32 %v18983_v61, 16  ;;  %v3582_v0 = vmax.f32 %v15939_v41, 0.0  ;;  %v15940_v26 = vadd.f32 %v18946_v36, %v3508_v63  ;;  %v14376_v54 = vpop.f32.mrb[47].mxu1  ;;  %14454 = vmatpush3.bf16.msra.mxu0 %v17161_v62  ;;  %14421 = vmatprep.mubr.msk.bf16.mxu0 %vm17454_vm0, %v17453_v1  ;;  %v3636_v32 = vshll.u32 %v18983_v61, 16 }
 0x488   : > { %14455 = vmatprep.subr.bf16.mxu0 %v17453_v1  ;;  %v19070_v54 = vld [vmem:[%s21786_s20 + $0x48] sm:$0xff] }
 0x489   : > { %v3583_v23 = vmax.f32 %v15940_v26, 0.0  ;;  %v3635_v6 = vrot.slane %v3633_v22, 7  ;;  %v3708_v38 = vrot.slane %v3636_v32, 1  ;;  %v3600_v24 = vmul.f32 %v19000_v3, %v3582_v0  ;;  %v19064_v0 = vld [vmem:[%s21786_s20 + $0x40] sm:$0xff] }
 0x48b   : > { %v3601_v25 = vmul.f32 %v19006_v34, %v3583_v23  ;;  %v3638_v11 = vor.u32 %v3636_v32, %v3635_v6  ;;  %14456 = vmatpush3.bf16.msra.mxu0 %v17162_v46  ;;  %v19013_v56 = vsel %vm951_vm5, %v3707_v20, %v3708_v38  ;;  %v3710_v12 = vor.u32 %v3708_v38, %v3633_v22  ;;  %v17167_v23 = vld [vmem:[%s21843_s28 + $0x1f0] sm:$0xff]  }
 0x48c   : > { %v3513_v5 = vpop.f32.mrb[48].mxu1  ;;  %14457 = vmatprep.subr.bf16.mxu0 %v17453_v1 }
 0x48d   : > { %v19016_v42 = vpack.c.bf16 %v3601_v25, %v3600_v24  ;;  %v15941_v43 = vadd.f32 %v18946_v36, %v3513_v5  ;;  %v14379_v57 = vpop.f32.mrb[49].mxu1  ;;  %v3639_v19 = vsel %vm875_vm1, %v3628_v51, %v3638_v11 }
 0x48e   : > { %v3516_v45 = vpop.f32.mrb[50].mxu1  ;;  %14422 = vmatmul.mubr.bf16.gmra.mrb[76].mxu0 %v3639_v19 }
 0x48f   : > { %v3641_v33 = vshrl.u32 %v19016_v42, 16  ;;  %v3584_v16 = vmax.f32 %v15941_v43, 0.0  ;;  %v15942_v49 = vadd.f32 %v18946_v36, %v3516_v45  ;;  %v14380_v30 = vpop.f32.mrb[51].mxu1  ;;  %14425 = vmatprep.mubr.msk.bf16.mxu0 %vm17454_vm0, %v17453_v1  ;;  %v3644_v28 = vshll.u32 %v19016_v42, 16  ;;  %14458 = vmatpush3.bf16.msra.mxu0 %v17163_v58 }
 0x490   : > { %14459 = vmatprep.subr.bf16.mxu0 %v17453_v1 }
 0x491   : > { %v3585_v60 = vmax.f32 %v15942_v49, 0.0  ;;  %v3643_v17 = vrot.slane %v3641_v33, 7  ;;  %v3711_v39 = vrot.slane %v3644_v28, 1  ;;  %v3602_v50 = vmul.f32 %v19032_v48, %v3584_v16  ;;  %v17168_v16 = vld [vmem:[%s21843_s28 + $0x1f8] sm:$0xff]  }
 0x493   : > { %v3603_v44 = vmul.f32 %v19038_v40, %v3585_v60  ;;  %v3646_v53 = vor.u32 %v3644_v28, %v3643_v17  ;;  %14460 = vmatpush3.bf16.msra.mxu0 %v17164_v27  ;;  %v19045_v15 = vsel %vm951_vm5, %v3710_v12, %v3711_v39  ;;  %v3713_v7 = vor.u32 %v3711_v39, %v3641_v33  ;;  %v19096_v27 = vld [vmem:[%s21786_s20 + $0x50] sm:$0xff] }
 0x494   : > { %v3521_v59 = vpop.f32.mrb[52].mxu1  ;;  %14461 = vmatprep.subr.bf16.mxu0 %v17453_v1 }
 0x495   : > { %v19048_v52 = vpack.c.bf16 %v3603_v44, %v3602_v50  ;;  %v15943_v35 = vadd.f32 %v18946_v36, %v3521_v59  ;;  %v14383_v51 = vpop.f32.mrb[53].mxu1  ;;  %v3647_v47 = vsel %vm875_vm1, %v3635_v6, %v3646_v53 }
 0x496   : > { %v3524_v29 = vpop.f32.mrb[54].mxu1  ;;  %14426 = vmatmul.mubr.bf16.gmra.mrb[80].mxu0 %v3647_v47 }
 0x497   : > { %v3649_v31 = vshrl.u32 %v19048_v52, 16  ;;  %v3586_v62 = vmax.f32 %v15943_v35, 0.0  ;;  %v15944_v20 = vadd.f32 %v18946_v36, %v3524_v29  ;;  %v14384_v13 = vpop.f32.mrb[55].mxu1  ;;  %14429 = vmatprep.mubr.msk.bf16.mxu0 %vm17454_vm0, %v17453_v1  ;;  %v3652_v41 = vshll.u32 %v19048_v52, 16  ;;  %14462 = vmatpush3.bf16.msra.mxu0 %v17165_v2 }
 0x498   : > { %14463 = vmatprep.subr.bf16.mxu0 %v17453_v1 }
 0x499   : > { %v3587_v37 = vmax.f32 %v15944_v20, 0.0  ;;  %v3651_v63 = vrot.slane %v3649_v31, 7  ;;  %v3714_v22 = vrot.slane %v3652_v41, 1  ;;  %v3604_v26 = vmul.f32 %v19064_v0, %v3586_v62 }
 0x49b   : > { %v3605_v32 = vmul.f32 %v19070_v54, %v3587_v37  ;;  %v3654_v46 = vor.u32 %v3652_v41, %v3651_v63  ;;  %14464 = vmatpush3.bf16.msra.mxu0 %v17166_v9  ;;  %v19077_v6 = vsel %vm951_vm5, %v3713_v7, %v3714_v22  ;;  %v3716_v38 = vor.u32 %v3714_v22, %v3649_v31 }
 0x49c   : > { %v3529_v24 = vpop.f32.mrb[56].mxu1  ;;  %14465 = vmatprep.subr.bf16.mxu0 %v17453_v1 }
 0x49d   : > { %v19080_v25 = vpack.c.bf16 %v3605_v32, %v3604_v26  ;;  %v15945_v11 = vadd.f32 %v18946_v36, %v3529_v24  ;;  %v14387_v58 = vpop.f32.mrb[57].mxu1  ;;  %v3655_v12 = vsel %vm875_vm1, %v3643_v17, %v3654_v46  ;;  %v19102_v17 = vld [vmem:[%s21786_s20 + $0x58] sm:$0xff]  ;;  %v19127_v26 = vld [vmem:[%s21786_s20 + $0x68] sm:$0xff] }
 0x49e   : > { %v3532_v5 = vpop.f32.mrb[58].mxu1  ;;  %14430 = vmatmul.mubr.bf16.gmra.mrb[84].mxu0 %v3655_v12 }
 0x49f   : > { %v3657_v43 = vshrl.u32 %v19080_v25, 16  ;;  %v3588_v57 = vmax.f32 %v15945_v11, 0.0  ;;  %v15946_v19 = vadd.f32 %v18946_v36, %v3532_v5  ;;  %v14388_v45 = vpop.f32.mrb[59].mxu1  ;;  %14433 = vmatprep.mubr.msk.bf16.mxu0 %vm17454_vm0, %v17453_v1  ;;  %v3660_v33 = vshll.u32 %v19080_v25, 16  ;;  %14466 = vmatpush3.bf16.msra.mxu0 %v17167_v23 }
 0x4a0   : > { %14467 = vmatprep.subr.bf16.mxu0 %v17453_v1 }
 0x4a1   : > { %v3589_v49 = vmax.f32 %v15946_v19, 0.0  ;;  %v3659_v30 = vrot.slane %v3657_v43, 7  ;;  %v3717_v28 = vrot.slane %v3660_v33, 1  ;;  %v3606_v60 = vmul.f32 %v19096_v27, %v3588_v57 }
 0x4a3   : > { %v3607_v39 = vmul.f32 %v19102_v17, %v3589_v49  ;;  %v3662_v50 = vor.u32 %v3660_v33, %v3659_v30  ;;  %14468 = vmatpush3.bf16.msra.mxu0 %v17168_v16  ;;  %v19106_v44 = vsel %vm951_vm5, %v3716_v38, %v3717_v28  ;;  %v3719_v53 = vor.u32 %v3717_v28, %v3657_v43 }
 0x4a4   : > { %v3537_v2 = vpop.f32.mrb[60].mxu1  ;;  %14505 = vmatprep.subr.bf16.mxu0 %v17453_v1 }
 0x4a5   : > { %v19109_v7 = vpack.c.bf16 %v3607_v39, %v3606_v60  ;;  %v15947_v59 = vadd.f32 %v18946_v36, %v3537_v2  ;;  %v14391_v35 = vpop.f32.mrb[61].mxu1  ;;  %v3663_v51 = vsel %vm875_vm1, %v3651_v63, %v3662_v50  ;;  %v19121_v63 = vld [vmem:[%s21786_s20 + $0x60] sm:$0xff]  ;;  %v19151_v50 = vld [vmem:[%s21786_s20 + $0x78] sm:$0xff] }
 0x4a6   : > { %v3540_v47 = vpop.f32.mrb[62].mxu1  ;;  %14434 = vmatmul.mubr.bf16.gmra.mrb[88].mxu0 %v3663_v51 }
 0x4a7   : > { %v3665_v29 = vshrl.u32 %v19109_v7, 16  ;;  %v3590_v31 = vmax.f32 %v15947_v59, 0.0  ;;  %v15948_v62 = vadd.f32 %v18946_v36, %v3540_v47  ;;  %v14392_v20 = vpop.f32.mrb[63].mxu1  ;;  %14437 = vmatprep.mubr.msk.bf16.mxu0 %vm17454_vm0, %v17453_v1  ;;  %v3668_v13 = vshll.u32 %v19109_v7, 16 }
 0x4a9   : > { %v3591_v41 = vmax.f32 %v15948_v62, 0.0  ;;  %v3667_v9 = vrot.slane %v3665_v29, 7  ;;  %v3720_v37 = vrot.slane %v3668_v13, 1  ;;  %v3608_v22 = vmul.f32 %v19121_v63, %v3590_v31 }
 0x4ab   : > { %v3609_v32 = vmul.f32 %v19127_v26, %v3591_v41  ;;  %v3670_v46 = vor.u32 %v3668_v13, %v3667_v9  ;;  %v19131_v23 = vsel %vm951_vm5, %v3719_v53, %v3720_v37  ;;  %v3722_v38 = vor.u32 %v3720_v37, %v3665_v29 }
 0x4ac   : > { %v3545_v24 = vpop.f32.mrb[64].mxu1 }
 0x4ad   : > { %v19133_v11 = vpack.c.bf16 %v3609_v32, %v3608_v22  ;;  %v15949_v58 = vadd.f32 %v18946_v36, %v3545_v24  ;;  %v14395_v12 = vpop.f32.mrb[65].mxu1  ;;  %v3671_v5 = vsel %vm875_vm1, %v3659_v30, %v3670_v46  ;;  %v19145_v30 = vld [vmem:[%s21786_s20 + $0x70] sm:$0xff] }
 0x4ae   : > { %v3548_v43 = vpop.f32.mrb[66].mxu1  ;;  %14438 = vmatmul.mubr.bf16.gmra.mrb[92].mxu0 %v3671_v5 }
 0x4af   : > { %v3673_v57 = vshrl.u32 %v19133_v11, 16  ;;  %v3592_v19 = vmax.f32 %v15949_v58, 0.0  ;;  %v15950_v45 = vadd.f32 %v18946_v36, %v3548_v43  ;;  %v14396_v33 = vpop.f32.mrb[67].mxu1  ;;  %14441 = vmatprep.mubr.msk.bf16.mxu0 %vm17454_vm0, %v17453_v1  ;;  %v3676_v16 = vshll.u32 %v19133_v11, 16 }
 0x4b1   : > { %v3593_v49 = vmax.f32 %v15950_v45, 0.0  ;;  %v3675_v28 = vrot.slane %v3673_v57, 7  ;;  %v3723_v60 = vrot.slane %v3676_v16, 1  ;;  %v3610_v39 = vmul.f32 %v19145_v30, %v3592_v19 }
 0x4b3   : > { %v3611_v53 = vmul.f32 %v19151_v50, %v3593_v49  ;;  %v3678_v2 = vor.u32 %v3676_v16, %v3675_v28  ;;  %v19155_v59 = vsel %vm951_vm5, %v3722_v38, %v3723_v60  ;;  %v3725_v35 = vor.u32 %v3723_v60, %v3673_v57 }
 0x4b4   : > { %v3553_v51 = vpop.f32.mrb[68].mxu1 }
 0x4b5   : > { %v19157_v47 = vpack.c.bf16 %v3611_v53, %v3610_v39  ;;  %v15951_v29 = vadd.f32 %v18946_v36, %v3553_v51  ;;  %v14399_v31 = vpop.f32.mrb[69].mxu1  ;;  %v3679_v62 = vsel %vm875_vm1, %v3667_v9, %v3678_v2  ;;  %v19169_v9 = vld [vmem:[%s21786_s20 + $0x80] sm:$0xff]  ;;  %v17170_v51 = vld [vmem:[%s21843_s28 + $0x208] sm:$0xff]  }
 0x4b6   : > { %v3556_v20 = vpop.f32.mrb[70].mxu1  ;;  %14442 = vmatmul.mubr.bf16.gmra.mrb[96].mxu0 %v3679_v62  ;;  %v17172_v31 = vld [vmem:[%s21843_s28 + $0x218] sm:$0xff]   ;;  %v17178_v62 = vld [vmem:[%s21843_s28 + $0x248] sm:$0xff]  }
 0x4b7   : > { %v3681_v13 = vshrl.u32 %v19157_v47, 16  ;;  %v3594_v41 = vmax.f32 %v15951_v29, 0.0  ;;  %v15952_v37 = vadd.f32 %v18946_v36, %v3556_v20  ;;  %v14400_v22 = vpop.f32.mrb[71].mxu1  ;;  %14445 = vmatprep.mubr.msk.bf16.mxu0 %vm17454_vm0, %v17453_v1  ;;  %v3684_v32 = vshll.u32 %v19157_v47, 16  ;;  %v19175_v36 = vld [vmem:[%s21786_s20 + $0x88] sm:$0xff]  ;;  %v17171_v29 = vld [vmem:[%s21843_s28 + $0x210] sm:$0xff]  }
 0x4b8   : > { %v17179_v20 = vld [vmem:[%s21843_s28 + $0x250] sm:$0xff]   ;;  %v17176_v22 = vld [vmem:[%s21843_s28 + $0x238] sm:$0xff]  }
 0x4b9   : > { %v3595_v46 = vmax.f32 %v15952_v37, 0.0  ;;  %v3683_v38 = vrot.slane %v3681_v13, 7  ;;  %v3726_v24 = vrot.slane %v3684_v32, 1  ;;  %v3612_v58 = vmul.f32 %v19169_v9, %v3594_v41  ;;  %v17180_v41 = vld [vmem:[%s21843_s28 + $0x258] sm:$0xff]   ;;  %v17181_v37 = vld [vmem:[%s21843_s28 + $0x260] sm:$0xff]  }
 0x4bb   : > { %v3613_v12 = vmul.f32 %v19175_v36, %v3595_v46  ;;  %v3686_v5 = vor.u32 %v3684_v32, %v3683_v38  ;;  %v19179_v43 = vsel %vm951_vm5, %v3725_v35, %v3726_v24  ;;  %v3728_v57 = vor.u32 %v3726_v24, %v3681_v13  ;;  %v17174_v13 = vld [vmem:[%s21843_s28 + $0x228] sm:$0xff]  }
 0x4bc   : > { %v17182_v32 = vld [vmem:[%s21843_s28 + $0x268] sm:$0xff]  }
 0x4bd   : > { %v19181_v19 = vpack.c.bf16 %v3613_v12, %v3612_v58  ;;  %v3687_v45 = vsel %vm875_vm1, %v3675_v28, %v3686_v5  ;;  %v17169_v28 = vld [vmem:[%s21843_s28 + $0x200] sm:$0xff]  }
 0x4be   : > { %14446 = vmatmul.mubr.bf16.gmra.mrb[100].mxu0 %v3687_v45 }
 0x4bf   : > { %v3689_v33 = vshrl.u32 %v19181_v19, 16  ;;  %14449 = vmatprep.mubr.msk.bf16.mxu0 %vm17454_vm0, %v17453_v1  ;;  %v3692_v16 = vshll.u32 %v19181_v19, 16 }
 0x4c1   : > { %v3691_v49 = vrot.slane %v3689_v33, 7  ;;  %v3729_v60 = vrot.slane %v3692_v16, 1 }
 0x4c3   : > { %v3694_v39 = vor.u32 %v3692_v16, %v3691_v49  ;;  %v19189_v53 = vsel %vm951_vm5, %v3728_v57, %v3729_v60  ;;  %v19191_v2 = vor.u32 %v3729_v60, %v3689_v33 }
 0x4c5   : > { %v3695_v35 = vsel %vm875_vm1, %v3683_v38, %v3694_v39 }
 0x4c6   : > { %14450 = vmatmul.mubr.bf16.gmra.mrb[104].mxu0 %v3695_v35  ;;  %v17185_v35 = vld [vmem:[%s21843_s28 + $0x280] sm:$0xff]  }
 0x4c7   : > { %14469 = vmatprep.mubr.msk.bf16.mxu0 %vm17454_vm0, %v17453_v1 }
 0x4ce   : > { %14470 = vmatmul.mubr.bf16.vlgmr.msra.gmra.mrb[72].mxu0 %v18962_v55  ;;  %v17177_v55 = vld [vmem:[%s21843_s28 + $0x240] sm:$0xff]  }
 0x4cf   : > { %14506 = vmatpush3.bf16.msra.mxu0 %v17169_v28  ;;  %14473 = vmatprep.mubr.msk.bf16.mxu0 %vm17454_vm0, %v17453_v1 }
 0x4d0   : > { %14507 = vmatprep.subr.bf16.mxu0 %v17453_v1  ;;  %14558 = vmatpush3.bf16.msra.mxu1 %v17177_v55 }
 0x4d1   : > { %14559 = vmatprep.subr.bf16.mxu1 %v17453_v1 }
 0x4d3   : > { %14508 = vmatpush3.bf16.msra.mxu0 %v17170_v51 }
 0x4d4   : > { %14509 = vmatprep.subr.bf16.mxu0 %v17453_v1  ;;  %14560 = vmatpush3.bf16.msra.mxu1 %v17178_v62 }
 0x4d5   : > { %14561 = vmatprep.subr.bf16.mxu1 %v17453_v1 }
 0x4d6   : > { %14474 = vmatmul.mubr.bf16.gmra.mrb[76].mxu0 %v18983_v61  ;;  %v17173_v61 = vld [vmem:[%s21843_s28 + $0x220] sm:$0xff]  }
 0x4d7   : > { %14477 = vmatprep.mubr.msk.bf16.mxu0 %vm17454_vm0, %v17453_v1  ;;  %14510 = vmatpush3.bf16.msra.mxu0 %v17171_v29 }
 0x4d8   : > { %14511 = vmatprep.subr.bf16.mxu0 %v17453_v1  ;;  %14562 = vmatpush3.bf16.msra.mxu1 %v17179_v20 }
 0x4d9   : > { %14563 = vmatprep.subr.bf16.mxu1 %v17453_v1 }
 0x4db   : > { %14512 = vmatpush3.bf16.msra.mxu0 %v17172_v31 }
 0x4dc   : > { %14513 = vmatprep.subr.bf16.mxu0 %v17453_v1  ;;  %14564 = vmatpush3.bf16.msra.mxu1 %v17180_v41 }
 0x4dd   : > { %14565 = vmatprep.subr.bf16.mxu1 %v17453_v1 }
 0x4de   : > { %14478 = vmatmul.mubr.bf16.gmra.mrb[80].mxu0 %v19016_v42  ;;  %v17175_v42 = vld [vmem:[%s21843_s28 + $0x230] sm:$0xff]  }
 0x4df   : > { %14481 = vmatprep.mubr.msk.bf16.mxu0 %vm17454_vm0, %v17453_v1  ;;  %14514 = vmatpush3.bf16.msra.mxu0 %v17173_v61 }
 0x4e0   : > { %14515 = vmatprep.subr.bf16.mxu0 %v17453_v1  ;;  %14566 = vmatpush3.bf16.msra.mxu1 %v17181_v37 }
 0x4e1   : > { %14567 = vmatprep.subr.bf16.mxu1 %v17453_v1 }
 0x4e3   : > { %14516 = vmatpush3.bf16.msra.mxu0 %v17174_v13 }
 0x4e4   : > { %14517 = vmatprep.subr.bf16.mxu0 %v17453_v1  ;;  %14568 = vmatpush3.bf16.msra.mxu1 %v17182_v32 }
 0x4e5   : > { %14569 = vmatprep.subr.bf16.mxu1 %v17453_v1 }
 0x4e6   : > { %14482 = vmatmul.mubr.bf16.gmra.mrb[84].mxu0 %v19048_v52  ;;  %v17184_v52 = vld [vmem:[%s21843_s28 + $0x278] sm:$0xff]  }
 0x4e7   : > { %14485 = vmatprep.mubr.msk.bf16.mxu0 %vm17454_vm0, %v17453_v1  ;;  %14518 = vmatpush3.bf16.msra.mxu0 %v17175_v42  ;;  %v17186_v42 = vld [vmem:[%s21843_s28 + $0x288] sm:$0xff]  }
 0x4e8   : > { %14519 = vmatprep.subr.bf16.mxu0 %v17453_v1 }
 0x4eb   : > { %14520 = vmatpush3.bf16.msra.mxu0 %v17176_v22 }
 0x4ec   : > { %14713 = vmatprep.subr.bf16.mxu0 %v17453_v1 }
 0x4ee   : > { %14486 = vmatmul.mubr.bf16.gmra.mrb[88].mxu0 %v19080_v25 }
 0x4ef   : > { %14489 = vmatprep.mubr.msk.bf16.mxu0 %vm17454_vm0, %v17453_v1 }
 0x4f6   : > { %14490 = vmatmul.mubr.bf16.gmra.mrb[92].mxu0 %v19109_v7 }
 0x4f7   : > { %14493 = vmatprep.mubr.msk.bf16.mxu0 %vm17454_vm0, %v17453_v1 }
 0x4fe   : > { %14494 = vmatmul.mubr.bf16.gmra.mrb[96].mxu0 %v19133_v11 }
 0x4ff   : > { %14497 = vmatprep.mubr.msk.bf16.mxu0 %vm17454_vm0, %v17453_v1 }
 0x506   : > { %14498 = vmatmul.mubr.bf16.gmra.mrb[100].mxu0 %v19157_v47 }
 0x507   : > { %14501 = vmatprep.mubr.msk.bf16.mxu0 %vm17454_vm0, %v17453_v1 }
 0x50e   : > { %14502 = vmatmul.mubr.bf16.gmra.mrb[104].mxu0 %v19181_v19 }
 0x50f   : > { %14521 = vmatprep.mubr.msk.bf16.mxu0 %vm17454_vm0, %v17453_v1 }
 0x516   : > { %14522 = vmatmul.mubr.bf16.vlgmr.msra.gmra.mrb[72].mxu0 %v19013_v56  ;;  %v3741_v56 = vsel %vm18070_vm7, %v19191_v2, 0 }
 0x517   : > { %14525 = vmatprep.mubr.msk.bf16.mxu0 %vm17454_vm0, %v17453_v1 }
 0x51e   : > { %14526 = vmatmul.mubr.bf16.gmra.mrb[76].mxu0 %v19045_v15  ;;  %v17183_v15 = vld [vmem:[%s21843_s28 + $0x270] sm:$0xff]  }
 0x51f   : > { %14529 = vmatprep.mubr.msk.bf16.mxu0 %vm17454_vm0, %v17453_v1  ;;  %14570 = vmatpush3.bf16.msra.mxu1 %v17183_v15 }
 0x520   : > { %14571 = vmatprep.subr.bf16.mxu1 %v17453_v1 }
 0x523   : > { %14572 = vmatpush3.bf16.msra.mxu1 %v17184_v52 }
 0x524   : > { %14609 = vmatprep.subr.bf16.mxu1 %v17453_v1 }
 0x526   : > { %14530 = vmatmul.mubr.bf16.gmra.mrb[80].mxu0 %v19077_v6  ;;  %v19319_v6 = vld [vmem:[%s21846_s10 + $0x2] ss:$0 sm:$0xff] }
 0x527   : > { %14533 = vmatprep.mubr.msk.bf16.mxu0 %vm17454_vm0, %v17453_v1 }
 0x52e   : > { %14534 = vmatmul.mubr.bf16.gmra.mrb[84].mxu0 %v19106_v44 }
 0x52f   : > { %14537 = vmatprep.mubr.msk.bf16.mxu0 %vm17454_vm0, %v17453_v1 }
 0x536   : > { %14538 = vmatmul.mubr.bf16.gmra.mrb[88].mxu0 %v19131_v23 }
 0x537   : > { %14541 = vmatprep.mubr.msk.bf16.mxu0 %vm17454_vm0, %v17453_v1 }
 0x53e   : > { %14542 = vmatmul.mubr.bf16.gmra.mrb[92].mxu0 %v19155_v59 }
 0x53f   : > { %14545 = vmatprep.mubr.msk.bf16.mxu0 %vm17454_vm0, %v17453_v1 }
 0x546   : > { %14546 = vmatmul.mubr.bf16.gmra.mrb[96].mxu0 %v19179_v43 }
 0x547   : > { %14549 = vmatprep.mubr.msk.bf16.mxu0 %vm17454_vm0, %v17453_v1 }
 0x54e   : > { %14550 = vmatmul.mubr.bf16.gmra.mrb[100].mxu0 %v19189_v53 }
 0x54f   : > { %14553 = vmatprep.mubr.msk.bf16.mxu0 %vm17454_vm0, %v17453_v1 }
 0x556   : > { %14554 = vmatmul.mubr.bf16.gmra.mrb[104].mxu0 %v3741_v56 }
 0x557   : > { %14729 = vmatprep.mubr.msk.bf16.mxu0 %vm17454_vm0, %v17453_v1 }
 0x5e9   : > { %v4205_v25 = vpop.f32.mrb[72].mxu0 }
 0x5ea   : > { %v15953_v44 = vadd.f32 %v19319_v6, %v4205_v25  ;;  %v14523_v7 = vpop.f32.mrb[73].mxu0  ;;  %v17187_v25 = vld [vmem:[%s21843_s28 + $0x290] sm:$0xff]  }
 0x5eb   : > { %v4208_v23 = vpop.f32.mrb[74].mxu0 }
 0x5ec   : > { %v4294_v11 = vmax.f32 %v15953_v44, 0.0  ;;  %v15954_v59 = vadd.f32 %v19319_v6, %v4208_v23  ;;  %v14524_v47 = vpop.f32.mrb[75].mxu0 }
 0x5ee   : > { %v4295_v46 = vmax.f32 %v15954_v59, 0.0  ;;  %v4312_v38 = vmul.f32 %v18953_v8, %v4294_v11 }
 0x5f0   : > { %v4313_v24 = vmul.f32 %v18959_v10, %v4295_v46 }
 0x5f1   : > { %v4213_v58 = vpop.f32.mrb[76].mxu0 }
 0x5f2   : > { %v19325_v12 = vpack.c.bf16 %v4313_v24, %v4312_v38  ;;  %v15955_v5 = vadd.f32 %v19319_v6, %v4213_v58  ;;  %v14527_v43 = vpop.f32.mrb[77].mxu0 }
 0x5f3   : > { %v4216_v57 = vpop.f32.mrb[78].mxu0  ;;  %v17188_v43 = vld [vmem:[%s21843_s28 + $0x298] sm:$0xff]  }
 0x5f4   : > { %v4342_v19 = vshrl.u32 %v19325_v12, 16  ;;  %v4345_v45 = vshll.u32 %v19325_v12, 16  ;;  %v4296_v33 = vmax.f32 %v15955_v5, 0.0  ;;  %v15956_v16 = vadd.f32 %v19319_v6, %v4216_v57  ;;  %v14528_v49 = vpop.f32.mrb[79].mxu0 }
 0x5f6   : > { %v4422_v60 = vrot.slane %v4345_v45, 1  ;;  %v4297_v39 = vmax.f32 %v15956_v16, 0.0  ;;  %v4344_v8 = vrot.slane %v4342_v19, 7  ;;  %v4314_v10 = vmul.f32 %v18971_v21, %v4296_v33 }
 0x5f8   : > { %v4315_v53 = vmul.f32 %v18977_v18, %v4297_v39  ;;  %v4347_v2 = vor.u32 %v4345_v45, %v4344_v8  ;;  %v4423_v28 = vor.u32 %v4422_v60, %v4342_v19  ;;  %v17189_v60 = vld [vmem:[%s21843_s28 + $0x2a0] sm:$0xff]  }
 0x5f9   : > { %v4221_v51 = vpop.f32.mrb[80].mxu0 }
 0x5fa   : > { %v19336_v29 = vpack.c.bf16 %v4315_v53, %v4314_v10  ;;  %v15957_v55 = vadd.f32 %v19319_v6, %v4221_v51  ;;  %v14531_v31 = vpop.f32.mrb[81].mxu0  ;;  %v4421_v62 = vsel %vm17646_vm4, 0, %v4347_v2 }
 0x5fb   : > { %v4224_v61 = vpop.f32.mrb[82].mxu0  ;;  %14574 = vmatmul.mubr.bf16.vlgmr.msra.gmra.mrb[72].mxu1 %v4421_v62 }
 0x5fc   : > { %v4349_v21 = vshrl.u32 %v19336_v29, 16  ;;  %v4298_v18 = vmax.f32 %v15957_v55, 0.0  ;;  %v15958_v20 = vadd.f32 %v19319_v6, %v4224_v61  ;;  %v14532_v13 = vpop.f32.mrb[83].mxu0  ;;  %14610 = vmatpush3.bf16.msra.mxu1 %v17185_v35  ;;  %14577 = vmatprep.mubr.msk.bf16.mxu1 %vm17454_vm0, %v17453_v1  ;;  %v4352_v41 = vshll.u32 %v19336_v29, 16  ;;  %v17190_v61 = vld [vmem:[%s21843_s28 + $0x2a8] sm:$0xff]  }
 0x5fd   : > { %14611 = vmatprep.subr.bf16.mxu1 %v17453_v1 }
 0x5fe   : > { %v4299_v37 = vmax.f32 %v15958_v20, 0.0  ;;  %v4351_v22 = vrot.slane %v4349_v21, 7  ;;  %v4424_v32 = vrot.slane %v4352_v41, 1  ;;  %v4316_v56 = vmul.f32 %v19000_v3, %v4298_v18 }
 0x600   : > { %v4317_v15 = vmul.f32 %v19006_v34, %v4299_v37  ;;  %v4354_v52 = vor.u32 %v4352_v41, %v4351_v22  ;;  %14612 = vmatpush3.bf16.msra.mxu1 %v17186_v42  ;;  %v19356_v44 = vsel %vm951_vm5, %v4423_v28, %v4424_v32  ;;  %v4426_v7 = vor.u32 %v4424_v32, %v4349_v21  ;;  %v17191_v37 = vld [vmem:[%s21843_s28 + $0x2b0] sm:$0xff]  }
 0x601   : > { %v4229_v23 = vpop.f32.mrb[84].mxu0  ;;  %14613 = vmatprep.subr.bf16.mxu1 %v17453_v1 }
 0x602   : > { %v19359_v11 = vpack.c.bf16 %v4317_v15, %v4316_v56  ;;  %v15959_v59 = vadd.f32 %v19319_v6, %v4229_v23  ;;  %v14535_v3 = vpop.f32.mrb[85].mxu0  ;;  %v4355_v34 = vsel %vm875_vm1, %v4344_v8, %v4354_v52 }
 0x603   : > { %v4232_v47 = vpop.f32.mrb[86].mxu0  ;;  %14578 = vmatmul.mubr.bf16.gmra.mrb[76].mxu1 %v4355_v34 }
 0x604   : > { %v4357_v46 = vshrl.u32 %v19359_v11, 16  ;;  %v4300_v38 = vmax.f32 %v15959_v59, 0.0  ;;  %v15960_v24 = vadd.f32 %v19319_v6, %v4232_v47  ;;  %v14536_v58 = vpop.f32.mrb[87].mxu0  ;;  %14581 = vmatprep.mubr.msk.bf16.mxu1 %vm17454_vm0, %v17453_v1  ;;  %v4360_v5 = vshll.u32 %v19359_v11, 16  ;;  %14614 = vmatpush3.bf16.msra.mxu1 %v17187_v25  ;;  %v17192_v47 = vld [vmem:[%s21843_s28 + $0x2b8] sm:$0xff]  }
 0x605   : > { %14615 = vmatprep.subr.bf16.mxu1 %v17453_v1 }
 0x606   : > { %v4301_v57 = vmax.f32 %v15960_v24, 0.0  ;;  %v4359_v19 = vrot.slane %v4357_v46, 7  ;;  %v4427_v45 = vrot.slane %v4360_v5, 1  ;;  %v4318_v33 = vmul.f32 %v19032_v48, %v4300_v38 }
 0x608   : > { %v4319_v16 = vmul.f32 %v19038_v40, %v4301_v57  ;;  %v4362_v49 = vor.u32 %v4360_v5, %v4359_v19  ;;  %14616 = vmatpush3.bf16.msra.mxu1 %v17188_v43  ;;  %v19378_v39 = vsel %vm951_vm5, %v4426_v7, %v4427_v45  ;;  %v4429_v8 = vor.u32 %v4427_v45, %v4357_v46 }
 0x609   : > { %v4237_v10 = vpop.f32.mrb[88].mxu0  ;;  %14617 = vmatprep.subr.bf16.mxu1 %v17453_v1 }
 0x60a   : > { %v19381_v53 = vpack.c.bf16 %v4319_v16, %v4318_v33  ;;  %v15961_v2 = vadd.f32 %v19319_v6, %v4237_v10  ;;  %v14539_v48 = vpop.f32.mrb[89].mxu0  ;;  %v4363_v40 = vsel %vm875_vm1, %v4351_v22, %v4362_v49 }
 0x60b   : > { %v4240_v35 = vpop.f32.mrb[90].mxu0  ;;  %14582 = vmatmul.mubr.bf16.gmra.mrb[80].mxu1 %v4363_v40 }
 0x60c   : > { %v4365_v28 = vshrl.u32 %v19381_v53, 16  ;;  %v4302_v51 = vmax.f32 %v15961_v2, 0.0  ;;  %v15962_v55 = vadd.f32 %v19319_v6, %v4240_v35  ;;  %v14540_v31 = vpop.f32.mrb[91].mxu0  ;;  %14585 = vmatprep.mubr.msk.bf16.mxu1 %vm17454_vm0, %v17453_v1  ;;  %v4368_v62 = vshll.u32 %v19381_v53, 16  ;;  %14618 = vmatpush3.bf16.msra.mxu1 %v17189_v60 }
 0x60d   : > { %14619 = vmatprep.subr.bf16.mxu1 %v17453_v1 }
 0x60e   : > { %v4303_v21 = vmax.f32 %v15962_v55, 0.0  ;;  %v4367_v18 = vrot.slane %v4365_v28, 7  ;;  %v4430_v20 = vrot.slane %v4368_v62, 1  ;;  %v4320_v13 = vmul.f32 %v19064_v0, %v4302_v51 }
 0x610   : > { %v4321_v41 = vmul.f32 %v19070_v54, %v4303_v21  ;;  %v4370_v42 = vor.u32 %v4368_v62, %v4367_v18  ;;  %14620 = vmatpush3.bf16.msra.mxu1 %v17190_v61  ;;  %v19400_v22 = vsel %vm951_vm5, %v4429_v8, %v4430_v20  ;;  %v4432_v32 = vor.u32 %v4430_v20, %v4365_v28 }
 0x611   : > { %v4245_v56 = vpop.f32.mrb[92].mxu0  ;;  %14621 = vmatprep.subr.bf16.mxu1 %v17453_v1 }
 0x612   : > { %v19403_v15 = vpack.c.bf16 %v4321_v41, %v4320_v13  ;;  %v15963_v52 = vadd.f32 %v19319_v6, %v4245_v56  ;;  %v14543_v0 = vpop.f32.mrb[93].mxu0  ;;  %v4371_v54 = vsel %vm875_vm1, %v4359_v19, %v4370_v42 }
 0x613   : > { %v4248_v25 = vpop.f32.mrb[94].mxu0  ;;  %14586 = vmatmul.mubr.bf16.gmra.mrb[84].mxu1 %v4371_v54 }
 0x614   : > { %v4373_v7 = vshrl.u32 %v19403_v15, 16  ;;  %v4304_v23 = vmax.f32 %v15963_v52, 0.0  ;;  %v15964_v59 = vadd.f32 %v19319_v6, %v4248_v25  ;;  %v14544_v3 = vpop.f32.mrb[95].mxu0  ;;  %14589 = vmatprep.mubr.msk.bf16.mxu1 %vm17454_vm0, %v17453_v1  ;;  %v4376_v34 = vshll.u32 %v19403_v15, 16  ;;  %14622 = vmatpush3.bf16.msra.mxu1 %v17191_v37 }
 0x615   : > { %14623 = vmatprep.subr.bf16.mxu1 %v17453_v1 }
 0x616   : > { %v4305_v46 = vmax.f32 %v15964_v59, 0.0  ;;  %v4375_v38 = vrot.slane %v4373_v7, 7  ;;  %v4433_v24 = vrot.slane %v4376_v34, 1  ;;  %v4322_v58 = vmul.f32 %v19096_v27, %v4304_v23 }
 0x618   : > { %v4323_v5 = vmul.f32 %v19102_v17, %v4305_v46  ;;  %v4378_v43 = vor.u32 %v4376_v34, %v4375_v38  ;;  %14624 = vmatpush3.bf16.msra.mxu1 %v17192_v47  ;;  %v19419_v57 = vsel %vm951_vm5, %v4432_v32, %v4433_v24  ;;  %v4435_v19 = vor.u32 %v4433_v24, %v4373_v7 }
 0x619   : > { %v4253_v45 = vpop.f32.mrb[96].mxu0  ;;  %14661 = vmatprep.subr.bf16.mxu1 %v17453_v1 }
 0x61a   : > { %v19422_v33 = vpack.c.bf16 %v4323_v5, %v4322_v58  ;;  %v15965_v16 = vadd.f32 %v19319_v6, %v4253_v45  ;;  %v14547_v49 = vpop.f32.mrb[97].mxu0  ;;  %v4379_v60 = vsel %vm875_vm1, %v4367_v18, %v4378_v43 }
 0x61b   : > { %v4256_v8 = vpop.f32.mrb[98].mxu0  ;;  %14590 = vmatmul.mubr.bf16.gmra.mrb[88].mxu1 %v4379_v60 }
 0x61c   : > { %v4381_v27 = vshrl.u32 %v19422_v33, 16  ;;  %v4306_v17 = vmax.f32 %v15965_v16, 0.0  ;;  %v15966_v10 = vadd.f32 %v19319_v6, %v4256_v8  ;;  %v14548_v2 = vpop.f32.mrb[99].mxu0  ;;  %14593 = vmatprep.mubr.msk.bf16.mxu1 %vm17454_vm0, %v17453_v1  ;;  %v4384_v48 = vshll.u32 %v19422_v33, 16 }
 0x61e   : > { %v4307_v40 = vmax.f32 %v15966_v10, 0.0  ;;  %v4383_v35 = vrot.slane %v4381_v27, 7  ;;  %v4436_v28 = vrot.slane %v4384_v48, 1  ;;  %v4324_v51 = vmul.f32 %v19121_v63, %v4306_v17 }
 0x620   : > { %v4325_v55 = vmul.f32 %v19127_v26, %v4307_v40  ;;  %v4386_v31 = vor.u32 %v4384_v48, %v4383_v35  ;;  %v19434_v62 = vsel %vm951_vm5, %v4435_v19, %v4436_v28  ;;  %v4438_v61 = vor.u32 %v4436_v28, %v4381_v27 }
 0x621   : > { %v4261_v21 = vpop.f32.mrb[100].mxu0 }
 0x622   : > { %v19436_v18 = vpack.c.bf16 %v4325_v55, %v4324_v51  ;;  %v15967_v20 = vadd.f32 %v19319_v6, %v4261_v21  ;;  %v14551_v13 = vpop.f32.mrb[101].mxu0  ;;  %v4387_v41 = vsel %vm875_vm1, %v4375_v38, %v4386_v31  ;;  %v17193_v31 = vld [vmem:[%s21843_s28 + $0x2c0] sm:$0xff]   ;;  %v17195_v21 = vld [vmem:[%s21843_s28 + $0x2d0] sm:$0xff]  }
 0x623   : > { %v4264_v42 = vpop.f32.mrb[102].mxu0  ;;  %14594 = vmatmul.mubr.bf16.gmra.mrb[92].mxu1 %v4387_v41  ;;  %v17202_v13 = vld [vmem:[%s21843_s28 + $0x308] sm:$0xff]   ;;  %v17203_v41 = vld [vmem:[%s21843_s28 + $0x310] sm:$0xff]  }
 0x624   : > { %v4389_v37 = vshrl.u32 %v19436_v18, 16  ;;  %v4308_v63 = vmax.f32 %v15967_v20, 0.0  ;;  %v15968_v26 = vadd.f32 %v19319_v6, %v4264_v42  ;;  %v14552_v32 = vpop.f32.mrb[103].mxu0  ;;  %14597 = vmatprep.mubr.msk.bf16.mxu1 %vm17454_vm0, %v17453_v1  ;;  %v4392_v56 = vshll.u32 %v19436_v18, 16  ;;  %v17196_v20 = vld [vmem:[%s21843_s28 + $0x2d8] sm:$0xff]   ;;  %v17198_v42 = vld [vmem:[%s21843_s28 + $0x2e8] sm:$0xff]  }
 0x625   : > { %v17206_v32 = vld [vmem:[%s21843_s28 + $0x328] sm:$0xff]  }
 0x626   : > { %v4309_v52 = vmax.f32 %v15968_v26, 0.0  ;;  %v4391_v0 = vrot.slane %v4389_v37, 7  ;;  %v4439_v54 = vrot.slane %v4392_v56, 1  ;;  %v4326_v25 = vmul.f32 %v19145_v30, %v4308_v63  ;;  %v17205_v63 = vld [vmem:[%s21843_s28 + $0x320] sm:$0xff]   ;;  %v17200_v26 = vld [vmem:[%s21843_s28 + $0x2f8] sm:$0xff]  }
 0x628   : > { %v4327_v7 = vmul.f32 %v19151_v50, %v4309_v52  ;;  %v4394_v23 = vor.u32 %v4392_v56, %v4391_v0  ;;  %v19448_v59 = vsel %vm951_vm5, %v4438_v61, %v4439_v54  ;;  %v4441_v3 = vor.u32 %v4439_v54, %v4389_v37  ;;  %v17194_v61 = vld [vmem:[%s21843_s28 + $0x2c8] sm:$0xff]   ;;  %v17204_v37 = vld [vmem:[%s21843_s28 + $0x318] sm:$0xff]   ;;  %v19609_v54 = vld [vmem:[%s21786_s20] sm:$0xff] }
 0x629   : > { %v4269_v34 = vpop.f32.mrb[104].mxu0 }
 0x62a   : > { %v19450_v47 = vpack.c.bf16 %v4327_v7, %v4326_v25  ;;  %v15969_v46 = vadd.f32 %v19319_v6, %v4269_v34  ;;  %v14555_v38 = vpop.f32.mrb[105].mxu0  ;;  %v4395_v24 = vsel %vm875_vm1, %v4383_v35, %v4394_v23  ;;  %v19615_v7 = vld [vmem:[%s21786_s20 + $0x8] sm:$0xff] }
 0x62b   : > { %v4272_v58 = vpop.f32.mrb[106].mxu0  ;;  %14598 = vmatmul.mubr.bf16.gmra.mrb[96].mxu1 %v4395_v24 }
 0x62c   : > { %v4397_v5 = vshrl.u32 %v19450_v47, 16  ;;  %v4310_v30 = vmax.f32 %v15969_v46, 0.0  ;;  %v15970_v50 = vadd.f32 %v19319_v6, %v4272_v58  ;;  %v14556_v43 = vpop.f32.mrb[107].mxu0  ;;  %14601 = vmatprep.mubr.msk.bf16.mxu1 %vm17454_vm0, %v17453_v1  ;;  %v4400_v19 = vshll.u32 %v19450_v47, 16 }
 0x62e   : > { %v4311_v45 = vmax.f32 %v15970_v50, 0.0  ;;  %v4399_v16 = vrot.slane %v4397_v5, 7  ;;  %v4442_v49 = vrot.slane %v4400_v19, 1  ;;  %v4328_v60 = vmul.f32 %v19169_v9, %v4310_v30 }
 0x630   : > { %v4329_v8 = vmul.f32 %v19175_v36, %v4311_v45  ;;  %v4402_v27 = vor.u32 %v4400_v19, %v4399_v16  ;;  %v19462_v17 = vsel %vm951_vm5, %v4441_v3, %v4442_v49  ;;  %v4444_v10 = vor.u32 %v4442_v49, %v4397_v5  ;;  %v19627_v45 = vld [vmem:[%s21786_s20 + $0x10] sm:$0xff]  ;;  %v19633_v49 = vld [vmem:[%s21786_s20 + $0x18] sm:$0xff] }
 0x632   : > { %v19464_v2 = vpack.c.bf16 %v4329_v8, %v4328_v60  ;;  %v4403_v6 = vsel %vm875_vm1, %v4391_v0, %v4402_v27  ;;  %v17209_v27 = vld [vmem:[%s21843_s28 + $0x340] sm:$0xff]  }
 0x633   : > { %14602 = vmatmul.mubr.bf16.gmra.mrb[100].mxu1 %v4403_v6 }
 0x634   : > { %v4405_v48 = vshrl.u32 %v19464_v2, 16  ;;  %14605 = vmatprep.mubr.msk.bf16.mxu1 %vm17454_vm0, %v17453_v1  ;;  %v4408_v40 = vshll.u32 %v19464_v2, 16 }
 0x636   : > { %v4407_v9 = vrot.slane %v4405_v48, 7  ;;  %v4445_v35 = vrot.slane %v4408_v40, 1 }
 0x638   : > { %v4410_v36 = vor.u32 %v4408_v40, %v4407_v9  ;;  %v19472_v28 = vsel %vm951_vm5, %v4444_v10, %v4445_v35  ;;  %v19474_v51 = vor.u32 %v4445_v35, %v4405_v48 }
 0x63a   : > { %v4411_v55 = vsel %vm875_vm1, %v4399_v16, %v4410_v36 }
 0x63b   : > { %14606 = vmatmul.mubr.bf16.gmra.mrb[104].mxu1 %v4411_v55 }
 0x63c   : > { %14625 = vmatprep.mubr.msk.bf16.mxu1 %vm17454_vm0, %v17453_v1 }
 0x643   : > { %14626 = vmatmul.mubr.bf16.vlgmr.msra.gmra.mrb[72].mxu1 %v19325_v12  ;;  %v17201_v12 = vld [vmem:[%s21843_s28 + $0x300] sm:$0xff]  }
 0x644   : > { %14662 = vmatpush3.bf16.msra.mxu1 %v17193_v31  ;;  %14629 = vmatprep.mubr.msk.bf16.mxu1 %vm17454_vm0, %v17453_v1  ;;  %v17210_v31 = vld [vmem:[%s21843_s28 + $0x348] sm:$0xff]  }
 0x645   : > { %14663 = vmatprep.subr.bf16.mxu1 %v17453_v1  ;;  %14714 = vmatpush3.bf16.msra.mxu0 %v17201_v12 }
 0x646   : > { %14715 = vmatprep.subr.bf16.mxu0 %v17453_v1 }
 0x648   : > { %14664 = vmatpush3.bf16.msra.mxu1 %v17194_v61 }
 0x649   : > { %14665 = vmatprep.subr.bf16.mxu1 %v17453_v1  ;;  %14716 = vmatpush3.bf16.msra.mxu0 %v17202_v13 }
 0x64a   : > { %14717 = vmatprep.subr.bf16.mxu0 %v17453_v1 }
 0x64b   : > { %14630 = vmatmul.mubr.bf16.gmra.mrb[76].mxu1 %v19336_v29  ;;  %v17197_v29 = vld [vmem:[%s21843_s28 + $0x2e0] sm:$0xff]  }
 0x64c   : > { %14633 = vmatprep.mubr.msk.bf16.mxu1 %vm17454_vm0, %v17453_v1  ;;  %14666 = vmatpush3.bf16.msra.mxu1 %v17195_v21 }
 0x64d   : > { %14667 = vmatprep.subr.bf16.mxu1 %v17453_v1  ;;  %14718 = vmatpush3.bf16.msra.mxu0 %v17203_v41 }
 0x64e   : > { %14719 = vmatprep.subr.bf16.mxu0 %v17453_v1 }
 0x650   : > { %14668 = vmatpush3.bf16.msra.mxu1 %v17196_v20  ;;  %v19656_v20 = vld [vmem:[%s21786_s20 + $0x20] sm:$0xff] }
 0x651   : > { %14669 = vmatprep.subr.bf16.mxu1 %v17453_v1  ;;  %14720 = vmatpush3.bf16.msra.mxu0 %v17204_v37  ;;  %v17211_v37 = vld [vmem:[%s21843_s28 + $0x350] sm:$0xff]  }
 0x652   : > { %14721 = vmatprep.subr.bf16.mxu0 %v17453_v1 }
 0x653   : > { %14634 = vmatmul.mubr.bf16.gmra.mrb[80].mxu1 %v19359_v11  ;;  %v17199_v11 = vld [vmem:[%s21843_s28 + $0x2f0] sm:$0xff]  }
 0x654   : > { %14637 = vmatprep.mubr.msk.bf16.mxu1 %vm17454_vm0, %v17453_v1  ;;  %14670 = vmatpush3.bf16.msra.mxu1 %v17197_v29  ;;  %v19662_v29 = vld [vmem:[%s21786_s20 + $0x28] sm:$0xff] }
 0x655   : > { %14671 = vmatprep.subr.bf16.mxu1 %v17453_v1  ;;  %14722 = vmatpush3.bf16.msra.mxu0 %v17205_v63 }
 0x656   : > { %14723 = vmatprep.subr.bf16.mxu0 %v17453_v1 }
 0x658   : > { %14672 = vmatpush3.bf16.msra.mxu1 %v17198_v42 }
 0x659   : > { %14673 = vmatprep.subr.bf16.mxu1 %v17453_v1  ;;  %14724 = vmatpush3.bf16.msra.mxu0 %v17206_v32 }
 0x65a   : > { %14725 = vmatprep.subr.bf16.mxu0 %v17453_v1 }
 0x65b   : > { %14638 = vmatmul.mubr.bf16.gmra.mrb[84].mxu1 %v19381_v53  ;;  %v17208_v53 = vld [vmem:[%s21843_s28 + $0x338] sm:$0xff]  }
 0x65c   : > { %14641 = vmatprep.mubr.msk.bf16.mxu1 %vm17454_vm0, %v17453_v1  ;;  %14674 = vmatpush3.bf16.msra.mxu1 %v17199_v11 }
 0x65d   : > { %14675 = vmatprep.subr.bf16.mxu1 %v17453_v1 }
 0x660   : > { %14676 = vmatpush3.bf16.msra.mxu1 %v17200_v26 }
 0x661   : > { %14869 = vmatprep.subr.bf16.mxu1 %v17453_v1 }
 0x663   : > { %14642 = vmatmul.mubr.bf16.gmra.mrb[88].mxu1 %v19403_v15 }
 0x664   : > { %14645 = vmatprep.mubr.msk.bf16.mxu1 %vm17454_vm0, %v17453_v1 }
 0x66b   : > { %14646 = vmatmul.mubr.bf16.gmra.mrb[92].mxu1 %v19422_v33 }
 0x66c   : > { %14649 = vmatprep.mubr.msk.bf16.mxu1 %vm17454_vm0, %v17453_v1 }
 0x673   : > { %14650 = vmatmul.mubr.bf16.gmra.mrb[96].mxu1 %v19436_v18 }
 0x674   : > { %14653 = vmatprep.mubr.msk.bf16.mxu1 %vm17454_vm0, %v17453_v1 }
 0x67b   : > { %14654 = vmatmul.mubr.bf16.gmra.mrb[100].mxu1 %v19450_v47 }
 0x67c   : > { %14657 = vmatprep.mubr.msk.bf16.mxu1 %vm17454_vm0, %v17453_v1 }
 0x683   : > { %14658 = vmatmul.mubr.bf16.gmra.mrb[104].mxu1 %v19464_v2 }
 0x684   : > { %14677 = vmatprep.mubr.msk.bf16.mxu1 %vm17454_vm0, %v17453_v1 }
 0x68b   : > { %14678 = vmatmul.mubr.bf16.vlgmr.msra.gmra.mrb[72].mxu1 %v19356_v44  ;;  %v4457_v44 = vsel %vm18070_vm7, %v19474_v51, 0 }
 0x68c   : > { %14681 = vmatprep.mubr.msk.bf16.mxu1 %vm17454_vm0, %v17453_v1 }
 0x693   : > { %14682 = vmatmul.mubr.bf16.gmra.mrb[76].mxu1 %v19378_v39  ;;  %v17207_v39 = vld [vmem:[%s21843_s28 + $0x330] sm:$0xff]  }
 0x694   : > { %14685 = vmatprep.mubr.msk.bf16.mxu1 %vm17454_vm0, %v17453_v1  ;;  %14726 = vmatpush3.bf16.msra.mxu0 %v17207_v39 }
 0x695   : > { %14727 = vmatprep.subr.bf16.mxu0 %v17453_v1 }
 0x698   : > { %14728 = vmatpush3.bf16.msra.mxu0 %v17208_v53 }
 0x699   : > { %14765 = vmatprep.subr.bf16.mxu0 %v17453_v1 }
 0x69b   : > { %14686 = vmatmul.mubr.bf16.gmra.mrb[80].mxu1 %v19400_v22  ;;  %v19602_v22 = vld [vmem:[%s21846_s10 + $0x3] ss:$0 sm:$0xff] }
 0x69c   : > { %14689 = vmatprep.mubr.msk.bf16.mxu1 %vm17454_vm0, %v17453_v1 }
 0x6a3   : > { %14690 = vmatmul.mubr.bf16.gmra.mrb[84].mxu1 %v19419_v57 }
 0x6a4   : > { %14693 = vmatprep.mubr.msk.bf16.mxu1 %vm17454_vm0, %v17453_v1 }
 0x6ab   : > { %14694 = vmatmul.mubr.bf16.gmra.mrb[88].mxu1 %v19434_v62 }
 0x6ac   : > { %14697 = vmatprep.mubr.msk.bf16.mxu1 %vm17454_vm0, %v17453_v1 }
 0x6b3   : > { %14698 = vmatmul.mubr.bf16.gmra.mrb[92].mxu1 %v19448_v59 }
 0x6b4   : > { %14701 = vmatprep.mubr.msk.bf16.mxu1 %vm17454_vm0, %v17453_v1 }
 0x6bb   : > { %14702 = vmatmul.mubr.bf16.gmra.mrb[96].mxu1 %v19462_v17 }
 0x6bc   : > { %14705 = vmatprep.mubr.msk.bf16.mxu1 %vm17454_vm0, %v17453_v1 }
 0x6c3   : > { %14706 = vmatmul.mubr.bf16.gmra.mrb[100].mxu1 %v19472_v28 }
 0x6c4   : > { %14709 = vmatprep.mubr.msk.bf16.mxu1 %vm17454_vm0, %v17453_v1 }
 0x6cb   : > { %14710 = vmatmul.mubr.bf16.gmra.mrb[104].mxu1 %v4457_v44 }
 0x6cc   : > { %14885 = vmatprep.mubr.msk.bf16.mxu1 %vm17454_vm0, %v17453_v1 }
 0x75e   : > { %v4921_v15 = vpop.f32.mrb[72].mxu1 }
 0x75f   : > { %v15971_v57 = vadd.f32 %v19602_v22, %v4921_v15  ;;  %v14679_v33 = vpop.f32.mrb[73].mxu1 }
 0x760   : > { %v4924_v62 = vpop.f32.mrb[74].mxu1 }
 0x761   : > { %v5010_v18 = vmax.f32 %v15971_v57, 0.0  ;;  %v15972_v56 = vadd.f32 %v19602_v22, %v4924_v62  ;;  %v14680_v52 = vpop.f32.mrb[75].mxu1 }
 0x762   : > { %v17212_v52 = vld [vmem:[%s21843_s28 + $0x358] sm:$0xff]  }
 0x763   : > { %v5011_v0 = vmax.f32 %v15972_v56, 0.0  ;;  %v5028_v25 = vmul.f32 %v19609_v54, %v5010_v18 }
 0x765   : > { %v5029_v23 = vmul.f32 %v19615_v7, %v5011_v0 }
 0x766   : > { %v4929_v59 = vpop.f32.mrb[76].mxu1 }
 0x767   : > { %v19618_v3 = vpack.c.bf16 %v5029_v23, %v5028_v25  ;;  %v15973_v34 = vadd.f32 %v19602_v22, %v4929_v59  ;;  %v14683_v47 = vpop.f32.mrb[77].mxu1  ;;  %v19688_v59 = vld [vmem:[%s21786_s20 + $0x30] sm:$0xff] }
 0x768   : > { %v4932_v46 = vpop.f32.mrb[78].mxu1  ;;  %v19694_v47 = vld [vmem:[%s21786_s20 + $0x38] sm:$0xff] }
 0x769   : > { %v5058_v38 = vshrl.u32 %v19618_v3, 16  ;;  %v5061_v24 = vshll.u32 %v19618_v3, 16  ;;  %v5012_v58 = vmax.f32 %v15973_v34, 0.0  ;;  %v15974_v5 = vadd.f32 %v19602_v22, %v4932_v46  ;;  %v14684_v30 = vpop.f32.mrb[79].mxu1 }
 0x76b   : > { %v5138_v50 = vrot.slane %v5061_v24, 1  ;;  %v5013_v43 = vmax.f32 %v15974_v5, 0.0  ;;  %v5060_v19 = vrot.slane %v5058_v38, 7  ;;  %v5030_v16 = vmul.f32 %v19627_v45, %v5012_v58 }
 0x76d   : > { %v5031_v60 = vmul.f32 %v19633_v49, %v5013_v43  ;;  %v5063_v8 = vor.u32 %v5061_v24, %v5060_v19  ;;  %v5139_v17 = vor.u32 %v5138_v50, %v5058_v38  ;;  %v17213_v24 = vld [vmem:[%s21843_s28 + $0x360] sm:$0xff]  }
 0x76e   : > { %v4937_v10 = vpop.f32.mrb[80].mxu1 }
 0x76f   : > { %v19639_v2 = vpack.c.bf16 %v5031_v60, %v5030_v16  ;;  %v15975_v6 = vadd.f32 %v19602_v22, %v4937_v10  ;;  %v14687_v48 = vpop.f32.mrb[81].mxu1  ;;  %v5137_v40 = vsel %vm17646_vm4, 0, %v5063_v8 }
 0x770   : > { %v4940_v9 = vpop.f32.mrb[82].mxu1  ;;  %14730 = vmatmul.mubr.bf16.vlgmr.msra.gmra.mrb[108].mxu0 %v5137_v40  ;;  %v17214_v48 = vld [vmem:[%s21843_s28 + $0x368] sm:$0xff]  }
 0x771   : > { %v5065_v35 = vshrl.u32 %v19639_v2, 16  ;;  %v5014_v36 = vmax.f32 %v15975_v6, 0.0  ;;  %v15976_v28 = vadd.f32 %v19602_v22, %v4940_v9  ;;  %v14688_v51 = vpop.f32.mrb[83].mxu1  ;;  %14766 = vmatpush3.bf16.msra.mxu0 %v17209_v27  ;;  %14733 = vmatprep.mubr.msk.bf16.mxu0 %vm17454_vm0, %v17453_v1  ;;  %v5068_v55 = vshll.u32 %v19639_v2, 16 }
 0x772   : > { %14767 = vmatprep.subr.bf16.mxu0 %v17453_v1  ;;  %v19726_v51 = vld [vmem:[%s21786_s20 + $0x48] sm:$0xff] }
 0x773   : > { %v5015_v61 = vmax.f32 %v15976_v28, 0.0  ;;  %v5067_v21 = vrot.slane %v5065_v35, 7  ;;  %v5140_v12 = vrot.slane %v5068_v55, 1  ;;  %v5032_v13 = vmul.f32 %v19656_v20, %v5014_v36  ;;  %v19720_v36 = vld [vmem:[%s21786_s20 + $0x40] sm:$0xff] }
 0x775   : > { %v5033_v41 = vmul.f32 %v19662_v29, %v5015_v61  ;;  %v5070_v42 = vor.u32 %v5068_v55, %v5067_v21  ;;  %14768 = vmatpush3.bf16.msra.mxu0 %v17210_v31  ;;  %v19669_v11 = vsel %vm951_vm5, %v5139_v17, %v5140_v12  ;;  %v5142_v63 = vor.u32 %v5140_v12, %v5065_v35  ;;  %v17215_v61 = vld [vmem:[%s21843_s28 + $0x370] sm:$0xff]  }
 0x776   : > { %v4945_v26 = vpop.f32.mrb[84].mxu1  ;;  %14769 = vmatprep.subr.bf16.mxu0 %v17453_v1 }
 0x777   : > { %v19672_v32 = vpack.c.bf16 %v5033_v41, %v5032_v13  ;;  %v15977_v44 = vadd.f32 %v19602_v22, %v4945_v26  ;;  %v14691_v39 = vpop.f32.mrb[85].mxu1  ;;  %v5071_v53 = vsel %vm875_vm1, %v5060_v19, %v5070_v42 }
 0x778   : > { %v4948_v15 = vpop.f32.mrb[86].mxu1  ;;  %14734 = vmatmul.mubr.bf16.gmra.mrb[112].mxu0 %v5071_v53 }
 0x779   : > { %v5073_v57 = vshrl.u32 %v19672_v32, 16  ;;  %v5016_v33 = vmax.f32 %v15977_v44, 0.0  ;;  %v15978_v62 = vadd.f32 %v19602_v22, %v4948_v15  ;;  %v14692_v18 = vpop.f32.mrb[87].mxu1  ;;  %14737 = vmatprep.mubr.msk.bf16.mxu0 %vm17454_vm0, %v17453_v1  ;;  %v5076_v56 = vshll.u32 %v19672_v32, 16  ;;  %14770 = vmatpush3.bf16.msra.mxu0 %v17211_v37 }
 0x77a   : > { %14771 = vmatprep.subr.bf16.mxu0 %v17453_v1 }
 0x77b   : > { %v5017_v0 = vmax.f32 %v15978_v62, 0.0  ;;  %v5075_v25 = vrot.slane %v5073_v57, 7  ;;  %v5143_v23 = vrot.slane %v5076_v56, 1  ;;  %v5034_v34 = vmul.f32 %v19688_v59, %v5016_v33  ;;  %v17216_v33 = vld [vmem:[%s21843_s28 + $0x378] sm:$0xff]  }
 0x77d   : > { %v5035_v46 = vmul.f32 %v19694_v47, %v5017_v0  ;;  %v5078_v38 = vor.u32 %v5076_v56, %v5075_v25  ;;  %14772 = vmatpush3.bf16.msra.mxu0 %v17212_v52  ;;  %v19701_v58 = vsel %vm951_vm5, %v5142_v63, %v5143_v23  ;;  %v5145_v5 = vor.u32 %v5143_v23, %v5073_v57  ;;  %v19752_v52 = vld [vmem:[%s21786_s20 + $0x50] sm:$0xff] }
 0x77e   : > { %v4953_v30 = vpop.f32.mrb[88].mxu1  ;;  %14773 = vmatprep.subr.bf16.mxu0 %v17453_v1 }
 0x77f   : > { %v19704_v50 = vpack.c.bf16 %v5035_v46, %v5034_v34  ;;  %v15979_v43 = vadd.f32 %v19602_v22, %v4953_v30  ;;  %v14695_v19 = vpop.f32.mrb[89].mxu1  ;;  %v5079_v16 = vsel %vm875_vm1, %v5067_v21, %v5078_v38 }
 0x780   : > { %v4956_v60 = vpop.f32.mrb[90].mxu1  ;;  %14738 = vmatmul.mubr.bf16.gmra.mrb[116].mxu0 %v5079_v16 }
 0x781   : > { %v5081_v8 = vshrl.u32 %v19704_v50, 16  ;;  %v5018_v27 = vmax.f32 %v15979_v43, 0.0  ;;  %v15980_v17 = vadd.f32 %v19602_v22, %v4956_v60  ;;  %v14696_v10 = vpop.f32.mrb[91].mxu1  ;;  %14741 = vmatprep.mubr.msk.bf16.mxu0 %vm17454_vm0, %v17453_v1  ;;  %v5084_v6 = vshll.u32 %v19704_v50, 16  ;;  %14774 = vmatpush3.bf16.msra.mxu0 %v17213_v24 }
 0x782   : > { %14775 = vmatprep.subr.bf16.mxu0 %v17453_v1 }
 0x783   : > { %v5019_v40 = vmax.f32 %v15980_v17, 0.0  ;;  %v5083_v9 = vrot.slane %v5081_v8, 7  ;;  %v5146_v35 = vrot.slane %v5084_v6, 1  ;;  %v5036_v28 = vmul.f32 %v19720_v36, %v5018_v27 }
 0x785   : > { %v5037_v55 = vmul.f32 %v19726_v51, %v5019_v40  ;;  %v5086_v31 = vor.u32 %v5084_v6, %v5083_v9  ;;  %14776 = vmatpush3.bf16.msra.mxu0 %v17214_v48  ;;  %v19733_v21 = vsel %vm951_vm5, %v5145_v5, %v5146_v35  ;;  %v5148_v12 = vor.u32 %v5146_v35, %v5081_v8 }
 0x786   : > { %v4961_v13 = vpop.f32.mrb[92].mxu1  ;;  %14777 = vmatprep.subr.bf16.mxu0 %v17453_v1 }
 0x787   : > { %v19736_v41 = vpack.c.bf16 %v5037_v55, %v5036_v28  ;;  %v15981_v42 = vadd.f32 %v19602_v22, %v4961_v13  ;;  %v14699_v37 = vpop.f32.mrb[93].mxu1  ;;  %v5087_v63 = vsel %vm875_vm1, %v5075_v25, %v5086_v31  ;;  %v19758_v25 = vld [vmem:[%s21786_s20 + $0x58] sm:$0xff]  ;;  %v19783_v28 = vld [vmem:[%s21786_s20 + $0x68] sm:$0xff] }
 0x788   : > { %v4964_v26 = vpop.f32.mrb[94].mxu1  ;;  %14742 = vmatmul.mubr.bf16.gmra.mrb[120].mxu0 %v5087_v63 }
 0x789   : > { %v5089_v44 = vshrl.u32 %v19736_v41, 16  ;;  %v5020_v39 = vmax.f32 %v15981_v42, 0.0  ;;  %v15982_v53 = vadd.f32 %v19602_v22, %v4964_v26  ;;  %v14700_v15 = vpop.f32.mrb[95].mxu1  ;;  %14745 = vmatprep.mubr.msk.bf16.mxu0 %vm17454_vm0, %v17453_v1  ;;  %v5092_v57 = vshll.u32 %v19736_v41, 16  ;;  %14778 = vmatpush3.bf16.msra.mxu0 %v17215_v61 }
 0x78a   : > { %14779 = vmatprep.subr.bf16.mxu0 %v17453_v1 }
 0x78b   : > { %v5021_v62 = vmax.f32 %v15982_v53, 0.0  ;;  %v5091_v18 = vrot.slane %v5089_v44, 7  ;;  %v5149_v56 = vrot.slane %v5092_v57, 1  ;;  %v5038_v0 = vmul.f32 %v19752_v52, %v5020_v39 }
 0x78d   : > { %v5039_v23 = vmul.f32 %v19758_v25, %v5021_v62  ;;  %v5094_v34 = vor.u32 %v5092_v57, %v5091_v18  ;;  %14780 = vmatpush3.bf16.msra.mxu0 %v17216_v33  ;;  %v19762_v46 = vsel %vm951_vm5, %v5148_v12, %v5149_v56  ;;  %v5151_v38 = vor.u32 %v5149_v56, %v5089_v44 }
 0x78e   : > { %v4969_v24 = vpop.f32.mrb[96].mxu1  ;;  %14817 = vmatprep.subr.bf16.mxu0 %v17453_v1 }
 0x78f   : > { %v19765_v5 = vpack.c.bf16 %v5039_v23, %v5038_v0  ;;  %v15983_v30 = vadd.f32 %v19602_v22, %v4969_v24  ;;  %v14703_v43 = vpop.f32.mrb[97].mxu1  ;;  %v5095_v19 = vsel %vm875_vm1, %v5083_v9, %v5094_v34  ;;  %v19777_v9 = vld [vmem:[%s21786_s20 + $0x60] sm:$0xff]  ;;  %v19807_v34 = vld [vmem:[%s21786_s20 + $0x78] sm:$0xff] }
 0x790   : > { %v4972_v16 = vpop.f32.mrb[98].mxu1  ;;  %14746 = vmatmul.mubr.bf16.gmra.mrb[124].mxu0 %v5095_v19 }
 0x791   : > { %v5097_v60 = vshrl.u32 %v19765_v5, 16  ;;  %v5022_v8 = vmax.f32 %v15983_v30, 0.0  ;;  %v15984_v27 = vadd.f32 %v19602_v22, %v4972_v16  ;;  %v14704_v17 = vpop.f32.mrb[99].mxu1  ;;  %14749 = vmatprep.mubr.msk.bf16.mxu0 %vm17454_vm0, %v17453_v1  ;;  %v5100_v10 = vshll.u32 %v19765_v5, 16 }
 0x793   : > { %v5023_v6 = vmax.f32 %v15984_v27, 0.0  ;;  %v5099_v48 = vrot.slane %v5097_v60, 7  ;;  %v5152_v40 = vrot.slane %v5100_v10, 1  ;;  %v5040_v35 = vmul.f32 %v19777_v9, %v5022_v8 }
 0x795   : > { %v5041_v55 = vmul.f32 %v19783_v28, %v5023_v6  ;;  %v5102_v31 = vor.u32 %v5100_v10, %v5099_v48  ;;  %v19787_v61 = vsel %vm951_vm5, %v5151_v38, %v5152_v40  ;;  %v5154_v12 = vor.u32 %v5152_v40, %v5097_v60 }
 0x796   : > { %v4977_v13 = vpop.f32.mrb[100].mxu1 }
 0x797   : > { %v19789_v42 = vpack.c.bf16 %v5041_v55, %v5040_v35  ;;  %v15985_v37 = vadd.f32 %v19602_v22, %v4977_v13  ;;  %v14707_v63 = vpop.f32.mrb[101].mxu1  ;;  %v5103_v26 = vsel %vm875_vm1, %v5091_v18, %v5102_v31  ;;  %v19801_v18 = vld [vmem:[%s21786_s20 + $0x70] sm:$0xff] }
 0x798   : > { %v4980_v44 = vpop.f32.mrb[102].mxu1  ;;  %14750 = vmatmul.mubr.bf16.gmra.mrb[128].mxu0 %v5103_v26 }
 0x799   : > { %v5105_v39 = vshrl.u32 %v19789_v42, 16  ;;  %v5024_v53 = vmax.f32 %v15985_v37, 0.0  ;;  %v15986_v15 = vadd.f32 %v19602_v22, %v4980_v44  ;;  %v14708_v57 = vpop.f32.mrb[103].mxu1  ;;  %14753 = vmatprep.mubr.msk.bf16.mxu0 %vm17454_vm0, %v17453_v1  ;;  %v5108_v33 = vshll.u32 %v19789_v42, 16 }
 0x79b   : > { %v5025_v62 = vmax.f32 %v15986_v15, 0.0  ;;  %v5107_v56 = vrot.slane %v5105_v39, 7  ;;  %v5155_v0 = vrot.slane %v5108_v33, 1  ;;  %v5042_v23 = vmul.f32 %v19801_v18, %v5024_v53 }
 0x79d   : > { %v5043_v38 = vmul.f32 %v19807_v34, %v5025_v62  ;;  %v5110_v24 = vor.u32 %v5108_v33, %v5107_v56  ;;  %v19811_v30 = vsel %vm951_vm5, %v5154_v12, %v5155_v0  ;;  %v5157_v43 = vor.u32 %v5155_v0, %v5105_v39 }
 0x79e   : > { %v4985_v19 = vpop.f32.mrb[104].mxu1 }
 0x79f   : > { %v19813_v16 = vpack.c.bf16 %v5043_v38, %v5042_v23  ;;  %v15987_v60 = vadd.f32 %v19602_v22, %v4985_v19  ;;  %v14711_v8 = vpop.f32.mrb[105].mxu1  ;;  %v5111_v27 = vsel %vm875_vm1, %v5099_v48, %v5110_v24  ;;  %v19825_v48 = vld [vmem:[%s21786_s20 + $0x80] sm:$0xff]  ;;  %v17218_v19 = vld [vmem:[%s21843_s28 + $0x388] sm:$0xff]  }
 0x7a0   : > { %v4988_v17 = vpop.f32.mrb[106].mxu1  ;;  %14754 = vmatmul.mubr.bf16.gmra.mrb[132].mxu0 %v5111_v27  ;;  %v17220_v8 = vld [vmem:[%s21843_s28 + $0x398] sm:$0xff]   ;;  %v17226_v27 = vld [vmem:[%s21843_s28 + $0x3c8] sm:$0xff]  }
 0x7a1   : > { %v5113_v10 = vshrl.u32 %v19813_v16, 16  ;;  %v5026_v6 = vmax.f32 %v15987_v60, 0.0  ;;  %v15988_v40 = vadd.f32 %v19602_v22, %v4988_v17  ;;  %v14712_v35 = vpop.f32.mrb[107].mxu1  ;;  %14757 = vmatprep.mubr.msk.bf16.mxu0 %vm17454_vm0, %v17453_v1  ;;  %v5116_v55 = vshll.u32 %v19813_v16, 16  ;;  %v19831_v22 = vld [vmem:[%s21786_s20 + $0x88] sm:$0xff]  ;;  %v17219_v60 = vld [vmem:[%s21843_s28 + $0x390] sm:$0xff]  }
 0x7a2   : > { %v17227_v17 = vld [vmem:[%s21843_s28 + $0x3d0] sm:$0xff]   ;;  %v17224_v35 = vld [vmem:[%s21843_s28 + $0x3b8] sm:$0xff]  }
 0x7a3   : > { %v5027_v31 = vmax.f32 %v15988_v40, 0.0  ;;  %v5115_v12 = vrot.slane %v5113_v10, 7  ;;  %v5158_v13 = vrot.slane %v5116_v55, 1  ;;  %v5044_v37 = vmul.f32 %v19825_v48, %v5026_v6  ;;  %v17228_v6 = vld [vmem:[%s21843_s28 + $0x3d8] sm:$0xff]   ;;  %v17229_v40 = vld [vmem:[%s21843_s28 + $0x3e0] sm:$0xff]  }
 0x7a5   : > { %v5045_v63 = vmul.f32 %v19831_v22, %v5027_v31  ;;  %v5118_v26 = vor.u32 %v5116_v55, %v5115_v12  ;;  %v19835_v44 = vsel %vm951_vm5, %v5157_v43, %v5158_v13  ;;  %v5160_v39 = vor.u32 %v5158_v13, %v5113_v10  ;;  %v17222_v10 = vld [vmem:[%s21843_s28 + $0x3a8] sm:$0xff]  }
 0x7a6   : > { %v17230_v55 = vld [vmem:[%s21843_s28 + $0x3e8] sm:$0xff]  }
 0x7a7   : > { %v19837_v53 = vpack.c.bf16 %v5045_v63, %v5044_v37  ;;  %v5119_v15 = vsel %vm875_vm1, %v5107_v56, %v5118_v26  ;;  %v17217_v56 = vld [vmem:[%s21843_s28 + $0x380] sm:$0xff]  }
 0x7a8   : > { %14758 = vmatmul.mubr.bf16.gmra.mrb[136].mxu0 %v5119_v15 }
 0x7a9   : > { %v5121_v57 = vshrl.u32 %v19837_v53, 16  ;;  %14761 = vmatprep.mubr.msk.bf16.mxu0 %vm17454_vm0, %v17453_v1  ;;  %v5124_v33 = vshll.u32 %v19837_v53, 16 }
 0x7ab   : > { %v5123_v62 = vrot.slane %v5121_v57, 7  ;;  %v5161_v0 = vrot.slane %v5124_v33, 1 }
 0x7ad   : > { %v5126_v23 = vor.u32 %v5124_v33, %v5123_v62  ;;  %v19845_v38 = vsel %vm951_vm5, %v5160_v39, %v5161_v0  ;;  %v19847_v24 = vor.u32 %v5161_v0, %v5121_v57 }
 0x7af   : > { %v5127_v43 = vsel %vm875_vm1, %v5115_v12, %v5126_v23 }
 0x7b0   : > { %14762 = vmatmul.mubr.bf16.gmra.mrb[140].mxu0 %v5127_v43  ;;  %v17233_v43 = vld [vmem:[%s21843_s28 + $0x400] sm:$0xff]  }
 0x7b1   : > { %14781 = vmatprep.mubr.msk.bf16.mxu0 %vm17454_vm0, %v17453_v1 }
 0x7b8   : > { %14782 = vmatmul.mubr.bf16.vlgmr.msra.gmra.mrb[108].mxu0 %v19618_v3  ;;  %v17225_v3 = vld [vmem:[%s21843_s28 + $0x3c0] sm:$0xff]  }
 0x7b9   : > { %14818 = vmatpush3.bf16.msra.mxu0 %v17217_v56  ;;  %14785 = vmatprep.mubr.msk.bf16.mxu0 %vm17454_vm0, %v17453_v1 }
 0x7ba   : > { %14819 = vmatprep.subr.bf16.mxu0 %v17453_v1  ;;  %14870 = vmatpush3.bf16.msra.mxu1 %v17225_v3 }
 0x7bb   : > { %14871 = vmatprep.subr.bf16.mxu1 %v17453_v1 }
 0x7bd   : > { %14820 = vmatpush3.bf16.msra.mxu0 %v17218_v19 }
 0x7be   : > { %14821 = vmatprep.subr.bf16.mxu0 %v17453_v1  ;;  %14872 = vmatpush3.bf16.msra.mxu1 %v17226_v27 }
 0x7bf   : > { %14873 = vmatprep.subr.bf16.mxu1 %v17453_v1 }
 0x7c0   : > { %14786 = vmatmul.mubr.bf16.gmra.mrb[112].mxu0 %v19639_v2  ;;  %v17221_v2 = vld [vmem:[%s21843_s28 + $0x3a0] sm:$0xff]  }
 0x7c1   : > { %14789 = vmatprep.mubr.msk.bf16.mxu0 %vm17454_vm0, %v17453_v1  ;;  %14822 = vmatpush3.bf16.msra.mxu0 %v17219_v60 }
 0x7c2   : > { %14823 = vmatprep.subr.bf16.mxu0 %v17453_v1  ;;  %14874 = vmatpush3.bf16.msra.mxu1 %v17227_v17 }
 0x7c3   : > { %14875 = vmatprep.subr.bf16.mxu1 %v17453_v1 }
 0x7c5   : > { %14824 = vmatpush3.bf16.msra.mxu0 %v17220_v8 }
 0x7c6   : > { %14825 = vmatprep.subr.bf16.mxu0 %v17453_v1  ;;  %14876 = vmatpush3.bf16.msra.mxu1 %v17228_v6 }
 0x7c7   : > { %14877 = vmatprep.subr.bf16.mxu1 %v17453_v1 }
 0x7c8   : > { %14790 = vmatmul.mubr.bf16.gmra.mrb[116].mxu0 %v19672_v32  ;;  %v17223_v32 = vld [vmem:[%s21843_s28 + $0x3b0] sm:$0xff]  }
 0x7c9   : > { %14793 = vmatprep.mubr.msk.bf16.mxu0 %vm17454_vm0, %v17453_v1  ;;  %14826 = vmatpush3.bf16.msra.mxu0 %v17221_v2 }
 0x7ca   : > { %14827 = vmatprep.subr.bf16.mxu0 %v17453_v1  ;;  %14878 = vmatpush3.bf16.msra.mxu1 %v17229_v40 }
 0x7cb   : > { %14879 = vmatprep.subr.bf16.mxu1 %v17453_v1 }
 0x7cd   : > { %14828 = vmatpush3.bf16.msra.mxu0 %v17222_v10 }
 0x7ce   : > { %14829 = vmatprep.subr.bf16.mxu0 %v17453_v1  ;;  %14880 = vmatpush3.bf16.msra.mxu1 %v17230_v55 }
 0x7cf   : > { %14881 = vmatprep.subr.bf16.mxu1 %v17453_v1 }
 0x7d0   : > { %14794 = vmatmul.mubr.bf16.gmra.mrb[120].mxu0 %v19704_v50  ;;  %v17232_v50 = vld [vmem:[%s21843_s28 + $0x3f8] sm:$0xff]  }
 0x7d1   : > { %14797 = vmatprep.mubr.msk.bf16.mxu0 %vm17454_vm0, %v17453_v1  ;;  %14830 = vmatpush3.bf16.msra.mxu0 %v17223_v32  ;;  %v17234_v32 = vld [vmem:[%s21843_s28 + $0x408] sm:$0xff]  }
 0x7d2   : > { %14831 = vmatprep.subr.bf16.mxu0 %v17453_v1 }
 0x7d5   : > { %14832 = vmatpush3.bf16.msra.mxu0 %v17224_v35 }
 0x7d8   : > { %14798 = vmatmul.mubr.bf16.gmra.mrb[124].mxu0 %v19736_v41 }
 0x7d9   : > { %14801 = vmatprep.mubr.msk.bf16.mxu0 %vm17454_vm0, %v17453_v1 }
 0x7e0   : > { %14802 = vmatmul.mubr.bf16.gmra.mrb[128].mxu0 %v19765_v5 }
 0x7e1   : > { %14805 = vmatprep.mubr.msk.bf16.mxu0 %vm17454_vm0, %v17453_v1 }
 0x7e8   : > { %14806 = vmatmul.mubr.bf16.gmra.mrb[132].mxu0 %v19789_v42 }
 0x7e9   : > { %14809 = vmatprep.mubr.msk.bf16.mxu0 %vm17454_vm0, %v17453_v1 }
 0x7f0   : > { %14810 = vmatmul.mubr.bf16.gmra.mrb[136].mxu0 %v19813_v16 }
 0x7f1   : > { %14813 = vmatprep.mubr.msk.bf16.mxu0 %vm17454_vm0, %v17453_v1 }
 0x7f8   : > { %14814 = vmatmul.mubr.bf16.gmra.mrb[140].mxu0 %v19837_v53 }
 0x7f9   : > { %14833 = vmatprep.mubr.msk.bf16.mxu0 %vm17454_vm0, %v17453_v1 }
 0x800   : > { %14834 = vmatmul.mubr.bf16.vlgmr.msra.gmra.mrb[108].mxu0 %v19669_v11  ;;  %v5173_v11 = vsel %vm18070_vm7, %v19847_v24, 0 }
 0x801   : > { %14837 = vmatprep.mubr.msk.bf16.mxu0 %vm17454_vm0, %v17453_v1 }
 0x808   : > { %14838 = vmatmul.mubr.bf16.gmra.mrb[112].mxu0 %v19701_v58  ;;  %v17231_v58 = vld [vmem:[%s21843_s28 + $0x3f0] sm:$0xff]  }
 0x809   : > { %14841 = vmatprep.mubr.msk.bf16.mxu0 %vm17454_vm0, %v17453_v1  ;;  %14882 = vmatpush3.bf16.msra.mxu1 %v17231_v58 }
 0x80a   : > { %14883 = vmatprep.subr.bf16.mxu1 %v17453_v1 }
 0x80d   : > { %14884 = vmatpush3.bf16.msra.mxu1 %v17232_v50 }
 0x80e   : > { %14921 = vmatprep.subr.bf16.mxu1 %v17453_v1 }
 0x810   : > { %14842 = vmatmul.mubr.bf16.gmra.mrb[116].mxu0 %v19733_v21  ;;  %v19972_v21 = vld [vmem:[%s21846_s10 + $0x4] ss:$0 sm:$0xff] }
 0x811   : > { %14845 = vmatprep.mubr.msk.bf16.mxu0 %vm17454_vm0, %v17453_v1 }
 0x818   : > { %14846 = vmatmul.mubr.bf16.gmra.mrb[120].mxu0 %v19762_v46 }
 0x819   : > { %14849 = vmatprep.mubr.msk.bf16.mxu0 %vm17454_vm0, %v17453_v1 }
 0x820   : > { %14850 = vmatmul.mubr.bf16.gmra.mrb[124].mxu0 %v19787_v61 }
 0x821   : > { %14853 = vmatprep.mubr.msk.bf16.mxu0 %vm17454_vm0, %v17453_v1 }
 0x828   : > { %14854 = vmatmul.mubr.bf16.gmra.mrb[128].mxu0 %v19811_v30 }
 0x829   : > { %14857 = vmatprep.mubr.msk.bf16.mxu0 %vm17454_vm0, %v17453_v1 }
 0x830   : > { %14858 = vmatmul.mubr.bf16.gmra.mrb[132].mxu0 %v19835_v44 }
 0x831   : > { %14861 = vmatprep.mubr.msk.bf16.mxu0 %vm17454_vm0, %v17453_v1 }
 0x838   : > { %14862 = vmatmul.mubr.bf16.gmra.mrb[136].mxu0 %v19845_v38 }
 0x839   : > { %14865 = vmatprep.mubr.msk.bf16.mxu0 %vm17454_vm0, %v17453_v1 }
 0x840   : > { %14866 = vmatmul.mubr.bf16.gmra.mrb[140].mxu0 %v5173_v11 }
 0x8d3   : > { %v5637_v41 = vpop.f32.mrb[108].mxu0 }
 0x8d4   : > { %v15989_v46 = vadd.f32 %v19972_v21, %v5637_v41  ;;  %v14835_v5 = vpop.f32.mrb[109].mxu0  ;;  %v17235_v41 = vld [vmem:[%s21843_s28 + $0x410] sm:$0xff]  }
 0x8d5   : > { %v5640_v61 = vpop.f32.mrb[110].mxu0 }
 0x8d6   : > { %v5726_v42 = vmax.f32 %v15989_v46, 0.0  ;;  %v15990_v30 = vadd.f32 %v19972_v21, %v5640_v61  ;;  %v14836_v16 = vpop.f32.mrb[111].mxu0 }
 0x8d8   : > { %v5727_v31 = vmax.f32 %v15990_v30, 0.0  ;;  %v5744_v12 = vmul.f32 %v19609_v54, %v5726_v42 }
 0x8da   : > { %v5745_v13 = vmul.f32 %v19615_v7, %v5727_v31 }
 0x8db   : > { %v5645_v37 = vpop.f32.mrb[112].mxu0 }
 0x8dc   : > { %v19978_v63 = vpack.c.bf16 %v5745_v13, %v5744_v12  ;;  %v15991_v26 = vadd.f32 %v19972_v21, %v5645_v37  ;;  %v14839_v44 = vpop.f32.mrb[113].mxu0 }
 0x8dd   : > { %v5648_v39 = vpop.f32.mrb[114].mxu0  ;;  %v17236_v44 = vld [vmem:[%s21843_s28 + $0x418] sm:$0xff]  }
 0x8de   : > { %v5774_v53 = vshrl.u32 %v19978_v63, 16  ;;  %v5777_v15 = vshll.u32 %v19978_v63, 16  ;;  %v5728_v57 = vmax.f32 %v15991_v26, 0.0  ;;  %v15992_v33 = vadd.f32 %v19972_v21, %v5648_v39  ;;  %v14840_v62 = vpop.f32.mrb[115].mxu0 }
 0x8e0   : > { %v5854_v0 = vrot.slane %v5777_v15, 1  ;;  %v5729_v23 = vmax.f32 %v15992_v33, 0.0  ;;  %v5776_v54 = vrot.slane %v5774_v53, 7  ;;  %v5746_v7 = vmul.f32 %v19627_v45, %v5728_v57 }
 0x8e2   : > { %v5747_v38 = vmul.f32 %v19633_v49, %v5729_v23  ;;  %v5779_v24 = vor.u32 %v5777_v15, %v5776_v54  ;;  %v5855_v56 = vor.u32 %v5854_v0, %v5774_v53  ;;  %v17237_v0 = vld [vmem:[%s21843_s28 + $0x420] sm:$0xff]  }
 0x8e3   : > { %v5653_v19 = vpop.f32.mrb[116].mxu0 }
 0x8e4   : > { %v19989_v60 = vpack.c.bf16 %v5747_v38, %v5746_v7  ;;  %v15993_v3 = vadd.f32 %v19972_v21, %v5653_v19  ;;  %v14843_v8 = vpop.f32.mrb[117].mxu0  ;;  %v5853_v27 = vsel %vm17646_vm4, 0, %v5779_v24 }
 0x8e5   : > { %v5656_v2 = vpop.f32.mrb[118].mxu0  ;;  %14886 = vmatmul.mubr.bf16.vlgmr.msra.gmra.mrb[108].mxu1 %v5853_v27 }
 0x8e6   : > { %v5781_v45 = vshrl.u32 %v19989_v60, 16  ;;  %v5730_v49 = vmax.f32 %v15993_v3, 0.0  ;;  %v15994_v17 = vadd.f32 %v19972_v21, %v5656_v2  ;;  %v14844_v10 = vpop.f32.mrb[119].mxu0  ;;  %14922 = vmatpush3.bf16.msra.mxu1 %v17233_v43  ;;  %14889 = vmatprep.mubr.msk.bf16.mxu1 %vm17454_vm0, %v17453_v1  ;;  %v5784_v6 = vshll.u32 %v19989_v60, 16  ;;  %v17238_v2 = vld [vmem:[%s21843_s28 + $0x428] sm:$0xff]  }
 0x8e7   : > { %14923 = vmatprep.subr.bf16.mxu1 %v17453_v1 }
 0x8e8   : > { %v5731_v40 = vmax.f32 %v15994_v17, 0.0  ;;  %v5783_v35 = vrot.slane %v5781_v45, 7  ;;  %v5856_v55 = vrot.slane %v5784_v6, 1  ;;  %v5748_v11 = vmul.f32 %v19656_v20, %v5730_v49 }
 0x8ea   : > { %v5749_v58 = vmul.f32 %v19662_v29, %v5731_v40  ;;  %v5786_v50 = vor.u32 %v5784_v6, %v5783_v35  ;;  %14924 = vmatpush3.bf16.msra.mxu1 %v17234_v32  ;;  %v20009_v46 = vsel %vm951_vm5, %v5855_v56, %v5856_v55  ;;  %v5858_v5 = vor.u32 %v5856_v55, %v5781_v45  ;;  %v17239_v40 = vld [vmem:[%s21843_s28 + $0x430] sm:$0xff]  }
 0x8eb   : > { %v5661_v61 = vpop.f32.mrb[120].mxu0  ;;  %14925 = vmatprep.subr.bf16.mxu1 %v17453_v1 }
 0x8ec   : > { %v20012_v42 = vpack.c.bf16 %v5749_v58, %v5748_v11  ;;  %v15995_v30 = vadd.f32 %v19972_v21, %v5661_v61  ;;  %v14847_v20 = vpop.f32.mrb[121].mxu0  ;;  %v5787_v29 = vsel %vm875_vm1, %v5776_v54, %v5786_v50 }
 0x8ed   : > { %v5664_v16 = vpop.f32.mrb[122].mxu0  ;;  %14890 = vmatmul.mubr.bf16.gmra.mrb[112].mxu1 %v5787_v29 }
 0x8ee   : > { %v5789_v31 = vshrl.u32 %v20012_v42, 16  ;;  %v5732_v12 = vmax.f32 %v15995_v30, 0.0  ;;  %v15996_v13 = vadd.f32 %v19972_v21, %v5664_v16  ;;  %v14848_v37 = vpop.f32.mrb[123].mxu0  ;;  %14893 = vmatprep.mubr.msk.bf16.mxu1 %vm17454_vm0, %v17453_v1  ;;  %v5792_v26 = vshll.u32 %v20012_v42, 16  ;;  %14926 = vmatpush3.bf16.msra.mxu1 %v17235_v41  ;;  %v17240_v16 = vld [vmem:[%s21843_s28 + $0x438] sm:$0xff]  }
 0x8ef   : > { %14927 = vmatprep.subr.bf16.mxu1 %v17453_v1 }
 0x8f0   : > { %v5733_v39 = vmax.f32 %v15996_v13, 0.0  ;;  %v5791_v53 = vrot.slane %v5789_v31, 7  ;;  %v5859_v15 = vrot.slane %v5792_v26, 1  ;;  %v5750_v57 = vmul.f32 %v19688_v59, %v5732_v12 }
 0x8f2   : > { %v5751_v33 = vmul.f32 %v19694_v47, %v5733_v39  ;;  %v5794_v62 = vor.u32 %v5792_v26, %v5791_v53  ;;  %14928 = vmatpush3.bf16.msra.mxu1 %v17236_v44  ;;  %v20031_v23 = vsel %vm951_vm5, %v5858_v5, %v5859_v15  ;;  %v5861_v54 = vor.u32 %v5859_v15, %v5789_v31 }
 0x8f3   : > { %v5669_v7 = vpop.f32.mrb[124].mxu0  ;;  %14929 = vmatprep.subr.bf16.mxu1 %v17453_v1 }
 0x8f4   : > { %v20034_v38 = vpack.c.bf16 %v5751_v33, %v5750_v57  ;;  %v15997_v24 = vadd.f32 %v19972_v21, %v5669_v7  ;;  %v14851_v59 = vpop.f32.mrb[125].mxu0  ;;  %v5795_v47 = vsel %vm875_vm1, %v5783_v35, %v5794_v62 }
 0x8f5   : > { %v5672_v43 = vpop.f32.mrb[126].mxu0  ;;  %14894 = vmatmul.mubr.bf16.gmra.mrb[116].mxu1 %v5795_v47 }
 0x8f6   : > { %v5797_v56 = vshrl.u32 %v20034_v38, 16  ;;  %v5734_v19 = vmax.f32 %v15997_v24, 0.0  ;;  %v15998_v3 = vadd.f32 %v19972_v21, %v5672_v43  ;;  %v14852_v8 = vpop.f32.mrb[127].mxu0  ;;  %14897 = vmatprep.mubr.msk.bf16.mxu1 %vm17454_vm0, %v17453_v1  ;;  %v5800_v27 = vshll.u32 %v20034_v38, 16  ;;  %14930 = vmatpush3.bf16.msra.mxu1 %v17237_v0 }
 0x8f7   : > { %14931 = vmatprep.subr.bf16.mxu1 %v17453_v1 }
 0x8f8   : > { %v5735_v45 = vmax.f32 %v15998_v3, 0.0  ;;  %v5799_v49 = vrot.slane %v5797_v56, 7  ;;  %v5862_v17 = vrot.slane %v5800_v27, 1  ;;  %v5752_v10 = vmul.f32 %v19720_v36, %v5734_v19 }
 0x8fa   : > { %v5753_v6 = vmul.f32 %v19726_v51, %v5735_v45  ;;  %v5802_v32 = vor.u32 %v5800_v27, %v5799_v49  ;;  %14932 = vmatpush3.bf16.msra.mxu1 %v17238_v2  ;;  %v20053_v35 = vsel %vm951_vm5, %v5861_v54, %v5862_v17  ;;  %v5864_v55 = vor.u32 %v5862_v17, %v5797_v56 }
 0x8fb   : > { %v5677_v11 = vpop.f32.mrb[128].mxu0  ;;  %14933 = vmatprep.subr.bf16.mxu1 %v17453_v1 }
 0x8fc   : > { %v20056_v58 = vpack.c.bf16 %v5753_v6, %v5752_v10  ;;  %v15999_v50 = vadd.f32 %v19972_v21, %v5677_v11  ;;  %v14855_v36 = vpop.f32.mrb[129].mxu0  ;;  %v5803_v51 = vsel %vm875_vm1, %v5791_v53, %v5802_v32 }
 0x8fd   : > { %v5680_v41 = vpop.f32.mrb[130].mxu0  ;;  %14898 = vmatmul.mubr.bf16.gmra.mrb[120].mxu1 %v5803_v51 }
 0x8fe   : > { %v5805_v5 = vshrl.u32 %v20056_v58, 16  ;;  %v5736_v61 = vmax.f32 %v15999_v50, 0.0  ;;  %v16000_v30 = vadd.f32 %v19972_v21, %v5680_v41  ;;  %v14856_v20 = vpop.f32.mrb[131].mxu0  ;;  %14901 = vmatprep.mubr.msk.bf16.mxu1 %vm17454_vm0, %v17453_v1  ;;  %v5808_v29 = vshll.u32 %v20056_v58, 16  ;;  %14934 = vmatpush3.bf16.msra.mxu1 %v17239_v40 }
 0x8ff   : > { %14935 = vmatprep.subr.bf16.mxu1 %v17453_v1 }
 0x900   : > { %v5737_v31 = vmax.f32 %v16000_v30, 0.0  ;;  %v5807_v12 = vrot.slane %v5805_v5, 7  ;;  %v5865_v13 = vrot.slane %v5808_v29, 1  ;;  %v5754_v37 = vmul.f32 %v19752_v52, %v5736_v61 }
 0x902   : > { %v5755_v26 = vmul.f32 %v19758_v25, %v5737_v31  ;;  %v5810_v44 = vor.u32 %v5808_v29, %v5807_v12  ;;  %14936 = vmatpush3.bf16.msra.mxu1 %v17240_v16  ;;  %v20072_v39 = vsel %vm951_vm5, %v5864_v55, %v5865_v13  ;;  %v5867_v53 = vor.u32 %v5865_v13, %v5805_v5 }
 0x903   : > { %v5685_v15 = vpop.f32.mrb[132].mxu0  ;;  %14973 = vmatprep.subr.bf16.mxu1 %v17453_v1 }
 0x904   : > { %v20075_v57 = vpack.c.bf16 %v5755_v26, %v5754_v37  ;;  %v16001_v33 = vadd.f32 %v19972_v21, %v5685_v15  ;;  %v14859_v62 = vpop.f32.mrb[133].mxu0  ;;  %v5811_v0 = vsel %vm875_vm1, %v5799_v49, %v5810_v44 }
 0x905   : > { %v5688_v54 = vpop.f32.mrb[134].mxu0  ;;  %14902 = vmatmul.mubr.bf16.gmra.mrb[124].mxu1 %v5811_v0 }
 0x906   : > { %v5813_v52 = vshrl.u32 %v20075_v57, 16  ;;  %v5738_v25 = vmax.f32 %v16001_v33, 0.0  ;;  %v16002_v7 = vadd.f32 %v19972_v21, %v5688_v54  ;;  %v14860_v24 = vpop.f32.mrb[135].mxu0  ;;  %14905 = vmatprep.mubr.msk.bf16.mxu1 %vm17454_vm0, %v17453_v1  ;;  %v5816_v59 = vshll.u32 %v20075_v57, 16 }
 0x908   : > { %v5739_v47 = vmax.f32 %v16002_v7, 0.0  ;;  %v5815_v43 = vrot.slane %v5813_v52, 7  ;;  %v5868_v56 = vrot.slane %v5816_v59, 1  ;;  %v5756_v19 = vmul.f32 %v19777_v9, %v5738_v25 }
 0x90a   : > { %v5757_v3 = vmul.f32 %v19783_v28, %v5739_v47  ;;  %v5818_v8 = vor.u32 %v5816_v59, %v5815_v43  ;;  %v20087_v27 = vsel %vm951_vm5, %v5867_v53, %v5868_v56  ;;  %v5870_v2 = vor.u32 %v5868_v56, %v5813_v52 }
 0x90b   : > { %v5693_v45 = vpop.f32.mrb[136].mxu0 }
 0x90c   : > { %v20089_v49 = vpack.c.bf16 %v5757_v3, %v5756_v19  ;;  %v16003_v17 = vadd.f32 %v19972_v21, %v5693_v45  ;;  %v14863_v10 = vpop.f32.mrb[137].mxu0  ;;  %v5819_v6 = vsel %vm875_vm1, %v5807_v12, %v5818_v8  ;;  %v17241_v8 = vld [vmem:[%s21843_s28 + $0x440] sm:$0xff]   ;;  %v17243_v45 = vld [vmem:[%s21843_s28 + $0x450] sm:$0xff]  }
 0x90d   : > { %v5696_v32 = vpop.f32.mrb[138].mxu0  ;;  %14906 = vmatmul.mubr.bf16.gmra.mrb[128].mxu1 %v5819_v6  ;;  %v17247_v10 = vld [vmem:[%s21843_s28 + $0x470] sm:$0xff]   ;;  %v17269_v6 = vld [vmem:[%s21847_s7 + $0x28] sm:$0xff]  }
 0x90e   : > { %v5821_v40 = vshrl.u32 %v20089_v49, 16  ;;  %v5740_v9 = vmax.f32 %v16003_v17, 0.0  ;;  %v16004_v28 = vadd.f32 %v19972_v21, %v5696_v32  ;;  %v14864_v55 = vpop.f32.mrb[139].mxu0  ;;  %14909 = vmatprep.mubr.msk.bf16.mxu1 %vm17454_vm0, %v17453_v1  ;;  %v5824_v11 = vshll.u32 %v20089_v49, 16  ;;  %v17245_v17 = vld [vmem:[%s21843_s28 + $0x460] sm:$0xff]  }
 0x90f   : > { %v17270_v55 = vld [vmem:[%s21847_s7 + $0x30] sm:$0xff]  }
 0x910   : > { %v5741_v50 = vmax.f32 %v16004_v28, 0.0  ;;  %v5823_v36 = vrot.slane %v5821_v40, 7  ;;  %v5871_v51 = vrot.slane %v5824_v11, 1  ;;  %v5758_v41 = vmul.f32 %v19801_v18, %v5740_v9 }
 0x912   : > { %v5759_v5 = vmul.f32 %v19807_v34, %v5741_v50  ;;  %v5826_v61 = vor.u32 %v5824_v11, %v5823_v36  ;;  %v20101_v30 = vsel %vm951_vm5, %v5870_v2, %v5871_v51  ;;  %v5873_v20 = vor.u32 %v5871_v51, %v5821_v40  ;;  %v17242_v2 = vld [vmem:[%s21843_s28 + $0x448] sm:$0xff]  }
 0x913   : > { %v5701_v29 = vpop.f32.mrb[140].mxu0 }
 0x914   : > { %v20103_v16 = vpack.c.bf16 %v5759_v5, %v5758_v41  ;;  %v16005_v31 = vadd.f32 %v19972_v21, %v5701_v29  ;;  %v14867_v12 = vpop.f32.mrb[141].mxu0  ;;  %v5827_v13 = vsel %vm875_vm1, %v5815_v43, %v5826_v61 }
 0x915   : > { %v5704_v37 = vpop.f32.mrb[142].mxu0  ;;  %14910 = vmatmul.mubr.bf16.gmra.mrb[132].mxu1 %v5827_v13 }
 0x916   : > { %v5829_v26 = vshrl.u32 %v20103_v16, 16  ;;  %v5742_v18 = vmax.f32 %v16005_v31, 0.0  ;;  %v16006_v34 = vadd.f32 %v19972_v21, %v5704_v37  ;;  %v14868_v44 = vpop.f32.mrb[143].mxu0  ;;  %14913 = vmatprep.mubr.msk.bf16.mxu1 %vm17454_vm0, %v17453_v1  ;;  %v5832_v53 = vshll.u32 %v20103_v16, 16 }
 0x918   : > { %v5743_v15 = vmax.f32 %v16006_v34, 0.0  ;;  %v5831_v33 = vrot.slane %v5829_v26, 7  ;;  %v5874_v62 = vrot.slane %v5832_v53, 1  ;;  %v5760_v0 = vmul.f32 %v19825_v48, %v5742_v18 }
 0x91a   : > { %v5761_v54 = vmul.f32 %v19831_v22, %v5743_v15  ;;  %v5834_v52 = vor.u32 %v5832_v53, %v5831_v33  ;;  %v20115_v25 = vsel %vm951_vm5, %v5873_v20, %v5874_v62  ;;  %v5876_v7 = vor.u32 %v5874_v62, %v5829_v26 }
 0x91c   : > { %v5770_v24 = vpack.c.bf16 %v5761_v54, %v5760_v0  ;;  %v5835_v21 = vsel %vm875_vm1, %v5823_v36, %v5834_v52 }
 0x91d   : > { %14914 = vmatmul.mubr.bf16.gmra.mrb[136].mxu1 %v5835_v21 }
 0x91e   : > { %v5837_v59 = vshrl.u32 %v5770_v24, 16  ;;  %14917 = vmatprep.mubr.msk.bf16.mxu1 %vm17454_vm0, %v17453_v1  ;;  %v5840_v47 = vshll.u32 %v5770_v24, 16 }
 0x920   : > { %v5839_v43 = vrot.slane %v5837_v59, 7  ;;  %v5877_v56 = vrot.slane %v5840_v47, 1 }
 0x922   : > { %v5842_v19 = vor.u32 %v5840_v47, %v5839_v43  ;;  %v5878_v48 = vsel %vm951_vm5, %v5876_v7, %v5877_v56  ;;  %v20121_v22 = vor.u32 %v5877_v56, %v5837_v59 }
 0x924   : > { %v5843_v3 = vsel %vm875_vm1, %v5831_v33, %v5842_v19 }
 0x925   : > { %14918 = vmatmul.mubr.bf16.gmra.mrb[140].mxu1 %v5843_v3 }
 0x926   : > { %14937 = vmatprep.mubr.msk.bf16.mxu1 %vm17454_vm0, %v17453_v1 }
 0x92d   : > { %14938 = vmatmul.mubr.bf16.vlgmr.msra.gmra.mrb[108].mxu1 %v19978_v63  ;;  %v17244_v63 = vld [vmem:[%s21843_s28 + $0x458] sm:$0xff]  }
 0x92e   : > { %14974 = vmatpush3.bf16.msra.mxu1 %v17241_v8  ;;  %14941 = vmatprep.mubr.msk.bf16.mxu1 %vm17454_vm0, %v17453_v1 }
 0x92f   : > { %14975 = vmatprep.subr.bf16.mxu1 %v17453_v1 }
 0x932   : > { %14976 = vmatpush3.bf16.msra.mxu1 %v17242_v2 }
 0x933   : > { %14977 = vmatprep.subr.bf16.mxu1 %v17453_v1 }
 0x935   : > { %14942 = vmatmul.mubr.bf16.gmra.mrb[112].mxu1 %v19989_v60  ;;  %v17246_v60 = vld [vmem:[%s21843_s28 + $0x468] sm:$0xff]  }
 0x936   : > { %14945 = vmatprep.mubr.msk.bf16.mxu1 %vm17454_vm0, %v17453_v1  ;;  %14978 = vmatpush3.bf16.msra.mxu1 %v17243_v45 }
 0x937   : > { %14979 = vmatprep.subr.bf16.mxu1 %v17453_v1 }
 0x93a   : > { %14980 = vmatpush3.bf16.msra.mxu1 %v17244_v63 }
 0x93b   : > { %14981 = vmatprep.subr.bf16.mxu1 %v17453_v1 }
 0x93d   : > { %14946 = vmatmul.mubr.bf16.gmra.mrb[116].mxu1 %v20012_v42  ;;  %v17248_v42 = vld [vmem:[%s21843_s28 + $0x478] sm:$0xff]  }
 0x93e   : > { %14949 = vmatprep.mubr.msk.bf16.mxu1 %vm17454_vm0, %v17453_v1  ;;  %14982 = vmatpush3.bf16.msra.mxu1 %v17245_v17 }
 0x93f   : > { %14983 = vmatprep.subr.bf16.mxu1 %v17453_v1 }
 0x942   : > { %14984 = vmatpush3.bf16.msra.mxu1 %v17246_v60 }
 0x943   : > { %14985 = vmatprep.subr.bf16.mxu1 %v17453_v1 }
 0x945   : > { %14950 = vmatmul.mubr.bf16.gmra.mrb[120].mxu1 %v20034_v38  ;;  %v17251_v38 = vld [vmem:[%s21783_s17 + $0x4] ss:$8 sps:$4 sm:$0xff]  }
 0x946   : > { %14953 = vmatprep.mubr.msk.bf16.mxu1 %vm17454_vm0, %v17453_v1  ;;  %14986 = vmatpush3.bf16.msra.mxu1 %v17247_v10 }
 0x947   : > { %14987 = vmatprep.subr.bf16.mxu1 %v17453_v1  ;;  %12673 = vmatprep.mubr.msk.bf16.mxu0 %vm996_vm3, %v17251_v38 }
 0x94a   : > { %14988 = vmatpush3.bf16.msra.mxu1 %v17248_v42 }
 0x94b   : > { %15025 = vmatprep.subr.bf16.mxu1 %v17453_v1 }
 0x94d   : > { %14954 = vmatmul.mubr.bf16.gmra.mrb[124].mxu1 %v20056_v58  ;;  %v17265_v58 = vld [vmem:[%s21847_s7 + $0x8] sm:$0xff]  }
 0x94e   : > { %14957 = vmatprep.mubr.msk.bf16.mxu1 %vm17454_vm0, %v17453_v1 }
 0x955   : > { %14958 = vmatmul.mubr.bf16.gmra.mrb[128].mxu1 %v20075_v57  ;;  %v17267_v57 = vld [vmem:[%s21847_s7 + $0x18] sm:$0xff]  }
 0x956   : > { %14961 = vmatprep.mubr.msk.bf16.mxu1 %vm17454_vm0, %v17453_v1 }
 0x95d   : > { %14962 = vmatmul.mubr.bf16.gmra.mrb[132].mxu1 %v20089_v49  ;;  %v20239_v49 = vld [vmem:[%s21846_s10 + $0x5] ss:$0 sm:$0xff] }
 0x95e   : > { %14965 = vmatprep.mubr.msk.bf16.mxu1 %vm17454_vm0, %v17453_v1 }
 0x965   : > { %14966 = vmatmul.mubr.bf16.gmra.mrb[136].mxu1 %v20103_v16 }
 0x966   : > { %14969 = vmatprep.mubr.msk.bf16.mxu1 %vm17454_vm0, %v17453_v1 }
 0x96d   : > { %14970 = vmatmul.mubr.bf16.gmra.mrb[140].mxu1 %v5770_v24 }
 0x96e   : > { %14989 = vmatprep.mubr.msk.bf16.mxu1 %vm17454_vm0, %v17453_v1 }
 0x975   : > { %14990 = vmatmul.mubr.bf16.vlgmr.msra.gmra.mrb[108].mxu1 %v20009_v46  ;;  %v5889_v46 = vsel %vm18070_vm7, %v20121_v22, 0 }
 0x976   : > { %14993 = vmatprep.mubr.msk.bf16.mxu1 %vm17454_vm0, %v17453_v1 }
 0x97d   : > { %14994 = vmatmul.mubr.bf16.gmra.mrb[112].mxu1 %v20031_v23  ;;  %v17455_v23 = vmov 0  }
 0x97e   : > { %14997 = vmatprep.mubr.msk.bf16.mxu1 %vm17454_vm0, %v17453_v1  ;;  %6539 = vmatprep.subr.bf16.mxu0 %v17455_v23 }
 0x985   : > { %14998 = vmatmul.mubr.bf16.gmra.mrb[116].mxu1 %v20053_v35  ;;  %v17264_v35 = vld [vmem:[%s21847_s7] sm:$0xff]  }
 0x986   : > { %15001 = vmatprep.mubr.msk.bf16.mxu1 %vm17454_vm0, %v17453_v1  ;;  %15026 = vmatpush3.bf16.msra.mxu1 %v17264_v35 }
 0x987   : > { %15027 = vmatprep.subr.bf16.mxu1 %v17453_v1 }
 0x98a   : > { %15028 = vmatpush3.bf16.msra.mxu1 %v17265_v58 }
 0x98b   : > { %15029 = vmatprep.subr.bf16.mxu1 %v17453_v1 }
 0x98d   : > { %15002 = vmatmul.mubr.bf16.gmra.mrb[120].mxu1 %v20072_v39  ;;  %v17266_v39 = vld [vmem:[%s21847_s7 + $0x10] sm:$0xff]  }
 0x98e   : > { %15005 = vmatprep.mubr.msk.bf16.mxu1 %vm17454_vm0, %v17453_v1  ;;  %15030 = vmatpush3.bf16.msra.mxu1 %v17266_v39 }
 0x98f   : > { %15031 = vmatprep.subr.bf16.mxu1 %v17453_v1 }
 0x992   : > { %15032 = vmatpush3.bf16.msra.mxu1 %v17267_v57 }
 0x993   : > { %15033 = vmatprep.subr.bf16.mxu1 %v17453_v1 }
 0x995   : > { %15006 = vmatmul.mubr.bf16.gmra.mrb[124].mxu1 %v20087_v27  ;;  %v17268_v27 = vld [vmem:[%s21847_s7 + $0x20] sm:$0xff]  }
 0x996   : > { %15009 = vmatprep.mubr.msk.bf16.mxu1 %vm17454_vm0, %v17453_v1  ;;  %15034 = vmatpush3.bf16.msra.mxu1 %v17268_v27 }
 0x997   : > { %15035 = vmatprep.subr.bf16.mxu1 %v17453_v1 }
 0x99a   : > { %15036 = vmatpush3.bf16.msra.mxu1 %v17269_v6 }
 0x99b   : > { %15037 = vmatprep.subr.bf16.mxu1 %v17453_v1 }
 0x99d   : > { %15010 = vmatmul.mubr.bf16.gmra.mrb[128].mxu1 %v20101_v30 }
 0x99e   : > { %15013 = vmatprep.mubr.msk.bf16.mxu1 %vm17454_vm0, %v17453_v1  ;;  %15038 = vmatpush3.bf16.msra.mxu1 %v17270_v55 }
 0x99f   : > { %15039 = vmatprep.subr.bf16.mxu1 %v17453_v1 }
 0x9a5   : > { %15014 = vmatmul.mubr.bf16.gmra.mrb[132].mxu1 %v20115_v25 }
 0x9a6   : > { %15017 = vmatprep.mubr.msk.bf16.mxu1 %vm17454_vm0, %v17453_v1 }
 0x9ad   : > { %15018 = vmatmul.mubr.bf16.gmra.mrb[136].mxu1 %v5878_v48 }
 0x9ae   : > { %15021 = vmatprep.mubr.msk.bf16.mxu1 %vm17454_vm0, %v17453_v1 }
 0x9b5   : > { %15022 = vmatmul.mubr.bf16.gmra.mrb[140].mxu1 %v5889_v46 }
 0x9b6   : > { %15041 = vmatprep.mubr.msk.bf16.mxu1 %vm17454_vm0, %v17453_v1 }
 0xa48   : > { %v6353_v32 = vpop.f32.mrb[108].mxu1 }
 0xa49   : > { %v16007_v40 = vadd.f32 %v20239_v49, %v6353_v32  ;;  %v14991_v9 = vpop.f32.mrb[109].mxu1 }
 0xa4a   : > { %v6356_v28 = vpop.f32.mrb[110].mxu1 }
 0xa4b   : > { %v16008_v11 = vadd.f32 %v20239_v49, %v6356_v28  ;;  %v14992_v50 = vpop.f32.mrb[111].mxu1  ;;  %v6442_v36 = vmax.f32 %v16007_v40, 0.0 }
 0xa4d   : > { %v6443_v51 = vmax.f32 %v16008_v11, 0.0 }
 0xa4f   : > { %v6460_v41 = vpack.c.bf16 %v6443_v51, %v6442_v36 }
 0xa50   : > { %v6361_v5 = vpop.f32.mrb[112].mxu1 }
 0xa51   : > { %v16009_v61 = vadd.f32 %v20239_v49, %v6361_v5  ;;  %v14995_v30 = vpop.f32.mrb[113].mxu1  ;;  %6540 = vmatpush1.bf16.msra.mxu0 %v6460_v41 }
 0xa52   : > { %v6364_v20 = vpop.f32.mrb[114].mxu1  ;;  %6541 = vmatprep.subr.bf16.mxu0 %v17455_v23 }
 0xa53   : > { %v16010_v29 = vadd.f32 %v20239_v49, %v6364_v20  ;;  %v14996_v16 = vpop.f32.mrb[115].mxu1  ;;  %v6444_v31 = vmax.f32 %v16009_v61, 0.0 }
 0xa55   : > { %v6445_v12 = vmax.f32 %v16010_v29, 0.0 }
 0xa57   : > { %v6461_v13 = vpack.c.bf16 %v6445_v12, %v6444_v31 }
 0xa58   : > { %v6369_v37 = vpop.f32.mrb[116].mxu1 }
 0xa59   : > { %v16011_v26 = vadd.f32 %v20239_v49, %v6369_v37  ;;  %v14999_v18 = vpop.f32.mrb[117].mxu1  ;;  %6542 = vmatpush1.bf16.msra.mxu0 %v6461_v13 }
 0xa5a   : > { %v6372_v34 = vpop.f32.mrb[118].mxu1  ;;  %6543 = vmatprep.subr.bf16.mxu0 %v17455_v23 }
 0xa5b   : > { %v16012_v44 = vadd.f32 %v20239_v49, %v6372_v34  ;;  %v15000_v53 = vpop.f32.mrb[119].mxu1  ;;  %v6446_v15 = vmax.f32 %v16011_v26, 0.0 }
 0xa5c   : > { %v17252_v53 = vld [vmem:[%s21783_s17 + $0x14] ss:$8 sps:$4 sm:$0xff]  }
 0xa5d   : > { %v6447_v33 = vmax.f32 %v16012_v44, 0.0  ;;  %v17249_v44 = vld [vmem:[%s21783_s17] ss:$8 sps:$4 sm:$0xff]  }
 0xa5f   : > { %v6462_v62 = vpack.c.bf16 %v6447_v33, %v6446_v15  ;;  %v17257_v15 = vld [vmem:[%s21783_s17 + $0x20] ss:$8 sps:$4 sm:$0xff]   ;;  %v17258_v33 = vld [vmem:[%s21783_s17 + $0x34] ss:$8 sps:$4 sm:$0xff]  }
 0xa60   : > { %v6377_v0 = vpop.f32.mrb[120].mxu1 }
 0xa61   : > { %v16013_v54 = vadd.f32 %v20239_v49, %v6377_v0  ;;  %v15003_v52 = vpop.f32.mrb[121].mxu1  ;;  %6544 = vmatpush1.bf16.msra.mxu0 %v6462_v62  ;;  %v17260_v62 = vld [vmem:[%s21783_s17 + $0x30] ss:$8 sps:$4 sm:$0xff]   ;;  %v17261_v0 = vld [vmem:[%s21783_s17 + $0x44] ss:$8 sps:$4 sm:$0xff]  }
 0xa62   : > { %v6380_v25 = vpop.f32.mrb[122].mxu1  ;;  %6545 = vmatprep.subr.bf16.mxu0 %v17455_v23  ;;  %v17271_v52 = vld [vmem:[%s21847_s7 + $0x38] sm:$0xff]  }
 0xa63   : > { %v16014_v7 = vadd.f32 %v20239_v49, %v6380_v25  ;;  %v15004_v24 = vpop.f32.mrb[123].mxu1  ;;  %v6448_v21 = vmax.f32 %v16013_v54, 0.0  ;;  %v17263_v54 = vld [vmem:[%s21783_s17 + $0x40] ss:$8 sps:$4 sm:$0xff]   ;;  %15040 = vmatpush3.bf16.msra.mxu1 %v17271_v52 }
 0xa64   : > { %15061 = vmatprep.subr.bf16.mxu1 %v17453_v1  ;;  %v17288_v25 = vld [vmem:[%s21848_s2] sm:$0xff]  }
 0xa65   : > { %v6449_v59 = vmax.f32 %v16014_v7, 0.0  ;;  %v17289_v7 = vld [vmem:[%s21848_s2 + $0x8] sm:$0xff]  }
 0xa67   : > { %v6463_v47 = vpack.c.bf16 %v6449_v59, %v6448_v21 }
 0xa68   : > { %v6385_v43 = vpop.f32.mrb[124].mxu1 }
 0xa69   : > { %v16015_v56 = vadd.f32 %v20239_v49, %v6385_v43  ;;  %v15007_v19 = vpop.f32.mrb[125].mxu1  ;;  %6546 = vmatpush1.bf16.msra.mxu0 %v6463_v47 }
 0xa6a   : > { %v6388_v48 = vpop.f32.mrb[126].mxu1  ;;  %6547 = vmatprep.subr.bf16.mxu0 %v17455_v23 }
 0xa6b   : > { %v16016_v22 = vadd.f32 %v20239_v49, %v6388_v48  ;;  %v15008_v3 = vpop.f32.mrb[127].mxu1  ;;  %v6450_v8 = vmax.f32 %v16015_v56, 0.0 }
 0xa6d   : > { %v6451_v2 = vmax.f32 %v16016_v22, 0.0 }
 0xa6f   : > { %v6464_v45 = vpack.c.bf16 %v6451_v2, %v6450_v8 }
 0xa70   : > { %v6393_v63 = vpop.f32.mrb[128].mxu1 }
 0xa71   : > { %v16017_v17 = vadd.f32 %v20239_v49, %v6393_v63  ;;  %v15011_v60 = vpop.f32.mrb[129].mxu1  ;;  %6548 = vmatpush1.bf16.msra.mxu0 %v6464_v45  ;;  %v17272_v63 = vld [vmem:[%s21847_s7 + $0x40] sm:$0xff]  }
 0xa72   : > { %v6396_v10 = vpop.f32.mrb[130].mxu1  ;;  %6549 = vmatprep.subr.bf16.mxu0 %v17455_v23 }
 0xa73   : > { %v16018_v42 = vadd.f32 %v20239_v49, %v6396_v10  ;;  %v15012_v46 = vpop.f32.mrb[131].mxu1  ;;  %v6452_v38 = vmax.f32 %v16017_v17, 0.0 }
 0xa75   : > { %v6453_v35 = vmax.f32 %v16018_v42, 0.0 }
 0xa77   : > { %v6465_v58 = vpack.c.bf16 %v6453_v35, %v6452_v38  ;;  %v17273_v35 = vld [vmem:[%s21847_s7 + $0x48] sm:$0xff]  }
 0xa78   : > { %v6401_v39 = vpop.f32.mrb[132].mxu1 }
 0xa79   : > { %v16019_v57 = vadd.f32 %v20239_v49, %v6401_v39  ;;  %v15015_v27 = vpop.f32.mrb[133].mxu1  ;;  %6550 = vmatpush1.bf16.msra.mxu0 %v6465_v58 }
 0xa7a   : > { %v6404_v6 = vpop.f32.mrb[134].mxu1  ;;  %6551 = vmatprep.subr.bf16.mxu0 %v17455_v23 }
 0xa7b   : > { %v16020_v32 = vadd.f32 %v20239_v49, %v6404_v6  ;;  %v15016_v40 = vpop.f32.mrb[135].mxu1  ;;  %v6454_v9 = vmax.f32 %v16019_v57, 0.0 }
 0xa7d   : > { %v6455_v28 = vmax.f32 %v16020_v32, 0.0  ;;  %v17274_v32 = vld [vmem:[%s21847_s7 + $0x50] sm:$0xff]  }
 0xa7f   : > { %v6466_v55 = vpack.c.bf16 %v6455_v28, %v6454_v9 }
 0xa80   : > { %v6409_v11 = vpop.f32.mrb[136].mxu1 }
 0xa81   : > { %v16021_v50 = vadd.f32 %v20239_v49, %v6409_v11  ;;  %v15019_v36 = vpop.f32.mrb[137].mxu1  ;;  %6552 = vmatpush1.bf16.msra.mxu0 %v6466_v55 }
 0xa82   : > { %v6412_v51 = vpop.f32.mrb[138].mxu1  ;;  %6553 = vmatprep.subr.bf16.mxu0 %v17455_v23 }
 0xa83   : > { %v16022_v41 = vadd.f32 %v20239_v49, %v6412_v51  ;;  %v15020_v5 = vpop.f32.mrb[139].mxu1  ;;  %v6456_v61 = vmax.f32 %v16021_v50, 0.0 }
 0xa85   : > { %v6457_v30 = vmax.f32 %v16022_v41, 0.0  ;;  %v17275_v41 = vld [vmem:[%s21847_s7 + $0x58] sm:$0xff]  }
 0xa87   : > { %v6467_v20 = vpack.c.bf16 %v6457_v30, %v6456_v61 }
 0xa88   : > { %v6417_v29 = vpop.f32.mrb[140].mxu1 }
 0xa89   : > { %v16023_v16 = vadd.f32 %v20239_v49, %v6417_v29  ;;  %v15023_v31 = vpop.f32.mrb[141].mxu1  ;;  %6554 = vmatpush1.bf16.msra.mxu0 %v6467_v20 }
 0xa8a   : > { %v6420_v12 = vpop.f32.mrb[142].mxu1  ;;  %6555 = vmatprep.subr.bf16.mxu0 %v17455_v23  ;;  %v17254_v23 = vld [vmem:[%s21783_s17 + $0x10] ss:$8 sps:$4 sm:$0xff]  }
 0xa8b   : > { %v16024_v13 = vadd.f32 %v20239_v49, %v6420_v12  ;;  %v15024_v37 = vpop.f32.mrb[143].mxu1  ;;  %v6458_v26 = vmax.f32 %v16023_v16, 0.0  ;;  %v17255_v49 = vld [vmem:[%s21783_s17 + $0x24] ss:$8 sps:$4 sm:$0xff]  }
 0xa8c   : > { %v17276_v16 = vld [vmem:[%s21847_s7 + $0x60] sm:$0xff]  }
 0xa8d   : > { %v6459_v18 = vmax.f32 %v16024_v13, 0.0 }
 0xa8f   : > { %v6468_v34 = vpack.c.bf16 %v6459_v18, %v6458_v26 }
 0xa91   : > { %6556 = vmatpush1.bf16.msra.mxu0 %v6468_v34 }
 0xa92   : > { %15133 = vmatprep.subr.bf16.mxu0 %v17453_v1 }
 0xa94   : > { %6572 = vmatmul.mubr.bf16.vlgmr.msra.gmra.mrb[144].mxu0 %v17249_v44 }
 0xa95   : > { %12674 = vmatprep.mubr.msk.bf16.mxu0 %vm996_vm3, %v17252_v53  ;;  %15134 = vmatpush3.bf16.msra.mxu0 %v17288_v25  ;;  %v17277_v53 = vld [vmem:[%s21847_s7 + $0x68] sm:$0xff]  }
 0xa96   : > { %15135 = vmatprep.subr.bf16.mxu0 %v17453_v1 }
 0xa99   : > { %15136 = vmatpush3.bf16.msra.mxu0 %v17289_v7 }
 0xa9a   : > { %15137 = vmatprep.subr.bf16.mxu0 %v17453_v1 }
 0xa9c   : > { %6580 = vmatmul.mubr.bf16.gmra.mrb[148].mxu0 %v17254_v23 }
 0xa9d   : > { %12675 = vmatprep.mubr.msk.bf16.mxu0 %vm996_vm3, %v17255_v49 }
 0xaa4   : > { %6588 = vmatmul.mubr.bf16.gmra.mrb[152].mxu0 %v17257_v15 }
 0xaa5   : > { %12676 = vmatprep.mubr.msk.bf16.mxu0 %vm996_vm3, %v17258_v33 }
 0xaac   : > { %6596 = vmatmul.mubr.bf16.gmra.mrb[156].mxu0 %v17260_v62 }
 0xaad   : > { %12677 = vmatprep.mubr.msk.bf16.mxu0 %vm996_vm3, %v17261_v0  ;;  %v17278_v0 = vld [vmem:[%s21847_s7 + $0x70] sm:$0xff]  }
 0xab4   : > { %6604 = vmatmul.mubr.bf16.gmra.mrb[160].mxu0 %v17263_v54 }
 0xab5   : > { %15141 = vmatprep.mubr.msk.bf16.mxu0 %vm17454_vm0, %v17453_v1 }
 0xb67   : > { %v6573_v24 = vpop.f32.mrb[144].mxu0 }
 0xb68   : > { %v6575_v21 = vpop.f32.mrb[145].mxu0 }
 0xb69   : > { %v6576_v59 = vpop.f32.mrb[146].mxu0 }
 0xb6a   : > { %v20321_v47 = vpack.c.bf16 %v6576_v59, %v6573_v24  ;;  %v6578_v43 = vpop.f32.mrb[147].mxu0 }
 0xb6c   : > { %v6619_v56 = vshrl.u32 %v20321_v47, 16  ;;  %v6622_v19 = vshll.u32 %v20321_v47, 16 }
 0xb6e   : > { %v6621_v48 = vrot.slane %v6619_v56, 7  ;;  %v6663_v22 = vrot.slane %v6622_v19, 1 }
 0xb6f   : > { %v6581_v3 = vpop.f32.mrb[148].mxu0 }
 0xb70   : > { %v6624_v8 = vor.u32 %v6622_v19, %v6621_v48  ;;  %v6664_v2 = vor.u32 %v6663_v22, %v6619_v56  ;;  %v6583_v45 = vpop.f32.mrb[149].mxu0  ;;  %v17279_v56 = vld [vmem:[%s21847_s7 + $0x78] sm:$0xff]  }
 0xb71   : > { %v6584_v17 = vpop.f32.mrb[150].mxu0  ;;  %v17280_v45 = vld [vmem:[%s21847_s7 + $0x80] sm:$0xff]  }
 0xb72   : > { %v20329_v60 = vpack.c.bf16 %v6584_v17, %v6581_v3  ;;  %v6586_v10 = vpop.f32.mrb[151].mxu0  ;;  %v6662_v42 = vsel %vm17646_vm4, 0, %v6624_v8  ;;  %v17282_v17 = vld [vmem:[%s21847_s7 + $0x90] sm:$0xff]  }
 0xb73   : > { %15042 = vmatmul.mubr.bf16.vlgmr.msra.gmra.mrb[144].mxu1 %v6662_v42  ;;  %v17284_v10 = vld [vmem:[%s21847_s7 + $0xa0] sm:$0xff]   ;;  %v17286_v42 = vld [vmem:[%s21847_s7 + $0xb0] sm:$0xff]  }
 0xb74   : > { %v6626_v46 = vshrl.u32 %v20329_v60, 16  ;;  %v6629_v38 = vshll.u32 %v20329_v60, 16  ;;  %15062 = vmatpush3.bf16.msra.mxu1 %v17272_v63  ;;  %15045 = vmatprep.mubr.msk.bf16.mxu1 %vm17454_vm0, %v17453_v1  ;;  %v17281_v63 = vld [vmem:[%s21847_s7 + $0x88] sm:$0xff]  }
 0xb75   : > { %15063 = vmatprep.subr.bf16.mxu1 %v17453_v1 }
 0xb76   : > { %v6628_v58 = vrot.slane %v6626_v46, 7  ;;  %v6665_v39 = vrot.slane %v6629_v38, 1 }
 0xb77   : > { %v6589_v57 = vpop.f32.mrb[152].mxu0 }
 0xb78   : > { %v6591_v27 = vpop.f32.mrb[153].mxu0  ;;  %v6631_v6 = vor.u32 %v6629_v38, %v6628_v58  ;;  %15064 = vmatpush3.bf16.msra.mxu1 %v17273_v35  ;;  %v20345_v40 = vsel %vm951_vm5, %v6664_v2, %v6665_v39  ;;  %v6667_v9 = vor.u32 %v6665_v39, %v6626_v46  ;;  %v17287_v46 = vld [vmem:[%s21847_s7 + $0xb8] sm:$0xff]   ;;  %v17290_v35 = vld [vmem:[%s21848_s2 + $0x10] sm:$0xff]   ;;  %v20465_v39 = vld [vmem:[%s21849_s30] ss:$0 sm:$0xff] }
 0xb79   : > { %v6592_v28 = vpop.f32.mrb[154].mxu0  ;;  %15065 = vmatprep.subr.bf16.mxu1 %v17453_v1  ;;  %15138 = vmatpush3.bf16.msra.mxu0 %v17290_v35 }
 0xb7a   : > { %v20348_v55 = vpack.c.bf16 %v6592_v28, %v6589_v57  ;;  %v6594_v11 = vpop.f32.mrb[155].mxu0  ;;  %v6632_v50 = vsel %vm875_vm1, %v6621_v48, %v6631_v6  ;;  %15139 = vmatprep.subr.bf16.mxu0 %v17453_v1 }
 0xb7b   : > { %15046 = vmatmul.mubr.bf16.gmra.mrb[148].mxu1 %v6632_v50  ;;  %v20475_v11 = vld [vmem:[%s21787_s21] sm:$0xff]  ;;  %v20480_v50 = vld [vmem:[%s21787_s21 + $0x8] sm:$0xff] }
 0xb7c   : > { %v6634_v36 = vshrl.u32 %v20348_v55, 16  ;;  %v6637_v51 = vshll.u32 %v20348_v55, 16  ;;  %15049 = vmatprep.mubr.msk.bf16.mxu1 %vm17454_vm0, %v17453_v1  ;;  %15066 = vmatpush3.bf16.msra.mxu1 %v17274_v32 }
 0xb7d   : > { %15067 = vmatprep.subr.bf16.mxu1 %v17453_v1 }
 0xb7e   : > { %v6636_v5 = vrot.slane %v6634_v36, 7  ;;  %v6668_v61 = vrot.slane %v6637_v51, 1 }
 0xb7f   : > { %v6597_v30 = vpop.f32.mrb[156].mxu0 }
 0xb80   : > { %v6599_v20 = vpop.f32.mrb[157].mxu0  ;;  %v6639_v29 = vor.u32 %v6637_v51, %v6636_v5  ;;  %15068 = vmatpush3.bf16.msra.mxu1 %v17275_v41  ;;  %v20363_v31 = vsel %vm951_vm5, %v6667_v9, %v6668_v61  ;;  %v6670_v12 = vor.u32 %v6668_v61, %v6634_v36  ;;  %v17301_v36 = vld [vmem:[%s21848_s2 + $0x68] sm:$0xff]  }
 0xb81   : > { %v6600_v13 = vpop.f32.mrb[158].mxu0  ;;  %15069 = vmatprep.subr.bf16.mxu1 %v17453_v1 }
 0xb82   : > { %v20366_v37 = vpack.c.bf16 %v6600_v13, %v6597_v30  ;;  %v6602_v26 = vpop.f32.mrb[159].mxu0  ;;  %v6640_v18 = vsel %vm875_vm1, %v6628_v58, %v6639_v29  ;;  %v17291_v58 = vld [vmem:[%s21848_s2 + $0x18] sm:$0xff]  }
 0xb83   : > { %15050 = vmatmul.mubr.bf16.gmra.mrb[152].mxu1 %v6640_v18  ;;  %15140 = vmatpush3.bf16.msra.mxu0 %v17291_v58  ;;  %v20498_v18 = vld [vmem:[%s21787_s21 + $0x10] sm:$0xff] }
 0xb84   : > { %v6642_v34 = vshrl.u32 %v20366_v37, 16  ;;  %v6645_v44 = vshll.u32 %v20366_v37, 16  ;;  %15053 = vmatprep.mubr.msk.bf16.mxu1 %vm17454_vm0, %v17453_v1  ;;  %15070 = vmatpush3.bf16.msra.mxu1 %v17276_v16 }
 0xb85   : > { %15071 = vmatprep.subr.bf16.mxu1 %v17453_v1  ;;  %15161 = vmatprep.subr.bf16.mxu0 %v17453_v1 }
 0xb86   : > { %v6644_v23 = vrot.slane %v6642_v34, 7  ;;  %v6671_v49 = vrot.slane %v6645_v44, 1 }
 0xb87   : > { %v6605_v15 = vpop.f32.mrb[160].mxu0 }
 0xb88   : > { %v6607_v33 = vpop.f32.mrb[161].mxu0  ;;  %v6647_v62 = vor.u32 %v6645_v44, %v6644_v23  ;;  %15072 = vmatpush3.bf16.msra.mxu1 %v17277_v53  ;;  %v6672_v54 = vsel %vm951_vm5, %v6670_v12, %v6671_v49  ;;  %v6673_v52 = vor.u32 %v6671_v49, %v6642_v34  ;;  %v20503_v34 = vld [vmem:[%s21787_s21 + $0x18] sm:$0xff] }
 0xb89   : > { %v6608_v25 = vpop.f32.mrb[162].mxu0  ;;  %15073 = vmatprep.subr.bf16.mxu1 %v17453_v1 }
 0xb8a   : > { %v6616_v7 = vpack.c.bf16 %v6608_v25, %v6605_v15  ;;  %v6610_v24 = vpop.f32.mrb[163].mxu0  ;;  %v6648_v21 = vsel %vm875_vm1, %v6636_v5, %v6647_v62 }
 0xb8b   : > { %15054 = vmatmul.mubr.bf16.gmra.mrb[156].mxu1 %v6648_v21 }
 0xb8c   : > { %v6650_v59 = vshrl.u32 %v6616_v7, 16  ;;  %v6653_v43 = vshll.u32 %v6616_v7, 16  ;;  %15057 = vmatprep.mubr.msk.bf16.mxu1 %vm17454_vm0, %v17453_v1  ;;  %15074 = vmatpush3.bf16.msra.mxu1 %v17278_v0  ;;  %v17292_v0 = vld [vmem:[%s21848_s2 + $0x20] sm:$0xff]  }
 0xb8d   : > { %15075 = vmatprep.subr.bf16.mxu1 %v17453_v1 }
 0xb8e   : > { %v6652_v19 = vrot.slane %v6650_v59, 7  ;;  %v6674_v48 = vrot.slane %v6653_v43, 1 }
 0xb90   : > { %v6655_v22 = vor.u32 %v6653_v43, %v6652_v19  ;;  %15076 = vmatpush3.bf16.msra.mxu1 %v17279_v56  ;;  %v6675_v3 = vsel %vm951_vm5, %v6673_v52, %v6674_v48  ;;  %v6676_v8 = vor.u32 %v6674_v48, %v6650_v59  ;;  %v20521_v19 = vld [vmem:[%s21787_s21 + $0x20] sm:$0xff] }
 0xb91   : > { %15097 = vmatprep.subr.bf16.mxu1 %v17453_v1 }
 0xb92   : > { %v6656_v2 = vsel %vm875_vm1, %v6644_v23, %v6655_v22  ;;  %v6682_v38 = vsel %vm18070_vm7, %v6676_v8, 0  ;;  %v20532_v8 = vld [vmem:[%s21787_s21 + $0x28] sm:$0xff] }
 0xb93   : > { %15058 = vmatmul.mubr.bf16.gmra.mrb[160].mxu1 %v6656_v2 }
 0xb94   : > { %15077 = vmatprep.mubr.msk.bf16.mxu1 %vm17454_vm0, %v17453_v1 }
 0xb9b   : > { %15078 = vmatmul.mubr.bf16.vlgmr.msra.gmra.mrb[144].mxu1 %v20321_v47  ;;  %v17283_v47 = vld [vmem:[%s21847_s7 + $0x98] sm:$0xff]  }
 0xb9c   : > { %15098 = vmatpush3.bf16.msra.mxu1 %v17280_v45  ;;  %15081 = vmatprep.mubr.msk.bf16.mxu1 %vm17454_vm0, %v17453_v1 }
 0xb9d   : > { %15099 = vmatprep.subr.bf16.mxu1 %v17453_v1 }
 0xba0   : > { %15100 = vmatpush3.bf16.msra.mxu1 %v17281_v63 }
 0xba1   : > { %15101 = vmatprep.subr.bf16.mxu1 %v17453_v1 }
 0xba3   : > { %15082 = vmatmul.mubr.bf16.gmra.mrb[148].mxu1 %v20329_v60  ;;  %v17285_v60 = vld [vmem:[%s21847_s7 + $0xa8] sm:$0xff]  }
 0xba4   : > { %15085 = vmatprep.mubr.msk.bf16.mxu1 %vm17454_vm0, %v17453_v1  ;;  %15102 = vmatpush3.bf16.msra.mxu1 %v17282_v17 }
 0xba5   : > { %15103 = vmatprep.subr.bf16.mxu1 %v17453_v1 }
 0xba8   : > { %15104 = vmatpush3.bf16.msra.mxu1 %v17283_v47 }
 0xba9   : > { %15105 = vmatprep.subr.bf16.mxu1 %v17453_v1 }
 0xbab   : > { %15086 = vmatmul.mubr.bf16.gmra.mrb[152].mxu1 %v20348_v55 }
 0xbac   : > { %15089 = vmatprep.mubr.msk.bf16.mxu1 %vm17454_vm0, %v17453_v1  ;;  %15106 = vmatpush3.bf16.msra.mxu1 %v17284_v10 }
 0xbad   : > { %15107 = vmatprep.subr.bf16.mxu1 %v17453_v1 }
 0xbb0   : > { %15108 = vmatpush3.bf16.msra.mxu1 %v17285_v60  ;;  %v17294_v60 = vld [vmem:[%s21848_s2 + $0x30] sm:$0xff]  }
 0xbb1   : > { %15109 = vmatprep.subr.bf16.mxu1 %v17453_v1 }
 0xbb3   : > { %15090 = vmatmul.mubr.bf16.gmra.mrb[156].mxu1 %v20366_v37 }
 0xbb4   : > { %15093 = vmatprep.mubr.msk.bf16.mxu1 %vm17454_vm0, %v17453_v1  ;;  %15110 = vmatpush3.bf16.msra.mxu1 %v17286_v42 }
 0xbb5   : > { %15111 = vmatprep.subr.bf16.mxu1 %v17453_v1 }
 0xbb8   : > { %15112 = vmatpush3.bf16.msra.mxu1 %v17287_v46 }
 0xbb9   : > { %15217 = vmatprep.subr.bf16.mxu1 %v17453_v1 }
 0xbbb   : > { %15094 = vmatmul.mubr.bf16.gmra.mrb[160].mxu1 %v6616_v7 }
 0xbbc   : > { %15113 = vmatprep.mubr.msk.bf16.mxu1 %vm17454_vm0, %v17453_v1 }
 0xbc3   : > { %15114 = vmatmul.mubr.bf16.vlgmr.msra.gmra.mrb[144].mxu1 %v20345_v40  ;;  %v17300_v40 = vld [vmem:[%s21848_s2 + $0x60] sm:$0xff]  }
 0xbc4   : > { %15117 = vmatprep.mubr.msk.bf16.mxu1 %vm17454_vm0, %v17453_v1  ;;  %15218 = vmatpush3.bf16.msra.mxu1 %v17300_v40 }
 0xbc5   : > { %15219 = vmatprep.subr.bf16.mxu1 %v17453_v1 }
 0xbc8   : > { %15220 = vmatpush3.bf16.msra.mxu1 %v17301_v36 }
 0xbc9   : > { %15221 = vmatprep.subr.bf16.mxu1 %v17453_v1 }
 0xbcb   : > { %15118 = vmatmul.mubr.bf16.gmra.mrb[148].mxu1 %v20363_v31 }
 0xbcc   : > { %15121 = vmatprep.mubr.msk.bf16.mxu1 %vm17454_vm0, %v17453_v1 }
 0xbd3   : > { %15122 = vmatmul.mubr.bf16.gmra.mrb[152].mxu1 %v6672_v54 }
 0xbd4   : > { %15125 = vmatprep.mubr.msk.bf16.mxu1 %vm17454_vm0, %v17453_v1 }
 0xbdb   : > { %15126 = vmatmul.mubr.bf16.gmra.mrb[156].mxu1 %v6675_v3  ;;  %v17293_v3 = vld [vmem:[%s21848_s2 + $0x28] sm:$0xff]  }
 0xbdc   : > { %15129 = vmatprep.mubr.msk.bf16.mxu1 %vm17454_vm0, %v17453_v1 }
 0xbe3   : > { %15130 = vmatmul.mubr.bf16.gmra.mrb[160].mxu1 %v6682_v38 }
 0xbe4   : > { %15225 = vmatprep.mubr.msk.bf16.mxu1 %vm17454_vm0, %v17453_v1 }
 0xc96   : > { %v7073_v57 = vpop.f32.mrb[144].mxu1 }
 0xc97   : > { %v16025_v27 = vadd.f32 %v20465_v39, %v7073_v57  ;;  %v15115_v6 = vpop.f32.mrb[145].mxu1 }
 0xc98   : > { %v7076_v32 = vpop.f32.mrb[146].mxu1 }
 0xc99   : > { %v7122_v9 = vmax.f32 %v16025_v27, 0.0  ;;  %v16026_v28 = vadd.f32 %v20465_v39, %v7076_v32  ;;  %v15116_v55 = vpop.f32.mrb[147].mxu1 }
 0xc9b   : > { %v7123_v51 = vmax.f32 %v16026_v28, 0.0  ;;  %v7142_v41 = vmul.f32 %v20475_v11, %v7122_v9  ;;  %v20554_v28 = vld [vmem:[%s21787_s21 + $0x30] sm:$0xff] }
 0xc9d   : > { %v7143_v5 = vmul.f32 %v20480_v50, %v7123_v51  ;;  %v17295_v51 = vld [vmem:[%s21848_s2 + $0x38] sm:$0xff]  }
 0xc9e   : > { %v7081_v61 = vpop.f32.mrb[148].mxu1 }
 0xc9f   : > { %v20488_v30 = vpack.c.bf16 %v7143_v5, %v7142_v41  ;;  %v16027_v20 = vadd.f32 %v20465_v39, %v7081_v61  ;;  %v15119_v29 = vpop.f32.mrb[149].mxu1  ;;  %v20565_v41 = vld [vmem:[%s21787_s21 + $0x38] sm:$0xff] }
 0xca0   : > { %v7084_v16 = vpop.f32.mrb[150].mxu1 }
 0xca1   : > { %v7160_v31 = vshrl.u32 %v20488_v30, 16  ;;  %v7163_v12 = vshll.u32 %v20488_v30, 16  ;;  %v7124_v13 = vmax.f32 %v16027_v20, 0.0  ;;  %v16028_v37 = vadd.f32 %v20465_v39, %v7084_v16  ;;  %v15120_v26 = vpop.f32.mrb[151].mxu1 }
 0xca3   : > { %v7162_v44 = vrot.slane %v7160_v31, 7  ;;  %v7200_v53 = vrot.slane %v7163_v12, 1  ;;  %v7125_v23 = vmax.f32 %v16028_v37, 0.0  ;;  %v7144_v15 = vmul.f32 %v20498_v18, %v7124_v13 }
 0xca5   : > { %v7201_v49 = vor.u32 %v7200_v53, %v7160_v31  ;;  %v7145_v33 = vmul.f32 %v20503_v34, %v7125_v23  ;;  %v7165_v62 = vor.u32 %v7163_v12, %v7162_v44 }
 0xca6   : > { %v7089_v54 = vpop.f32.mrb[152].mxu1 }
 0xca7   : > { %v20510_v52 = vpack.c.bf16 %v7145_v33, %v7144_v15  ;;  %v16029_v25 = vadd.f32 %v20465_v39, %v7089_v54  ;;  %v15123_v7 = vpop.f32.mrb[153].mxu1  ;;  %v7199_v24 = vsel %vm17646_vm4, 0, %v7165_v62 }
 0xca8   : > { %v7092_v21 = vpop.f32.mrb[154].mxu1  ;;  %15142 = vmatmul.mubr.msk.bf16.vlgmr.msra.gmra.mrb[164].mxu0 %vm7254_vm8, %v7199_v24  ;;  %v20588_v7 = vld [vmem:[%s21787_s21 + $0x48] sm:$0xff] }
 0xca9   : > { %v7167_v59 = vshrl.u32 %v20510_v52, 16  ;;  %v7170_v43 = vshll.u32 %v20510_v52, 16  ;;  %v7126_v56 = vmax.f32 %v16029_v25, 0.0  ;;  %v16030_v48 = vadd.f32 %v20465_v39, %v7092_v21  ;;  %v15124_v22 = vpop.f32.mrb[155].mxu1  ;;  %15162 = vmatpush3.bf16.msra.mxu0 %v17292_v0  ;;  %15145 = vmatprep.mubr.msk.bf16.mxu0 %vm17454_vm0, %v17453_v1  ;;  %v20580_v0 = vld [vmem:[%s21787_s21 + $0x40] sm:$0xff] }
 0xcaa   : > { %15163 = vmatprep.subr.bf16.mxu0 %v17453_v1 }
 0xcab   : > { %v7202_v2 = vrot.slane %v7170_v43, 1  ;;  %v7127_v45 = vmax.f32 %v16030_v48, 0.0  ;;  %v7169_v63 = vrot.slane %v7167_v59, 7  ;;  %v7146_v17 = vmul.f32 %v20521_v19, %v7126_v56 }
 0xcad   : > { %v7147_v47 = vmul.f32 %v20532_v8, %v7127_v45  ;;  %v7172_v10 = vor.u32 %v7170_v43, %v7169_v63  ;;  %15164 = vmatpush3.bf16.msra.mxu0 %v17293_v3  ;;  %v20541_v42 = vsel %vm951_vm5, %v7201_v49, %v7202_v2  ;;  %v7204_v46 = vor.u32 %v7202_v2, %v7167_v59 }
 0xcae   : > { %v7097_v38 = vpop.f32.mrb[156].mxu1  ;;  %15165 = vmatprep.subr.bf16.mxu0 %v17453_v1 }
 0xcaf   : > { %v20544_v35 = vpack.c.bf16 %v7147_v47, %v7146_v17  ;;  %v16031_v58 = vadd.f32 %v20465_v39, %v7097_v38  ;;  %v15127_v57 = vpop.f32.mrb[157].mxu1  ;;  %v7173_v27 = vsel %vm875_vm1, %v7162_v44, %v7172_v10 }
 0xcb0   : > { %v7100_v6 = vpop.f32.mrb[158].mxu1  ;;  %15146 = vmatmul.mubr.msk.bf16.gmra.mrb[168].mxu0 %vm7254_vm8, %v7173_v27  ;;  %v17297_v57 = vld [vmem:[%s21848_s2 + $0x48] sm:$0xff]   ;;  %v17298_v27 = vld [vmem:[%s21848_s2 + $0x50] sm:$0xff]  }
 0xcb1   : > { %v7175_v32 = vshrl.u32 %v20544_v35, 16  ;;  %v7178_v40 = vshll.u32 %v20544_v35, 16  ;;  %v7128_v9 = vmax.f32 %v16031_v58, 0.0  ;;  %v16032_v55 = vadd.f32 %v20465_v39, %v7100_v6  ;;  %v15128_v36 = vpop.f32.mrb[159].mxu1  ;;  %15149 = vmatprep.mubr.msk.bf16.mxu0 %vm17454_vm0, %v17453_v1  ;;  %15166 = vmatpush3.bf16.msra.mxu0 %v17294_v60  ;;  %v17296_v58 = vld [vmem:[%s21848_s2 + $0x40] sm:$0xff]  }
 0xcb2   : > { %15167 = vmatprep.subr.bf16.mxu0 %v17453_v1  ;;  %v20666_v6 = vld [vmem:[%s21849_s30 + $0x1] ss:$0 sm:$0xff] }
 0xcb3   : > { %v7129_v5 = vmax.f32 %v16032_v55, 0.0  ;;  %v7177_v61 = vrot.slane %v7175_v32, 7  ;;  %v7205_v20 = vrot.slane %v7178_v40, 1  ;;  %v7148_v29 = vmul.f32 %v20554_v28, %v7128_v9  ;;  %v17312_v36 = vld [vmem:[%s21848_s2 + $0xc0] sm:$0xff]  }
 0xcb5   : > { %v7149_v16 = vmul.f32 %v20565_v41, %v7129_v5  ;;  %v7180_v31 = vor.u32 %v7178_v40, %v7177_v61  ;;  %15168 = vmatpush3.bf16.msra.mxu0 %v17295_v51  ;;  %v20571_v12 = vsel %vm951_vm5, %v7204_v46, %v7205_v20  ;;  %v7207_v13 = vor.u32 %v7205_v20, %v7175_v32  ;;  %v17313_v20 = vld [vmem:[%s21848_s2 + $0xc8] sm:$0xff]  }
 0xcb6   : > { %v7105_v37 = vpop.f32.mrb[160].mxu1  ;;  %15189 = vmatprep.subr.bf16.mxu0 %v17453_v1 }
 0xcb7   : > { %v7155_v26 = vpack.c.bf16 %v7149_v16, %v7148_v29  ;;  %v16033_v44 = vadd.f32 %v20465_v39, %v7105_v37  ;;  %v15131_v53 = vpop.f32.mrb[161].mxu1  ;;  %v7181_v23 = vsel %vm875_vm1, %v7169_v63, %v7180_v31 }
 0xcb8   : > { %v7108_v49 = vpop.f32.mrb[162].mxu1  ;;  %15150 = vmatmul.mubr.msk.bf16.gmra.mrb[172].mxu0 %vm7254_vm8, %v7181_v23 }
 0xcb9   : > { %v7183_v15 = vshrl.u32 %v7155_v26, 16  ;;  %v7186_v33 = vshll.u32 %v7155_v26, 16  ;;  %v7130_v62 = vmax.f32 %v16033_v44, 0.0  ;;  %v16034_v54 = vadd.f32 %v20465_v39, %v7108_v49  ;;  %v15132_v25 = vpop.f32.mrb[163].mxu1  ;;  %15153 = vmatprep.mubr.msk.bf16.mxu0 %vm17454_vm0, %v17453_v1 }
 0xcbb   : > { %v7131_v24 = vmax.f32 %v16034_v54, 0.0  ;;  %v7185_v21 = vrot.slane %v7183_v15, 7  ;;  %v7208_v59 = vrot.slane %v7186_v33, 1  ;;  %v7150_v43 = vmul.f32 %v20580_v0, %v7130_v62 }
 0xcbd   : > { %v7151_v56 = vmul.f32 %v20588_v7, %v7131_v24  ;;  %v7188_v48 = vor.u32 %v7186_v33, %v7185_v21  ;;  %v7209_v22 = vsel %vm951_vm5, %v7207_v13, %v7208_v59  ;;  %v7210_v39 = vor.u32 %v7208_v59, %v7183_v15 }
 0xcbf   : > { %v7156_v3 = vpack.c.bf16 %v7151_v56, %v7150_v43  ;;  %v7189_v2 = vsel %vm875_vm1, %v7177_v61, %v7188_v48  ;;  %v17304_v56 = vld [vmem:[%s21848_s2 + $0x80] sm:$0xff]  }
 0xcc0   : > { %15154 = vmatmul.mubr.msk.bf16.gmra.mrb[176].mxu0 %vm7254_vm8, %v7189_v2 }
 0xcc1   : > { %v7191_v45 = vshrl.u32 %v7156_v3, 16  ;;  %v7194_v63 = vshll.u32 %v7156_v3, 16  ;;  %15157 = vmatprep.mubr.msk.bf16.mxu0 %vm17454_vm0, %v17453_v1 }
 0xcc3   : > { %v7193_v17 = vrot.slane %v7191_v45, 7  ;;  %v7211_v47 = vrot.slane %v7194_v63, 1 }
 0xcc5   : > { %v7196_v10 = vor.u32 %v7194_v63, %v7193_v17  ;;  %v7212_v60 = vsel %vm951_vm5, %v7210_v39, %v7211_v47  ;;  %v7213_v46 = vor.u32 %v7211_v47, %v7191_v45 }
 0xcc7   : > { %v7197_v38 = vsel %vm875_vm1, %v7185_v21, %v7196_v10 }
 0xcc8   : > { %15158 = vmatmul.mubr.msk.bf16.gmra.mrb[180].mxu0 %vm7254_vm8, %v7197_v38 }
 0xcc9   : > { %15169 = vmatprep.mubr.msk.bf16.mxu0 %vm17454_vm0, %v17453_v1 }
 0xcd0   : > { %15170 = vmatmul.mubr.msk.bf16.vlgmr.msra.gmra.mrb[164].mxu0 %vm7254_vm8, %v20488_v30  ;;  %v17299_v30 = vld [vmem:[%s21848_s2 + $0x58] sm:$0xff]  }
 0xcd1   : > { %15190 = vmatpush3.bf16.msra.mxu0 %v17296_v58  ;;  %15173 = vmatprep.mubr.msk.bf16.mxu0 %vm17454_vm0, %v17453_v1 }
 0xcd2   : > { %15191 = vmatprep.subr.bf16.mxu0 %v17453_v1 }
 0xcd5   : > { %15192 = vmatpush3.bf16.msra.mxu0 %v17297_v57 }
 0xcd6   : > { %15193 = vmatprep.subr.bf16.mxu0 %v17453_v1 }
 0xcd8   : > { %15174 = vmatmul.mubr.msk.bf16.gmra.mrb[168].mxu0 %vm7254_vm8, %v20510_v52  ;;  %v7215_v52 = vsel %vm18070_vm7, %v7213_v46, 0  ;;  %v17305_v46 = vld [vmem:[%s21848_s2 + $0x88] sm:$0xff]  }
 0xcd9   : > { %15177 = vmatprep.mubr.msk.bf16.mxu0 %vm17454_vm0, %v17453_v1  ;;  %15194 = vmatpush3.bf16.msra.mxu0 %v17298_v27 }
 0xcda   : > { %15195 = vmatprep.subr.bf16.mxu0 %v17453_v1 }
 0xcdd   : > { %15196 = vmatpush3.bf16.msra.mxu0 %v17299_v30 }
 0xcde   : > { %15301 = vmatprep.subr.bf16.mxu0 %v17453_v1 }
 0xce0   : > { %15178 = vmatmul.mubr.msk.bf16.gmra.mrb[172].mxu0 %vm7254_vm8, %v20544_v35  ;;  %v17303_v35 = vld [vmem:[%s21848_s2 + $0x78] sm:$0xff]  }
 0xce1   : > { %15181 = vmatprep.mubr.msk.bf16.mxu0 %vm17454_vm0, %v17453_v1 }
 0xce8   : > { %15182 = vmatmul.mubr.msk.bf16.gmra.mrb[176].mxu0 %vm7254_vm8, %v7155_v26 }
 0xce9   : > { %15185 = vmatprep.mubr.msk.bf16.mxu0 %vm17454_vm0, %v17453_v1 }
 0xcf0   : > { %15186 = vmatmul.mubr.msk.bf16.gmra.mrb[180].mxu0 %vm7254_vm8, %v7156_v3 }
 0xcf1   : > { %15197 = vmatprep.mubr.msk.bf16.mxu0 %vm17454_vm0, %v17453_v1 }
 0xcf8   : > { %15198 = vmatmul.mubr.msk.bf16.vlgmr.msra.gmra.mrb[164].mxu0 %vm7254_vm8, %v20541_v42  ;;  %v17302_v42 = vld [vmem:[%s21848_s2 + $0x70] sm:$0xff]  }
 0xcf9   : > { %15201 = vmatprep.mubr.msk.bf16.mxu0 %vm17454_vm0, %v17453_v1  ;;  %15222 = vmatpush3.bf16.msra.mxu1 %v17302_v42  ;;  %v17306_v42 = vld [vmem:[%s21848_s2 + $0x90] sm:$0xff]  }
 0xcfa   : > { %15223 = vmatprep.subr.bf16.mxu1 %v17453_v1  ;;  %15302 = vmatpush3.bf16.msra.mxu0 %v17312_v36 }
 0xcfb   : > { %15303 = vmatprep.subr.bf16.mxu0 %v17453_v1 }
 0xcfd   : > { %15224 = vmatpush3.bf16.msra.mxu1 %v17303_v35 }
 0xcfe   : > { %15245 = vmatprep.subr.bf16.mxu1 %v17453_v1  ;;  %15304 = vmatpush3.bf16.msra.mxu0 %v17313_v20 }
 0xcff   : > { %15305 = vmatprep.subr.bf16.mxu0 %v17453_v1 }
 0xd00   : > { %15202 = vmatmul.mubr.msk.bf16.gmra.mrb[168].mxu0 %vm7254_vm8, %v20571_v12 }
 0xd01   : > { %15205 = vmatprep.mubr.msk.bf16.mxu0 %vm17454_vm0, %v17453_v1 }
 0xd08   : > { %15206 = vmatmul.mubr.msk.bf16.gmra.mrb[172].mxu0 %vm7254_vm8, %v7209_v22 }
 0xd09   : > { %15209 = vmatprep.mubr.msk.bf16.mxu0 %vm17454_vm0, %v17453_v1 }
 0xd10   : > { %15210 = vmatmul.mubr.msk.bf16.gmra.mrb[176].mxu0 %vm7254_vm8, %v7212_v60 }
 0xd11   : > { %15213 = vmatprep.mubr.msk.bf16.mxu0 %vm17454_vm0, %v17453_v1 }
 0xd18   : > { %15214 = vmatmul.mubr.msk.bf16.gmra.mrb[180].mxu0 %vm7254_vm8, %v7215_v52 }
 0xd19   : > { %15309 = vmatprep.mubr.msk.bf16.mxu0 %vm17454_vm0, %v17453_v1 }
 0xdcb   : > { %v7551_v32 = vpop.f32.mrb[164].mxu0 }
 0xdcc   : > { %v16035_v40 = vadd.f32 %v20666_v6, %v7551_v32  ;;  %v15199_v9 = vpop.f32.mrb[165].mxu0 }
 0xdcd   : > { %v7554_v55 = vpop.f32.mrb[166].mxu0 }
 0xdce   : > { %v7600_v51 = vmax.f32 %v16035_v40, 0.0  ;;  %v16036_v5 = vadd.f32 %v20666_v6, %v7554_v55  ;;  %v15200_v61 = vpop.f32.mrb[167].mxu0 }
 0xdd0   : > { %v7601_v29 = vmax.f32 %v16036_v5, 0.0  ;;  %v7610_v16 = vmul.f32 %v7600_v51, %v20475_v11 }
 0xdd2   : > { %v7611_v31 = vmul.f32 %v7601_v29, %v20480_v50 }
 0xdd3   : > { %v7559_v12 = vpop.f32.mrb[168].mxu0 }
 0xdd4   : > { %v20679_v13 = vpack.c.bf16 %v7611_v31, %v7610_v16  ;;  %v16037_v37 = vadd.f32 %v20666_v6, %v7559_v12  ;;  %v15203_v26 = vpop.f32.mrb[169].mxu0  ;;  %v17307_v12 = vld [vmem:[%s21848_s2 + $0x98] sm:$0xff]  }
 0xdd5   : > { %v7562_v44 = vpop.f32.mrb[170].mxu0 }
 0xdd6   : > { %v7628_v53 = vshrl.u32 %v20679_v13, 16  ;;  %v7631_v23 = vshll.u32 %v20679_v13, 16  ;;  %v7602_v49 = vmax.f32 %v16037_v37, 0.0  ;;  %v16038_v15 = vadd.f32 %v20666_v6, %v7562_v44  ;;  %v15204_v33 = vpop.f32.mrb[171].mxu0 }
 0xdd8   : > { %v7630_v62 = vrot.slane %v7628_v53, 7  ;;  %v7668_v54 = vrot.slane %v7631_v23, 1  ;;  %v7603_v25 = vmax.f32 %v16038_v15, 0.0  ;;  %v7612_v21 = vmul.f32 %v7602_v49, %v20498_v18 }
 0xdda   : > { %v7669_v24 = vor.u32 %v7668_v54, %v7628_v53  ;;  %v7613_v59 = vmul.f32 %v7603_v25, %v20503_v34  ;;  %v7633_v43 = vor.u32 %v7631_v23, %v7630_v62 }
 0xddb   : > { %v7567_v48 = vpop.f32.mrb[172].mxu0 }
 0xddc   : > { %v20691_v22 = vpack.c.bf16 %v7613_v59, %v7612_v21  ;;  %v16039_v39 = vadd.f32 %v20666_v6, %v7567_v48  ;;  %v15207_v3 = vpop.f32.mrb[173].mxu0  ;;  %v7667_v2 = vsel %vm17646_vm4, 0, %v7633_v43 }
 0xddd   : > { %v7570_v45 = vpop.f32.mrb[174].mxu0  ;;  %15226 = vmatmul.mubr.msk.bf16.vlgmr.msra.gmra.mrb[164].mxu1 %vm7254_vm8, %v7667_v2 }
 0xdde   : > { %v7635_v63 = vshrl.u32 %v20691_v22, 16  ;;  %v7638_v17 = vshll.u32 %v20691_v22, 16  ;;  %v7604_v47 = vmax.f32 %v16039_v39, 0.0  ;;  %v16040_v10 = vadd.f32 %v20666_v6, %v7570_v45  ;;  %v15208_v60 = vpop.f32.mrb[175].mxu0  ;;  %15246 = vmatpush3.bf16.msra.mxu1 %v17304_v56  ;;  %15229 = vmatprep.mubr.msk.bf16.mxu1 %vm17454_vm0, %v17453_v1 }
 0xddf   : > { %15247 = vmatprep.subr.bf16.mxu1 %v17453_v1 }
 0xde0   : > { %v7670_v38 = vrot.slane %v7638_v17, 1  ;;  %v7605_v58 = vmax.f32 %v16040_v10, 0.0  ;;  %v7637_v57 = vrot.slane %v7635_v63, 7  ;;  %v7614_v27 = vmul.f32 %v7604_v47, %v20521_v19 }
 0xde2   : > { %v7615_v30 = vmul.f32 %v7605_v58, %v20532_v8  ;;  %v7640_v52 = vor.u32 %v7638_v17, %v7637_v57  ;;  %15248 = vmatpush3.bf16.msra.mxu1 %v17305_v46  ;;  %v20712_v35 = vsel %vm951_vm5, %v7669_v24, %v7670_v38  ;;  %v7672_v32 = vor.u32 %v7670_v38, %v7635_v63 }
 0xde3   : > { %v7575_v40 = vpop.f32.mrb[176].mxu0  ;;  %15249 = vmatprep.subr.bf16.mxu1 %v17453_v1 }
 0xde4   : > { %v20715_v9 = vpack.c.bf16 %v7615_v30, %v7614_v27  ;;  %v16041_v55 = vadd.f32 %v20666_v6, %v7575_v40  ;;  %v15211_v36 = vpop.f32.mrb[177].mxu0  ;;  %v7641_v51 = vsel %vm875_vm1, %v7630_v62, %v7640_v52 }
 0xde5   : > { %v7578_v5 = vpop.f32.mrb[178].mxu0  ;;  %15230 = vmatmul.mubr.msk.bf16.gmra.mrb[168].mxu1 %vm7254_vm8, %v7641_v51  ;;  %v17309_v36 = vld [vmem:[%s21848_s2 + $0xa8] sm:$0xff]   ;;  %v17310_v51 = vld [vmem:[%s21848_s2 + $0xb0] sm:$0xff]  }
 0xde6   : > { %v7643_v61 = vshrl.u32 %v20715_v9, 16  ;;  %v7646_v20 = vshll.u32 %v20715_v9, 16  ;;  %v7606_v29 = vmax.f32 %v16041_v55, 0.0  ;;  %v16042_v16 = vadd.f32 %v20666_v6, %v7578_v5  ;;  %v15212_v31 = vpop.f32.mrb[179].mxu0  ;;  %15233 = vmatprep.mubr.msk.bf16.mxu1 %vm17454_vm0, %v17453_v1  ;;  %15250 = vmatpush3.bf16.msra.mxu1 %v17306_v42  ;;  %v17308_v55 = vld [vmem:[%s21848_s2 + $0xa0] sm:$0xff]  }
 0xde7   : > { %15251 = vmatprep.subr.bf16.mxu1 %v17453_v1  ;;  %v20814_v5 = vld [vmem:[%s21849_s30 + $0x2] ss:$0 sm:$0xff] }
 0xde8   : > { %v7607_v37 = vmax.f32 %v16042_v16, 0.0  ;;  %v7645_v26 = vrot.slane %v7643_v61, 7  ;;  %v7673_v44 = vrot.slane %v7646_v20, 1  ;;  %v7616_v53 = vmul.f32 %v7606_v29, %v20554_v28  ;;  %v17324_v31 = vld [vmem:[%s21848_s2 + $0x120] sm:$0xff]  }
 0xdea   : > { %v7617_v23 = vmul.f32 %v7607_v37, %v20565_v41  ;;  %v7648_v49 = vor.u32 %v7646_v20, %v7645_v26  ;;  %15252 = vmatpush3.bf16.msra.mxu1 %v17307_v12  ;;  %v7674_v15 = vsel %vm951_vm5, %v7672_v32, %v7673_v44  ;;  %v7675_v33 = vor.u32 %v7673_v44, %v7643_v61  ;;  %v17325_v44 = vld [vmem:[%s21848_s2 + $0x128] sm:$0xff]  }
 0xdeb   : > { %v7583_v62 = vpop.f32.mrb[180].mxu0  ;;  %15273 = vmatprep.subr.bf16.mxu1 %v17453_v1 }
 0xdec   : > { %v7623_v54 = vpack.c.bf16 %v7617_v23, %v7616_v53  ;;  %v16043_v25 = vadd.f32 %v20666_v6, %v7583_v62  ;;  %v15215_v24 = vpop.f32.mrb[181].mxu0  ;;  %v7649_v21 = vsel %vm875_vm1, %v7637_v57, %v7648_v49 }
 0xded   : > { %v7586_v59 = vpop.f32.mrb[182].mxu0  ;;  %15234 = vmatmul.mubr.msk.bf16.gmra.mrb[172].mxu1 %vm7254_vm8, %v7649_v21 }
 0xdee   : > { %v7651_v43 = vshrl.u32 %v7623_v54, 16  ;;  %v7654_v56 = vshll.u32 %v7623_v54, 16  ;;  %v7608_v48 = vmax.f32 %v16043_v25, 0.0  ;;  %v16044_v39 = vadd.f32 %v20666_v6, %v7586_v59  ;;  %v15216_v3 = vpop.f32.mrb[183].mxu0  ;;  %15237 = vmatprep.mubr.msk.bf16.mxu1 %vm17454_vm0, %v17453_v1 }
 0xdf0   : > { %v7609_v2 = vmax.f32 %v16044_v39, 0.0  ;;  %v7653_v45 = vrot.slane %v7651_v43, 7  ;;  %v7676_v63 = vrot.slane %v7654_v56, 1  ;;  %v7618_v17 = vmul.f32 %v7608_v48, %v20580_v0 }
 0xdf2   : > { %v7619_v47 = vmul.f32 %v7609_v2, %v20588_v7  ;;  %v7656_v10 = vor.u32 %v7654_v56, %v7653_v45  ;;  %v7677_v60 = vsel %vm951_vm5, %v7675_v33, %v7676_v63  ;;  %v7678_v46 = vor.u32 %v7676_v63, %v7651_v43 }
 0xdf4   : > { %v7624_v38 = vpack.c.bf16 %v7619_v47, %v7618_v17  ;;  %v7657_v58 = vsel %vm875_vm1, %v7645_v26, %v7656_v10  ;;  %v17316_v47 = vld [vmem:[%s21848_s2 + $0xe0] sm:$0xff]  }
 0xdf5   : > { %15238 = vmatmul.mubr.msk.bf16.gmra.mrb[176].mxu1 %vm7254_vm8, %v7657_v58 }
 0xdf6   : > { %v7659_v6 = vshrl.u32 %v7624_v38, 16  ;;  %v7662_v57 = vshll.u32 %v7624_v38, 16  ;;  %15241 = vmatprep.mubr.msk.bf16.mxu1 %vm17454_vm0, %v17453_v1 }
 0xdf8   : > { %v7661_v27 = vrot.slane %v7659_v6, 7  ;;  %v7679_v30 = vrot.slane %v7662_v57, 1 }
 0xdfa   : > { %v7664_v52 = vor.u32 %v7662_v57, %v7661_v27  ;;  %v7680_v42 = vsel %vm951_vm5, %v7678_v46, %v7679_v30  ;;  %v7681_v32 = vor.u32 %v7679_v30, %v7659_v6 }
 0xdfc   : > { %v7665_v40 = vsel %vm875_vm1, %v7653_v45, %v7664_v52 }
 0xdfd   : > { %15242 = vmatmul.mubr.msk.bf16.gmra.mrb[180].mxu1 %vm7254_vm8, %v7665_v40 }
 0xdfe   : > { %15253 = vmatprep.mubr.msk.bf16.mxu1 %vm17454_vm0, %v17453_v1 }
 0xe05   : > { %15254 = vmatmul.mubr.msk.bf16.vlgmr.msra.gmra.mrb[164].mxu1 %vm7254_vm8, %v20679_v13  ;;  %v17311_v13 = vld [vmem:[%s21848_s2 + $0xb8] sm:$0xff]  }
 0xe06   : > { %15274 = vmatpush3.bf16.msra.mxu1 %v17308_v55  ;;  %15257 = vmatprep.mubr.msk.bf16.mxu1 %vm17454_vm0, %v17453_v1 }
 0xe07   : > { %15275 = vmatprep.subr.bf16.mxu1 %v17453_v1 }
 0xe0a   : > { %15276 = vmatpush3.bf16.msra.mxu1 %v17309_v36 }
 0xe0b   : > { %15277 = vmatprep.subr.bf16.mxu1 %v17453_v1 }
 0xe0d   : > { %15258 = vmatmul.mubr.msk.bf16.gmra.mrb[168].mxu1 %vm7254_vm8, %v20691_v22  ;;  %v7683_v22 = vsel %vm18070_vm7, %v7681_v32, 0  ;;  %v17317_v32 = vld [vmem:[%s21848_s2 + $0xe8] sm:$0xff]  }
 0xe0e   : > { %15261 = vmatprep.mubr.msk.bf16.mxu1 %vm17454_vm0, %v17453_v1  ;;  %15278 = vmatpush3.bf16.msra.mxu1 %v17310_v51 }
 0xe0f   : > { %15279 = vmatprep.subr.bf16.mxu1 %v17453_v1 }
 0xe12   : > { %15280 = vmatpush3.bf16.msra.mxu1 %v17311_v13 }
 0xe13   : > { %15385 = vmatprep.subr.bf16.mxu1 %v17453_v1 }
 0xe15   : > { %15262 = vmatmul.mubr.msk.bf16.gmra.mrb[172].mxu1 %vm7254_vm8, %v20715_v9  ;;  %v17315_v9 = vld [vmem:[%s21848_s2 + $0xd8] sm:$0xff]  }
 0xe16   : > { %15265 = vmatprep.mubr.msk.bf16.mxu1 %vm17454_vm0, %v17453_v1 }
 0xe1d   : > { %15266 = vmatmul.mubr.msk.bf16.gmra.mrb[176].mxu1 %vm7254_vm8, %v7623_v54 }
 0xe1e   : > { %15269 = vmatprep.mubr.msk.bf16.mxu1 %vm17454_vm0, %v17453_v1 }
 0xe25   : > { %15270 = vmatmul.mubr.msk.bf16.gmra.mrb[180].mxu1 %vm7254_vm8, %v7624_v38 }
 0xe26   : > { %15281 = vmatprep.mubr.msk.bf16.mxu1 %vm17454_vm0, %v17453_v1 }
 0xe2d   : > { %15282 = vmatmul.mubr.msk.bf16.vlgmr.msra.gmra.mrb[164].mxu1 %vm7254_vm8, %v20712_v35  ;;  %v17314_v35 = vld [vmem:[%s21848_s2 + $0xd0] sm:$0xff]  }
 0xe2e   : > { %15285 = vmatprep.mubr.msk.bf16.mxu1 %vm17454_vm0, %v17453_v1  ;;  %15306 = vmatpush3.bf16.msra.mxu0 %v17314_v35  ;;  %v17318_v35 = vld [vmem:[%s21848_s2 + $0xf0] sm:$0xff]  }
 0xe2f   : > { %15307 = vmatprep.subr.bf16.mxu0 %v17453_v1  ;;  %15386 = vmatpush3.bf16.msra.mxu1 %v17324_v31 }
 0xe30   : > { %15387 = vmatprep.subr.bf16.mxu1 %v17453_v1 }
 0xe32   : > { %15308 = vmatpush3.bf16.msra.mxu0 %v17315_v9 }
 0xe33   : > { %15329 = vmatprep.subr.bf16.mxu0 %v17453_v1  ;;  %15388 = vmatpush3.bf16.msra.mxu1 %v17325_v44 }
 0xe34   : > { %15389 = vmatprep.subr.bf16.mxu1 %v17453_v1 }
 0xe35   : > { %15286 = vmatmul.mubr.msk.bf16.gmra.mrb[168].mxu1 %vm7254_vm8, %v7674_v15 }
 0xe36   : > { %15289 = vmatprep.mubr.msk.bf16.mxu1 %vm17454_vm0, %v17453_v1 }
 0xe3d   : > { %15290 = vmatmul.mubr.msk.bf16.gmra.mrb[172].mxu1 %vm7254_vm8, %v7677_v60 }
 0xe3e   : > { %15293 = vmatprep.mubr.msk.bf16.mxu1 %vm17454_vm0, %v17453_v1 }
 0xe45   : > { %15294 = vmatmul.mubr.msk.bf16.gmra.mrb[176].mxu1 %vm7254_vm8, %v7680_v42 }
 0xe46   : > { %15297 = vmatprep.mubr.msk.bf16.mxu1 %vm17454_vm0, %v17453_v1 }
 0xe4d   : > { %15298 = vmatmul.mubr.msk.bf16.gmra.mrb[180].mxu1 %vm7254_vm8, %v7683_v22 }
 0xe4e   : > { %15393 = vmatprep.mubr.msk.bf16.mxu1 %vm17454_vm0, %v17453_v1 }
 0xf00   : > { %v8019_v61 = vpop.f32.mrb[164].mxu1 }
 0xf01   : > { %v16045_v20 = vadd.f32 %v20814_v5, %v8019_v61  ;;  %v15283_v29 = vpop.f32.mrb[165].mxu1 }
 0xf02   : > { %v8022_v16 = vpop.f32.mrb[166].mxu1 }
 0xf03   : > { %v8068_v12 = vmax.f32 %v16045_v20, 0.0  ;;  %v16046_v37 = vadd.f32 %v20814_v5, %v8022_v16  ;;  %v15284_v26 = vpop.f32.mrb[167].mxu1 }
 0xf05   : > { %v8069_v53 = vmax.f32 %v16046_v37, 0.0  ;;  %v8078_v23 = vmul.f32 %v8068_v12, %v20475_v11 }
 0xf07   : > { %v8079_v49 = vmul.f32 %v8069_v53, %v20480_v50 }
 0xf08   : > { %v8027_v15 = vpop.f32.mrb[168].mxu1 }
 0xf09   : > { %v20827_v33 = vpack.c.bf16 %v8079_v49, %v8078_v23  ;;  %v16047_v62 = vadd.f32 %v20814_v5, %v8027_v15  ;;  %v15287_v54 = vpop.f32.mrb[169].mxu1  ;;  %v17319_v15 = vld [vmem:[%s21848_s2 + $0xf8] sm:$0xff]  }
 0xf0a   : > { %v8030_v25 = vpop.f32.mrb[170].mxu1 }
 0xf0b   : > { %v8096_v24 = vshrl.u32 %v20827_v33, 16  ;;  %v8099_v21 = vshll.u32 %v20827_v33, 16  ;;  %v8070_v59 = vmax.f32 %v16047_v62, 0.0  ;;  %v16048_v43 = vadd.f32 %v20814_v5, %v8030_v25  ;;  %v15288_v56 = vpop.f32.mrb[171].mxu1 }
 0xf0d   : > { %v8098_v48 = vrot.slane %v8096_v24, 7  ;;  %v8136_v39 = vrot.slane %v8099_v21, 1  ;;  %v8071_v3 = vmax.f32 %v16048_v43, 0.0  ;;  %v8080_v45 = vmul.f32 %v8070_v59, %v20498_v18 }
 0xf0f   : > { %v8137_v2 = vor.u32 %v8136_v39, %v8096_v24  ;;  %v8081_v63 = vmul.f32 %v8071_v3, %v20503_v34  ;;  %v8101_v17 = vor.u32 %v8099_v21, %v8098_v48 }
 0xf10   : > { %v8035_v10 = vpop.f32.mrb[172].mxu1 }
 0xf11   : > { %v20839_v60 = vpack.c.bf16 %v8081_v63, %v8080_v45  ;;  %v16049_v46 = vadd.f32 %v20814_v5, %v8035_v10  ;;  %v15291_v38 = vpop.f32.mrb[173].mxu1  ;;  %v8135_v58 = vsel %vm17646_vm4, 0, %v8101_v17 }
 0xf12   : > { %v8038_v6 = vpop.f32.mrb[174].mxu1  ;;  %15310 = vmatmul.mubr.msk.bf16.vlgmr.msra.gmra.mrb[184].mxu0 %vm7254_vm8, %v8135_v58 }
 0xf13   : > { %v8103_v57 = vshrl.u32 %v20839_v60, 16  ;;  %v8106_v27 = vshll.u32 %v20839_v60, 16  ;;  %v8072_v30 = vmax.f32 %v16049_v46, 0.0  ;;  %v16050_v52 = vadd.f32 %v20814_v5, %v8038_v6  ;;  %v15292_v42 = vpop.f32.mrb[175].mxu1  ;;  %15330 = vmatpush3.bf16.msra.mxu0 %v17316_v47  ;;  %15313 = vmatprep.mubr.msk.bf16.mxu0 %vm17454_vm0, %v17453_v1 }
 0xf14   : > { %15331 = vmatprep.subr.bf16.mxu0 %v17453_v1 }
 0xf15   : > { %v8138_v40 = vrot.slane %v8106_v27, 1  ;;  %v8073_v55 = vmax.f32 %v16050_v52, 0.0  ;;  %v8105_v36 = vrot.slane %v8103_v57, 7  ;;  %v8082_v51 = vmul.f32 %v8072_v30, %v20521_v19 }
 0xf17   : > { %v8083_v13 = vmul.f32 %v8073_v55, %v20532_v8  ;;  %v8108_v22 = vor.u32 %v8106_v27, %v8105_v36  ;;  %15332 = vmatpush3.bf16.msra.mxu0 %v17317_v32  ;;  %v20860_v9 = vsel %vm951_vm5, %v8137_v2, %v8138_v40  ;;  %v8140_v61 = vor.u32 %v8138_v40, %v8103_v57 }
 0xf18   : > { %v8043_v20 = vpop.f32.mrb[176].mxu1  ;;  %15333 = vmatprep.subr.bf16.mxu0 %v17453_v1 }
 0xf19   : > { %v20863_v29 = vpack.c.bf16 %v8083_v13, %v8082_v51  ;;  %v16051_v16 = vadd.f32 %v20814_v5, %v8043_v20  ;;  %v15295_v31 = vpop.f32.mrb[177].mxu1  ;;  %v8109_v12 = vsel %vm875_vm1, %v8098_v48, %v8108_v22 }
 0xf1a   : > { %v8046_v37 = vpop.f32.mrb[178].mxu1  ;;  %15314 = vmatmul.mubr.msk.bf16.gmra.mrb[188].mxu0 %vm7254_vm8, %v8109_v12  ;;  %v17321_v31 = vld [vmem:[%s21848_s2 + $0x108] sm:$0xff]   ;;  %v17322_v12 = vld [vmem:[%s21848_s2 + $0x110] sm:$0xff]  }
 0xf1b   : > { %v8111_v26 = vshrl.u32 %v20863_v29, 16  ;;  %v8114_v44 = vshll.u32 %v20863_v29, 16  ;;  %v8074_v53 = vmax.f32 %v16051_v16, 0.0  ;;  %v16052_v23 = vadd.f32 %v20814_v5, %v8046_v37  ;;  %v15296_v49 = vpop.f32.mrb[179].mxu1  ;;  %15317 = vmatprep.mubr.msk.bf16.mxu0 %vm17454_vm0, %v17453_v1  ;;  %15334 = vmatpush3.bf16.msra.mxu0 %v17318_v35  ;;  %v17320_v16 = vld [vmem:[%s21848_s2 + $0x100] sm:$0xff]  }
 0xf1c   : > { %15335 = vmatprep.subr.bf16.mxu0 %v17453_v1  ;;  %v20962_v37 = vld [vmem:[%s21849_s30 + $0x3] ss:$0 sm:$0xff] }
 0xf1d   : > { %v8075_v62 = vmax.f32 %v16052_v23, 0.0  ;;  %v8113_v54 = vrot.slane %v8111_v26, 7  ;;  %v8141_v25 = vrot.slane %v8114_v44, 1  ;;  %v8084_v24 = vmul.f32 %v8074_v53, %v20554_v28  ;;  %v17336_v49 = vld [vmem:[%s21848_s2 + $0x180] sm:$0xff]  }
 0xf1f   : > { %v8085_v21 = vmul.f32 %v8075_v62, %v20565_v41  ;;  %v8116_v59 = vor.u32 %v8114_v44, %v8113_v54  ;;  %15336 = vmatpush3.bf16.msra.mxu0 %v17319_v15  ;;  %v8142_v43 = vsel %vm951_vm5, %v8140_v61, %v8141_v25  ;;  %v8143_v56 = vor.u32 %v8141_v25, %v8111_v26  ;;  %v17337_v25 = vld [vmem:[%s21848_s2 + $0x188] sm:$0xff]  }
 0xf20   : > { %v8051_v48 = vpop.f32.mrb[180].mxu1  ;;  %15357 = vmatprep.subr.bf16.mxu0 %v17453_v1 }
 0xf21   : > { %v8091_v39 = vpack.c.bf16 %v8085_v21, %v8084_v24  ;;  %v16053_v3 = vadd.f32 %v20814_v5, %v8051_v48  ;;  %v15299_v2 = vpop.f32.mrb[181].mxu1  ;;  %v8117_v45 = vsel %vm875_vm1, %v8105_v36, %v8116_v59 }
 0xf22   : > { %v8054_v63 = vpop.f32.mrb[182].mxu1  ;;  %15318 = vmatmul.mubr.msk.bf16.gmra.mrb[192].mxu0 %vm7254_vm8, %v8117_v45 }
 0xf23   : > { %v8119_v17 = vshrl.u32 %v8091_v39, 16  ;;  %v8122_v47 = vshll.u32 %v8091_v39, 16  ;;  %v8076_v10 = vmax.f32 %v16053_v3, 0.0  ;;  %v16054_v46 = vadd.f32 %v20814_v5, %v8054_v63  ;;  %v15300_v38 = vpop.f32.mrb[183].mxu1  ;;  %15321 = vmatprep.mubr.msk.bf16.mxu0 %vm17454_vm0, %v17453_v1 }
 0xf25   : > { %v8077_v58 = vmax.f32 %v16054_v46, 0.0  ;;  %v8121_v6 = vrot.slane %v8119_v17, 7  ;;  %v8144_v57 = vrot.slane %v8122_v47, 1  ;;  %v8086_v27 = vmul.f32 %v8076_v10, %v20580_v0 }
 0xf27   : > { %v8087_v30 = vmul.f32 %v8077_v58, %v20588_v7  ;;  %v8124_v52 = vor.u32 %v8122_v47, %v8121_v6  ;;  %v8145_v42 = vsel %vm951_vm5, %v8143_v56, %v8144_v57  ;;  %v8146_v32 = vor.u32 %v8144_v57, %v8119_v17  ;;  %v17328_v57 = vld [vmem:[%s21848_s2 + $0x140] sm:$0xff]  }
 0xf29   : > { %v8092_v40 = vpack.c.bf16 %v8087_v30, %v8086_v27  ;;  %v8125_v55 = vsel %vm875_vm1, %v8113_v54, %v8124_v52 }
 0xf2a   : > { %15322 = vmatmul.mubr.msk.bf16.gmra.mrb[196].mxu0 %vm7254_vm8, %v8125_v55 }
 0xf2b   : > { %v8127_v5 = vshrl.u32 %v8092_v40, 16  ;;  %v8130_v36 = vshll.u32 %v8092_v40, 16  ;;  %15325 = vmatprep.mubr.msk.bf16.mxu0 %vm17454_vm0, %v17453_v1 }
 0xf2d   : > { %v8129_v51 = vrot.slane %v8127_v5, 7  ;;  %v8147_v13 = vrot.slane %v8130_v36, 1 }
 0xf2f   : > { %v8132_v22 = vor.u32 %v8130_v36, %v8129_v51  ;;  %v8148_v35 = vsel %vm951_vm5, %v8146_v32, %v8147_v13  ;;  %v8149_v61 = vor.u32 %v8147_v13, %v8127_v5  ;;  %v17329_v51 = vld [vmem:[%s21848_s2 + $0x148] sm:$0xff]  }
 0xf31   : > { %v8133_v20 = vsel %vm875_vm1, %v8121_v6, %v8132_v22 }
 0xf32   : > { %15326 = vmatmul.mubr.msk.bf16.gmra.mrb[200].mxu0 %vm7254_vm8, %v8133_v20 }
 0xf33   : > { %15337 = vmatprep.mubr.msk.bf16.mxu0 %vm17454_vm0, %v17453_v1 }
 0xf3a   : > { %15338 = vmatmul.mubr.msk.bf16.vlgmr.msra.gmra.mrb[184].mxu0 %vm7254_vm8, %v20827_v33  ;;  %v17323_v33 = vld [vmem:[%s21848_s2 + $0x118] sm:$0xff]  }
 0xf3b   : > { %15358 = vmatpush3.bf16.msra.mxu0 %v17320_v16  ;;  %15341 = vmatprep.mubr.msk.bf16.mxu0 %vm17454_vm0, %v17453_v1 }
 0xf3c   : > { %15359 = vmatprep.subr.bf16.mxu0 %v17453_v1 }
 0xf3f   : > { %15360 = vmatpush3.bf16.msra.mxu0 %v17321_v31  ;;  %v17330_v31 = vld [vmem:[%s21848_s2 + $0x150] sm:$0xff]  }
 0xf40   : > { %15361 = vmatprep.subr.bf16.mxu0 %v17453_v1 }
 0xf42   : > { %15342 = vmatmul.mubr.msk.bf16.gmra.mrb[188].mxu0 %vm7254_vm8, %v20839_v60  ;;  %v8151_v60 = vsel %vm18070_vm7, %v8149_v61, 0 }
 0xf43   : > { %15345 = vmatprep.mubr.msk.bf16.mxu0 %vm17454_vm0, %v17453_v1  ;;  %15362 = vmatpush3.bf16.msra.mxu0 %v17322_v12 }
 0xf44   : > { %15363 = vmatprep.subr.bf16.mxu0 %v17453_v1 }
 0xf47   : > { %15364 = vmatpush3.bf16.msra.mxu0 %v17323_v33 }
 0xf48   : > { %15469 = vmatprep.subr.bf16.mxu0 %v17453_v1 }
 0xf4a   : > { %15346 = vmatmul.mubr.msk.bf16.gmra.mrb[192].mxu0 %vm7254_vm8, %v20863_v29  ;;  %v17327_v29 = vld [vmem:[%s21848_s2 + $0x138] sm:$0xff]  }
 0xf4b   : > { %15349 = vmatprep.mubr.msk.bf16.mxu0 %vm17454_vm0, %v17453_v1 }
 0xf52   : > { %15350 = vmatmul.mubr.msk.bf16.gmra.mrb[196].mxu0 %vm7254_vm8, %v8091_v39 }
 0xf53   : > { %15353 = vmatprep.mubr.msk.bf16.mxu0 %vm17454_vm0, %v17453_v1 }
 0xf5a   : > { %15354 = vmatmul.mubr.msk.bf16.gmra.mrb[200].mxu0 %vm7254_vm8, %v8092_v40 }
 0xf5b   : > { %15365 = vmatprep.mubr.msk.bf16.mxu0 %vm17454_vm0, %v17453_v1 }
 0xf62   : > { %15366 = vmatmul.mubr.msk.bf16.vlgmr.msra.gmra.mrb[184].mxu0 %vm7254_vm8, %v20860_v9  ;;  %v17326_v9 = vld [vmem:[%s21848_s2 + $0x130] sm:$0xff]  }
 0xf63   : > { %15369 = vmatprep.mubr.msk.bf16.mxu0 %vm17454_vm0, %v17453_v1  ;;  %15390 = vmatpush3.bf16.msra.mxu1 %v17326_v9 }
 0xf64   : > { %15391 = vmatprep.subr.bf16.mxu1 %v17453_v1  ;;  %15470 = vmatpush3.bf16.msra.mxu0 %v17336_v49 }
 0xf65   : > { %15471 = vmatprep.subr.bf16.mxu0 %v17453_v1 }
 0xf67   : > { %15392 = vmatpush3.bf16.msra.mxu1 %v17327_v29 }
 0xf68   : > { %15413 = vmatprep.subr.bf16.mxu1 %v17453_v1  ;;  %15472 = vmatpush3.bf16.msra.mxu0 %v17337_v25 }
 0xf69   : > { %15473 = vmatprep.subr.bf16.mxu0 %v17453_v1 }
 0xf6a   : > { %15370 = vmatmul.mubr.msk.bf16.gmra.mrb[188].mxu0 %vm7254_vm8, %v8142_v43 }
 0xf6b   : > { %15373 = vmatprep.mubr.msk.bf16.mxu0 %vm17454_vm0, %v17453_v1 }
 0xf72   : > { %15374 = vmatmul.mubr.msk.bf16.gmra.mrb[192].mxu0 %vm7254_vm8, %v8145_v42 }
 0xf73   : > { %15377 = vmatprep.mubr.msk.bf16.mxu0 %vm17454_vm0, %v17453_v1 }
 0xf7a   : > { %15378 = vmatmul.mubr.msk.bf16.gmra.mrb[196].mxu0 %vm7254_vm8, %v8148_v35 }
 0xf7b   : > { %15381 = vmatprep.mubr.msk.bf16.mxu0 %vm17454_vm0, %v17453_v1 }
 0xf82   : > { %15382 = vmatmul.mubr.msk.bf16.gmra.mrb[200].mxu0 %vm7254_vm8, %v8151_v60 }
 0xf83   : > { %15477 = vmatprep.mubr.msk.bf16.mxu0 %vm17454_vm0, %v17453_v1 }
0x1035   : > { %v8487_v26 = vpop.f32.mrb[184].mxu0 }
0x1036   : > { %v16055_v44 = vadd.f32 %v20962_v37, %v8487_v26  ;;  %v15367_v53 = vpop.f32.mrb[185].mxu0 }
0x1037   : > { %v8490_v23 = vpop.f32.mrb[186].mxu0 }
0x1038   : > { %v8536_v15 = vmax.f32 %v16055_v44, 0.0  ;;  %v16056_v62 = vadd.f32 %v20962_v37, %v8490_v23  ;;  %v15368_v54 = vpop.f32.mrb[187].mxu0 }
0x103a   : > { %v8537_v24 = vmax.f32 %v16056_v62, 0.0  ;;  %v8546_v21 = vmul.f32 %v8536_v15, %v20475_v11  ;;  %v17331_v62 = vld [vmem:[%s21848_s2 + $0x158] sm:$0xff]  }
0x103c   : > { %v8547_v59 = vmul.f32 %v8537_v24, %v20480_v50 }
0x103d   : > { %v8495_v43 = vpop.f32.mrb[188].mxu0 }
0x103e   : > { %v20975_v56 = vpack.c.bf16 %v8547_v59, %v8546_v21  ;;  %v16057_v48 = vadd.f32 %v20962_v37, %v8495_v43  ;;  %v15371_v39 = vpop.f32.mrb[189].mxu0 }
0x103f   : > { %v8498_v3 = vpop.f32.mrb[190].mxu0 }
0x1040   : > { %v8564_v2 = vshrl.u32 %v20975_v56, 16  ;;  %v8567_v45 = vshll.u32 %v20975_v56, 16  ;;  %v8538_v63 = vmax.f32 %v16057_v48, 0.0  ;;  %v16058_v17 = vadd.f32 %v20962_v37, %v8498_v3  ;;  %v15372_v11 = vpop.f32.mrb[191].mxu0 }
0x1042   : > { %v8566_v47 = vrot.slane %v8564_v2, 7  ;;  %v8604_v50 = vrot.slane %v8567_v45, 1  ;;  %v8539_v10 = vmax.f32 %v16058_v17, 0.0  ;;  %v8548_v38 = vmul.f32 %v8538_v63, %v20498_v18 }
0x1044   : > { %v8605_v46 = vor.u32 %v8604_v50, %v8564_v2  ;;  %v8549_v58 = vmul.f32 %v8539_v10, %v20503_v34  ;;  %v8569_v6 = vor.u32 %v8567_v45, %v8566_v47 }
0x1045   : > { %v8503_v27 = vpop.f32.mrb[192].mxu0 }
0x1046   : > { %v20987_v30 = vpack.c.bf16 %v8549_v58, %v8548_v38  ;;  %v16059_v52 = vadd.f32 %v20962_v37, %v8503_v27  ;;  %v15375_v42 = vpop.f32.mrb[193].mxu0  ;;  %v8603_v32 = vsel %vm17646_vm4, 0, %v8569_v6 }
0x1047   : > { %v8506_v40 = vpop.f32.mrb[194].mxu0  ;;  %15394 = vmatmul.mubr.msk.bf16.vlgmr.msra.gmra.mrb[184].mxu1 %vm7254_vm8, %v8603_v32 }
0x1048   : > { %v8571_v18 = vshrl.u32 %v20987_v30, 16  ;;  %v8574_v34 = vshll.u32 %v20987_v30, 16  ;;  %v8540_v55 = vmax.f32 %v16059_v52, 0.0  ;;  %v16060_v5 = vadd.f32 %v20962_v37, %v8506_v40  ;;  %v15376_v36 = vpop.f32.mrb[195].mxu0  ;;  %15414 = vmatpush3.bf16.msra.mxu1 %v17328_v57  ;;  %15397 = vmatprep.mubr.msk.bf16.mxu1 %vm17454_vm0, %v17453_v1 }
0x1049   : > { %15415 = vmatprep.subr.bf16.mxu1 %v17453_v1 }
0x104a   : > { %v8606_v13 = vrot.slane %v8574_v34, 1  ;;  %v8541_v22 = vmax.f32 %v16060_v5, 0.0  ;;  %v8573_v35 = vrot.slane %v8571_v18, 7  ;;  %v8550_v61 = vmul.f32 %v8540_v55, %v20521_v19 }
0x104c   : > { %v8551_v20 = vmul.f32 %v8541_v22, %v20532_v8  ;;  %v8576_v16 = vor.u32 %v8574_v34, %v8573_v35  ;;  %15416 = vmatpush3.bf16.msra.mxu1 %v17329_v51  ;;  %v21008_v12 = vsel %vm951_vm5, %v8605_v46, %v8606_v13  ;;  %v8608_v33 = vor.u32 %v8606_v13, %v8571_v18  ;;  %v17332_v51 = vld [vmem:[%s21848_s2 + $0x160] sm:$0xff]   ;;  %v17333_v13 = vld [vmem:[%s21848_s2 + $0x168] sm:$0xff]   ;;  %v17334_v22 = vld [vmem:[%s21848_s2 + $0x170] sm:$0xff]  }
0x104d   : > { %v8511_v60 = vpop.f32.mrb[196].mxu0  ;;  %15417 = vmatprep.subr.bf16.mxu1 %v17453_v1 }
0x104e   : > { %v21011_v9 = vpack.c.bf16 %v8551_v20, %v8550_v61  ;;  %v16061_v29 = vadd.f32 %v20962_v37, %v8511_v60  ;;  %v15379_v19 = vpop.f32.mrb[197].mxu0  ;;  %v8577_v8 = vsel %vm875_vm1, %v8566_v47, %v8576_v16  ;;  %v17339_v61 = vld [vmem:[%s21848_s2 + $0x198] sm:$0xff]   ;;  %v21110_v20 = vld [vmem:[%s21849_s30 + $0x4] ss:$0 sm:$0xff] }
0x104f   : > { %v8514_v26 = vpop.f32.mrb[198].mxu0  ;;  %15398 = vmatmul.mubr.msk.bf16.gmra.mrb[188].mxu1 %vm7254_vm8, %v8577_v8  ;;  %v17435_v8 = vld [vmem:[%s21787_s21] sm:$0xff] }
0x1050   : > { %v8579_v44 = vshrl.u32 %v21011_v9, 16  ;;  %v8582_v53 = vshll.u32 %v21011_v9, 16  ;;  %v8542_v23 = vmax.f32 %v16061_v29, 0.0  ;;  %v16062_v49 = vadd.f32 %v20962_v37, %v8514_v26  ;;  %v15380_v15 = vpop.f32.mrb[199].mxu0  ;;  %15401 = vmatprep.mubr.msk.bf16.mxu1 %vm17454_vm0, %v17453_v1  ;;  %15418 = vmatpush3.bf16.msra.mxu1 %v17330_v31 }
0x1051   : > { %15419 = vmatprep.subr.bf16.mxu1 %v17453_v1 }
0x1052   : > { %v8543_v54 = vmax.f32 %v16062_v49, 0.0  ;;  %v8581_v25 = vrot.slane %v8579_v44, 7  ;;  %v8609_v24 = vrot.slane %v8582_v53, 1  ;;  %v8552_v21 = vmul.f32 %v8542_v23, %v20554_v28 }
0x1054   : > { %v8553_v59 = vmul.f32 %v8543_v54, %v20565_v41  ;;  %v8584_v43 = vor.u32 %v8582_v53, %v8581_v25  ;;  %15420 = vmatpush3.bf16.msra.mxu1 %v17331_v62  ;;  %v8610_v48 = vsel %vm951_vm5, %v8608_v33, %v8609_v24  ;;  %v8611_v39 = vor.u32 %v8609_v24, %v8579_v44  ;;  %v17436_v44 = vld [vmem:[%s21787_s21 + $0x8] sm:$0xff] }
0x1055   : > { %v8519_v3 = vpop.f32.mrb[200].mxu0  ;;  %15441 = vmatprep.subr.bf16.mxu1 %v17453_v1 }
0x1056   : > { %v8559_v2 = vpack.c.bf16 %v8553_v59, %v8552_v21  ;;  %v16063_v45 = vadd.f32 %v20962_v37, %v8519_v3  ;;  %v15383_v63 = vpop.f32.mrb[201].mxu0  ;;  %v8585_v17 = vsel %vm875_vm1, %v8573_v35, %v8584_v43  ;;  %v17338_v35 = vld [vmem:[%s21848_s2 + $0x190] sm:$0xff]  }
0x1057   : > { %v8522_v11 = vpop.f32.mrb[202].mxu0  ;;  %15402 = vmatmul.mubr.msk.bf16.gmra.mrb[192].mxu1 %vm7254_vm8, %v8585_v17  ;;  %15474 = vmatpush3.bf16.msra.mxu0 %v17338_v35  ;;  %v17438_v17 = vld [vmem:[%s21787_s21 + $0x18] sm:$0xff] }
0x1058   : > { %v8587_v28 = vshrl.u32 %v8559_v2, 16  ;;  %v8590_v47 = vshll.u32 %v8559_v2, 16  ;;  %v8544_v41 = vmax.f32 %v16063_v45, 0.0  ;;  %v16064_v50 = vadd.f32 %v20962_v37, %v8522_v11  ;;  %v15384_v10 = vpop.f32.mrb[203].mxu0  ;;  %15405 = vmatprep.mubr.msk.bf16.mxu1 %vm17454_vm0, %v17453_v1  ;;  %15475 = vmatprep.subr.bf16.mxu0 %v17453_v1  ;;  %v17437_v45 = vld [vmem:[%s21787_s21 + $0x10] sm:$0xff] }
0x105a   : > { %v8545_v46 = vmax.f32 %v16064_v50, 0.0  ;;  %v8589_v38 = vrot.slane %v8587_v28, 7  ;;  %v8612_v58 = vrot.slane %v8590_v47, 1  ;;  %v8554_v6 = vmul.f32 %v8544_v41, %v20580_v0 }
0x105b   : > { %15476 = vmatpush3.bf16.msra.mxu0 %v17339_v61 }
0x105c   : > { %v8555_v57 = vmul.f32 %v8545_v46, %v20588_v7  ;;  %v8592_v27 = vor.u32 %v8590_v47, %v8589_v38  ;;  %v8613_v52 = vsel %vm951_vm5, %v8611_v39, %v8612_v58  ;;  %v8614_v42 = vor.u32 %v8612_v58, %v8587_v28  ;;  %15497 = vmatprep.subr.bf16.mxu0 %v17453_v1  ;;  %v17340_v47 = vld [vmem:[%s21848_s2 + $0x1a0] sm:$0xff]  }
0x105e   : > { %v8560_v32 = vpack.c.bf16 %v8555_v57, %v8554_v6  ;;  %v8593_v40 = vsel %vm875_vm1, %v8581_v25, %v8592_v27 }
0x105f   : > { %15406 = vmatmul.mubr.msk.bf16.gmra.mrb[196].mxu1 %vm7254_vm8, %v8593_v40 }
0x1060   : > { %v8595_v37 = vshrl.u32 %v8560_v32, 16  ;;  %v8598_v18 = vshll.u32 %v8560_v32, 16  ;;  %15409 = vmatprep.mubr.msk.bf16.mxu1 %vm17454_vm0, %v17453_v1 }
0x1062   : > { %v8597_v34 = vrot.slane %v8595_v37, 7  ;;  %v8615_v55 = vrot.slane %v8598_v18, 1 }
0x1064   : > { %v8600_v5 = vor.u32 %v8598_v18, %v8597_v34  ;;  %v8616_v0 = vsel %vm951_vm5, %v8614_v42, %v8615_v55  ;;  %v8617_v7 = vor.u32 %v8615_v55, %v8595_v37  ;;  %v17439_v34 = vld [vmem:[%s21787_s21 + $0x20] sm:$0xff] }
0x1066   : > { %v8601_v36 = vsel %vm875_vm1, %v8589_v38, %v8600_v5  ;;  %v17440_v5 = vld [vmem:[%s21787_s21 + $0x28] sm:$0xff] }
0x1067   : > { %15410 = vmatmul.mubr.msk.bf16.gmra.mrb[200].mxu1 %vm7254_vm8, %v8601_v36  ;;  %v17342_v36 = vld [vmem:[%s21848_s2 + $0x1b0] sm:$0xff]  }
0x1068   : > { %15421 = vmatprep.mubr.msk.bf16.mxu1 %vm17454_vm0, %v17453_v1 }
0x106f   : > { %15422 = vmatmul.mubr.msk.bf16.vlgmr.msra.gmra.mrb[184].mxu1 %vm7254_vm8, %v20975_v56  ;;  %v17335_v56 = vld [vmem:[%s21848_s2 + $0x178] sm:$0xff]  }
0x1070   : > { %15442 = vmatpush3.bf16.msra.mxu1 %v17332_v51  ;;  %15425 = vmatprep.mubr.msk.bf16.mxu1 %vm17454_vm0, %v17453_v1 }
0x1071   : > { %15443 = vmatprep.subr.bf16.mxu1 %v17453_v1 }
0x1074   : > { %15444 = vmatpush3.bf16.msra.mxu1 %v17333_v13 }
0x1075   : > { %15445 = vmatprep.subr.bf16.mxu1 %v17453_v1 }
0x1077   : > { %15426 = vmatmul.mubr.msk.bf16.gmra.mrb[188].mxu1 %vm7254_vm8, %v20987_v30  ;;  %v8619_v30 = vsel %vm18070_vm7, %v8617_v7, 0 }
0x1078   : > { %15429 = vmatprep.mubr.msk.bf16.mxu1 %vm17454_vm0, %v17453_v1  ;;  %15446 = vmatpush3.bf16.msra.mxu1 %v17334_v22 }
0x1079   : > { %15447 = vmatprep.subr.bf16.mxu1 %v17453_v1 }
0x107c   : > { %15448 = vmatpush3.bf16.msra.mxu1 %v17335_v56 }
0x107d   : > { %15553 = vmatprep.subr.bf16.mxu1 %v17453_v1 }
0x107f   : > { %15430 = vmatmul.mubr.msk.bf16.gmra.mrb[192].mxu1 %vm7254_vm8, %v21011_v9 }
0x1080   : > { %15433 = vmatprep.mubr.msk.bf16.mxu1 %vm17454_vm0, %v17453_v1 }
0x1087   : > { %15434 = vmatmul.mubr.msk.bf16.gmra.mrb[196].mxu1 %vm7254_vm8, %v8559_v2 }
0x1088   : > { %15437 = vmatprep.mubr.msk.bf16.mxu1 %vm17454_vm0, %v17453_v1 }
0x108f   : > { %15438 = vmatmul.mubr.msk.bf16.gmra.mrb[200].mxu1 %vm7254_vm8, %v8560_v32  ;;  %v17341_v32 = vld [vmem:[%s21848_s2 + $0x1a8] sm:$0xff]  }
0x1090   : > { %15449 = vmatprep.mubr.msk.bf16.mxu1 %vm17454_vm0, %v17453_v1 }
0x1097   : > { %15450 = vmatmul.mubr.msk.bf16.vlgmr.msra.gmra.mrb[184].mxu1 %vm7254_vm8, %v21008_v12 }
0x1098   : > { %15453 = vmatprep.mubr.msk.bf16.mxu1 %vm17454_vm0, %v17453_v1 }
0x109f   : > { %15454 = vmatmul.mubr.msk.bf16.gmra.mrb[188].mxu1 %vm7254_vm8, %v8610_v48 }
0x10a0   : > { %15457 = vmatprep.mubr.msk.bf16.mxu1 %vm17454_vm0, %v17453_v1 }
0x10a7   : > { %15458 = vmatmul.mubr.msk.bf16.gmra.mrb[192].mxu1 %vm7254_vm8, %v8613_v52 }
0x10a8   : > { %15461 = vmatprep.mubr.msk.bf16.mxu1 %vm17454_vm0, %v17453_v1 }
0x10af   : > { %15462 = vmatmul.mubr.msk.bf16.gmra.mrb[196].mxu1 %vm7254_vm8, %v8616_v0 }
0x10b0   : > { %15465 = vmatprep.mubr.msk.bf16.mxu1 %vm17454_vm0, %v17453_v1 }
0x10b7   : > { %15466 = vmatmul.mubr.msk.bf16.gmra.mrb[200].mxu1 %vm7254_vm8, %v8619_v30 }
0x10b8   : > { %15563 = vmatprep.mubr.msk.bf16.mxu1 %vm17454_vm0, %v17453_v1 }
0x116a   : > { %v8955_v16 = vpop.f32.mrb[184].mxu1 }
0x116b   : > { %v16065_v31 = vadd.f32 %v21110_v20, %v8955_v16  ;;  %v15451_v12 = vpop.f32.mrb[185].mxu1 }
0x116c   : > { %v8958_v33 = vpop.f32.mrb[186].mxu1 }
0x116d   : > { %v9004_v60 = vmax.f32 %v16065_v31, 0.0  ;;  %v16066_v9 = vadd.f32 %v21110_v20, %v8958_v33  ;;  %v15452_v29 = vpop.f32.mrb[187].mxu1 }
0x116e   : > { %v17343_v29 = vld [vmem:[%s21848_s2 + $0x1b8] sm:$0xff]  }
0x116f   : > { %v9005_v19 = vmax.f32 %v16066_v9, 0.0  ;;  %v9014_v26 = vmul.f32 %v17435_v8, %v9004_v60 }
0x1171   : > { %v9015_v53 = vmul.f32 %v17436_v44, %v9005_v19  ;;  %v17441_v44 = vld [vmem:[%s21787_s21 + $0x30] sm:$0xff] }
0x1172   : > { %v8963_v23 = vpop.f32.mrb[188].mxu1 }
0x1173   : > { %v21120_v49 = vpack.c.bf16 %v9015_v53, %v9014_v26  ;;  %v16067_v15 = vadd.f32 %v21110_v20, %v8963_v23  ;;  %v15455_v62 = vpop.f32.mrb[189].mxu1  ;;  %v17442_v23 = vld [vmem:[%s21787_s21 + $0x38] sm:$0xff] }
0x1174   : > { %v8966_v54 = vpop.f32.mrb[190].mxu1 }
0x1175   : > { %v9032_v25 = vshrl.u32 %v21120_v49, 16  ;;  %v9035_v24 = vshll.u32 %v21120_v49, 16  ;;  %v9006_v21 = vmax.f32 %v16067_v15, 0.0  ;;  %v16068_v59 = vadd.f32 %v21110_v20, %v8966_v54  ;;  %v15456_v43 = vpop.f32.mrb[191].mxu1 }
0x1177   : > { %v9034_v48 = vrot.slane %v9032_v25, 7  ;;  %v9072_v39 = vrot.slane %v9035_v24, 1  ;;  %v9007_v3 = vmax.f32 %v16068_v59, 0.0  ;;  %v9016_v63 = vmul.f32 %v17437_v45, %v9006_v21 }
0x1179   : > { %v9073_v2 = vor.u32 %v9072_v39, %v9032_v25  ;;  %v9017_v11 = vmul.f32 %v17438_v17, %v9007_v3  ;;  %v9037_v28 = vor.u32 %v9035_v24, %v9034_v48 }
0x117a   : > { %v8971_v41 = vpop.f32.mrb[192].mxu1 }
0x117b   : > { %v21135_v50 = vpack.c.bf16 %v9017_v11, %v9016_v63  ;;  %v16069_v10 = vadd.f32 %v21110_v20, %v8971_v41  ;;  %v15459_v46 = vpop.f32.mrb[193].mxu1  ;;  %v9071_v38 = vsel %vm17646_vm4, 0, %v9037_v28  ;;  %v17443_v41 = vld [vmem:[%s21787_s21 + $0x40] sm:$0xff] }
0x117c   : > { %v8974_v58 = vpop.f32.mrb[194].mxu1  ;;  %15478 = vmatmul.mubr.msk.bf16.vlgmr.msra.gmra.mrb[204].mxu0 %vm7254_vm8, %v9071_v38  ;;  %v17444_v46 = vld [vmem:[%s21787_s21 + $0x48] sm:$0xff] }
0x117d   : > { %v9039_v6 = vshrl.u32 %v21135_v50, 16  ;;  %v9042_v57 = vshll.u32 %v21135_v50, 16  ;;  %v9008_v27 = vmax.f32 %v16069_v10, 0.0  ;;  %v16070_v52 = vadd.f32 %v21110_v20, %v8974_v58  ;;  %v15460_v42 = vpop.f32.mrb[195].mxu1  ;;  %15498 = vmatpush3.bf16.msra.mxu0 %v17340_v47  ;;  %15481 = vmatprep.mubr.msk.bf16.mxu0 %vm17454_vm0, %v17453_v1 }
0x117e   : > { %15499 = vmatprep.subr.bf16.mxu0 %v17453_v1 }
0x117f   : > { %v9074_v40 = vrot.slane %v9042_v57, 1  ;;  %v9009_v37 = vmax.f32 %v16070_v52, 0.0  ;;  %v9041_v18 = vrot.slane %v9039_v6, 7  ;;  %v9018_v55 = vmul.f32 %v17439_v34, %v9008_v27 }
0x1181   : > { %v9019_v0 = vmul.f32 %v17440_v5, %v9009_v37  ;;  %v9044_v7 = vor.u32 %v9042_v57, %v9041_v18  ;;  %15500 = vmatpush3.bf16.msra.mxu0 %v17341_v32  ;;  %v21160_v51 = vsel %vm951_vm5, %v9073_v2, %v9074_v40  ;;  %v9076_v13 = vor.u32 %v9074_v40, %v9039_v6  ;;  %v17344_v5 = vld [vmem:[%s21848_s2 + $0x1c0] sm:$0xff]  }
0x1182   : > { %v8979_v22 = vpop.f32.mrb[196].mxu1  ;;  %15501 = vmatprep.subr.bf16.mxu0 %v17453_v1 }
0x1183   : > { %v21163_v56 = vpack.c.bf16 %v9019_v0, %v9018_v55  ;;  %v16071_v30 = vadd.f32 %v21110_v20, %v8979_v22  ;;  %v15463_v35 = vpop.f32.mrb[197].mxu1  ;;  %v9045_v61 = vsel %vm875_vm1, %v9034_v48, %v9044_v7  ;;  %v17345_v0 = vld [vmem:[%s21848_s2 + $0x1c8] sm:$0xff]   ;;  %v17346_v7 = vld [vmem:[%s21848_s2 + $0x1d0] sm:$0xff]  }
0x1184   : > { %v8982_v16 = vpop.f32.mrb[198].mxu1  ;;  %15482 = vmatmul.mubr.msk.bf16.gmra.mrb[208].mxu0 %vm7254_vm8, %v9045_v61 }
0x1185   : > { %v9047_v31 = vshrl.u32 %v21163_v56, 16  ;;  %v9050_v12 = vshll.u32 %v21163_v56, 16  ;;  %v9010_v33 = vmax.f32 %v16071_v30, 0.0  ;;  %v16072_v60 = vadd.f32 %v21110_v20, %v8982_v16  ;;  %v15464_v9 = vpop.f32.mrb[199].mxu1  ;;  %15485 = vmatprep.mubr.msk.bf16.mxu0 %vm17454_vm0, %v17453_v1  ;;  %15502 = vmatpush3.bf16.msra.mxu0 %v17342_v36  ;;  %v12948_v36 = vld [vmem:[%s21849_s30 + $0x5] ss:$0 sm:$0xff] }
0x1186   : > { %15503 = vmatprep.subr.bf16.mxu0 %v17453_v1 }
0x1187   : > { %v9011_v19 = vmax.f32 %v16072_v60, 0.0  ;;  %v9049_v8 = vrot.slane %v9047_v31, 7  ;;  %v9077_v26 = vrot.slane %v9050_v12, 1  ;;  %v9020_v53 = vmul.f32 %v17441_v44, %v9010_v33 }
0x1189   : > { %v9021_v15 = vmul.f32 %v17442_v23, %v9011_v19  ;;  %v9052_v62 = vor.u32 %v9050_v12, %v9049_v8  ;;  %15504 = vmatpush3.bf16.msra.mxu0 %v17343_v29  ;;  %v21184_v54 = vsel %vm951_vm5, %v9076_v13, %v9077_v26  ;;  %v9079_v25 = vor.u32 %v9077_v26, %v9047_v31 }
0x118a   : > { %v8987_v24 = vpop.f32.mrb[200].mxu1  ;;  %15525 = vmatprep.subr.bf16.mxu0 %v17453_v1 }
0x118b   : > { %v9027_v21 = vpack.c.bf16 %v9021_v15, %v9020_v53  ;;  %v16073_v59 = vadd.f32 %v21110_v20, %v8987_v24  ;;  %v15467_v43 = vpop.f32.mrb[201].mxu1  ;;  %v9053_v48 = vsel %vm875_vm1, %v9041_v18, %v9052_v62 }
0x118c   : > { %v8990_v39 = vpop.f32.mrb[202].mxu1  ;;  %15486 = vmatmul.mubr.msk.bf16.gmra.mrb[212].mxu0 %vm7254_vm8, %v9053_v48 }
0x118d   : > { %v9055_v3 = vshrl.u32 %v9027_v21, 16  ;;  %v9058_v2 = vshll.u32 %v9027_v21, 16  ;;  %v9012_v45 = vmax.f32 %v16073_v59, 0.0  ;;  %v16074_v63 = vadd.f32 %v21110_v20, %v8990_v39  ;;  %v15468_v17 = vpop.f32.mrb[203].mxu1  ;;  %15489 = vmatprep.mubr.msk.bf16.mxu0 %vm17454_vm0, %v17453_v1 }
0x118f   : > { %v9013_v11 = vmax.f32 %v16074_v63, 0.0  ;;  %v9057_v28 = vrot.slane %v9055_v3, 7  ;;  %v9080_v47 = vrot.slane %v9058_v2, 1  ;;  %v9022_v10 = vmul.f32 %v17443_v41, %v9012_v45 }
0x1191   : > { %v9023_v38 = vmul.f32 %v17444_v46, %v9013_v11  ;;  %v9060_v58 = vor.u32 %v9058_v2, %v9057_v28  ;;  %v9081_v20 = vsel %vm951_vm5, %v9079_v25, %v9080_v47  ;;  %v9082_v6 = vor.u32 %v9080_v47, %v9055_v3 }
0x1193   : > { %v9028_v57 = vpack.c.bf16 %v9023_v38, %v9022_v10  ;;  %v9061_v27 = vsel %vm875_vm1, %v9049_v8, %v9060_v58 }
0x1194   : > { %15490 = vmatmul.mubr.msk.bf16.gmra.mrb[216].mxu0 %vm7254_vm8, %v9061_v27  ;;  %v17351_v27 = vld [vmem:[%s21777_s11] sm:$0xff]  }
0x1195   : > { %v9063_v52 = vshrl.u32 %v9028_v57, 16  ;;  %v9066_v42 = vshll.u32 %v9028_v57, 16  ;;  %15493 = vmatprep.mubr.msk.bf16.mxu0 %vm17454_vm0, %v17453_v1 }
0x1197   : > { %v9065_v32 = vrot.slane %v9063_v52, 7  ;;  %v9083_v40 = vrot.slane %v9066_v42, 1 }
0x1199   : > { %v9068_v37 = vor.u32 %v9066_v42, %v9065_v32  ;;  %v9084_v18 = vsel %vm951_vm5, %v9082_v6, %v9083_v40  ;;  %v9085_v34 = vor.u32 %v9083_v40, %v9063_v52  ;;  %v17352_v52 = vld [vmem:[%s21777_s11 + $0x8] sm:$0xff]   ;;  %v17350_v32 = vld [vmem:[%s21784_s18 + $0x10] sm:$0xff]  }
0x119a   : > { %v17349_v42 = vld [vmem:[%s21784_s18 + $0x8] sm:$0xff]   ;;  %v17353_v40 = vld [vmem:[%s21777_s11 + $0x10] sm:$0xff]  }
0x119b   : > { %v9069_v55 = vsel %vm875_vm1, %v9057_v28, %v9068_v37  ;;  %v17354_v37 = vld [vmem:[%s21777_s11 + $0x18] sm:$0xff]  }
0x119c   : > { %15494 = vmatmul.mubr.msk.bf16.gmra.mrb[220].mxu0 %vm7254_vm8, %v9069_v55 }
0x119d   : > { %15505 = vmatprep.mubr.msk.bf16.mxu0 %vm17454_vm0, %v17453_v1 }
0x11a4   : > { %15506 = vmatmul.mubr.msk.bf16.vlgmr.msra.gmra.mrb[204].mxu0 %vm7254_vm8, %v21120_v49  ;;  %v17347_v49 = vld [vmem:[%s21848_s2 + $0x1d8] sm:$0xff]  }
0x11a5   : > { %15526 = vmatpush3.bf16.msra.mxu0 %v17344_v5  ;;  %15509 = vmatprep.mubr.msk.bf16.mxu0 %vm17454_vm0, %v17453_v1 }
0x11a6   : > { %15527 = vmatprep.subr.bf16.mxu0 %v17453_v1 }
0x11a9   : > { %15528 = vmatpush3.bf16.msra.mxu0 %v17345_v0 }
0x11aa   : > { %15529 = vmatprep.subr.bf16.mxu0 %v17453_v1 }
0x11ac   : > { %15510 = vmatmul.mubr.msk.bf16.gmra.mrb[208].mxu0 %vm7254_vm8, %v21135_v50  ;;  %v9087_v50 = vsel %vm18070_vm7, %v9085_v34, 0 }
0x11ad   : > { %15513 = vmatprep.mubr.msk.bf16.mxu0 %vm17454_vm0, %v17453_v1  ;;  %15530 = vmatpush3.bf16.msra.mxu0 %v17346_v7 }
0x11ae   : > { %15531 = vmatprep.subr.bf16.mxu0 %v17453_v1 }
0x11b1   : > { %15532 = vmatpush3.bf16.msra.mxu0 %v17347_v49 }
0x11b2   : > { %15635 = vmatprep.subr.bf16.mxu0 %v17453_v1 }
0x11b4   : > { %15514 = vmatmul.mubr.msk.bf16.gmra.mrb[212].mxu0 %vm7254_vm8, %v21163_v56 }
0x11b5   : > { %15517 = vmatprep.mubr.msk.bf16.mxu0 %vm17454_vm0, %v17453_v1 }
0x11bc   : > { %15518 = vmatmul.mubr.msk.bf16.gmra.mrb[216].mxu0 %vm7254_vm8, %v9027_v21 }
0x11bd   : > { %15521 = vmatprep.mubr.msk.bf16.mxu0 %vm17454_vm0, %v17453_v1 }
0x11c4   : > { %15522 = vmatmul.mubr.msk.bf16.gmra.mrb[220].mxu0 %vm7254_vm8, %v9028_v57  ;;  %v17348_v57 = vld [vmem:[%s21784_s18] sm:$0xff]  }
0x11c5   : > { %15533 = vmatprep.mubr.msk.bf16.mxu0 %vm17454_vm0, %v17453_v1 }
0x11cc   : > { %15534 = vmatmul.mubr.msk.bf16.vlgmr.msra.gmra.mrb[204].mxu0 %vm7254_vm8, %v21160_v51 }
0x11cd   : > { %15537 = vmatprep.mubr.msk.bf16.mxu0 %vm17454_vm0, %v17453_v1 }
0x11d4   : > { %15538 = vmatmul.mubr.msk.bf16.gmra.mrb[208].mxu0 %vm7254_vm8, %v21184_v54 }
0x11d5   : > { %15541 = vmatprep.mubr.msk.bf16.mxu0 %vm17454_vm0, %v17453_v1 }
0x11dc   : > { %15542 = vmatmul.mubr.msk.bf16.gmra.mrb[212].mxu0 %vm7254_vm8, %v9081_v20 }
0x11dd   : > { %15545 = vmatprep.mubr.msk.bf16.mxu0 %vm17454_vm0, %v17453_v1 }
0x11e4   : > { %15546 = vmatmul.mubr.msk.bf16.gmra.mrb[216].mxu0 %vm7254_vm8, %v9084_v18  ;;  %v17363_v18 = vld [vmem:[%s21778_s12] sm:$0xff]  }
0x11e5   : > { %15549 = vmatprep.mubr.msk.bf16.mxu0 %vm17454_vm0, %v17453_v1  ;;  %15636 = vmatpush3.bf16.msra.mxu0 %v17363_v18 }
0x11e6   : > { %15637 = vmatprep.subr.bf16.mxu0 %v17453_v1 }
0x11ec   : > { %15550 = vmatmul.mubr.msk.bf16.gmra.mrb[220].mxu0 %vm7254_vm8, %v9087_v50 }
0x11ed   : > { %15639 = vmatprep.mubr.msk.bf16.mxu0 %vm17454_vm0, %v17453_v1 }
0x129f   : > { %v9423_v51 = vpop.f32.mrb[204].mxu0 }
0x12a0   : > { %v16075_v13 = vadd.f32 %v12948_v36, %v9423_v51  ;;  %v15535_v22 = vpop.f32.mrb[205].mxu0 }
0x12a1   : > { %v9426_v56 = vpop.f32.mrb[206].mxu0 }
0x12a2   : > { %v16076_v30 = vadd.f32 %v12948_v36, %v9426_v56  ;;  %v15536_v35 = vpop.f32.mrb[207].mxu0  ;;  %v9472_v61 = vmax.f32 %v16075_v13, 0.0  ;;  %v17355_v56 = vld [vmem:[%s21777_s11 + $0x20] sm:$0xff]  }
0x12a4   : > { %v9473_v16 = vmax.f32 %v16076_v30, 0.0 }
0x12a6   : > { %v9482_v31 = vpack.c.bf16 %v9473_v16, %v9472_v61 }
0x12a7   : > { %v9431_v12 = vpop.f32.mrb[208].mxu0 }
0x12a8   : > { %v16077_v33 = vadd.f32 %v12948_v36, %v9431_v12  ;;  %v15539_v60 = vpop.f32.mrb[209].mxu0  ;;  %15554 = vmatpush3.bf16.msra.mxu1 %v9482_v31 }
0x12a9   : > { %v9434_v9 = vpop.f32.mrb[210].mxu0  ;;  %15555 = vmatprep.subr.bf16.mxu1 %v17453_v1  ;;  %v17356_v60 = vld [vmem:[%s21777_s11 + $0x28] sm:$0xff]  }
0x12aa   : > { %v16078_v29 = vadd.f32 %v12948_v36, %v9434_v9  ;;  %v15540_v19 = vpop.f32.mrb[211].mxu0  ;;  %v9474_v8 = vmax.f32 %v16077_v33, 0.0 }
0x12ac   : > { %v9475_v26 = vmax.f32 %v16078_v29, 0.0 }
0x12ae   : > { %v9483_v44 = vpack.c.bf16 %v9475_v26, %v9474_v8 }
0x12af   : > { %v9439_v53 = vpop.f32.mrb[212].mxu0 }
0x12b0   : > { %v16079_v23 = vadd.f32 %v12948_v36, %v9439_v53  ;;  %v15543_v15 = vpop.f32.mrb[213].mxu0  ;;  %15556 = vmatpush3.bf16.msra.mxu1 %v9483_v44  ;;  %v17357_v53 = vld [vmem:[%s21777_s11 + $0x30] sm:$0xff]  }
0x12b1   : > { %v9442_v62 = vpop.f32.mrb[214].mxu0  ;;  %15557 = vmatprep.subr.bf16.mxu1 %v17453_v1 }
0x12b2   : > { %v16080_v54 = vadd.f32 %v12948_v36, %v9442_v62  ;;  %v15544_v25 = vpop.f32.mrb[215].mxu0  ;;  %v9476_v24 = vmax.f32 %v16079_v23, 0.0 }
0x12b4   : > { %v9477_v21 = vmax.f32 %v16080_v54, 0.0 }
0x12b6   : > { %v9484_v59 = vpack.c.bf16 %v9477_v21, %v9476_v24 }
0x12b7   : > { %v9447_v43 = vpop.f32.mrb[216].mxu0 }
0x12b8   : > { %v16081_v48 = vadd.f32 %v12948_v36, %v9447_v43  ;;  %v15547_v39 = vpop.f32.mrb[217].mxu0  ;;  %15558 = vmatpush3.bf16.msra.mxu1 %v9484_v59  ;;  %v17358_v59 = vld [vmem:[%s21777_s11 + $0x38] sm:$0xff]  }
0x12b9   : > { %v9450_v3 = vpop.f32.mrb[218].mxu0  ;;  %15559 = vmatprep.subr.bf16.mxu1 %v17453_v1 }
0x12ba   : > { %v16082_v2 = vadd.f32 %v12948_v36, %v9450_v3  ;;  %v15548_v45 = vpop.f32.mrb[219].mxu0  ;;  %v9478_v63 = vmax.f32 %v16081_v48, 0.0 }
0x12bc   : > { %v9479_v17 = vmax.f32 %v16082_v2, 0.0 }
0x12be   : > { %v9485_v11 = vpack.c.bf16 %v9479_v17, %v9478_v63  ;;  %v17359_v63 = vld [vmem:[%s21777_s11 + $0x40] sm:$0xff]   ;;  %v17360_v17 = vld [vmem:[%s21777_s11 + $0x48] sm:$0xff]  }
0x12bf   : > { %v9455_v28 = vpop.f32.mrb[220].mxu0 }
0x12c0   : > { %v16083_v47 = vadd.f32 %v12948_v36, %v9455_v28  ;;  %v15551_v41 = vpop.f32.mrb[221].mxu0  ;;  %15560 = vmatpush3.bf16.msra.mxu1 %v9485_v11  ;;  %v17361_v11 = vld [vmem:[%s21777_s11 + $0x50] sm:$0xff]   ;;  %v17362_v28 = vld [vmem:[%s21777_s11 + $0x58] sm:$0xff]  }
0x12c1   : > { %v9458_v10 = vpop.f32.mrb[222].mxu0  ;;  %15561 = vmatprep.subr.bf16.mxu1 %v17453_v1 }
0x12c2   : > { %v16084_v46 = vadd.f32 %v12948_v36, %v9458_v10  ;;  %v15552_v38 = vpop.f32.mrb[223].mxu0  ;;  %v9480_v58 = vmax.f32 %v16083_v47, 0.0  ;;  %v17364_v10 = vld [vmem:[%s21778_s12 + $0x8] sm:$0xff]  }
0x12c3   : > { %15638 = vmatpush3.bf16.msra.mxu0 %v17364_v10  ;;  %v12998_v38 = vld [vmem:[%s21779_s13] ss:$0 sm:$0xff] }
0x12c4   : > { %v9481_v20 = vmax.f32 %v16084_v46, 0.0  ;;  %15651 = vmatprep.subr.bf16.mxu0 %v17453_v1  ;;  %v17369_v46 = vld [vmem:[%s21778_s12 + $0x30] sm:$0xff]  }
0x12c6   : > { %v9486_v6 = vpack.c.bf16 %v9481_v20, %v9480_v58 }
0x12c8   : > { %15562 = vmatpush3.bf16.msra.mxu1 %v9486_v6 }
0x12c9   : > { %15575 = vmatprep.subr.bf16.mxu1 %v17453_v1 }
0x12cb   : > { %15564 = vmatmul.mubr.msk.bf16.vlgmr.msra.gmra.mrb[204].mxu1 %vm9508_vm9, %v17348_v57 }
0x12cc   : > { %15567 = vmatprep.mubr.msk.bf16.mxu1 %vm17454_vm0, %v17453_v1  ;;  %15576 = vmatpush3.bf16.msra.mxu1 %v17351_v27 }
0x12cd   : > { %15577 = vmatprep.subr.bf16.mxu1 %v17453_v1 }
0x12d0   : > { %15578 = vmatpush3.bf16.msra.mxu1 %v17352_v52 }
0x12d1   : > { %15579 = vmatprep.subr.bf16.mxu1 %v17453_v1 }
0x12d3   : > { %15568 = vmatmul.mubr.msk.bf16.gmra.mrb[208].mxu1 %vm9508_vm9, %v17349_v42 }
0x12d4   : > { %15571 = vmatprep.mubr.msk.bf16.mxu1 %vm17454_vm0, %v17453_v1  ;;  %15580 = vmatpush3.bf16.msra.mxu1 %v17353_v40  ;;  %v21391_v40 = vld [vmem:[%s21788_s22 + $0x8] sm:$0xff] }
0x12d5   : > { %15581 = vmatprep.subr.bf16.mxu1 %v17453_v1 }
0x12d8   : > { %15582 = vmatpush3.bf16.msra.mxu1 %v17354_v37 }
0x12d9   : > { %15595 = vmatprep.subr.bf16.mxu1 %v17453_v1 }
0x12db   : > { %15572 = vmatmul.mubr.msk.bf16.gmra.mrb[212].mxu1 %vm9508_vm9, %v17350_v32  ;;  %v21386_v32 = vld [vmem:[%s21788_s22] sm:$0xff] }
0x12dc   : > { %15583 = vmatprep.mubr.msk.bf16.mxu1 %vm17454_vm0, %v17453_v1 }
0x139e   : > { %v9552_v34 = vpop.f32.mrb[204].mxu1 }
0x139f   : > { %v15565_v55 = vpop.f32.mrb[205].mxu1 }
0x13a0   : > { %v9555_v5 = vpop.f32.mrb[206].mxu1 }
0x13a1   : > { %v9575_v0 = vpack.c.bf16 %v9555_v5, %v9552_v34  ;;  %v15566_v7 = vpop.f32.mrb[207].mxu1 }
0x13a3   : > { %v9580_v49 = vshrl.u32 %v9575_v0, 16  ;;  %v9583_v36 = vshll.u32 %v9575_v0, 16 }
0x13a5   : > { %v9582_v50 = vrot.slane %v9580_v49, 7  ;;  %v9604_v35 = vrot.slane %v9583_v36, 1 }
0x13a6   : > { %v9560_v51 = vpop.f32.mrb[208].mxu1 }
0x13a7   : > { %v9585_v13 = vor.u32 %v9583_v36, %v9582_v50  ;;  %v15569_v22 = vpop.f32.mrb[209].mxu1  ;;  %v9605_v9 = vor.u32 %v9604_v35, %v9580_v49 }
0x13a8   : > { %v9563_v30 = vpop.f32.mrb[210].mxu1  ;;  %v21398_v22 = vld [vmem:[%s21788_s22 + $0x10] sm:$0xff] }
0x13a9   : > { %v9576_v61 = vpack.c.bf16 %v9563_v30, %v9560_v51  ;;  %v15570_v16 = vpop.f32.mrb[211].mxu1  ;;  %v9603_v31 = vsel %vm17646_vm4, 0, %v9585_v13 }
0x13aa   : > { %15584 = vmatmul.mubr.msk.bf16.vlgmr.msra.gmra.mrb[216].mxu1 %vm7254_vm8, %v9603_v31 }
0x13ab   : > { %v9587_v12 = vshrl.u32 %v9576_v61, 16  ;;  %v9590_v33 = vshll.u32 %v9576_v61, 16  ;;  %15596 = vmatpush3.bf16.msra.mxu1 %v17355_v56  ;;  %15587 = vmatprep.mubr.msk.bf16.mxu1 %vm17454_vm0, %v17453_v1  ;;  %v21403_v56 = vld [vmem:[%s21788_s22 + $0x18] sm:$0xff] }
0x13ac   : > { %15597 = vmatprep.subr.bf16.mxu1 %v17453_v1 }
0x13ad   : > { %v9589_v29 = vrot.slane %v9587_v12, 7  ;;  %v9606_v19 = vrot.slane %v9590_v33, 1 }
0x13ae   : > { %v9568_v8 = vpop.f32.mrb[212].mxu1 }
0x13af   : > { %v9592_v26 = vor.u32 %v9590_v33, %v9589_v29  ;;  %v15573_v44 = vpop.f32.mrb[213].mxu1  ;;  %15598 = vmatpush3.bf16.msra.mxu1 %v17356_v60  ;;  %v9607_v23 = vsel %vm951_vm5, %v9605_v9, %v9606_v19  ;;  %v9608_v43 = vor.u32 %v9606_v19, %v9587_v12  ;;  %v17365_v33 = vld [vmem:[%s21778_s12 + $0x10] sm:$0xff]  }
0x13b0   : > { %v9571_v15 = vpop.f32.mrb[214].mxu1  ;;  %15599 = vmatprep.subr.bf16.mxu1 %v17453_v1 }
0x13b1   : > { %v9577_v62 = vpack.c.bf16 %v9571_v15, %v9568_v8  ;;  %v15574_v54 = vpop.f32.mrb[215].mxu1  ;;  %v9593_v25 = vsel %vm875_vm1, %v9582_v50, %v9592_v26 }
0x13b2   : > { %15588 = vmatmul.mubr.msk.bf16.gmra.mrb[220].mxu1 %vm7254_vm8, %v9593_v25  ;;  %v17366_v25 = vld [vmem:[%s21778_s12 + $0x18] sm:$0xff]  }
0x13b3   : > { %v9595_v24 = vshrl.u32 %v9577_v62, 16  ;;  %v9598_v21 = vshll.u32 %v9577_v62, 16  ;;  %15591 = vmatprep.mubr.msk.bf16.mxu1 %vm17454_vm0, %v17453_v1  ;;  %15600 = vmatpush3.bf16.msra.mxu1 %v17357_v53 }
0x13b4   : > { %15601 = vmatprep.subr.bf16.mxu1 %v17453_v1 }
0x13b5   : > { %v9597_v48 = vrot.slane %v9595_v24, 7  ;;  %v9609_v39 = vrot.slane %v9598_v21, 1 }
0x13b7   : > { %v9600_v3 = vor.u32 %v9598_v21, %v9597_v48  ;;  %15602 = vmatpush3.bf16.msra.mxu1 %v17358_v59  ;;  %v9610_v2 = vsel %vm951_vm5, %v9608_v43, %v9609_v39  ;;  %v9611_v47 = vor.u32 %v9609_v39, %v9595_v24  ;;  %v21421_v24 = vld [vmem:[%s21788_s22 + $0x20] sm:$0xff]  ;;  %v21426_v21 = vld [vmem:[%s21788_s22 + $0x28] sm:$0xff] }
0x13b8   : > { %15615 = vmatprep.subr.bf16.mxu1 %v17453_v1 }
0x13b9   : > { %v9601_v45 = vsel %vm875_vm1, %v9589_v29, %v9600_v3  ;;  %v9613_v41 = vsel %vm18070_vm7, %v9611_v47, 0 }
0x13ba   : > { %15592 = vmatmul.mubr.msk.bf16.gmra.mrb[224].mxu1 %vm7254_vm8, %v9601_v45 }
0x13bb   : > { %15603 = vmatprep.mubr.msk.bf16.mxu1 %vm17454_vm0, %v17453_v1 }
0x13c2   : > { %15604 = vmatmul.mubr.msk.bf16.vlgmr.msra.gmra.mrb[216].mxu1 %vm7254_vm8, %v9575_v0 }
0x13c3   : > { %15616 = vmatpush3.bf16.msra.mxu1 %v17359_v63  ;;  %15607 = vmatprep.mubr.msk.bf16.mxu1 %vm17454_vm0, %v17453_v1 }
0x13c4   : > { %15617 = vmatprep.subr.bf16.mxu1 %v17453_v1 }
0x13c7   : > { %15618 = vmatpush3.bf16.msra.mxu1 %v17360_v17 }
0x13c8   : > { %15619 = vmatprep.subr.bf16.mxu1 %v17453_v1 }
0x13ca   : > { %15608 = vmatmul.mubr.msk.bf16.gmra.mrb[220].mxu1 %vm7254_vm8, %v9576_v61 }
0x13cb   : > { %15611 = vmatprep.mubr.msk.bf16.mxu1 %vm17454_vm0, %v17453_v1  ;;  %15620 = vmatpush3.bf16.msra.mxu1 %v17361_v11 }
0x13cc   : > { %15621 = vmatprep.subr.bf16.mxu1 %v17453_v1 }
0x13cf   : > { %15622 = vmatpush3.bf16.msra.mxu1 %v17362_v28 }
0x13d0   : > { %15683 = vmatprep.subr.bf16.mxu1 %v17453_v1 }
0x13d2   : > { %15612 = vmatmul.mubr.msk.bf16.gmra.mrb[224].mxu1 %vm7254_vm8, %v9577_v62 }
0x13d3   : > { %15623 = vmatprep.mubr.msk.bf16.mxu1 %vm17454_vm0, %v17453_v1 }
0x13da   : > { %15624 = vmatmul.mubr.msk.bf16.vlgmr.msra.gmra.mrb[216].mxu1 %vm7254_vm8, %v9607_v23 }
0x13db   : > { %15627 = vmatprep.mubr.msk.bf16.mxu1 %vm17454_vm0, %v17453_v1  ;;  %15684 = vmatpush3.bf16.msra.mxu1 %v17369_v46 }
0x13dc   : > { %15685 = vmatprep.subr.bf16.mxu1 %v17453_v1 }
0x13e2   : > { %15628 = vmatmul.mubr.msk.bf16.gmra.mrb[220].mxu1 %vm7254_vm8, %v9610_v2 }
0x13e3   : > { %15631 = vmatprep.mubr.msk.bf16.mxu1 %vm17454_vm0, %v17453_v1 }
0x13ea   : > { %15632 = vmatmul.mubr.msk.bf16.gmra.mrb[224].mxu1 %vm7254_vm8, %v9613_v41 }
0x13eb   : > { %15687 = vmatprep.mubr.msk.bf16.mxu1 %vm17454_vm0, %v17453_v1 }
0x14ad   : > { %v9896_v58 = vpop.f32.mrb[216].mxu1 }
0x14ae   : > { %v16085_v20 = vadd.f32 %v12998_v38, %v9896_v58  ;;  %v15625_v6 = vpop.f32.mrb[217].mxu1 }
0x14af   : > { %v9899_v57 = vpop.f32.mrb[218].mxu1  ;;  %v17367_v6 = vld [vmem:[%s21778_s12 + $0x20] sm:$0xff]  }
0x14b0   : > { %v9925_v27 = vmax.f32 %v16085_v20, 0.0  ;;  %v16086_v52 = vadd.f32 %v12998_v38, %v9899_v57  ;;  %v15626_v42 = vpop.f32.mrb[219].mxu1  ;;  %v17368_v57 = vld [vmem:[%s21778_s12 + $0x28] sm:$0xff]  }
0x14b1   : > { %v17370_v42 = vld [vmem:[%s21778_s12 + $0x38] sm:$0xff]  }
0x14b2   : > { %v9926_v37 = vmax.f32 %v16086_v52, 0.0  ;;  %v9937_v18 = vmul.f32 %v21386_v32, %v9925_v27  ;;  %15686 = vmatpush3.bf16.msra.mxu1 %v17370_v42 }
0x14b3   : > { %15699 = vmatprep.subr.bf16.mxu1 %v17453_v1 }
0x14b4   : > { %v9938_v34 = vmul.f32 %v21391_v40, %v9926_v37  ;;  %v17375_v37 = vld [vmem:[%s21778_s12 + $0x60] sm:$0xff]  }
0x14b5   : > { %v9904_v55 = vpop.f32.mrb[220].mxu1 }
0x14b6   : > { %v9943_v5 = vpack.c.bf16 %v9938_v34, %v9937_v18  ;;  %v16087_v0 = vadd.f32 %v12998_v38, %v9904_v55  ;;  %v15629_v7 = vpop.f32.mrb[221].mxu1  ;;  %v13037_v18 = vld [vmem:[%s21779_s13 + $0x1] ss:$0 sm:$0xff] }
0x14b7   : > { %v9907_v49 = vpop.f32.mrb[222].mxu1 }
0x14b8   : > { %v9949_v50 = vshrl.u32 %v9943_v5, 16  ;;  %v9927_v36 = vmax.f32 %v16087_v0, 0.0  ;;  %v16088_v51 = vadd.f32 %v12998_v38, %v9907_v49  ;;  %v15630_v13 = vpop.f32.mrb[223].mxu1  ;;  %v9952_v35 = vshll.u32 %v9943_v5, 16 }
0x14ba   : > { %v9951_v30 = vrot.slane %v9949_v50, 7  ;;  %v9928_v61 = vmax.f32 %v16088_v51, 0.0  ;;  %v9939_v16 = vmul.f32 %v21398_v22, %v9927_v36  ;;  %v9973_v9 = vrot.slane %v9952_v35, 1 }
0x14bc   : > { %v9940_v31 = vmul.f32 %v21403_v56, %v9928_v61  ;;  %v9954_v12 = vor.u32 %v9952_v35, %v9951_v30  ;;  %v9974_v59 = vor.u32 %v9973_v9, %v9949_v50 }
0x14bd   : > { %v9912_v60 = vpop.f32.mrb[224].mxu1 }
0x14be   : > { %v9944_v29 = vpack.c.bf16 %v9940_v31, %v9939_v16  ;;  %v16089_v19 = vadd.f32 %v12998_v38, %v9912_v60  ;;  %v15633_v8 = vpop.f32.mrb[225].mxu1  ;;  %v9972_v26 = vsel %vm17646_vm4, 0, %v9954_v12 }
0x14bf   : > { %v9915_v44 = vpop.f32.mrb[226].mxu1  ;;  %15640 = vmatmul.mubr.msk.bf16.vlgmr.msra.gmra.mrb[224].mxu0 %vm10005_vm10, %v9972_v26 }
0x14c0   : > { %v9956_v53 = vshrl.u32 %v9944_v29, 16  ;;  %v9959_v23 = vshll.u32 %v9944_v29, 16  ;;  %v9929_v15 = vmax.f32 %v16089_v19, 0.0  ;;  %v16090_v62 = vadd.f32 %v12998_v38, %v9915_v44  ;;  %v15634_v54 = vpop.f32.mrb[227].mxu1  ;;  %15652 = vmatpush3.bf16.msra.mxu0 %v17365_v33  ;;  %15643 = vmatprep.mubr.msk.bf16.mxu0 %vm17454_vm0, %v17453_v1 }
0x14c1   : > { %15653 = vmatprep.subr.bf16.mxu0 %v17453_v1 }
0x14c2   : > { %v9975_v43 = vrot.slane %v9959_v23, 1  ;;  %v9930_v48 = vmax.f32 %v16090_v62, 0.0  ;;  %v9958_v39 = vrot.slane %v9956_v53, 7  ;;  %v9941_v3 = vmul.f32 %v21421_v24, %v9929_v15 }
0x14c4   : > { %v9942_v2 = vmul.f32 %v21426_v21, %v9930_v48  ;;  %v9961_v45 = vor.u32 %v9959_v23, %v9958_v39  ;;  %15654 = vmatpush3.bf16.msra.mxu0 %v17366_v25  ;;  %v9976_v63 = vsel %vm951_vm5, %v9974_v59, %v9975_v43  ;;  %v9977_v10 = vor.u32 %v9975_v43, %v9956_v53  ;;  %v17371_v23 = vld [vmem:[%s21778_s12 + $0x40] sm:$0xff]  }
0x14c5   : > { %15667 = vmatprep.subr.bf16.mxu0 %v17453_v1 }
0x14c6   : > { %v9945_v17 = vpack.c.bf16 %v9942_v2, %v9941_v3  ;;  %v9962_v11 = vsel %vm875_vm1, %v9951_v30, %v9961_v45 }
0x14c7   : > { %15644 = vmatmul.mubr.msk.bf16.gmra.mrb[228].mxu0 %vm10005_vm10, %v9962_v11 }
0x14c8   : > { %v9964_v28 = vshrl.u32 %v9945_v17, 16  ;;  %v9967_v47 = vshll.u32 %v9945_v17, 16  ;;  %15647 = vmatprep.mubr.msk.bf16.mxu0 %vm17454_vm0, %v17453_v1 }
0x14ca   : > { %v9966_v41 = vrot.slane %v9964_v28, 7  ;;  %v9978_v46 = vrot.slane %v9967_v47, 1 }
0x14cc   : > { %v9969_v38 = vor.u32 %v9967_v47, %v9966_v41  ;;  %v9979_v58 = vsel %vm951_vm5, %v9977_v10, %v9978_v46  ;;  %v9980_v27 = vor.u32 %v9978_v46, %v9964_v28 }
0x14ce   : > { %v9970_v20 = vsel %vm875_vm1, %v9958_v39, %v9969_v38  ;;  %v9982_v52 = vsel %vm18070_vm7, %v9980_v27, 0 }
0x14cf   : > { %15648 = vmatmul.mubr.msk.bf16.gmra.mrb[232].mxu0 %vm10005_vm10, %v9970_v20 }
0x14d0   : > { %15655 = vmatprep.mubr.msk.bf16.mxu0 %vm17454_vm0, %v17453_v1 }
0x14d7   : > { %15656 = vmatmul.mubr.msk.bf16.vlgmr.msra.gmra.mrb[224].mxu0 %vm10005_vm10, %v9943_v5 }
0x14d8   : > { %15668 = vmatpush3.bf16.msra.mxu0 %v17367_v6  ;;  %15659 = vmatprep.mubr.msk.bf16.mxu0 %vm17454_vm0, %v17453_v1 }
0x14d9   : > { %15669 = vmatprep.subr.bf16.mxu0 %v17453_v1 }
0x14dc   : > { %15670 = vmatpush3.bf16.msra.mxu0 %v17368_v57 }
0x14dd   : > { %15731 = vmatprep.subr.bf16.mxu0 %v17453_v1 }
0x14df   : > { %15660 = vmatmul.mubr.msk.bf16.gmra.mrb[228].mxu0 %vm10005_vm10, %v9944_v29 }
0x14e0   : > { %15663 = vmatprep.mubr.msk.bf16.mxu0 %vm17454_vm0, %v17453_v1 }
0x14e7   : > { %15664 = vmatmul.mubr.msk.bf16.gmra.mrb[232].mxu0 %vm10005_vm10, %v9945_v17  ;;  %v17372_v17 = vld [vmem:[%s21778_s12 + $0x48] sm:$0xff]  }
0x14e8   : > { %15671 = vmatprep.mubr.msk.bf16.mxu0 %vm17454_vm0, %v17453_v1 }
0x14ef   : > { %15672 = vmatmul.mubr.msk.bf16.vlgmr.msra.gmra.mrb[224].mxu0 %vm10005_vm10, %v9976_v63 }
0x14f0   : > { %15675 = vmatprep.mubr.msk.bf16.mxu0 %vm17454_vm0, %v17453_v1  ;;  %15732 = vmatpush3.bf16.msra.mxu0 %v17375_v37 }
0x14f1   : > { %15733 = vmatprep.subr.bf16.mxu0 %v17453_v1 }
0x14f7   : > { %15676 = vmatmul.mubr.msk.bf16.gmra.mrb[228].mxu0 %vm10005_vm10, %v9979_v58 }
0x14f8   : > { %15679 = vmatprep.mubr.msk.bf16.mxu0 %vm17454_vm0, %v17453_v1 }
0x14ff   : > { %15680 = vmatmul.mubr.msk.bf16.gmra.mrb[232].mxu0 %vm10005_vm10, %v9982_v52 }
0x1500   : > { %15735 = vmatprep.mubr.msk.bf16.mxu0 %vm17454_vm0, %v17453_v1 }
0x15c2   : > { %v10218_v34 = vpop.f32.mrb[224].mxu0 }
0x15c3   : > { %v16091_v55 = vadd.f32 %v13037_v18, %v10218_v34  ;;  %v15673_v5 = vpop.f32.mrb[225].mxu0 }
0x15c4   : > { %v10221_v0 = vpop.f32.mrb[226].mxu0  ;;  %v17373_v5 = vld [vmem:[%s21778_s12 + $0x50] sm:$0xff]  }
0x15c5   : > { %v10247_v7 = vmax.f32 %v16091_v55, 0.0  ;;  %v16092_v49 = vadd.f32 %v13037_v18, %v10221_v0  ;;  %v15674_v50 = vpop.f32.mrb[227].mxu0  ;;  %v17374_v0 = vld [vmem:[%s21778_s12 + $0x58] sm:$0xff]  }
0x15c6   : > { %v17376_v50 = vld [vmem:[%s21778_s12 + $0x68] sm:$0xff]  }
0x15c7   : > { %v10248_v36 = vmax.f32 %v16092_v49, 0.0  ;;  %v10253_v51 = vmul.f32 %v10247_v7, %v21386_v32  ;;  %15734 = vmatpush3.bf16.msra.mxu0 %v17376_v50 }
0x15c8   : > { %15747 = vmatprep.subr.bf16.mxu0 %v17453_v1 }
0x15c9   : > { %v10254_v13 = vmul.f32 %v10248_v36, %v21391_v40  ;;  %v13066_v36 = vld [vmem:[%s21779_s13 + $0x2] ss:$0 sm:$0xff] }
0x15ca   : > { %v10226_v30 = vpop.f32.mrb[228].mxu0 }
0x15cb   : > { %v10259_v35 = vpack.c.bf16 %v10254_v13, %v10253_v51  ;;  %v16093_v61 = vadd.f32 %v13037_v18, %v10226_v30  ;;  %v15677_v16 = vpop.f32.mrb[229].mxu0 }
0x15cc   : > { %v10229_v31 = vpop.f32.mrb[230].mxu0 }
0x15cd   : > { %v10265_v12 = vshrl.u32 %v10259_v35, 16  ;;  %v10249_v33 = vmax.f32 %v16093_v61, 0.0  ;;  %v16094_v60 = vadd.f32 %v13037_v18, %v10229_v31  ;;  %v15678_v9 = vpop.f32.mrb[231].mxu0  ;;  %v10268_v19 = vshll.u32 %v10259_v35, 16 }
0x15cf   : > { %v10267_v29 = vrot.slane %v10265_v12, 7  ;;  %v10250_v8 = vmax.f32 %v16094_v60, 0.0  ;;  %v10255_v26 = vmul.f32 %v10249_v33, %v21398_v22  ;;  %v10289_v62 = vrot.slane %v10268_v19, 1 }
0x15d1   : > { %v10256_v44 = vmul.f32 %v10250_v8, %v21403_v56  ;;  %v10270_v53 = vor.u32 %v10268_v19, %v10267_v29  ;;  %v10290_v11 = vor.u32 %v10289_v62, %v10265_v12 }
0x15d2   : > { %v10234_v15 = vpop.f32.mrb[232].mxu0 }
0x15d3   : > { %v10260_v54 = vpack.c.bf16 %v10256_v44, %v10255_v26  ;;  %v16095_v25 = vadd.f32 %v13037_v18, %v10234_v15  ;;  %v15681_v59 = vpop.f32.mrb[233].mxu0  ;;  %v10288_v43 = vsel %vm17646_vm4, 0, %v10270_v53 }
0x15d4   : > { %v10237_v48 = vpop.f32.mrb[234].mxu0  ;;  %15688 = vmatmul.mubr.msk.bf16.vlgmr.msra.gmra.mrb[228].mxu1 %vm10005_vm10, %v10288_v43 }
0x15d5   : > { %v10272_v39 = vshrl.u32 %v10260_v54, 16  ;;  %v10275_v3 = vshll.u32 %v10260_v54, 16  ;;  %v10251_v2 = vmax.f32 %v16095_v25, 0.0  ;;  %v16096_v45 = vadd.f32 %v13037_v18, %v10237_v48  ;;  %v15682_v63 = vpop.f32.mrb[235].mxu0  ;;  %15700 = vmatpush3.bf16.msra.mxu1 %v17371_v23  ;;  %15691 = vmatprep.mubr.msk.bf16.mxu1 %vm17454_vm0, %v17453_v1 }
0x15d6   : > { %15701 = vmatprep.subr.bf16.mxu1 %v17453_v1 }
0x15d7   : > { %v10291_v28 = vrot.slane %v10275_v3, 1  ;;  %v10252_v47 = vmax.f32 %v16096_v45, 0.0  ;;  %v10274_v41 = vrot.slane %v10272_v39, 7  ;;  %v10257_v10 = vmul.f32 %v10251_v2, %v21421_v24 }
0x15d9   : > { %v10258_v46 = vmul.f32 %v10252_v47, %v21426_v21  ;;  %v10277_v38 = vor.u32 %v10275_v3, %v10274_v41  ;;  %15702 = vmatpush3.bf16.msra.mxu1 %v17372_v17  ;;  %v10292_v58 = vsel %vm951_vm5, %v10290_v11, %v10291_v28  ;;  %v10293_v42 = vor.u32 %v10291_v28, %v10272_v39 }
0x15da   : > { %15715 = vmatprep.subr.bf16.mxu1 %v17453_v1 }
0x15db   : > { %v10261_v20 = vpack.c.bf16 %v10258_v46, %v10257_v10  ;;  %v10278_v6 = vsel %vm875_vm1, %v10267_v29, %v10277_v38 }
0x15dc   : > { %15692 = vmatmul.mubr.msk.bf16.gmra.mrb[232].mxu1 %vm10005_vm10, %v10278_v6 }
0x15dd   : > { %v10280_v57 = vshrl.u32 %v10261_v20, 16  ;;  %v10283_v27 = vshll.u32 %v10261_v20, 16  ;;  %15695 = vmatprep.mubr.msk.bf16.mxu1 %vm17454_vm0, %v17453_v1 }
0x15df   : > { %v10282_v52 = vrot.slane %v10280_v57, 7  ;;  %v10294_v37 = vrot.slane %v10283_v27, 1 }
0x15e1   : > { %v10285_v18 = vor.u32 %v10283_v27, %v10282_v52  ;;  %v10295_v34 = vsel %vm951_vm5, %v10293_v42, %v10294_v37  ;;  %v10296_v7 = vor.u32 %v10294_v37, %v10280_v57 }
0x15e3   : > { %v10286_v55 = vsel %vm875_vm1, %v10274_v41, %v10285_v18  ;;  %v10298_v49 = vsel %vm18070_vm7, %v10296_v7, 0  ;;  %v17378_v41 = vld [vmem:[%s21778_s12 + $0x78] sm:$0xff]   ;;  %v17379_v7 = vld [vmem:[%s21778_s12 + $0x80] sm:$0xff]  }
0x15e4   : > { %15696 = vmatmul.mubr.msk.bf16.gmra.mrb[236].mxu1 %vm10005_vm10, %v10286_v55 }
0x15e5   : > { %15703 = vmatprep.mubr.msk.bf16.mxu1 %vm17454_vm0, %v17453_v1 }
0x15ec   : > { %15704 = vmatmul.mubr.msk.bf16.vlgmr.msra.gmra.mrb[228].mxu1 %vm10005_vm10, %v10259_v35 }
0x15ed   : > { %15716 = vmatpush3.bf16.msra.mxu1 %v17373_v5  ;;  %15707 = vmatprep.mubr.msk.bf16.mxu1 %vm17454_vm0, %v17453_v1 }
0x15ee   : > { %15717 = vmatprep.subr.bf16.mxu1 %v17453_v1 }
0x15f1   : > { %15718 = vmatpush3.bf16.msra.mxu1 %v17374_v0 }
0x15f4   : > { %15708 = vmatmul.mubr.msk.bf16.gmra.mrb[232].mxu1 %vm10005_vm10, %v10260_v54 }
0x15f5   : > { %15711 = vmatprep.mubr.msk.bf16.mxu1 %vm17454_vm0, %v17453_v1 }
0x15fc   : > { %15712 = vmatmul.mubr.msk.bf16.gmra.mrb[236].mxu1 %vm10005_vm10, %v10261_v20 }
0x15fd   : > { %15719 = vmatprep.mubr.msk.bf16.mxu1 %vm17454_vm0, %v17453_v1 }
0x1604   : > { %15720 = vmatmul.mubr.msk.bf16.vlgmr.msra.gmra.mrb[228].mxu1 %vm10005_vm10, %v10292_v58 }
0x1605   : > { %15723 = vmatprep.mubr.msk.bf16.mxu1 %vm17454_vm0, %v17453_v1 }
0x160c   : > { %15724 = vmatmul.mubr.msk.bf16.gmra.mrb[232].mxu1 %vm10005_vm10, %v10295_v34 }
0x160d   : > { %15727 = vmatprep.mubr.msk.bf16.mxu1 %vm17454_vm0, %v17453_v1 }
0x1614   : > { %15728 = vmatmul.mubr.msk.bf16.gmra.mrb[236].mxu1 %vm10005_vm10, %v10298_v49  ;;  %v17380_v49 = vld [vmem:[%s21778_s12 + $0x88] sm:$0xff]  }
0x16d7   : > { %v10534_v51 = vpop.f32.mrb[228].mxu1 }
0x16d8   : > { %v16097_v13 = vadd.f32 %v13066_v36, %v10534_v51  ;;  %v15721_v30 = vpop.f32.mrb[229].mxu1  ;;  %v17381_v51 = vld [vmem:[%s21785_s19] sm:$0xff]  }
0x16d9   : > { %v10537_v35 = vpop.f32.mrb[230].mxu1  ;;  %15785 = vmatprep.mubr.msk.bf16.mxu1 %vm10902_vm11, %v17381_v51 }
0x16da   : > { %v10563_v61 = vmax.f32 %v16097_v13, 0.0  ;;  %v16098_v16 = vadd.f32 %v13066_v36, %v10537_v35  ;;  %v15722_v31 = vpop.f32.mrb[231].mxu1  ;;  %v13095_v13 = vld [vmem:[%s21779_s13 + $0x3] ss:$0 sm:$0xff] }
0x16dc   : > { %v10564_v12 = vmax.f32 %v16098_v16, 0.0  ;;  %v10569_v33 = vmul.f32 %v10563_v61, %v21386_v32  ;;  %v17377_v32 = vld [vmem:[%s21778_s12 + $0x70] sm:$0xff]  }
0x16de   : > { %v10570_v60 = vmul.f32 %v10564_v12, %v21391_v40 }
0x16df   : > { %v10542_v9 = vpop.f32.mrb[232].mxu1 }
0x16e0   : > { %v10575_v29 = vpack.c.bf16 %v10570_v60, %v10569_v33  ;;  %v16099_v19 = vadd.f32 %v13066_v36, %v10542_v9  ;;  %v15725_v8 = vpop.f32.mrb[233].mxu1 }
0x16e1   : > { %v10545_v26 = vpop.f32.mrb[234].mxu1 }
0x16e2   : > { %v10581_v44 = vshrl.u32 %v10575_v29, 16  ;;  %v10565_v53 = vmax.f32 %v16099_v19, 0.0  ;;  %v16100_v23 = vadd.f32 %v13066_v36, %v10545_v26  ;;  %v15726_v15 = vpop.f32.mrb[235].mxu1  ;;  %v10584_v54 = vshll.u32 %v10575_v29, 16 }
0x16e4   : > { %v10583_v62 = vrot.slane %v10581_v44, 7  ;;  %v10566_v25 = vmax.f32 %v16100_v23, 0.0  ;;  %v10571_v59 = vmul.f32 %v10565_v53, %v21398_v22  ;;  %v10605_v39 = vrot.slane %v10584_v54, 1 }
0x16e6   : > { %v10572_v43 = vmul.f32 %v10566_v25, %v21403_v56  ;;  %v10586_v48 = vor.u32 %v10584_v54, %v10583_v62  ;;  %v10606_v10 = vor.u32 %v10605_v39, %v10581_v44 }
0x16e7   : > { %v10550_v40 = vpop.f32.mrb[236].mxu1 }
0x16e8   : > { %v10576_v3 = vpack.c.bf16 %v10572_v43, %v10571_v59  ;;  %v16101_v2 = vadd.f32 %v13066_v36, %v10550_v40  ;;  %v15729_v45 = vpop.f32.mrb[237].mxu1  ;;  %v10604_v63 = vsel %vm17646_vm4, 0, %v10586_v48 }
0x16e9   : > { %v10553_v17 = vpop.f32.mrb[238].mxu1  ;;  %15736 = vmatmul.mubr.msk.bf16.vlgmr.msra.gmra.mrb[236].mxu0 %vm10005_vm10, %v10604_v63  ;;  %v17383_v45 = vld [vmem:[%s21780_s14] sm:$0xff]   ;;  %v17384_v63 = vld [vmem:[%s21780_s14 + $0x8] sm:$0xff]  }
0x16ea   : > { %v10588_v11 = vshrl.u32 %v10576_v3, 16  ;;  %v10591_v22 = vshll.u32 %v10576_v3, 16  ;;  %v10567_v28 = vmax.f32 %v16101_v2, 0.0  ;;  %v16102_v56 = vadd.f32 %v13066_v36, %v10553_v17  ;;  %v15730_v47 = vpop.f32.mrb[239].mxu1  ;;  %15748 = vmatpush3.bf16.msra.mxu0 %v17377_v32  ;;  %15739 = vmatprep.mubr.msk.bf16.mxu0 %vm17454_vm0, %v17453_v1  ;;  %v17382_v2 = vld [vmem:[%s21785_s19 + $0x8] sm:$0xff]   ;;  %v17385_v17 = vld [vmem:[%s21780_s14 + $0x10] sm:$0xff]  }
0x16eb   : > { %15749 = vmatprep.subr.bf16.mxu0 %v17453_v1 }
0x16ec   : > { %v10607_v46 = vrot.slane %v10591_v22, 1  ;;  %v10568_v38 = vmax.f32 %v16102_v56, 0.0  ;;  %v10590_v58 = vrot.slane %v10588_v11, 7  ;;  %v10573_v20 = vmul.f32 %v10567_v28, %v21421_v24 }
0x16ee   : > { %v10574_v6 = vmul.f32 %v10568_v38, %v21426_v21  ;;  %v10593_v57 = vor.u32 %v10591_v22, %v10590_v58  ;;  %15750 = vmatpush3.bf16.msra.mxu0 %v17378_v41  ;;  %v10608_v27 = vsel %vm951_vm5, %v10606_v10, %v10607_v46  ;;  %v10609_v24 = vor.u32 %v10607_v46, %v10588_v11 }
0x16ef   : > { %15763 = vmatprep.subr.bf16.mxu0 %v17453_v1 }
0x16f0   : > { %v10577_v52 = vpack.c.bf16 %v10574_v6, %v10573_v20  ;;  %v10594_v42 = vsel %vm875_vm1, %v10583_v62, %v10593_v57 }
0x16f1   : > { %15740 = vmatmul.mubr.msk.bf16.gmra.mrb[240].mxu0 %vm10005_vm10, %v10594_v42 }
0x16f2   : > { %v10596_v37 = vshrl.u32 %v10577_v52, 16  ;;  %v10599_v18 = vshll.u32 %v10577_v52, 16  ;;  %15743 = vmatprep.mubr.msk.bf16.mxu0 %vm17454_vm0, %v17453_v1 }
0x16f4   : > { %v10598_v34 = vrot.slane %v10596_v37, 7  ;;  %v10610_v55 = vrot.slane %v10599_v18, 1 }
0x16f6   : > { %v10601_v21 = vor.u32 %v10599_v18, %v10598_v34  ;;  %v10611_v5 = vsel %vm951_vm5, %v10609_v24, %v10610_v55  ;;  %v10612_v50 = vor.u32 %v10610_v55, %v10596_v37  ;;  %v17386_v24 = vld [vmem:[%s21780_s14 + $0x18] sm:$0xff]  }
0x16f8   : > { %v10602_v0 = vsel %vm875_vm1, %v10590_v58, %v10601_v21  ;;  %v10614_v36 = vsel %vm18070_vm7, %v10612_v50, 0  ;;  %v17387_v21 = vld [vmem:[%s21780_s14 + $0x20] sm:$0xff]   ;;  %v17390_v50 = vld [vmem:[%s21781_s15 + $0x8] sm:$0xff]  }
0x16f9   : > { %15744 = vmatmul.mubr.msk.bf16.gmra.mrb[244].mxu0 %vm10005_vm10, %v10602_v0 }
0x16fa   : > { %15751 = vmatprep.mubr.msk.bf16.mxu0 %vm17454_vm0, %v17453_v1 }
0x1701   : > { %15752 = vmatmul.mubr.msk.bf16.vlgmr.msra.gmra.mrb[236].mxu0 %vm10005_vm10, %v10575_v29 }
0x1702   : > { %15764 = vmatpush3.bf16.msra.mxu0 %v17379_v7  ;;  %15755 = vmatprep.mubr.msk.bf16.mxu0 %vm17454_vm0, %v17453_v1 }
0x1703   : > { %15765 = vmatprep.subr.bf16.mxu0 %v17453_v1 }
0x1706   : > { %15766 = vmatpush3.bf16.msra.mxu0 %v17380_v49  ;;  %v17389_v49 = vld [vmem:[%s21781_s15] sm:$0xff]  }
0x1707   : > { %15813 = vmatprep.subr.bf16.mxu0 %v17389_v49 }
0x1709   : > { %15756 = vmatmul.mubr.msk.bf16.gmra.mrb[240].mxu0 %vm10005_vm10, %v10576_v3 }
0x170a   : > { %15759 = vmatprep.mubr.msk.bf16.mxu0 %vm17454_vm0, %v17453_v1 }
0x1711   : > { %15760 = vmatmul.mubr.msk.bf16.gmra.mrb[244].mxu0 %vm10005_vm10, %v10577_v52 }
0x1712   : > { %15767 = vmatprep.mubr.msk.bf16.mxu0 %vm17454_vm0, %v17453_v1 }
0x1719   : > { %15768 = vmatmul.mubr.msk.bf16.vlgmr.msra.gmra.mrb[236].mxu0 %vm10005_vm10, %v10608_v27 }
0x171a   : > { %15771 = vmatprep.mubr.msk.bf16.mxu0 %vm17454_vm0, %v17453_v1  ;;  %15814 = vmatpush3.bf16.msra.mxu0 %v17389_v49 }
0x171b   : > { %15819 = vmatprep.subr.bf16.mxu0 %v17390_v50 }
0x1721   : > { %15772 = vmatmul.mubr.msk.bf16.gmra.mrb[240].mxu0 %vm10005_vm10, %v10611_v5  ;;  %v17388_v5 = vld [vmem:[%s21780_s14 + $0x28] sm:$0xff]  }
0x1722   : > { %15775 = vmatprep.mubr.msk.bf16.mxu0 %vm17454_vm0, %v17453_v1 }
0x1729   : > { %15776 = vmatmul.mubr.msk.bf16.gmra.mrb[244].mxu0 %vm10005_vm10, %v10614_v36  ;;  %v13123_v36 = vld [vmem:[%s21782_s16] ss:$0 sm:$0xff] }
0x17ec   : > { %v10850_v30 = vpop.f32.mrb[236].mxu0 }
0x17ed   : > { %v16103_v35 = vadd.f32 %v13095_v13, %v10850_v30  ;;  %v15769_v61 = vpop.f32.mrb[237].mxu0 }
0x17ee   : > { %v10853_v16 = vpop.f32.mrb[238].mxu0 }
0x17ef   : > { %v16104_v31 = vadd.f32 %v13095_v13, %v10853_v16  ;;  %v15770_v12 = vpop.f32.mrb[239].mxu0  ;;  %v10879_v33 = vmax.f32 %v16103_v35, 0.0 }
0x17f1   : > { %v10880_v60 = vmax.f32 %v16104_v31, 0.0 }
0x17f3   : > { %v10885_v9 = vpack.c.bf16 %v10880_v60, %v10879_v33  ;;  %v21649_v33 = vld [vmem:[%s21789_s23 + $0x10] sm:$0xff] }
0x17f4   : > { %v10858_v29 = vpop.f32.mrb[240].mxu0 }
0x17f5   : > { %v16105_v19 = vadd.f32 %v13095_v13, %v10858_v29  ;;  %v15773_v8 = vpop.f32.mrb[241].mxu0  ;;  %15779 = vmatprep.subr.bf16.mxu1 %v10885_v9 }
0x17f6   : > { %v10861_v26 = vpop.f32.mrb[242].mxu0  ;;  %15780 = vmatpush3.bf16.msra.mxu1 %v10885_v9  ;;  %v21654_v9 = vld [vmem:[%s21789_s23 + $0x18] sm:$0xff] }
0x17f7   : > { %v16106_v44 = vadd.f32 %v13095_v13, %v10861_v26  ;;  %v15774_v53 = vpop.f32.mrb[243].mxu0  ;;  %v10881_v23 = vmax.f32 %v16105_v19, 0.0  ;;  %v21659_v19 = vld [vmem:[%s21789_s23] sm:$0xff]  ;;  %v21664_v26 = vld [vmem:[%s21789_s23 + $0x8] sm:$0xff] }
0x17f9   : > { %v10882_v15 = vmax.f32 %v16106_v44, 0.0 }
0x17fb   : > { %v10886_v62 = vpack.c.bf16 %v10882_v15, %v10881_v23 }
0x17fc   : > { %v10866_v54 = vpop.f32.mrb[244].mxu0 }
0x17fd   : > { %v16107_v25 = vadd.f32 %v13095_v13, %v10866_v54  ;;  %v15777_v59 = vpop.f32.mrb[245].mxu0  ;;  %15781 = vmatprep.subr.bf16.mxu1 %v10886_v62 }
0x17fe   : > { %v10869_v43 = vpop.f32.mrb[246].mxu0  ;;  %15782 = vmatpush3.bf16.msra.mxu1 %v10886_v62 }
0x17ff   : > { %v16108_v48 = vadd.f32 %v13095_v13, %v10869_v43  ;;  %v15778_v32 = vpop.f32.mrb[247].mxu0  ;;  %v10883_v40 = vmax.f32 %v16107_v25, 0.0 }
0x1801   : > { %v10884_v39 = vmax.f32 %v16108_v48, 0.0 }
0x1803   : > { %v10887_v3 = vpack.c.bf16 %v10884_v39, %v10883_v40 }
0x1805   : > { %15783 = vmatprep.subr.bf16.mxu1 %v10887_v3 }
0x1806   : > { %15784 = vmatpush3.bf16.msra.mxu1 %v10887_v3 }
0x1807   : > { %15789 = vmatprep.subr.bf16.mxu1 %v17383_v45 }
0x1809   : > { %15786 = vmatmul.mubr.msk.bf16.vlgmr.msra.gmra.mrb[240].mxu1 %vm10902_vm11, %v17382_v2 }
0x180a   : > { %15790 = vmatpush3.bf16.msra.mxu1 %v17383_v45 }
0x180b   : > { %15791 = vmatprep.subr.bf16.mxu1 %v17384_v63 }
0x180e   : > { %15792 = vmatpush3.bf16.msra.mxu1 %v17384_v63 }
0x180f   : > { %15797 = vmatprep.subr.bf16.mxu1 %v17385_v17 }
0x18dc   : > { %v15787_v11 = vpop.f32.mrb[240].mxu1 }
0x18dd   : > { %v10943_v22 = vpop.f32.mrb[241].mxu1 }
0x18de   : > { %v15788_v28 = vpop.f32.mrb[242].mxu1 }
0x18df   : > { %v10959_v56 = vpack.c.bf16 %v15788_v28, %v15787_v11  ;;  %v10946_v47 = vpop.f32.mrb[243].mxu1 }
0x18e0   : > { %v10958_v41 = vpack.c.bf16 %v10946_v47, %v10943_v22 }
0x18e1   : > { %v10969_v10 = vshrl.u32 %v10959_v56, 16  ;;  %v10972_v46 = vshll.u32 %v10959_v56, 16 }
0x18e2   : > { %v10962_v38 = vshrl.u32 %v10958_v41, 16  ;;  %v10965_v58 = vshll.u32 %v10958_v41, 16 }
0x18e3   : > { %v10971_v20 = vrot.slane %v10969_v10, 7  ;;  %v10980_v52 = vrot.slane %v10972_v46, 1 }
0x18e4   : > { %v10964_v6 = vrot.slane %v10962_v38, 7  ;;  %v10978_v57 = vrot.slane %v10965_v58, 1 }
0x18e5   : > { %v10974_v27 = vor.u32 %v10972_v46, %v10971_v20  ;;  %v10982_v0 = vor.u32 %v10980_v52, %v10969_v10  ;;  %v17392_v10 = vld [vmem:[%s21781_s15 + $0x18] sm:$0xff]   ;;  %v17393_v46 = vld [vmem:[%s21781_s15 + $0x20] sm:$0xff]  }
0x18e6   : > { %v10979_v42 = vor.u32 %v10978_v57, %v10962_v38  ;;  %v10967_v37 = vor.u32 %v10965_v58, %v10964_v6  ;;  %v13145_v38 = vld [vmem:[%s21782_s16 + $0x1] ss:$0 sm:$0xff] }
0x18e7   : > { %v10975_v18 = vsel %vm875_vm1, %v10964_v6, %v10974_v27  ;;  %v10984_v7 = vsel %vm18070_vm7, %v10982_v0, 0 }
0x18e8   : > { %v10977_v34 = vsel %vm17646_vm4, 0, %v10967_v37  ;;  %v10981_v55 = vsel %vm951_vm5, %v10979_v42, %v10980_v52 }
0x18e9   : > { %15793 = vmatprep.mubr.msk.bf16.mxu1 %vm10005_vm10, %v10977_v34 }
0x18ea   : > { %15794 = vmatmul.mubr.msk.bf16.vlgmr.msra.gmra.mrb[244].mxu1 %vm10005_vm10, %v10975_v18 }
0x18eb   : > { %15801 = vmatprep.mubr.msk.bf16.mxu1 %vm10005_vm10, %v10958_v41  ;;  %15798 = vmatpush3.bf16.msra.mxu1 %v17385_v17 }
0x18ec   : > { %15799 = vmatprep.subr.bf16.mxu1 %v17386_v24 }
0x18ef   : > { %15800 = vmatpush3.bf16.msra.mxu1 %v17386_v24 }
0x18f0   : > { %15805 = vmatprep.subr.bf16.mxu1 %v17387_v21 }
0x18f6   : > { %15802 = vmatmul.mubr.msk.bf16.vlgmr.msra.gmra.mrb[244].mxu1 %vm10005_vm10, %v10959_v56  ;;  %v17391_v56 = vld [vmem:[%s21781_s15 + $0x10] sm:$0xff]  }
0x18f7   : > { %15809 = vmatprep.mubr.msk.bf16.mxu1 %vm10005_vm10, %v10981_v55  ;;  %15806 = vmatpush3.bf16.msra.mxu1 %v17387_v21 }
0x18f8   : > { %15807 = vmatprep.subr.bf16.mxu1 %v17388_v5 }
0x18fb   : > { %15808 = vmatpush3.bf16.msra.mxu1 %v17388_v5 }
0x18fc   : > { %15831 = vmatprep.subr.bf16.mxu1 %v17392_v10 }
0x1902   : > { %15810 = vmatmul.mubr.msk.bf16.vlgmr.msra.gmra.mrb[244].mxu1 %vm10005_vm10, %v10984_v7 }
0x1903   : > { %15832 = vmatpush3.bf16.msra.mxu1 %v17392_v10 }
0x1904   : > { %15837 = vmatprep.subr.bf16.mxu1 %v17393_v46 }
0x19d5   : > { %v15811_v51 = vpop.f32.mrb[244].mxu1 }
0x19d6   : > { %v16109_v13 = vadd.f32 %v15811_v51, %v13123_v36  ;;  %v11193_v30 = vpop.f32.mrb[245].mxu1 }
0x19d7   : > { %v16110_v35 = vadd.f32 %v13123_v36, %v11193_v30  ;;  %v15812_v61 = vpop.f32.mrb[246].mxu1 }
0x19d8   : > { %v11214_v16 = vmax.f32 %v16109_v13, 0.0  ;;  %v16111_v31 = vadd.f32 %v15812_v61, %v13123_v36  ;;  %v11196_v12 = vpop.f32.mrb[247].mxu1 }
0x19d9   : > { %v11212_v60 = vmax.f32 %v16110_v35, 0.0  ;;  %v16112_v29 = vadd.f32 %v13123_v36, %v11196_v12 }
0x19da   : > { %v11215_v8 = vmax.f32 %v16111_v31, 0.0  ;;  %v11222_v53 = vmul.f32 %v21649_v33, %v11214_v16 }
0x19db   : > { %v11213_v44 = vmax.f32 %v16112_v29, 0.0  ;;  %v11220_v15 = vmul.f32 %v21659_v19, %v11212_v60 }
0x19dc   : > { %v11223_v23 = vmul.f32 %v21654_v9, %v11215_v8 }
0x19dd   : > { %v11221_v62 = vmul.f32 %v21664_v26, %v11213_v44 }
0x19de   : > { %v11225_v54 = vpack.c.bf16 %v11223_v23, %v11222_v53  ;;  %v17394_v23 = vld [vmem:[%s21781_s15 + $0x28] sm:$0xff]  }
0x19df   : > { %v11224_v25 = vpack.c.bf16 %v11221_v62, %v11220_v15 }
0x19e0   : > { %v11236_v59 = vshrl.u32 %v11225_v54, 16  ;;  %v11239_v43 = vshll.u32 %v11225_v54, 16 }
0x19e1   : > { %v11229_v48 = vshrl.u32 %v11224_v25, 16  ;;  %v11232_v32 = vshll.u32 %v11224_v25, 16 }
0x19e2   : > { %v11238_v40 = vrot.slane %v11236_v59, 7  ;;  %v11247_v17 = vrot.slane %v11239_v43, 1 }
0x19e3   : > { %v11231_v39 = vrot.slane %v11229_v48, 7  ;;  %v11245_v3 = vrot.slane %v11232_v32, 1 }
0x19e4   : > { %v11241_v2 = vor.u32 %v11239_v43, %v11238_v40  ;;  %v11249_v47 = vor.u32 %v11247_v17, %v11236_v59  ;;  %v13162_v59 = vld [vmem:[%s21782_s16 + $0x2] ss:$0 sm:$0xff] }
0x19e5   : > { %v11234_v45 = vor.u32 %v11232_v32, %v11231_v39  ;;  %v11246_v63 = vor.u32 %v11245_v3, %v11229_v48 }
0x19e6   : > { %v11242_v11 = vsel %vm875_vm1, %v11231_v39, %v11241_v2  ;;  %v11251_v41 = vsel %vm18070_vm7, %v11249_v47, 0 }
0x19e7   : > { %v11244_v22 = vsel %vm17646_vm4, 0, %v11234_v45  ;;  %v11248_v28 = vsel %vm951_vm5, %v11246_v63, %v11247_v17 }
0x19e8   : > { %15815 = vmatprep.mubr.msk.bf16.mxu0 %vm996_vm3, %v11244_v22 }
0x19e9   : > { %15816 = vmatmul.mubr.msk.bf16.vlgmr.msra.gmra.mrb[248].mxu0 %vm996_vm3, %v11242_v11 }
0x19ea   : > { %15821 = vmatprep.mubr.msk.bf16.mxu0 %vm996_vm3, %v11224_v25  ;;  %15820 = vmatpush3.bf16.msra.mxu0 %v17390_v50  ;;  %v17396_v25 = vld [vmem:[%s21781_s15 + $0x38] sm:$0xff]  }
0x19eb   : > { %15825 = vmatprep.subr.bf16.mxu0 %v17391_v56 }
0x19f5   : > { %15822 = vmatmul.mubr.msk.bf16.vlgmr.msra.gmra.mrb[248].mxu0 %vm996_vm3, %v11225_v54  ;;  %v17395_v54 = vld [vmem:[%s21781_s15 + $0x30] sm:$0xff]  }
0x19f6   : > { %15827 = vmatprep.mubr.msk.bf16.mxu0 %vm996_vm3, %v11248_v28  ;;  %15826 = vmatpush3.bf16.msra.mxu0 %v17391_v56 }
0x19f7   : > { %15849 = vmatprep.subr.bf16.mxu0 %v17395_v54 }
0x1a01   : > { %15828 = vmatmul.mubr.msk.bf16.vlgmr.msra.gmra.mrb[248].mxu0 %vm996_vm3, %v11251_v41 }
0x1a02   : > { %15850 = vmatpush3.bf16.msra.mxu0 %v17395_v54 }
0x1a03   : > { %15855 = vmatprep.subr.bf16.mxu0 %v17396_v25 }
0x1ad4   : > { %v15829_v58 = vpop.f32.mrb[248].mxu0 }
0x1ad5   : > { %v16113_v20 = vadd.f32 %v15829_v58, %v13145_v38  ;;  %v11436_v6 = vpop.f32.mrb[249].mxu0 }
0x1ad6   : > { %v16114_v57 = vadd.f32 %v13145_v38, %v11436_v6  ;;  %v15830_v27 = vpop.f32.mrb[250].mxu0 }
0x1ad7   : > { %v11457_v52 = vmax.f32 %v16113_v20, 0.0  ;;  %v16115_v42 = vadd.f32 %v15830_v27, %v13145_v38  ;;  %v11439_v37 = vpop.f32.mrb[251].mxu0 }
0x1ad8   : > { %v11455_v18 = vmax.f32 %v16114_v57, 0.0  ;;  %v16116_v34 = vadd.f32 %v13145_v38, %v11439_v37 }
0x1ad9   : > { %v11458_v24 = vmax.f32 %v16115_v42, 0.0  ;;  %v11461_v21 = vmul.f32 %v11457_v52, %v21649_v33 }
0x1ada   : > { %v11456_v55 = vmax.f32 %v16116_v34, 0.0  ;;  %v11459_v0 = vmul.f32 %v11455_v18, %v21659_v19 }
0x1adb   : > { %v11462_v5 = vmul.f32 %v11458_v24, %v21654_v9 }
0x1adc   : > { %v11460_v7 = vmul.f32 %v11456_v55, %v21664_v26  ;;  %v17398_v55 = vld [vmem:[%s21791_s25] sm:$0xff]  }
0x1add   : > { %v11464_v49 = vpack.c.bf16 %v11462_v5, %v11461_v21  ;;  %v13179_v21 = vld [vmem:[%s21782_s16 + $0x3] ss:$0 sm:$0xff] }
0x1ade   : > { %v11463_v50 = vpack.c.bf16 %v11460_v7, %v11459_v0 }
0x1adf   : > { %v11475_v36 = vshrl.u32 %v11464_v49, 16  ;;  %v11478_v51 = vshll.u32 %v11464_v49, 16 }
0x1ae0   : > { %v11468_v13 = vshrl.u32 %v11463_v50, 16  ;;  %v11471_v30 = vshll.u32 %v11463_v50, 16 }
0x1ae1   : > { %v11477_v35 = vrot.slane %v11475_v36, 7  ;;  %v11486_v29 = vrot.slane %v11478_v51, 1 }
0x1ae2   : > { %v11470_v61 = vrot.slane %v11468_v13, 7  ;;  %v11484_v16 = vrot.slane %v11471_v30, 1 }
0x1ae3   : > { %v11480_v31 = vor.u32 %v11478_v51, %v11477_v35  ;;  %v11488_v15 = vor.u32 %v11486_v29, %v11475_v36 }
0x1ae4   : > { %v11473_v12 = vor.u32 %v11471_v30, %v11470_v61  ;;  %v11485_v60 = vor.u32 %v11484_v16, %v11468_v13 }
0x1ae5   : > { %v11481_v8 = vsel %vm875_vm1, %v11470_v61, %v11480_v31  ;;  %v11490_v62 = vsel %vm18070_vm7, %v11488_v15, 0 }
0x1ae6   : > { %v11483_v44 = vsel %vm17646_vm4, 0, %v11473_v12  ;;  %v11487_v53 = vsel %vm951_vm5, %v11485_v60, %v11486_v29  ;;  %v11941_v12 = vld [vmem:[%s21790_s24] sm:$0xf] }
0x1ae7   : > { %15833 = vmatprep.mubr.msk.bf16.mxu1 %vm996_vm3, %v11483_v44 }
0x1ae8   : > { %15834 = vmatmul.mubr.msk.bf16.vlgmr.msra.gmra.mrb[248].mxu1 %vm996_vm3, %v11481_v8 }
0x1ae9   : > { %15839 = vmatprep.mubr.msk.bf16.mxu1 %vm996_vm3, %v11463_v50  ;;  %15838 = vmatpush3.bf16.msra.mxu1 %v17393_v46 }
0x1aea   : > { %15843 = vmatprep.subr.bf16.mxu1 %v17394_v23 }
0x1af4   : > { %15840 = vmatmul.mubr.msk.bf16.vlgmr.msra.gmra.mrb[248].mxu1 %vm996_vm3, %v11464_v49 }
0x1af5   : > { %15845 = vmatprep.mubr.msk.bf16.mxu1 %vm996_vm3, %v11487_v53  ;;  %15844 = vmatpush3.bf16.msra.mxu1 %v17394_v23 }
0x1af6   : > { %15867 = vmatprep.subr.bf16.mxu1 %v17453_v1 }
0x1b00   : > { %15846 = vmatmul.mubr.msk.bf16.vlgmr.msra.gmra.mrb[248].mxu1 %vm996_vm3, %v11490_v62 }
0x1b01   : > { %15871 = vmatprep.mubr.msk.bf16.mxu1 %vm17454_vm0, %v17453_v1 }
0x1bd3   : > { %v15847_v43 = vpop.f32.mrb[248].mxu1 }
0x1bd4   : > { %v16117_v48 = vadd.f32 %v15847_v43, %v13162_v59  ;;  %v11676_v32 = vpop.f32.mrb[249].mxu1 }
0x1bd5   : > { %v16118_v40 = vadd.f32 %v13162_v59, %v11676_v32  ;;  %v15848_v39 = vpop.f32.mrb[250].mxu1 }
0x1bd6   : > { %v11697_v3 = vmax.f32 %v16117_v48, 0.0  ;;  %v16119_v2 = vadd.f32 %v15848_v39, %v13162_v59  ;;  %v11679_v45 = vpop.f32.mrb[251].mxu1 }
0x1bd7   : > { %v11695_v63 = vmax.f32 %v16118_v40, 0.0  ;;  %v16120_v17 = vadd.f32 %v13162_v59, %v11679_v45 }
0x1bd8   : > { %v11698_v11 = vmax.f32 %v16119_v2, 0.0  ;;  %v11701_v28 = vmul.f32 %v11697_v3, %v21649_v33 }
0x1bd9   : > { %v11696_v22 = vmax.f32 %v16120_v17, 0.0  ;;  %v11699_v47 = vmul.f32 %v11695_v63, %v21659_v19 }
0x1bda   : > { %v11702_v56 = vmul.f32 %v11698_v11, %v21654_v9 }
0x1bdb   : > { %v11700_v41 = vmul.f32 %v11696_v22, %v21664_v26  ;;  %v17397_v26 = vld [vmem:[%s21781_s15 + $0x40] sm:$0xff]  }
0x1bdc   : > { %v11704_v10 = vpack.c.bf16 %v11702_v56, %v11701_v28 }
0x1bdd   : > { %v11703_v46 = vpack.c.bf16 %v11700_v41, %v11699_v47 }
0x1bde   : > { %v11715_v38 = vshrl.u32 %v11704_v10, 16  ;;  %v11718_v58 = vshll.u32 %v11704_v10, 16 }
0x1bdf   : > { %v11708_v20 = vshrl.u32 %v11703_v46, 16  ;;  %v11711_v6 = vshll.u32 %v11703_v46, 16 }
0x1be0   : > { %v11717_v57 = vrot.slane %v11715_v38, 7  ;;  %v11726_v34 = vrot.slane %v11718_v58, 1 }
0x1be1   : > { %v11710_v27 = vrot.slane %v11708_v20, 7  ;;  %v11724_v52 = vrot.slane %v11711_v6, 1 }
0x1be2   : > { %v11720_v42 = vor.u32 %v11718_v58, %v11717_v57  ;;  %v11728_v14 = vor.u32 %v11726_v34, %v11715_v38 }
0x1be3   : > { %v11713_v37 = vor.u32 %v11711_v6, %v11710_v27  ;;  %v11725_v18 = vor.u32 %v11724_v52, %v11708_v20 }
0x1be4   : > { %v11721_v33 = vsel %vm875_vm1, %v11710_v27, %v11720_v42  ;;  %v11730_v24 = vsel %vm18070_vm7, %v11728_v14, 0 }
0x1be5   : > { %v11723_v9 = vsel %vm17646_vm4, 0, %v11713_v37  ;;  %v11727_v19 = vsel %vm951_vm5, %v11725_v18, %v11726_v34 }
0x1be6   : > { %15851 = vmatprep.mubr.msk.bf16.mxu0 %vm996_vm3, %v11723_v9 }
0x1be7   : > { %15852 = vmatmul.mubr.msk.bf16.vlgmr.msra.gmra.mrb[252].mxu0 %vm996_vm3, %v11721_v33 }
0x1be8   : > { %15857 = vmatprep.mubr.msk.bf16.mxu0 %vm996_vm3, %v11703_v46  ;;  %15856 = vmatpush3.bf16.msra.mxu0 %v17396_v25 }
0x1be9   : > { %15861 = vmatprep.subr.bf16.mxu0 %v17397_v26 }
0x1bf3   : > { %15858 = vmatmul.mubr.msk.bf16.vlgmr.msra.gmra.mrb[252].mxu0 %vm996_vm3, %v11704_v10 }
0x1bf4   : > { %15863 = vmatprep.mubr.msk.bf16.mxu0 %vm996_vm3, %v11727_v19  ;;  %15862 = vmatpush3.bf16.msra.mxu0 %v17397_v26 }
0x1bf5   : > { %15875 = vmatprep.subr.bf16.mxu0 %v17453_v1 }
0x1bff   : > { %15864 = vmatmul.mubr.msk.bf16.vlgmr.msra.gmra.mrb[252].mxu0 %vm996_vm3, %v11730_v24 }
0x1c00   : > { %15877 = vmatprep.mubr.msk.bf16.mxu0 %vm17454_vm0, %v17453_v1  ;;  %15876 = vmatpush3.bf16.msra.mxu0 %v17398_v55 }
0x1cd2   : > { %v15865_v5 = vpop.f32.mrb[252].mxu0 }
0x1cd3   : > { %v16121_v0 = vadd.f32 %v15865_v5, %v13179_v21  ;;  %v11916_v7 = vpop.f32.mrb[253].mxu0 }
0x1cd4   : > { %v16122_v49 = vadd.f32 %v13179_v21, %v11916_v7  ;;  %v15866_v4 = vpop.f32.mrb[254].mxu0 }
0x1cd5   : > { %v16123_v50 = vadd.f32 %v15866_v4, %v13179_v21  ;;  %v11919_v36 = vpop.f32.mrb[255].mxu0  ;;  %v11937_v13 = vmax.f32 %v16121_v0, 0.0 }
0x1cd6   : > { %v16124_v51 = vadd.f32 %v13179_v21, %v11919_v36  ;;  %v11935_v35 = vmax.f32 %v16122_v49, 0.0 }
0x1cd7   : > { %v11938_v30 = vmax.f32 %v16123_v50, 0.0 }
0x1cd8   : > { %v11936_v61 = vmax.f32 %v16124_v51, 0.0 }
0x1cd9   : > { %v11940_v16 = vpack.c.bf16 %v11938_v30, %v11937_v13 }
0x1cda   : > { %v11939_v31 = vpack.c.bf16 %v11936_v61, %v11935_v35 }
0x1cdc   : > { %15868 = vmatpush3.bf16.msra.mxu1 %v11939_v31 }
0x1cdd   : > { %15869 = vmatprep.subr.bf16.mxu1 %v17453_v1 }
0x1ce0   : > { %15870 = vmatpush3.bf16.msra.mxu1 %v11940_v16 }
0x1ce3   : > { %15872 = vmatmul.mubr.msk.bf16.vlgmr.msra.gmra.mrb[252].mxu1 %vm10005_vm10, %v11941_v12 }
0x1db6   : > { %v11979_v60 = vpop.f32.mrb[252].mxu1 }
0x1db7   : > { %v11985_v29 = vpack.c.bf16 %v11979_v60, %v11979_v60  ;;  %v15873_v8 = vpop.f32.mrb[253].mxu1 }
0x1db8   : > { %v11982_v44 = vpop.f32.mrb[254].mxu1 }
0x1db9   : > { %v15874_v53 = vpop.f32.mrb[255].mxu1  ;;  %15878 = vmatmul.mubr.msk.bf16.vlgmr.msra.gmra.mrb[0].mxu0 %vm996_vm3, %v11985_v29 }
0x1e8c   : > { %v12031_v1 = vpop.f32.mrb[0].mxu0 }
0x1e8d   : > { %12038 = vst.msk [vmem:[%s809_s5] sm:$0xff] %vm12037_vm12, %v12031_v1  ;;  %v15879_v23 = vpop.f32.mrb[1].mxu0 }
0x1e8e   : > { %v12034_v15 = vpop.f32.mrb[2].mxu0 }
0x1e8f   : > { %v15880_v62 = vpop.f32.mrb[3].mxu0 }
0x1e90 PF: > { %s36_s27 = sadd.s32 1, %s17451_s27  }
0x1e91   : > { %p33_p4 = scmp.ge.s32.totalorder %s36_s27, 4  }
0x1e93   :  { %35 = sbr.rel (!%p33_p4) target bundleno = 12 (0xc), region = 230 }

</bundles_post_ra>
